<compile_context>
chip_gen: v6e
topology: v6e:2x2x1
jax: 0.10.0
libtpu: 0.0.40
codegen_flags: <defaults>
</compile_context>

<pallas_src>
import functools

import jax
import jax.numpy as jnp
from jax.experimental import pallas as pl
from jax.experimental.pallas import tpu as pltpu

BN_EPS = 1e-5
_VMEM_LIMIT = 32 * 1024 * 1024  # safe scoped-VMEM budget on v5e/v6e/v7x


def _pick_tile_h(H, W, C, maxd, n_branches, budget_bytes=8 << 20):
    """Largest H-tile (multiple of 8 dividing H, or H itself) whose
    single-buffer footprint stays under `budget_bytes`, so BlockSpec
    double-buffering stays inside the 32 MiB scoped-VMEM limit."""
    bytes_per_row = 4 * ((W + 2 * maxd) * C + (n_branches + 1) * W * C)
    cap = max(8, budget_bytes // max(bytes_per_row, 1))
    if H <= cap:
        return H
    th = (min(cap, H) // 8) * 8
    while th >= 8:
        if H % th == 0:
            return th
        th -= 8
    # TODO(synk): ragged H (no multiple-of-8 divisor under the cap) falls back
    # to whole-H tiles; add masking if such shapes ever matter.
    return H


def _conv_stats_kernel(xw_ref, w_ref, bias_ref, y_ref, stats_ref, acc_ref, *,
                       dilations, maxd, TH, W, C):
    """Pass 1: dilated conv + bias for all branches on one (batch, H-tile)
    block, plus one-pass BN statistics.

    xw_ref:    (TH+2*maxd, W+2*maxd, C)  zero-padded NHWC input window (halo)
    w_ref:     (B, 9, C, C)              per-branch per-tap weights (t = ki*3+kj)
    bias_ref:  (B, C)                    conv bias
    y_ref:     (B, TH*W, C)              conv+bias output (pre-BN), f32
    stats_ref: (2*B, C)                  rows 2b / 2b+1 = sum / sumsq of branch b
    acc_ref:   (TH*W, C) f32 scratch     accumulator reused across branches
    """
    f32 = jnp.float32
    taps = [(ki, kj) for ki in range(3) for kj in range(3)]
    stats_rows = []
    for b, d in enumerate(dilations):
        wb = w_ref[b].astype(f32)                              # (9, C, C)
        # 3x3 dilated conv = 9 shifted (TH*W, C) x (C, C) MXU matmuls.
        for t, (ki, kj) in enumerate(taps):
            roff = (maxd - d) + ki * d
            coff = (maxd - d) + kj * d
            xwin = xw_ref[roff:roff + TH, coff:coff + W, :]    # ref-window load
            xwin = xwin.reshape(TH * W, C).astype(f32)         # layout-free merge
            # TODO(synk): cast xwin/wb to bf16 for ~2x MXU on v6e/v7x (loosens
            # the f32 tolerance vs the PyTorch reference), keep f32 accumulate.
            contrib = jnp.dot(xwin, wb[t], preferred_element_type=f32)
            if t == 0:
                acc_ref[...] = contrib
            else:
                acc_ref[...] += contrib
        acc = acc_ref[...] + bias_ref[b:b + 1, :].astype(f32)  # (TH*W, C)
        y_ref[b] = acc.astype(y_ref.dtype)
        stats_rows.append(jnp.sum(acc, axis=0, keepdims=True))
        stats_rows.append(jnp.sum(acc * acc, axis=0, keepdims=True))
    stats_ref[...] = jnp.concatenate(stats_rows, axis=0)       # (2B, C)


def _bn_relu_kernel(y_ref, scale_ref, shift_ref, o_ref):
    """Pass 2: fused BN affine + ReLU on a lane-dense (..., W*C) layout.

    y_ref:     (B, TH, W*C)   conv+bias activations
    scale_ref: (B, W*C)       gamma * rsqrt(var + eps), tiled over W
    shift_ref: (B, W*C)       beta - mean * scale,      tiled over W
    o_ref:     (B, TH, W*C)
    """
    y = y_ref[...].astype(jnp.float32)
    s = scale_ref[...][:, None, :]
    t = shift_ref[...][:, None, :]
    o_ref[...] = jnp.maximum(y * s + t, 0.0).astype(o_ref.dtype)


def dilated_conv_block_forward(x_nchw, params, dilated_rate=(1, 3, 5)):
    """params: list of dicts with 'w' (3,3,C,C HWIO), 'b', 'gamma', 'beta' (C,)."""
    N, C, H, W = x_nchw.shape
    B = len(dilated_rate)
    maxd = max(dilated_rate)
    m2 = 2 * maxd
    out_dtype = x_nchw.dtype

    # Layout + single shared padding: the input is read once for all branches.
    x_nhwc = jnp.transpose(x_nchw, (0, 2, 3, 1))
    xp = jnp.pad(x_nhwc, ((0, 0), (maxd, maxd), (maxd, maxd), (0, 0)))

    TH = _pick_tile_h(H, W, C, maxd, B)
    HT = H // TH
    if HT == 1:
        xw5 = xp[:, None]                                    # (N,1,H+2m,W+2m,C)
    else:
        # Overlapping H-tiles (with conv halos) materialized once in XLA so the
        # Pallas grid uses plain non-overlapping BlockSpec pipelining.
        xw5 = jnp.stack(
            [xp[:, i * TH:i * TH + TH + m2] for i in range(HT)], axis=1)

    w_all = jnp.stack([p["w"].reshape(9, C, C) for p in params]).astype(jnp.float32)
    b_all = jnp.stack([p["b"] for p in params]).astype(jnp.float32)       # (B, C)
    gamma = jnp.stack([p["gamma"] for p in params]).astype(jnp.float32)   # (B, C)
    beta = jnp.stack([p["beta"] for p in params]).astype(jnp.float32)     # (B, C)

    kernel1 = functools.partial(_conv_stats_kernel, dilations=tuple(dilated_rate),
                                maxd=maxd, TH=TH, W=W, C=C)
    y, stats = pl.pallas_call(
        kernel1,
        grid=(N, HT),
        in_specs=[
            pl.BlockSpec((None, None, TH + m2, W + m2, C),
                         lambda n, i: (n, i, 0, 0, 0)),
            pl.BlockSpec((B, 9, C, C), lambda n, i: (0, 0, 0, 0)),
            pl.BlockSpec((B, C), lambda n, i: (0, 0)),
        ],
        out_specs=[
            pl.BlockSpec((B, None, TH * W, C), lambda n, i: (0, n, i, 0)),
            pl.BlockSpec((None, None, 2 * B, C), lambda n, i: (n, i, 0, 0)),
        ],
        out_shape=[
            jax.ShapeDtypeStruct((B, N, H * W, C), jnp.float32),
            jax.ShapeDtypeStruct((N, HT, 2 * B, C), jnp.float32),
        ],
        scratch_shapes=[pltpu.VMEM((TH * W, C), jnp.float32)],
        compiler_params=pltpu.CompilerParams(
            dimension_semantics=("parallel", "parallel"),
            vmem_limit_bytes=_VMEM_LIMIT),
    )(xw5, w_all, b_all)

    # Tiny cross-tile reduction + BN coefficient fold (global training-mode
    # statistics over (N, H, W); one-pass sum/sumsq, f32 accumulators).
    tot = jnp.sum(stats, axis=(0, 1))                        # (2B, C)
    cnt = float(N * H * W)
    mean = tot[0::2] / cnt                                   # (B, C)
    var = jnp.maximum(tot[1::2] / cnt - mean * mean, 0.0)    # biased variance
    scale = gamma * jax.lax.rsqrt(var + BN_EPS)
    shift = beta - mean * scale
    scale_wc = jnp.tile(scale, (1, W))                       # (B, W*C) lane-dense
    shift_wc = jnp.tile(shift, (1, W))

    # Free reshape: (H*W, C) and (H, W*C) share the same linear element order.
    y_wc = y.reshape(B, N, H, W * C)

    out = pl.pallas_call(
        _bn_relu_kernel,
        grid=(N, HT),
        in_specs=[
            pl.BlockSpec((B, None, TH, W * C), lambda n, i: (0, n, i, 0)),
            pl.BlockSpec((B, W * C), lambda n, i: (0, 0)),
            pl.BlockSpec((B, W * C), lambda n, i: (0, 0)),
        ],
        out_specs=pl.BlockSpec((B, None, TH, W * C), lambda n, i: (0, n, i, 0)),
        out_shape=jax.ShapeDtypeStruct((B, N, H, W * C), out_dtype),
        compiler_params=pltpu.CompilerParams(
            dimension_semantics=("parallel", "parallel"),
            vmem_limit_bytes=_VMEM_LIMIT),
    )(y_wc, scale_wc, shift_wc)

    out = out.reshape(B, N, H, W, C)
    # TODO(synk): keep NHWC end-to-end if the surrounding model allows; this
    # per-branch NCHW transpose is pure extra HBM traffic outside the kernel.
    return tuple(jnp.transpose(out[b], (0, 3, 1, 2)) for b in range(B))


def _reference_branch(x_nhwc, w_hwio, bias, gamma, beta, d):
    """Pure-JAX reference (lax conv) for correctness checking."""
    y = jax.lax.conv_general_dilated(
        x_nhwc.astype(jnp.float32), w_hwio.astype(jnp.float32),
        window_strides=(1, 1), padding=[(d, d), (d, d)],
        rhs_dilation=(d, d),
        dimension_numbers=("NHWC", "HWIO", "NHWC"))
    y = y + bias.reshape(1, 1, 1, -1)
    mean = jnp.mean(y, axis=(0, 1, 2), keepdims=True)
    var = jnp.mean((y - mean) ** 2, axis=(0, 1, 2), keepdims=True)
    y = (y - mean) * jax.lax.rsqrt(var + BN_EPS)
    y = y * gamma.reshape(1, 1, 1, -1) + beta.reshape(1, 1, 1, -1)
    return jnp.maximum(y, 0.0)


def make_params(key, ch):
    """Deterministic parameter init (shapes match nn.Conv2d/BatchNorm2d)."""
    params = []
    for i in range(3):
        k_w, k_b, k_g, k_be = jax.random.split(jax.random.fold_in(key, i), 4)
        fan_in = ch * 3 * 3
        bound = 1.0 / jnp.sqrt(fan_in)
        w = jax.random.uniform(k_w, (3, 3, ch, ch), jnp.float32, -bound, bound)
        b = jax.random.uniform(k_b, (ch,), jnp.float32, -bound, bound)
        gamma = 1.0 + 0.1 * jax.random.normal(k_g, (ch,), jnp.float32)
        beta = 0.1 * jax.random.normal(k_be, (ch,), jnp.float32)
        params.append({"w": w, "b": b, "gamma": gamma, "beta": beta})
    return params


if __name__ == "__main__":
    key = jax.random.PRNGKey(0)
    N, C, H, W = 2, 4, 16, 16
    x = jax.random.normal(jax.random.fold_in(key, 100), (N, C, H, W), jnp.float32)
    params = make_params(jax.random.fold_in(key, 200), C)

    outs = dilated_conv_block_forward(x, params)
    outs = jax.block_until_ready(outs)

    # Self-check against a pure-JAX reference.
    x_nhwc = jnp.transpose(x, (0, 2, 3, 1))
    for p, d, o in zip(params, (1, 3, 5), outs):
        ref = _reference_branch(x_nhwc, p["w"], p["b"], p["gamma"], p["beta"], d)
        ref = jnp.transpose(ref, (0, 3, 1, 2))
        if not jnp.allclose(o, ref, atol=1e-4, rtol=1e-4):
            raise AssertionError(f"mismatch for dilation {d}: "
                                 f"max err {jnp.max(jnp.abs(o - ref))}")

    print("KERNEL_OK")
</pallas_src>

<mosaic_0001>
module attributes {stable_mosaic.version = 11 : i64} {
  func.func @_conv_stats_kernel(%arg0: i32, %arg1: i32, %arg2: memref<1x1x26x26x4xf32, #tpu.memory_space<vmem>>, %arg3: memref<3x9x4x4xf32, #tpu.memory_space<vmem>>, %arg4: memref<3x4xf32, #tpu.memory_space<vmem>>, %arg5: memref<3x1x256x4xf32, #tpu.memory_space<vmem>>, %arg6: memref<1x1x6x4xf32, #tpu.memory_space<vmem>>, %arg7: memref<256x4xf32, #tpu.memory_space<vmem>>) attributes {dimension_semantics = [#tpu.dimension_semantics<parallel>, #tpu.dimension_semantics<parallel>], iteration_bounds = array<i64: 2, 1>, scalar_prefetch = 0 : i64, scratch_operands = 1 : i64, tpu.core_type = #tpu.core_type<tc>, window_params = [{transform_indices = @transform_0, window_bounds = array<i64: 1, 1, 26, 26, 4>}, {pipeline_mode = #tpu.pipeline_mode<synchronous>, transform_indices = @transform_1, window_bounds = array<i64: 3, 9, 4, 4>}, {pipeline_mode = #tpu.pipeline_mode<synchronous>, transform_indices = @transform_2, window_bounds = array<i64: 3, 4>}, {transform_indices = @transform_3, window_bounds = array<i64: 3, 1, 256, 4>}, {transform_indices = @transform_4, window_bounds = array<i64: 1, 1, 6, 4>}]} {
    %c0 = arith.constant 0 : index
    %c0_0 = arith.constant 0 : index
    %c0_1 = arith.constant 0 : index
    %c0_2 = arith.constant 0 : index
    %0 = vector.load %arg3[%c0, %c0_0, %c0_1, %c0_2] : memref<3x9x4x4xf32, #tpu.memory_space<vmem>>, vector<1x9x4x4xf32>
    %1 = vector.shape_cast %0 : vector<1x9x4x4xf32> to vector<9x4x4xf32>
    %c0_3 = arith.constant 0 : index
    %c0_4 = arith.constant 0 : index
    %c4 = arith.constant 4 : index
    %c4_5 = arith.constant 4 : index
    %c0_6 = arith.constant 0 : index
    %2 = vector.load %arg2[%c0_3, %c0_4, %c4, %c4_5, %c0_6] : memref<1x1x26x26x4xf32, #tpu.memory_space<vmem>>, vector<1x1x16x16x4xf32>
    %3 = vector.shape_cast %2 : vector<1x1x16x16x4xf32> to vector<16x16x4xf32>
    %4 = vector.shape_cast %3 : vector<16x16x4xf32> to vector<256x4xf32>
    %5 = vector.extract_strided_slice %1 {offsets = [0, 0, 0], sizes = [1, 4, 4], strides = [1, 1, 1]} : vector<9x4x4xf32> to vector<1x4x4xf32>
    %6 = vector.shape_cast %5 : vector<1x4x4xf32> to vector<4x4xf32>
    %cst = arith.constant dense<0.000000e+00> : vector<256x4xf32>
    %7 = tpu.matmul %4, %6, %cst {dimension_numbers = #tpu.dot_dimension_numbers<[1], [0], [0], [1], [0, 0, 1, 1], [], []>} : vector<256x4xf32>, vector<4x4xf32>, vector<256x4xf32> -> vector<256x4xf32>
    %c0_7 = arith.constant 0 : index
    %c0_8 = arith.constant 0 : index
    %8 = vector.load %arg7[%c0_7, %c0_8] : memref<256x4xf32, #tpu.memory_space<vmem>>, vector<256x4xf32>
    tpu.vector_store %arg7[%c0_7, %c0_8], %7 {strides = array<i32>} : memref<256x4xf32, #tpu.memory_space<vmem>>, vector<256x4xf32>,
    %c0_9 = arith.constant 0 : index
    %c0_10 = arith.constant 0 : index
    %c4_11 = arith.constant 4 : index
    %c5 = arith.constant 5 : index
    %c0_12 = arith.constant 0 : index
    %9 = vector.load %arg2[%c0_9, %c0_10, %c4_11, %c5, %c0_12] : memref<1x1x26x26x4xf32, #tpu.memory_space<vmem>>, vector<1x1x16x16x4xf32>
    %10 = vector.shape_cast %9 : vector<1x1x16x16x4xf32> to vector<16x16x4xf32>
    %11 = vector.shape_cast %10 : vector<16x16x4xf32> to vector<256x4xf32>
    %12 = vector.extract_strided_slice %1 {offsets = [1, 0, 0], sizes = [1, 4, 4], strides = [1, 1, 1]} : vector<9x4x4xf32> to vector<1x4x4xf32>
    %13 = vector.shape_cast %12 : vector<1x4x4xf32> to vector<4x4xf32>
    %cst_13 = arith.constant dense<0.000000e+00> : vector<256x4xf32>
    %14 = tpu.matmul %11, %13, %cst_13 {dimension_numbers = #tpu.dot_dimension_numbers<[1], [0], [0], [1], [0, 0, 1, 1], [], []>} : vector<256x4xf32>, vector<4x4xf32>, vector<256x4xf32> -> vector<256x4xf32>
    %c0_14 = arith.constant 0 : index
    %c0_15 = arith.constant 0 : index
    %15 = vector.load %arg7[%c0_14, %c0_15] : memref<256x4xf32, #tpu.memory_space<vmem>>, vector<256x4xf32>
    %16 = arith.addf %15, %14 : vector<256x4xf32>
    %c0_16 = arith.constant 0 : index
    %c0_17 = arith.constant 0 : index
    %17 = vector.load %arg7[%c0_16, %c0_17] : memref<256x4xf32, #tpu.memory_space<vmem>>, vector<256x4xf32>
    tpu.vector_store %arg7[%c0_16, %c0_17], %16 {strides = array<i32>} : memref<256x4xf32, #tpu.memory_space<vmem>>, vector<256x4xf32>,
    %c0_18 = arith.constant 0 : index
    %c0_19 = arith.constant 0 : index
    %c4_20 = arith.constant 4 : index
    %c6 = arith.constant 6 : index
    %c0_21 = arith.constant 0 : index
    %18 = vector.load %arg2[%c0_18, %c0_19, %c4_20, %c6, %c0_21] : memref<1x1x26x26x4xf32, #tpu.memory_space<vmem>>, vector<1x1x16x16x4xf32>
    %19 = vector.shape_cast %18 : vector<1x1x16x16x4xf32> to vector<16x16x4xf32>
    %20 = vector.shape_cast %19 : vector<16x16x4xf32> to vector<256x4xf32>
    %21 = vector.extract_strided_slice %1 {offsets = [2, 0, 0], sizes = [1, 4, 4], strides = [1, 1, 1]} : vector<9x4x4xf32> to vector<1x4x4xf32>
    %22 = vector.shape_cast %21 : vector<1x4x4xf32> to vector<4x4xf32>
    %cst_22 = arith.constant dense<0.000000e+00> : vector<256x4xf32>
    %23 = tpu.matmul %20, %22, %cst_22 {dimension_numbers = #tpu.dot_dimension_numbers<[1], [0], [0], [1], [0, 0, 1, 1], [], []>} : vector<256x4xf32>, vector<4x4xf32>, vector<256x4xf32> -> vector<256x4xf32>
    %c0_23 = arith.constant 0 : index
    %c0_24 = arith.constant 0 : index
    %24 = vector.load %arg7[%c0_23, %c0_24] : memref<256x4xf32, #tpu.memory_space<vmem>>, vector<256x4xf32>
    %25 = arith.addf %24, %23 : vector<256x4xf32>
    %c0_25 = arith.constant 0 : index
    %c0_26 = arith.constant 0 : index
    %26 = vector.load %arg7[%c0_25, %c0_26] : memref<256x4xf32, #tpu.memory_space<vmem>>, vector<256x4xf32>
    tpu.vector_store %arg7[%c0_25, %c0_26], %25 {strides = array<i32>} : memref<256x4xf32, #tpu.memory_space<vmem>>, vector<256x4xf32>,
    %c0_27 = arith.constant 0 : index
    %c0_28 = arith.constant 0 : index
    %c5_29 = arith.constant 5 : index
    %c4_30 = arith.constant 4 : index
    %c0_31 = arith.constant 0 : index
    %27 = vector.load %arg2[%c0_27, %c0_28, %c5_29, %c4_30, %c0_31] : memref<1x1x26x26x4xf32, #tpu.memory_space<vmem>>, vector<1x1x16x16x4xf32>
    %28 = vector.shape_cast %27 : vector<1x1x16x16x4xf32> to vector<16x16x4xf32>
    %29 = vector.shape_cast %28 : vector<16x16x4xf32> to vector<256x4xf32>
    %30 = vector.extract_strided_slice %1 {offsets = [3, 0, 0], sizes = [1, 4, 4], strides = [1, 1, 1]} : vector<9x4x4xf32> to vector<1x4x4xf32>
    %31 = vector.shape_cast %30 : vector<1x4x4xf32> to vector<4x4xf32>
    %cst_32 = arith.constant dense<0.000000e+00> : vector<256x4xf32>
    %32 = tpu.matmul %29, %31, %cst_32 {dimension_numbers = #tpu.dot_dimension_numbers<[1], [0], [0], [1], [0, 0, 1, 1], [], []>} : vector<256x4xf32>, vector<4x4xf32>, vector<256x4xf32> -> vector<256x4xf32>
    %c0_33 = arith.constant 0 : index
    %c0_34 = arith.constant 0 : index
    %33 = vector.load %arg7[%c0_33, %c0_34] : memref<256x4xf32, #tpu.memory_space<vmem>>, vector<256x4xf32>
    %34 = arith.addf %33, %32 : vector<256x4xf32>
    %c0_35 = arith.constant 0 : index
    %c0_36 = arith.constant 0 : index
    %35 = vector.load %arg7[%c0_35, %c0_36] : memref<256x4xf32, #tpu.memory_space<vmem>>, vector<256x4xf32>
    tpu.vector_store %arg7[%c0_35, %c0_36], %34 {strides = array<i32>} : memref<256x4xf32, #tpu.memory_space<vmem>>, vector<256x4xf32>,
    %c0_37 = arith.constant 0 : index
    %c0_38 = arith.constant 0 : index
    %c5_39 = arith.constant 5 : index
    %c5_40 = arith.constant 5 : index
    %c0_41 = arith.constant 0 : index
    %36 = vector.load %arg2[%c0_37, %c0_38, %c5_39, %c5_40, %c0_41] : memref<1x1x26x26x4xf32, #tpu.memory_space<vmem>>, vector<1x1x16x16x4xf32>
    %37 = vector.shape_cast %36 : vector<1x1x16x16x4xf32> to vector<16x16x4xf32>
    %38 = vector.shape_cast %37 : vector<16x16x4xf32> to vector<256x4xf32>
    %39 = vector.extract_strided_slice %1 {offsets = [4, 0, 0], sizes = [1, 4, 4], strides = [1, 1, 1]} : vector<9x4x4xf32> to vector<1x4x4xf32>
    %40 = vector.shape_cast %39 : vector<1x4x4xf32> to vector<4x4xf32>
    %cst_42 = arith.constant dense<0.000000e+00> : vector<256x4xf32>
    %41 = tpu.matmul %38, %40, %cst_42 {dimension_numbers = #tpu.dot_dimension_numbers<[1], [0], [0], [1], [0, 0, 1, 1], [], []>} : vector<256x4xf32>, vector<4x4xf32>, vector<256x4xf32> -> vector<256x4xf32>
    %c0_43 = arith.constant 0 : index
    %c0_44 = arith.constant 0 : index
    %42 = vector.load %arg7[%c0_43, %c0_44] : memref<256x4xf32, #tpu.memory_space<vmem>>, vector<256x4xf32>
    %43 = arith.addf %42, %41 : vector<256x4xf32>
    %c0_45 = arith.constant 0 : index
    %c0_46 = arith.constant 0 : index
    %44 = vector.load %arg7[%c0_45, %c0_46] : memref<256x4xf32, #tpu.memory_space<vmem>>, vector<256x4xf32>
    tpu.vector_store %arg7[%c0_45, %c0_46], %43 {strides = array<i32>} : memref<256x4xf32, #tpu.memory_space<vmem>>, vector<256x4xf32>,
    %c0_47 = arith.constant 0 : index
    %c0_48 = arith.constant 0 : index
    %c5_49 = arith.constant 5 : index
    %c6_50 = arith.constant 6 : index
    %c0_51 = arith.constant 0 : index
    %45 = vector.load %arg2[%c0_47, %c0_48, %c5_49, %c6_50, %c0_51] : memref<1x1x26x26x4xf32, #tpu.memory_space<vmem>>, vector<1x1x16x16x4xf32>
    %46 = vector.shape_cast %45 : vector<1x1x16x16x4xf32> to vector<16x16x4xf32>
    %47 = vector.shape_cast %46 : vector<16x16x4xf32> to vector<256x4xf32>
    %48 = vector.extract_strided_slice %1 {offsets = [5, 0, 0], sizes = [1, 4, 4], strides = [1, 1, 1]} : vector<9x4x4xf32> to vector<1x4x4xf32>
    %49 = vector.shape_cast %48 : vector<1x4x4xf32> to vector<4x4xf32>
    %cst_52 = arith.constant dense<0.000000e+00> : vector<256x4xf32>
    %50 = tpu.matmul %47, %49, %cst_52 {dimension_numbers = #tpu.dot_dimension_numbers<[1], [0], [0], [1], [0, 0, 1, 1], [], []>} : vector<256x4xf32>, vector<4x4xf32>, vector<256x4xf32> -> vector<256x4xf32>
    %c0_53 = arith.constant 0 : index
    %c0_54 = arith.constant 0 : index
    %51 = vector.load %arg7[%c0_53, %c0_54] : memref<256x4xf32, #tpu.memory_space<vmem>>, vector<256x4xf32>
    %52 = arith.addf %51, %50 : vector<256x4xf32>
    %c0_55 = arith.constant 0 : index
    %c0_56 = arith.constant 0 : index
    %53 = vector.load %arg7[%c0_55, %c0_56] : memref<256x4xf32, #tpu.memory_space<vmem>>, vector<256x4xf32>
    tpu.vector_store %arg7[%c0_55, %c0_56], %52 {strides = array<i32>} : memref<256x4xf32, #tpu.memory_space<vmem>>, vector<256x4xf32>,
    %c0_57 = arith.constant 0 : index
    %c0_58 = arith.constant 0 : index
    %c6_59 = arith.constant 6 : index
    %c4_60 = arith.constant 4 : index
    %c0_61 = arith.constant 0 : index
    %54 = vector.load %arg2[%c0_57, %c0_58, %c6_59, %c4_60, %c0_61] : memref<1x1x26x26x4xf32, #tpu.memory_space<vmem>>, vector<1x1x16x16x4xf32>
    %55 = vector.shape_cast %54 : vector<1x1x16x16x4xf32> to vector<16x16x4xf32>
    %56 = vector.shape_cast %55 : vector<16x16x4xf32> to vector<256x4xf32>
    %57 = vector.extract_strided_slice %1 {offsets = [6, 0, 0], sizes = [1, 4, 4], strides = [1, 1, 1]} : vector<9x4x4xf32> to vector<1x4x4xf32>
    %58 = vector.shape_cast %57 : vector<1x4x4xf32> to vector<4x4xf32>
    %cst_62 = arith.constant dense<0.000000e+00> : vector<256x4xf32>
    %59 = tpu.matmul %56, %58, %cst_62 {dimension_numbers = #tpu.dot_dimension_numbers<[1], [0], [0], [1], [0, 0, 1, 1], [], []>} : vector<256x4xf32>, vector<4x4xf32>, vector<256x4xf32> -> vector<256x4xf32>
    %c0_63 = arith.constant 0 : index
    %c0_64 = arith.constant 0 : index
    %60 = vector.load %arg7[%c0_63, %c0_64] : memref<256x4xf32, #tpu.memory_space<vmem>>, vector<256x4xf32>
    %61 = arith.addf %60, %59 : vector<256x4xf32>
    %c0_65 = arith.constant 0 : index
    %c0_66 = arith.constant 0 : index
    %62 = vector.load %arg7[%c0_65, %c0_66] : memref<256x4xf32, #tpu.memory_space<vmem>>, vector<256x4xf32>
    tpu.vector_store %arg7[%c0_65, %c0_66], %61 {strides = array<i32>} : memref<256x4xf32, #tpu.memory_space<vmem>>, vector<256x4xf32>,
    %c0_67 = arith.constant 0 : index
    %c0_68 = arith.constant 0 : index
    %c6_69 = arith.constant 6 : index
    %c5_70 = arith.constant 5 : index
    %c0_71 = arith.constant 0 : index
    %63 = vector.load %arg2[%c0_67, %c0_68, %c6_69, %c5_70, %c0_71] : memref<1x1x26x26x4xf32, #tpu.memory_space<vmem>>, vector<1x1x16x16x4xf32>
    %64 = vector.shape_cast %63 : vector<1x1x16x16x4xf32> to vector<16x16x4xf32>
    %65 = vector.shape_cast %64 : vector<16x16x4xf32> to vector<256x4xf32>
    %66 = vector.extract_strided_slice %1 {offsets = [7, 0, 0], sizes = [1, 4, 4], strides = [1, 1, 1]} : vector<9x4x4xf32> to vector<1x4x4xf32>
    %67 = vector.shape_cast %66 : vector<1x4x4xf32> to vector<4x4xf32>
    %cst_72 = arith.constant dense<0.000000e+00> : vector<256x4xf32>
    %68 = tpu.matmul %65, %67, %cst_72 {dimension_numbers = #tpu.dot_dimension_numbers<[1], [0], [0], [1], [0, 0, 1, 1], [], []>} : vector<256x4xf32>, vector<4x4xf32>, vector<256x4xf32> -> vector<256x4xf32>
    %c0_73 = arith.constant 0 : index
    %c0_74 = arith.constant 0 : index
    %69 = vector.load %arg7[%c0_73, %c0_74] : memref<256x4xf32, #tpu.memory_space<vmem>>, vector<256x4xf32>
    %70 = arith.addf %69, %68 : vector<256x4xf32>
    %c0_75 = arith.constant 0 : index
    %c0_76 = arith.constant 0 : index
    %71 = vector.load %arg7[%c0_75, %c0_76] : memref<256x4xf32, #tpu.memory_space<vmem>>, vector<256x4xf32>
    tpu.vector_store %arg7[%c0_75, %c0_76], %70 {strides = array<i32>} : memref<256x4xf32, #tpu.memory_space<vmem>>, vector<256x4xf32>,
    %c0_77 = arith.constant 0 : index
    %c0_78 = arith.constant 0 : index
    %c6_79 = arith.constant 6 : index
    %c6_80 = arith.constant 6 : index
    %c0_81 = arith.constant 0 : index
    %72 = vector.load %arg2[%c0_77, %c0_78, %c6_79, %c6_80, %c0_81] : memref<1x1x26x26x4xf32, #tpu.memory_space<vmem>>, vector<1x1x16x16x4xf32>
    %73 = vector.shape_cast %72 : vector<1x1x16x16x4xf32> to vector<16x16x4xf32>
    %74 = vector.shape_cast %73 : vector<16x16x4xf32> to vector<256x4xf32>
    %75 = vector.extract_strided_slice %1 {offsets = [8, 0, 0], sizes = [1, 4, 4], strides = [1, 1, 1]} : vector<9x4x4xf32> to vector<1x4x4xf32>
    %76 = vector.shape_cast %75 : vector<1x4x4xf32> to vector<4x4xf32>
    %cst_82 = arith.constant dense<0.000000e+00> : vector<256x4xf32>
    %77 = tpu.matmul %74, %76, %cst_82 {dimension_numbers = #tpu.dot_dimension_numbers<[1], [0], [0], [1], [0, 0, 1, 1], [], []>} : vector<256x4xf32>, vector<4x4xf32>, vector<256x4xf32> -> vector<256x4xf32>
    %c0_83 = arith.constant 0 : index
    %c0_84 = arith.constant 0 : index
    %78 = vector.load %arg7[%c0_83, %c0_84] : memref<256x4xf32, #tpu.memory_space<vmem>>, vector<256x4xf32>
    %79 = arith.addf %78, %77 : vector<256x4xf32>
    %c0_85 = arith.constant 0 : index
    %c0_86 = arith.constant 0 : index
    %80 = vector.load %arg7[%c0_85, %c0_86] : memref<256x4xf32, #tpu.memory_space<vmem>>, vector<256x4xf32>
    tpu.vector_store %arg7[%c0_85, %c0_86], %79 {strides = array<i32>} : memref<256x4xf32, #tpu.memory_space<vmem>>, vector<256x4xf32>,
    %c0_87 = arith.constant 0 : index
    %c0_88 = arith.constant 0 : index
    %81 = vector.load %arg7[%c0_87, %c0_88] : memref<256x4xf32, #tpu.memory_space<vmem>>, vector<256x4xf32>
    %c0_89 = arith.constant 0 : index
    %c0_90 = arith.constant 0 : index
    %82 = vector.load %arg4[%c0_89, %c0_90] : memref<3x4xf32, #tpu.memory_space<vmem>>, vector<1x4xf32>
    %83 = vector.broadcast %82 : vector<1x4xf32> to vector<256x4xf32>
    %84 = arith.addf %81, %83 : vector<256x4xf32>
    %c0_91 = arith.constant 0 : index
    %c0_92 = arith.constant 0 : index
    %c0_93 = arith.constant 0 : index
    %c0_94 = arith.constant 0 : index
    %85 = vector.load %arg5[%c0_91, %c0_92, %c0_93, %c0_94] : memref<3x1x256x4xf32, #tpu.memory_space<vmem>>, vector<1x1x256x4xf32>
    %86 = vector.shape_cast %85 : vector<1x1x256x4xf32> to vector<256x4xf32>
    %87 = vector.shape_cast %84 : vector<256x4xf32> to vector<1x1x256x4xf32>
    tpu.vector_store %arg5[%c0_91, %c0_92, %c0_93, %c0_94], %87 {strides = array<i32>} : memref<3x1x256x4xf32, #tpu.memory_space<vmem>>, vector<1x1x256x4xf32>,
    %cst_95 = arith.constant dense<0.000000e+00> : vector<4xf32>
    %88 = vector.multi_reduction <add>, %84, %cst_95 [0] : vector<256x4xf32> to vector<4xf32>
    %89 = vector.shape_cast %88 : vector<4xf32> to vector<1x4xf32>
    %90 = arith.mulf %84, %84 : vector<256x4xf32>
    %cst_96 = arith.constant dense<0.000000e+00> : vector<4xf32>
    %91 = vector.multi_reduction <add>, %90, %cst_96 [0] : vector<256x4xf32> to vector<4xf32>
    %92 = vector.shape_cast %91 : vector<4xf32> to vector<1x4xf32>
    %c1 = arith.constant 1 : index
    %c0_97 = arith.constant 0 : index
    %c0_98 = arith.constant 0 : index
    %c0_99 = arith.constant 0 : index
    %93 = vector.load %arg3[%c1, %c0_97, %c0_98, %c0_99] : memref<3x9x4x4xf32, #tpu.memory_space<vmem>>, vector<1x9x4x4xf32>
    %94 = vector.shape_cast %93 : vector<1x9x4x4xf32> to vector<9x4x4xf32>
    %c0_100 = arith.constant 0 : index
    %c0_101 = arith.constant 0 : index
    %c2 = arith.constant 2 : index
    %c2_102 = arith.constant 2 : index
    %c0_103 = arith.constant 0 : index
    %95 = vector.load %arg2[%c0_100, %c0_101, %c2, %c2_102, %c0_103] : memref<1x1x26x26x4xf32, #tpu.memory_space<vmem>>, vector<1x1x16x16x4xf32>
    %96 = vector.shape_cast %95 : vector<1x1x16x16x4xf32> to vector<16x16x4xf32>
    %97 = vector.shape_cast %96 : vector<16x16x4xf32> to vector<256x4xf32>
    %98 = vector.extract_strided_slice %94 {offsets = [0, 0, 0], sizes = [1, 4, 4], strides = [1, 1, 1]} : vector<9x4x4xf32> to vector<1x4x4xf32>
    %99 = vector.shape_cast %98 : vector<1x4x4xf32> to vector<4x4xf32>
    %cst_104 = arith.constant dense<0.000000e+00> : vector<256x4xf32>
    %100 = tpu.matmul %97, %99, %cst_104 {dimension_numbers = #tpu.dot_dimension_numbers<[1], [0], [0], [1], [0, 0, 1, 1], [], []>} : vector<256x4xf32>, vector<4x4xf32>, vector<256x4xf32> -> vector<256x4xf32>
    %c0_105 = arith.constant 0 : index
    %c0_106 = arith.constant 0 : index
    %101 = vector.load %arg7[%c0_105, %c0_106] : memref<256x4xf32, #tpu.memory_space<vmem>>, vector<256x4xf32>
    tpu.vector_store %arg7[%c0_105, %c0_106], %100 {strides = array<i32>} : memref<256x4xf32, #tpu.memory_space<vmem>>, vector<256x4xf32>,
    %c0_107 = arith.constant 0 : index
    %c0_108 = arith.constant 0 : index
    %c2_109 = arith.constant 2 : index
    %c5_110 = arith.constant 5 : index
    %c0_111 = arith.constant 0 : index
    %102 = vector.load %arg2[%c0_107, %c0_108, %c2_109, %c5_110, %c0_111] : memref<1x1x26x26x4xf32, #tpu.memory_space<vmem>>, vector<1x1x16x16x4xf32>
    %103 = vector.shape_cast %102 : vector<1x1x16x16x4xf32> to vector<16x16x4xf32>
    %104 = vector.shape_cast %103 : vector<16x16x4xf32> to vector<256x4xf32>
    %105 = vector.extract_strided_slice %94 {offsets = [1, 0, 0], sizes = [1, 4, 4], strides = [1, 1, 1]} : vector<9x4x4xf32> to vector<1x4x4xf32>
    %106 = vector.shape_cast %105 : vector<1x4x4xf32> to vector<4x4xf32>
    %cst_112 = arith.constant dense<0.000000e+00> : vector<256x4xf32>
    %107 = tpu.matmul %104, %106, %cst_112 {dimension_numbers = #tpu.dot_dimension_numbers<[1], [0], [0], [1], [0, 0, 1, 1], [], []>} : vector<256x4xf32>, vector<4x4xf32>, vector<256x4xf32> -> vector<256x4xf32>
    %c0_113 = arith.constant 0 : index
    %c0_114 = arith.constant 0 : index
    %108 = vector.load %arg7[%c0_113, %c0_114] : memref<256x4xf32, #tpu.memory_space<vmem>>, vector<256x4xf32>
    %109 = arith.addf %108, %107 : vector<256x4xf32>
    %c0_115 = arith.constant 0 : index
    %c0_116 = arith.constant 0 : index
    %110 = vector.load %arg7[%c0_115, %c0_116] : memref<256x4xf32, #tpu.memory_space<vmem>>, vector<256x4xf32>
    tpu.vector_store %arg7[%c0_115, %c0_116], %109 {strides = array<i32>} : memref<256x4xf32, #tpu.memory_space<vmem>>, vector<256x4xf32>,
    %c0_117 = arith.constant 0 : index
    %c0_118 = arith.constant 0 : index
    %c2_119 = arith.constant 2 : index
    %c8 = arith.constant 8 : index
    %c0_120 = arith.constant 0 : index
    %111 = vector.load %arg2[%c0_117, %c0_118, %c2_119, %c8, %c0_120] : memref<1x1x26x26x4xf32, #tpu.memory_space<vmem>>, vector<1x1x16x16x4xf32>
    %112 = vector.shape_cast %111 : vector<1x1x16x16x4xf32> to vector<16x16x4xf32>
    %113 = vector.shape_cast %112 : vector<16x16x4xf32> to vector<256x4xf32>
    %114 = vector.extract_strided_slice %94 {offsets = [2, 0, 0], sizes = [1, 4, 4], strides = [1, 1, 1]} : vector<9x4x4xf32> to vector<1x4x4xf32>
    %115 = vector.shape_cast %114 : vector<1x4x4xf32> to vector<4x4xf32>
    %cst_121 = arith.constant dense<0.000000e+00> : vector<256x4xf32>
    %116 = tpu.matmul %113, %115, %cst_121 {dimension_numbers = #tpu.dot_dimension_numbers<[1], [0], [0], [1], [0, 0, 1, 1], [], []>} : vector<256x4xf32>, vector<4x4xf32>, vector<256x4xf32> -> vector<256x4xf32>
    %c0_122 = arith.constant 0 : index
    %c0_123 = arith.constant 0 : index
    %117 = vector.load %arg7[%c0_122, %c0_123] : memref<256x4xf32, #tpu.memory_space<vmem>>, vector<256x4xf32>
    %118 = arith.addf %117, %116 : vector<256x4xf32>
    %c0_124 = arith.constant 0 : index
    %c0_125 = arith.constant 0 : index
    %119 = vector.load %arg7[%c0_124, %c0_125] : memref<256x4xf32, #tpu.memory_space<vmem>>, vector<256x4xf32>
    tpu.vector_store %arg7[%c0_124, %c0_125], %118 {strides = array<i32>} : memref<256x4xf32, #tpu.memory_space<vmem>>, vector<256x4xf32>,
    %c0_126 = arith.constant 0 : index
    %c0_127 = arith.constant 0 : index
    %c5_128 = arith.constant 5 : index
    %c2_129 = arith.constant 2 : index
    %c0_130 = arith.constant 0 : index
    %120 = vector.load %arg2[%c0_126, %c0_127, %c5_128, %c2_129, %c0_130] : memref<1x1x26x26x4xf32, #tpu.memory_space<vmem>>, vector<1x1x16x16x4xf32>
    %121 = vector.shape_cast %120 : vector<1x1x16x16x4xf32> to vector<16x16x4xf32>
    %122 = vector.shape_cast %121 : vector<16x16x4xf32> to vector<256x4xf32>
    %123 = vector.extract_strided_slice %94 {offsets = [3, 0, 0], sizes = [1, 4, 4], strides = [1, 1, 1]} : vector<9x4x4xf32> to vector<1x4x4xf32>
    %124 = vector.shape_cast %123 : vector<1x4x4xf32> to vector<4x4xf32>
    %cst_131 = arith.constant dense<0.000000e+00> : vector<256x4xf32>
    %125 = tpu.matmul %122, %124, %cst_131 {dimension_numbers = #tpu.dot_dimension_numbers<[1], [0], [0], [1], [0, 0, 1, 1], [], []>} : vector<256x4xf32>, vector<4x4xf32>, vector<256x4xf32> -> vector<256x4xf32>
    %c0_132 = arith.constant 0 : index
    %c0_133 = arith.constant 0 : index
    %126 = vector.load %arg7[%c0_132, %c0_133] : memref<256x4xf32, #tpu.memory_space<vmem>>, vector<256x4xf32>
    %127 = arith.addf %126, %125 : vector<256x4xf32>
    %c0_134 = arith.constant 0 : index
    %c0_135 = arith.constant 0 : index
    %128 = vector.load %arg7[%c0_134, %c0_135] : memref<256x4xf32, #tpu.memory_space<vmem>>, vector<256x4xf32>
    tpu.vector_store %arg7[%c0_134, %c0_135], %127 {strides = array<i32>} : memref<256x4xf32, #tpu.memory_space<vmem>>, vector<256x4xf32>,
    %c0_136 = arith.constant 0 : index
    %c0_137 = arith.constant 0 : index
    %c5_138 = arith.constant 5 : index
    %c5_139 = arith.constant 5 : index
    %c0_140 = arith.constant 0 : index
    %129 = vector.load %arg2[%c0_136, %c0_137, %c5_138, %c5_139, %c0_140] : memref<1x1x26x26x4xf32, #tpu.memory_space<vmem>>, vector<1x1x16x16x4xf32>
    %130 = vector.shape_cast %129 : vector<1x1x16x16x4xf32> to vector<16x16x4xf32>
    %131 = vector.shape_cast %130 : vector<16x16x4xf32> to vector<256x4xf32>
    %132 = vector.extract_strided_slice %94 {offsets = [4, 0, 0], sizes = [1, 4, 4], strides = [1, 1, 1]} : vector<9x4x4xf32> to vector<1x4x4xf32>
    %133 = vector.shape_cast %132 : vector<1x4x4xf32> to vector<4x4xf32>
    %cst_141 = arith.constant dense<0.000000e+00> : vector<256x4xf32>
    %134 = tpu.matmul %131, %133, %cst_141 {dimension_numbers = #tpu.dot_dimension_numbers<[1], [0], [0], [1], [0, 0, 1, 1], [], []>} : vector<256x4xf32>, vector<4x4xf32>, vector<256x4xf32> -> vector<256x4xf32>
    %c0_142 = arith.constant 0 : index
    %c0_143 = arith.constant 0 : index
    %135 = vector.load %arg7[%c0_142, %c0_143] : memref<256x4xf32, #tpu.memory_space<vmem>>, vector<256x4xf32>
    %136 = arith.addf %135, %134 : vector<256x4xf32>
    %c0_144 = arith.constant 0 : index
    %c0_145 = arith.constant 0 : index
    %137 = vector.load %arg7[%c0_144, %c0_145] : memref<256x4xf32, #tpu.memory_space<vmem>>, vector<256x4xf32>
    tpu.vector_store %arg7[%c0_144, %c0_145], %136 {strides = array<i32>} : memref<256x4xf32, #tpu.memory_space<vmem>>, vector<256x4xf32>,
    %c0_146 = arith.constant 0 : index
    %c0_147 = arith.constant 0 : index
    %c5_148 = arith.constant 5 : index
    %c8_149 = arith.constant 8 : index
    %c0_150 = arith.constant 0 : index
    %138 = vector.load %arg2[%c0_146, %c0_147, %c5_148, %c8_149, %c0_150] : memref<1x1x26x26x4xf32, #tpu.memory_space<vmem>>, vector<1x1x16x16x4xf32>
    %139 = vector.shape_cast %138 : vector<1x1x16x16x4xf32> to vector<16x16x4xf32>
    %140 = vector.shape_cast %139 : vector<16x16x4xf32> to vector<256x4xf32>
    %141 = vector.extract_strided_slice %94 {offsets = [5, 0, 0], sizes = [1, 4, 4], strides = [1, 1, 1]} : vector<9x4x4xf32> to vector<1x4x4xf32>
    %142 = vector.shape_cast %141 : vector<1x4x4xf32> to vector<4x4xf32>
    %cst_151 = arith.constant dense<0.000000e+00> : vector<256x4xf32>
    %143 = tpu.matmul %140, %142, %cst_151 {dimension_numbers = #tpu.dot_dimension_numbers<[1], [0], [0], [1], [0, 0, 1, 1], [], []>} : vector<256x4xf32>, vector<4x4xf32>, vector<256x4xf32> -> vector<256x4xf32>
    %c0_152 = arith.constant 0 : index
    %c0_153 = arith.constant 0 : index
    %144 = vector.load %arg7[%c0_152, %c0_153] : memref<256x4xf32, #tpu.memory_space<vmem>>, vector<256x4xf32>
    %145 = arith.addf %144, %143 : vector<256x4xf32>
    %c0_154 = arith.constant 0 : index
    %c0_155 = arith.constant 0 : index
    %146 = vector.load %arg7[%c0_154, %c0_155] : memref<256x4xf32, #tpu.memory_space<vmem>>, vector<256x4xf32>
    tpu.vector_store %arg7[%c0_154, %c0_155], %145 {strides = array<i32>} : memref<256x4xf32, #tpu.memory_space<vmem>>, vector<256x4xf32>,
    %c0_156 = arith.constant 0 : index
    %c0_157 = arith.constant 0 : index
    %c8_158 = arith.constant 8 : index
    %c2_159 = arith.constant 2 : index
    %c0_160 = arith.constant 0 : index
    %147 = vector.load %arg2[%c0_156, %c0_157, %c8_158, %c2_159, %c0_160] : memref<1x1x26x26x4xf32, #tpu.memory_space<vmem>>, vector<1x1x16x16x4xf32>
    %148 = vector.shape_cast %147 : vector<1x1x16x16x4xf32> to vector<16x16x4xf32>
    %149 = vector.shape_cast %148 : vector<16x16x4xf32> to vector<256x4xf32>
    %150 = vector.extract_strided_slice %94 {offsets = [6, 0, 0], sizes = [1, 4, 4], strides = [1, 1, 1]} : vector<9x4x4xf32> to vector<1x4x4xf32>
    %151 = vector.shape_cast %150 : vector<1x4x4xf32> to vector<4x4xf32>
    %cst_161 = arith.constant dense<0.000000e+00> : vector<256x4xf32>
    %152 = tpu.matmul %149, %151, %cst_161 {dimension_numbers = #tpu.dot_dimension_numbers<[1], [0], [0], [1], [0, 0, 1, 1], [], []>} : vector<256x4xf32>, vector<4x4xf32>, vector<256x4xf32> -> vector<256x4xf32>
    %c0_162 = arith.constant 0 : index
    %c0_163 = arith.constant 0 : index
    %153 = vector.load %arg7[%c0_162, %c0_163] : memref<256x4xf32, #tpu.memory_space<vmem>>, vector<256x4xf32>
    %154 = arith.addf %153, %152 : vector<256x4xf32>
    %c0_164 = arith.constant 0 : index
    %c0_165 = arith.constant 0 : index
    %155 = vector.load %arg7[%c0_164, %c0_165] : memref<256x4xf32, #tpu.memory_space<vmem>>, vector<256x4xf32>
    tpu.vector_store %arg7[%c0_164, %c0_165], %154 {strides = array<i32>} : memref<256x4xf32, #tpu.memory_space<vmem>>, vector<256x4xf32>,
    %c0_166 = arith.constant 0 : index
    %c0_167 = arith.constant 0 : index
    %c8_168 = arith.constant 8 : index
    %c5_169 = arith.constant 5 : index
    %c0_170 = arith.constant 0 : index
    %156 = vector.load %arg2[%c0_166, %c0_167, %c8_168, %c5_169, %c0_170] : memref<1x1x26x26x4xf32, #tpu.memory_space<vmem>>, vector<1x1x16x16x4xf32>
    %157 = vector.shape_cast %156 : vector<1x1x16x16x4xf32> to vector<16x16x4xf32>
    %158 = vector.shape_cast %157 : vector<16x16x4xf32> to vector<256x4xf32>
    %159 = vector.extract_strided_slice %94 {offsets = [7, 0, 0], sizes = [1, 4, 4], strides = [1, 1, 1]} : vector<9x4x4xf32> to vector<1x4x4xf32>
    %160 = vector.shape_cast %159 : vector<1x4x4xf32> to vector<4x4xf32>
    %cst_171 = arith.constant dense<0.000000e+00> : vector<256x4xf32>
    %161 = tpu.matmul %158, %160, %cst_171 {dimension_numbers = #tpu.dot_dimension_numbers<[1], [0], [0], [1], [0, 0, 1, 1], [], []>} : vector<256x4xf32>, vector<4x4xf32>, vector<256x4xf32> -> vector<256x4xf32>
    %c0_172 = arith.constant 0 : index
    %c0_173 = arith.constant 0 : index
    %162 = vector.load %arg7[%c0_172, %c0_173] : memref<256x4xf32, #tpu.memory_space<vmem>>, vector<256x4xf32>
    %163 = arith.addf %162, %161 : vector<256x4xf32>
    %c0_174 = arith.constant 0 : index
    %c0_175 = arith.constant 0 : index
    %164 = vector.load %arg7[%c0_174, %c0_175] : memref<256x4xf32, #tpu.memory_space<vmem>>, vector<256x4xf32>
    tpu.vector_store %arg7[%c0_174, %c0_175], %163 {strides = array<i32>} : memref<256x4xf32, #tpu.memory_space<vmem>>, vector<256x4xf32>,
    %c0_176 = arith.constant 0 : index
    %c0_177 = arith.constant 0 : index
    %c8_178 = arith.constant 8 : index
    %c8_179 = arith.constant 8 : index
    %c0_180 = arith.constant 0 : index
    %165 = vector.load %arg2[%c0_176, %c0_177, %c8_178, %c8_179, %c0_180] : memref<1x1x26x26x4xf32, #tpu.memory_space<vmem>>, vector<1x1x16x16x4xf32>
    %166 = vector.shape_cast %165 : vector<1x1x16x16x4xf32> to vector<16x16x4xf32>
    %167 = vector.shape_cast %166 : vector<16x16x4xf32> to vector<256x4xf32>
    %168 = vector.extract_strided_slice %94 {offsets = [8, 0, 0], sizes = [1, 4, 4], strides = [1, 1, 1]} : vector<9x4x4xf32> to vector<1x4x4xf32>
    %169 = vector.shape_cast %168 : vector<1x4x4xf32> to vector<4x4xf32>
    %cst_181 = arith.constant dense<0.000000e+00> : vector<256x4xf32>
    %170 = tpu.matmul %167, %169, %cst_181 {dimension_numbers = #tpu.dot_dimension_numbers<[1], [0], [0], [1], [0, 0, 1, 1], [], []>} : vector<256x4xf32>, vector<4x4xf32>, vector<256x4xf32> -> vector<256x4xf32>
    %c0_182 = arith.constant 0 : index
    %c0_183 = arith.constant 0 : index
    %171 = vector.load %arg7[%c0_182, %c0_183] : memref<256x4xf32, #tpu.memory_space<vmem>>, vector<256x4xf32>
    %172 = arith.addf %171, %170 : vector<256x4xf32>
    %c0_184 = arith.constant 0 : index
    %c0_185 = arith.constant 0 : index
    %173 = vector.load %arg7[%c0_184, %c0_185] : memref<256x4xf32, #tpu.memory_space<vmem>>, vector<256x4xf32>
    tpu.vector_store %arg7[%c0_184, %c0_185], %172 {strides = array<i32>} : memref<256x4xf32, #tpu.memory_space<vmem>>, vector<256x4xf32>,
    %c0_186 = arith.constant 0 : index
    %c0_187 = arith.constant 0 : index
    %174 = vector.load %arg7[%c0_186, %c0_187] : memref<256x4xf32, #tpu.memory_space<vmem>>, vector<256x4xf32>
    %c1_188 = arith.constant 1 : index
    %c0_189 = arith.constant 0 : index
    %175 = vector.load %arg4[%c1_188, %c0_189] : memref<3x4xf32, #tpu.memory_space<vmem>>, vector<1x4xf32>
    %176 = vector.broadcast %175 : vector<1x4xf32> to vector<256x4xf32>
    %177 = arith.addf %174, %176 : vector<256x4xf32>
    %c1_190 = arith.constant 1 : index
    %c0_191 = arith.constant 0 : index
    %c0_192 = arith.constant 0 : index
    %c0_193 = arith.constant 0 : index
    %178 = vector.load %arg5[%c1_190, %c0_191, %c0_192, %c0_193] : memref<3x1x256x4xf32, #tpu.memory_space<vmem>>, vector<1x1x256x4xf32>
    %179 = vector.shape_cast %178 : vector<1x1x256x4xf32> to vector<256x4xf32>
    %180 = vector.shape_cast %177 : vector<256x4xf32> to vector<1x1x256x4xf32>
    tpu.vector_store %arg5[%c1_190, %c0_191, %c0_192, %c0_193], %180 {strides = array<i32>} : memref<3x1x256x4xf32, #tpu.memory_space<vmem>>, vector<1x1x256x4xf32>,
    %cst_194 = arith.constant dense<0.000000e+00> : vector<4xf32>
    %181 = vector.multi_reduction <add>, %177, %cst_194 [0] : vector<256x4xf32> to vector<4xf32>
    %182 = vector.shape_cast %181 : vector<4xf32> to vector<1x4xf32>
    %183 = arith.mulf %177, %177 : vector<256x4xf32>
    %cst_195 = arith.constant dense<0.000000e+00> : vector<4xf32>
    %184 = vector.multi_reduction <add>, %183, %cst_195 [0] : vector<256x4xf32> to vector<4xf32>
    %185 = vector.shape_cast %184 : vector<4xf32> to vector<1x4xf32>
    %c2_196 = arith.constant 2 : index
    %c0_197 = arith.constant 0 : index
    %c0_198 = arith.constant 0 : index
    %c0_199 = arith.constant 0 : index
    %186 = vector.load %arg3[%c2_196, %c0_197, %c0_198, %c0_199] : memref<3x9x4x4xf32, #tpu.memory_space<vmem>>, vector<1x9x4x4xf32>
    %187 = vector.shape_cast %186 : vector<1x9x4x4xf32> to vector<9x4x4xf32>
    %c0_200 = arith.constant 0 : index
    %c0_201 = arith.constant 0 : index
    %c0_202 = arith.constant 0 : index
    %c0_203 = arith.constant 0 : index
    %c0_204 = arith.constant 0 : index
    %188 = vector.load %arg2[%c0_200, %c0_201, %c0_202, %c0_203, %c0_204] : memref<1x1x26x26x4xf32, #tpu.memory_space<vmem>>, vector<1x1x16x16x4xf32>
    %189 = vector.shape_cast %188 : vector<1x1x16x16x4xf32> to vector<16x16x4xf32>
    %190 = vector.shape_cast %189 : vector<16x16x4xf32> to vector<256x4xf32>
    %191 = vector.extract_strided_slice %187 {offsets = [0, 0, 0], sizes = [1, 4, 4], strides = [1, 1, 1]} : vector<9x4x4xf32> to vector<1x4x4xf32>
    %192 = vector.shape_cast %191 : vector<1x4x4xf32> to vector<4x4xf32>
    %cst_205 = arith.constant dense<0.000000e+00> : vector<256x4xf32>
    %193 = tpu.matmul %190, %192, %cst_205 {dimension_numbers = #tpu.dot_dimension_numbers<[1], [0], [0], [1], [0, 0, 1, 1], [], []>} : vector<256x4xf32>, vector<4x4xf32>, vector<256x4xf32> -> vector<256x4xf32>
    %c0_206 = arith.constant 0 : index
    %c0_207 = arith.constant 0 : index
    %194 = vector.load %arg7[%c0_206, %c0_207] : memref<256x4xf32, #tpu.memory_space<vmem>>, vector<256x4xf32>
    tpu.vector_store %arg7[%c0_206, %c0_207], %193 {strides = array<i32>} : memref<256x4xf32, #tpu.memory_space<vmem>>, vector<256x4xf32>,
    %c0_208 = arith.constant 0 : index
    %c0_209 = arith.constant 0 : index
    %c0_210 = arith.constant 0 : index
    %c5_211 = arith.constant 5 : index
    %c0_212 = arith.constant 0 : index
    %195 = vector.load %arg2[%c0_208, %c0_209, %c0_210, %c5_211, %c0_212] : memref<1x1x26x26x4xf32, #tpu.memory_space<vmem>>, vector<1x1x16x16x4xf32>
    %196 = vector.shape_cast %195 : vector<1x1x16x16x4xf32> to vector<16x16x4xf32>
    %197 = vector.shape_cast %196 : vector<16x16x4xf32> to vector<256x4xf32>
    %198 = vector.extract_strided_slice %187 {offsets = [1, 0, 0], sizes = [1, 4, 4], strides = [1, 1, 1]} : vector<9x4x4xf32> to vector<1x4x4xf32>
    %199 = vector.shape_cast %198 : vector<1x4x4xf32> to vector<4x4xf32>
    %cst_213 = arith.constant dense<0.000000e+00> : vector<256x4xf32>
    %200 = tpu.matmul %197, %199, %cst_213 {dimension_numbers = #tpu.dot_dimension_numbers<[1], [0], [0], [1], [0, 0, 1, 1], [], []>} : vector<256x4xf32>, vector<4x4xf32>, vector<256x4xf32> -> vector<256x4xf32>
    %c0_214 = arith.constant 0 : index
    %c0_215 = arith.constant 0 : index
    %201 = vector.load %arg7[%c0_214, %c0_215] : memref<256x4xf32, #tpu.memory_space<vmem>>, vector<256x4xf32>
    %202 = arith.addf %201, %200 : vector<256x4xf32>
    %c0_216 = arith.constant 0 : index
    %c0_217 = arith.constant 0 : index
    %203 = vector.load %arg7[%c0_216, %c0_217] : memref<256x4xf32, #tpu.memory_space<vmem>>, vector<256x4xf32>
    tpu.vector_store %arg7[%c0_216, %c0_217], %202 {strides = array<i32>} : memref<256x4xf32, #tpu.memory_space<vmem>>, vector<256x4xf32>,
    %c0_218 = arith.constant 0 : index
    %c0_219 = arith.constant 0 : index
    %c0_220 = arith.constant 0 : index
    %c10 = arith.constant 10 : index
    %c0_221 = arith.constant 0 : index
    %204 = vector.load %arg2[%c0_218, %c0_219, %c0_220, %c10, %c0_221] : memref<1x1x26x26x4xf32, #tpu.memory_space<vmem>>, vector<1x1x16x16x4xf32>
    %205 = vector.shape_cast %204 : vector<1x1x16x16x4xf32> to vector<16x16x4xf32>
    %206 = vector.shape_cast %205 : vector<16x16x4xf32> to vector<256x4xf32>
    %207 = vector.extract_strided_slice %187 {offsets = [2, 0, 0], sizes = [1, 4, 4], strides = [1, 1, 1]} : vector<9x4x4xf32> to vector<1x4x4xf32>
    %208 = vector.shape_cast %207 : vector<1x4x4xf32> to vector<4x4xf32>
    %cst_222 = arith.constant dense<0.000000e+00> : vector<256x4xf32>
    %209 = tpu.matmul %206, %208, %cst_222 {dimension_numbers = #tpu.dot_dimension_numbers<[1], [0], [0], [1], [0, 0, 1, 1], [], []>} : vector<256x4xf32>, vector<4x4xf32>, vector<256x4xf32> -> vector<256x4xf32>
    %c0_223 = arith.constant 0 : index
    %c0_224 = arith.constant 0 : index
    %210 = vector.load %arg7[%c0_223, %c0_224] : memref<256x4xf32, #tpu.memory_space<vmem>>, vector<256x4xf32>
    %211 = arith.addf %210, %209 : vector<256x4xf32>
    %c0_225 = arith.constant 0 : index
    %c0_226 = arith.constant 0 : index
    %212 = vector.load %arg7[%c0_225, %c0_226] : memref<256x4xf32, #tpu.memory_space<vmem>>, vector<256x4xf32>
    tpu.vector_store %arg7[%c0_225, %c0_226], %211 {strides = array<i32>} : memref<256x4xf32, #tpu.memory_space<vmem>>, vector<256x4xf32>,
    %c0_227 = arith.constant 0 : index
    %c0_228 = arith.constant 0 : index
    %c5_229 = arith.constant 5 : index
    %c0_230 = arith.constant 0 : index
    %c0_231 = arith.constant 0 : index
    %213 = vector.load %arg2[%c0_227, %c0_228, %c5_229, %c0_230, %c0_231] : memref<1x1x26x26x4xf32, #tpu.memory_space<vmem>>, vector<1x1x16x16x4xf32>
    %214 = vector.shape_cast %213 : vector<1x1x16x16x4xf32> to vector<16x16x4xf32>
    %215 = vector.shape_cast %214 : vector<16x16x4xf32> to vector<256x4xf32>
    %216 = vector.extract_strided_slice %187 {offsets = [3, 0, 0], sizes = [1, 4, 4], strides = [1, 1, 1]} : vector<9x4x4xf32> to vector<1x4x4xf32>
    %217 = vector.shape_cast %216 : vector<1x4x4xf32> to vector<4x4xf32>
    %cst_232 = arith.constant dense<0.000000e+00> : vector<256x4xf32>
    %218 = tpu.matmul %215, %217, %cst_232 {dimension_numbers = #tpu.dot_dimension_numbers<[1], [0], [0], [1], [0, 0, 1, 1], [], []>} : vector<256x4xf32>, vector<4x4xf32>, vector<256x4xf32> -> vector<256x4xf32>
    %c0_233 = arith.constant 0 : index
    %c0_234 = arith.constant 0 : index
    %219 = vector.load %arg7[%c0_233, %c0_234] : memref<256x4xf32, #tpu.memory_space<vmem>>, vector<256x4xf32>
    %220 = arith.addf %219, %218 : vector<256x4xf32>
    %c0_235 = arith.constant 0 : index
    %c0_236 = arith.constant 0 : index
    %221 = vector.load %arg7[%c0_235, %c0_236] : memref<256x4xf32, #tpu.memory_space<vmem>>, vector<256x4xf32>
    tpu.vector_store %arg7[%c0_235, %c0_236], %220 {strides = array<i32>} : memref<256x4xf32, #tpu.memory_space<vmem>>, vector<256x4xf32>,
    %c0_237 = arith.constant 0 : index
    %c0_238 = arith.constant 0 : index
    %c5_239 = arith.constant 5 : index
    %c5_240 = arith.constant 5 : index
    %c0_241 = arith.constant 0 : index
    %222 = vector.load %arg2[%c0_237, %c0_238, %c5_239, %c5_240, %c0_241] : memref<1x1x26x26x4xf32, #tpu.memory_space<vmem>>, vector<1x1x16x16x4xf32>
    %223 = vector.shape_cast %222 : vector<1x1x16x16x4xf32> to vector<16x16x4xf32>
    %224 = vector.shape_cast %223 : vector<16x16x4xf32> to vector<256x4xf32>
    %225 = vector.extract_strided_slice %187 {offsets = [4, 0, 0], sizes = [1, 4, 4], strides = [1, 1, 1]} : vector<9x4x4xf32> to vector<1x4x4xf32>
    %226 = vector.shape_cast %225 : vector<1x4x4xf32> to vector<4x4xf32>
    %cst_242 = arith.constant dense<0.000000e+00> : vector<256x4xf32>
    %227 = tpu.matmul %224, %226, %cst_242 {dimension_numbers = #tpu.dot_dimension_numbers<[1], [0], [0], [1], [0, 0, 1, 1], [], []>} : vector<256x4xf32>, vector<4x4xf32>, vector<256x4xf32> -> vector<256x4xf32>
    %c0_243 = arith.constant 0 : index
    %c0_244 = arith.constant 0 : index
    %228 = vector.load %arg7[%c0_243, %c0_244] : memref<256x4xf32, #tpu.memory_space<vmem>>, vector<256x4xf32>
    %229 = arith.addf %228, %227 : vector<256x4xf32>
    %c0_245 = arith.constant 0 : index
    %c0_246 = arith.constant 0 : index
    %230 = vector.load %arg7[%c0_245, %c0_246] : memref<256x4xf32, #tpu.memory_space<vmem>>, vector<256x4xf32>
    tpu.vector_store %arg7[%c0_245, %c0_246], %229 {strides = array<i32>} : memref<256x4xf32, #tpu.memory_space<vmem>>, vector<256x4xf32>,
    %c0_247 = arith.constant 0 : index
    %c0_248 = arith.constant 0 : index
    %c5_249 = arith.constant 5 : index
    %c10_250 = arith.constant 10 : index
    %c0_251 = arith.constant 0 : index
    %231 = vector.load %arg2[%c0_247, %c0_248, %c5_249, %c10_250, %c0_251] : memref<1x1x26x26x4xf32, #tpu.memory_space<vmem>>, vector<1x1x16x16x4xf32>
    %232 = vector.shape_cast %231 : vector<1x1x16x16x4xf32> to vector<16x16x4xf32>
    %233 = vector.shape_cast %232 : vector<16x16x4xf32> to vector<256x4xf32>
    %234 = vector.extract_strided_slice %187 {offsets = [5, 0, 0], sizes = [1, 4, 4], strides = [1, 1, 1]} : vector<9x4x4xf32> to vector<1x4x4xf32>
    %235 = vector.shape_cast %234 : vector<1x4x4xf32> to vector<4x4xf32>
    %cst_252 = arith.constant dense<0.000000e+00> : vector<256x4xf32>
    %236 = tpu.matmul %233, %235, %cst_252 {dimension_numbers = #tpu.dot_dimension_numbers<[1], [0], [0], [1], [0, 0, 1, 1], [], []>} : vector<256x4xf32>, vector<4x4xf32>, vector<256x4xf32> -> vector<256x4xf32>
    %c0_253 = arith.constant 0 : index
    %c0_254 = arith.constant 0 : index
    %237 = vector.load %arg7[%c0_253, %c0_254] : memref<256x4xf32, #tpu.memory_space<vmem>>, vector<256x4xf32>
    %238 = arith.addf %237, %236 : vector<256x4xf32>
    %c0_255 = arith.constant 0 : index
    %c0_256 = arith.constant 0 : index
    %239 = vector.load %arg7[%c0_255, %c0_256] : memref<256x4xf32, #tpu.memory_space<vmem>>, vector<256x4xf32>
    tpu.vector_store %arg7[%c0_255, %c0_256], %238 {strides = array<i32>} : memref<256x4xf32, #tpu.memory_space<vmem>>, vector<256x4xf32>,
    %c0_257 = arith.constant 0 : index
    %c0_258 = arith.constant 0 : index
    %c10_259 = arith.constant 10 : index
    %c0_260 = arith.constant 0 : index
    %c0_261 = arith.constant 0 : index
    %240 = vector.load %arg2[%c0_257, %c0_258, %c10_259, %c0_260, %c0_261] : memref<1x1x26x26x4xf32, #tpu.memory_space<vmem>>, vector<1x1x16x16x4xf32>
    %241 = vector.shape_cast %240 : vector<1x1x16x16x4xf32> to vector<16x16x4xf32>
    %242 = vector.shape_cast %241 : vector<16x16x4xf32> to vector<256x4xf32>
    %243 = vector.extract_strided_slice %187 {offsets = [6, 0, 0], sizes = [1, 4, 4], strides = [1, 1, 1]} : vector<9x4x4xf32> to vector<1x4x4xf32>
    %244 = vector.shape_cast %243 : vector<1x4x4xf32> to vector<4x4xf32>
    %cst_262 = arith.constant dense<0.000000e+00> : vector<256x4xf32>
    %245 = tpu.matmul %242, %244, %cst_262 {dimension_numbers = #tpu.dot_dimension_numbers<[1], [0], [0], [1], [0, 0, 1, 1], [], []>} : vector<256x4xf32>, vector<4x4xf32>, vector<256x4xf32> -> vector<256x4xf32>
    %c0_263 = arith.constant 0 : index
    %c0_264 = arith.constant 0 : index
    %246 = vector.load %arg7[%c0_263, %c0_264] : memref<256x4xf32, #tpu.memory_space<vmem>>, vector<256x4xf32>
    %247 = arith.addf %246, %245 : vector<256x4xf32>
    %c0_265 = arith.constant 0 : index
    %c0_266 = arith.constant 0 : index
    %248 = vector.load %arg7[%c0_265, %c0_266] : memref<256x4xf32, #tpu.memory_space<vmem>>, vector<256x4xf32>
    tpu.vector_store %arg7[%c0_265, %c0_266], %247 {strides = array<i32>} : memref<256x4xf32, #tpu.memory_space<vmem>>, vector<256x4xf32>,
    %c0_267 = arith.constant 0 : index
    %c0_268 = arith.constant 0 : index
    %c10_269 = arith.constant 10 : index
    %c5_270 = arith.constant 5 : index
    %c0_271 = arith.constant 0 : index
    %249 = vector.load %arg2[%c0_267, %c0_268, %c10_269, %c5_270, %c0_271] : memref<1x1x26x26x4xf32, #tpu.memory_space<vmem>>, vector<1x1x16x16x4xf32>
    %250 = vector.shape_cast %249 : vector<1x1x16x16x4xf32> to vector<16x16x4xf32>
    %251 = vector.shape_cast %250 : vector<16x16x4xf32> to vector<256x4xf32>
    %252 = vector.extract_strided_slice %187 {offsets = [7, 0, 0], sizes = [1, 4, 4], strides = [1, 1, 1]} : vector<9x4x4xf32> to vector<1x4x4xf32>
    %253 = vector.shape_cast %252 : vector<1x4x4xf32> to vector<4x4xf32>
    %cst_272 = arith.constant dense<0.000000e+00> : vector<256x4xf32>
    %254 = tpu.matmul %251, %253, %cst_272 {dimension_numbers = #tpu.dot_dimension_numbers<[1], [0], [0], [1], [0, 0, 1, 1], [], []>} : vector<256x4xf32>, vector<4x4xf32>, vector<256x4xf32> -> vector<256x4xf32>
    %c0_273 = arith.constant 0 : index
    %c0_274 = arith.constant 0 : index
    %255 = vector.load %arg7[%c0_273, %c0_274] : memref<256x4xf32, #tpu.memory_space<vmem>>, vector<256x4xf32>
    %256 = arith.addf %255, %254 : vector<256x4xf32>
    %c0_275 = arith.constant 0 : index
    %c0_276 = arith.constant 0 : index
    %257 = vector.load %arg7[%c0_275, %c0_276] : memref<256x4xf32, #tpu.memory_space<vmem>>, vector<256x4xf32>
    tpu.vector_store %arg7[%c0_275, %c0_276], %256 {strides = array<i32>} : memref<256x4xf32, #tpu.memory_space<vmem>>, vector<256x4xf32>,
    %c0_277 = arith.constant 0 : index
    %c0_278 = arith.constant 0 : index
    %c10_279 = arith.constant 10 : index
    %c10_280 = arith.constant 10 : index
    %c0_281 = arith.constant 0 : index
    %258 = vector.load %arg2[%c0_277, %c0_278, %c10_279, %c10_280, %c0_281] : memref<1x1x26x26x4xf32, #tpu.memory_space<vmem>>, vector<1x1x16x16x4xf32>
    %259 = vector.shape_cast %258 : vector<1x1x16x16x4xf32> to vector<16x16x4xf32>
    %260 = vector.shape_cast %259 : vector<16x16x4xf32> to vector<256x4xf32>
    %261 = vector.extract_strided_slice %187 {offsets = [8, 0, 0], sizes = [1, 4, 4], strides = [1, 1, 1]} : vector<9x4x4xf32> to vector<1x4x4xf32>
    %262 = vector.shape_cast %261 : vector<1x4x4xf32> to vector<4x4xf32>
    %cst_282 = arith.constant dense<0.000000e+00> : vector<256x4xf32>
    %263 = tpu.matmul %260, %262, %cst_282 {dimension_numbers = #tpu.dot_dimension_numbers<[1], [0], [0], [1], [0, 0, 1, 1], [], []>} : vector<256x4xf32>, vector<4x4xf32>, vector<256x4xf32> -> vector<256x4xf32>
    %c0_283 = arith.constant 0 : index
    %c0_284 = arith.constant 0 : index
    %264 = vector.load %arg7[%c0_283, %c0_284] : memref<256x4xf32, #tpu.memory_space<vmem>>, vector<256x4xf32>
    %265 = arith.addf %264, %263 : vector<256x4xf32>
    %c0_285 = arith.constant 0 : index
    %c0_286 = arith.constant 0 : index
    %266 = vector.load %arg7[%c0_285, %c0_286] : memref<256x4xf32, #tpu.memory_space<vmem>>, vector<256x4xf32>
    tpu.vector_store %arg7[%c0_285, %c0_286], %265 {strides = array<i32>} : memref<256x4xf32, #tpu.memory_space<vmem>>, vector<256x4xf32>,
    %c0_287 = arith.constant 0 : index
    %c0_288 = arith.constant 0 : index
    %267 = vector.load %arg7[%c0_287, %c0_288] : memref<256x4xf32, #tpu.memory_space<vmem>>, vector<256x4xf32>
    %c2_289 = arith.constant 2 : index
    %c0_290 = arith.constant 0 : index
    %268 = vector.load %arg4[%c2_289, %c0_290] : memref<3x4xf32, #tpu.memory_space<vmem>>, vector<1x4xf32>
    %269 = vector.broadcast %268 : vector<1x4xf32> to vector<256x4xf32>
    %270 = arith.addf %267, %269 : vector<256x4xf32>
    %c2_291 = arith.constant 2 : index
    %c0_292 = arith.constant 0 : index
    %c0_293 = arith.constant 0 : index
    %c0_294 = arith.constant 0 : index
    %271 = vector.load %arg5[%c2_291, %c0_292, %c0_293, %c0_294] : memref<3x1x256x4xf32, #tpu.memory_space<vmem>>, vector<1x1x256x4xf32>
    %272 = vector.shape_cast %271 : vector<1x1x256x4xf32> to vector<256x4xf32>
    %273 = vector.shape_cast %270 : vector<256x4xf32> to vector<1x1x256x4xf32>
    tpu.vector_store %arg5[%c2_291, %c0_292, %c0_293, %c0_294], %273 {strides = array<i32>} : memref<3x1x256x4xf32, #tpu.memory_space<vmem>>, vector<1x1x256x4xf32>,
    %cst_295 = arith.constant dense<0.000000e+00> : vector<4xf32>
    %274 = vector.multi_reduction <add>, %270, %cst_295 [0] : vector<256x4xf32> to vector<4xf32>
    %275 = vector.shape_cast %274 : vector<4xf32> to vector<1x4xf32>
    %276 = arith.mulf %270, %270 : vector<256x4xf32>
    %cst_296 = arith.constant dense<0.000000e+00> : vector<4xf32>
    %277 = vector.multi_reduction <add>, %276, %cst_296 [0] : vector<256x4xf32> to vector<4xf32>
    %278 = vector.shape_cast %277 : vector<4xf32> to vector<1x4xf32>
    %279 = tpu.concatenate %89, %92, %182, %185, %275, %278 in 0 : vector<1x4xf32>, vector<1x4xf32>, vector<1x4xf32>, vector<1x4xf32>, vector<1x4xf32>, vector<1x4xf32> -> vector<6x4xf32>
    %c0_297 = arith.constant 0 : index
    %c0_298 = arith.constant 0 : index
    %c0_299 = arith.constant 0 : index
    %c0_300 = arith.constant 0 : index
    %280 = vector.load %arg6[%c0_297, %c0_298, %c0_299, %c0_300] : memref<1x1x6x4xf32, #tpu.memory_space<vmem>>, vector<1x1x6x4xf32>
    %281 = vector.shape_cast %280 : vector<1x1x6x4xf32> to vector<6x4xf32>
    %282 = vector.shape_cast %279 : vector<6x4xf32> to vector<1x1x6x4xf32>
    tpu.vector_store %arg6[%c0_297, %c0_298, %c0_299, %c0_300], %282 {strides = array<i32>} : memref<1x1x6x4xf32, #tpu.memory_space<vmem>>, vector<1x1x6x4xf32>,
    return
  }
  func.func @transform_0(%arg0: i32, %arg1: i32) -> (i32, i32, i32, i32, i32) {
    %c0_i32 = arith.constant 0 : i32
    %c0_i32_0 = arith.constant 0 : i32
    %c0_i32_1 = arith.constant 0 : i32
    %c0_i32_2 = arith.constant 0 : i32
    return %arg0, %arg1, %c0_i32, %c0_i32_0, %c0_i32_1 : i32, i32, i32, i32, i32
  }
  func.func @transform_1(%arg0: i32, %arg1: i32) -> (i32, i32, i32, i32) {
    %c0_i32 = arith.constant 0 : i32
    %c0_i32_0 = arith.constant 0 : i32
    %c0_i32_1 = arith.constant 0 : i32
    %c0_i32_2 = arith.constant 0 : i32
    %c0_i32_3 = arith.constant 0 : i32
    return %c0_i32, %c0_i32_0, %c0_i32_1, %c0_i32_2 : i32, i32, i32, i32
  }
  func.func @transform_2(%arg0: i32, %arg1: i32) -> (i32, i32) {
    %c0_i32 = arith.constant 0 : i32
    %c0_i32_0 = arith.constant 0 : i32
    %c0_i32_1 = arith.constant 0 : i32
    return %c0_i32, %c0_i32_0 : i32, i32
  }
  func.func @transform_3(%arg0: i32, %arg1: i32) -> (i32, i32, i32, i32) {
    %c0_i32 = arith.constant 0 : i32
    %c0_i32_0 = arith.constant 0 : i32
    %c0_i32_1 = arith.constant 0 : i32
    return %c0_i32, %arg0, %arg1, %c0_i32_0 : i32, i32, i32, i32
  }
  func.func @transform_4(%arg0: i32, %arg1: i32) -> (i32, i32, i32, i32) {
    %c0_i32 = arith.constant 0 : i32
    %c0_i32_0 = arith.constant 0 : i32
    %c0_i32_1 = arith.constant 0 : i32
    return %arg0, %arg1, %c0_i32, %c0_i32_0 : i32, i32, i32, i32
  }
}

</mosaic_0001>

<bundles_post_ra>
// kernel: tpu_custom_call.1
= control target key start
LH: loop header
LB: loop body
LE: loop exit
PB: predicated region body
PF: predicated region fallthrough
CT: control target
= control target key end

     0   :  { %s17771_s15 = smov 0   ;;  %s17773_s16 = smov 0   ;;  %s22300_s0 = inlined_call_operand.vmem [shape: f32[2,1,26,26,4], index: 0, kind: input, shape index: {}]   ;;  %s22301_s1 = inlined_call_operand.vmem [shape: f32[3,9,4,4], index: 1, kind: input, shape index: {}]   ;;  %s22302_s2 = inlined_call_operand.vmem [shape: f32[3,4], index: 2, kind: input, shape index: {}]   ;;  %s22303_s3 = inlined_call_operand.vmem [shape: f32[3,2,256,4], index: 3, kind: output, shape index: {0}]   ;;  %s22304_s4 = inlined_call_operand.vmem [shape: f32[2,1,6,4], index: 4, kind: output, shape index: {1}]  }
   0x1   :  { %s17775_s17 = smov 0   ;;  %s17777_s18 = smov 0  }
   0x2   :  { %s17779_s19 = smov 0  }
   0x3 LB: > { %s13652_s20 = sadd.s32 4294967295, %s17744_s19   ;;  %s27_s21 = sadd.s32 1, %s17740_s18  ;;  %s17744_s19 = sphi %s17779_s19, %s15_s19   ;;  %s17740_s18 = sphi %s17777_s18, %s22404_s18   ;;  %s17736_s17 = sphi %s17775_s17, %s22403_s17   ;;  %s17732_s16 = sphi %s17773_s16, %s22402_s16   ;;  %s17728_s15 = sphi %s17771_s15, %s22401_s15  }
   0x4   : > { %p29_p0 = scmp.ge.s32.totalorder %s27_s21, 2  ;;  %s106_s22 = sadd.s32 1, %s17732_s16 }
   0x5   : > { %p116_p1 = scmp.ne.s32.totalorder %s17732_s16, %s17728_s15  ;;  %p117_p2 = scmp.eq.s32.totalorder %s13652_s20, 1 }
   0x6   : > { %s22406_s21 = smov (%p29_p0, %s27_s21), 0  ;;  %p13656_p4 = scmp.ge.s32.totalorder %s17744_s19, 1 }
   0x7   : > { %p17803_p3 = por %p117_p2, %p116_p1  ;;  %s101_s24 = ssub.s32 %s17740_s18, %s22406_s21 }
   0x8   : > { %p187_p5 = scmp.lt.s32.totalorder %s17744_s19, 3  ;;  %p104_p6 = scmp.eq.s32.totalorder %s101_s24, 0 }
   0xa   : > { %p188_p7 = pnand %p13656_p4, %p187_p5 }
   0xb   : > { %s17812_s25 = scalar_select %p104_p6, %s17732_s16, %s106_s22  }
   0xc   : > { %191 = sbr.rel (%p188_p7) target bundleno = 1151 (0x47f), region = 32 }
  0x11   : > { %v240_v0 = vld [vmem:[%s22301_s1] sm:$0xf]  ;;  %vm379_vm0 = vcmask 1043456   ;;  %p223_p8 = scmp.lt.s32.totalorder %s17736_s17, 1  ;;  %v241_v1 = vld [vmem:[%s22301_s1 + $0x4] sm:$0xf] }
  0x12   : > { %17649 = vmatprep.subr.msk.mxu1 %vm379_vm0, %v240_v0  ;;  %16299 = vmatprep.subr.msk.mxu0 %vm379_vm0, %v240_v0  ;;  %v242_v2 = vld [vmem:[%s22301_s1 + $0x8] sm:$0xf]  ;;  %vm282_vm1 = vcmask 31744   ;;  %v17854_v7 = vld [vmem:[%s22301_s1 + $0xc] sm:$0xf]  ;;  %s211_s11 = sand.u32 1, %s17728_s15  }
  0x13   : > { %17650 = vmatpush3.msk.msra.mxu1 %vm379_vm0, %v240_v0  ;;  %s17828_s6 = scalar_select %p223_p8, %s17736_s17, 1  ;;  %16300 = vmatpush3.msk.msra.mxu0 %vm379_vm0, %v240_v0  ;;  %v17872_v11 = vld [vmem:[%s22301_s1 + $0x10] sm:$0xf]  ;;  %v18021_v42 = vld [vmem:[%s22301_s1 + $0x14] sm:$0xf]  ;;  %vm13104_vm2 = vcmask 1040384  }
  0x14   : > { %16349 = vmatprep.subr.msk.mxu1 %vm379_vm0, %v241_v1  ;;  %16399 = vmatprep.subr.msk.mxu0 %vm379_vm0, %v242_v2  ;;  %v18037_v45 = vld [vmem:[%s22301_s1 + $0x18] sm:$0xf]  ;;  %s19496_s15 = smul.u32 768, %s211_s11  ;;  %vm13106_vm3 = vcmask 1041408   ;;  %vm13108_vm4 = vcmask 1042432   ;;  %vm13111_vm5 = vcmask 1044480  }
  0x15   : > { %s17652_s7 = smul.u32 832, %s17828_s6  ;;  %s13658_s9 = sshll.u32 %s17828_s6, 3  ;;  %vm13113_vm6 = vcmask 29696  }
  0x16   : > { %s19533_s14 = scalar_lea.vmem [#allocation3], %s19496_s15  ;;  %s239_s12 = scalar_lea.vmem %s22304_s4, %s13658_s9 }
  0x17   : > { %s17837_s10 = scalar_lea.vmem %s22300_s0, %s17652_s7  ;;  %s15407_s6 = sshll.u32 (%p17803_p3), %s17736_s17, 8 }
  0x18   : > { %v17840_v3 = vld [vmem:[%s17837_s10 + $0x184] sm:$0xff]  ;;  %v17843_v4 = vld [vmem:[%s17837_s10 + $0x18c] sm:$0xff]  ;;  %s22094_s22 = scalar_lea.vmem (%p17803_p3), %s22303_s3, %s15407_s6 }
  0x19   : > { %v17846_v5 = vld [vmem:[%s17837_s10 + $0x1a4] sm:$0xff]  ;;  %16325 = vmatprep.mubr.msk.f32.mxu1 %vm282_vm1, %v17840_v3  ;;  %v13660_v8 = vld [vmem:[%s17837_s10 + $0x8c] sm:$0xff] }
  0x1a   : > { %v13659_v6 = vld [vmem:[%s17837_s10 + $0x84] sm:$0xff]  ;;  %16326 = vmatmul.mubr.msk.f32.vlgmr.msra.gmra.mxu1 %vm282_vm1, %v17843_v4  ;;  %v17867_v10 = vld [vmem:[%s17837_s10 + $0x1ac] sm:$0xff] }
  0x1b   : > { %16301 = vmatprep.mubr.msk.f32.mxu0 %vm282_vm1, %v13659_v6  ;;  %v17861_v9 = vld [vmem:[%s17837_s10 + $0xa4] sm:$0xff]  ;;  %16350 = vmatpush3.msk.msra.mxu1 %vm379_vm0, %v241_v1  ;;  %v17884_v13 = vld [vmem:[%s17837_s10 + $0xac] sm:$0xff] }
  0x1c   : > { %16328 = vmatprep.mubr.msk.f32.mxu1 %vm282_vm1, %v17846_v5  ;;  %v17875_v12 = vld [vmem:[%s17837_s10 + $0x1c4] sm:$0xff]  ;;  %16302 = vmatmul.mubr.msk.f32.vlgmr.msra.gmra.mxu0 %vm282_vm1, %v13660_v8  ;;  %v17896_v15 = vld [vmem:[%s17837_s10 + $0x1cc] sm:$0xff] }
  0x1d   : > { %16449 = vmatprep.subr.msk.mxu1 %vm379_vm0, %v17854_v7  ;;  %16400 = vmatpush3.msk.msra.mxu0 %vm379_vm0, %v242_v2  ;;  %v17889_v14 = vld [vmem:[%s17837_s10 + $0xc4] sm:$0xff]  ;;  %v17906_v17 = vld [vmem:[%s17837_s10 + $0xcc] sm:$0xff] }
  0x1e   : > { %16304 = vmatprep.mubr.msk.f32.mxu0 %vm282_vm1, %v17861_v9  ;;  %16329 = vmatmul.mubr.msk.f32.gmra.mxu1 %vm282_vm1, %v17867_v10  ;;  %v17899_v16 = vld [vmem:[%s17837_s10 + $0x1e4] sm:$0xff]  ;;  %v17916_v19 = vld [vmem:[%s17837_s10 + $0x1ec] sm:$0xff] }
  0x1f   : > { %16499 = vmatprep.subr.msk.mxu0 %vm379_vm0, %v17872_v11  ;;  %16331 = vmatprep.mubr.msk.f32.mxu1 %vm282_vm1, %v17875_v12  ;;  %v17911_v18 = vld [vmem:[%s17837_s10 + $0xe4] sm:$0xff]  ;;  %v17926_v21 = vld [vmem:[%s17837_s10 + $0xec] sm:$0xff] }
  0x20   : > { %16305 = vmatmul.mubr.msk.f32.gmra.mxu0 %vm282_vm1, %v17884_v13  ;;  %v17919_v20 = vld [vmem:[%s17837_s10 + $0x204] sm:$0xff]  ;;  %v17936_v23 = vld [vmem:[%s17837_s10 + $0x20c] sm:$0xff] }
  0x21   : > { %16307 = vmatprep.mubr.msk.f32.mxu0 %vm282_vm1, %v17889_v14  ;;  %v17931_v22 = vld [vmem:[%s17837_s10 + $0x104] sm:$0xff]  ;;  %v17946_v25 = vld [vmem:[%s17837_s10 + $0x10c] sm:$0xff] }
  0x22   : > { %16332 = vmatmul.mubr.msk.f32.gmra.mxu1 %vm282_vm1, %v17896_v15  ;;  %v17939_v24 = vld [vmem:[%s17837_s10 + $0x224] sm:$0xff]  ;;  %v17956_v27 = vld [vmem:[%s17837_s10 + $0x22c] sm:$0xff] }
  0x23   : > { %16334 = vmatprep.mubr.msk.f32.mxu1 %vm282_vm1, %v17899_v16  ;;  %v17951_v26 = vld [vmem:[%s17837_s10 + $0x124] sm:$0xff]  ;;  %v17966_v29 = vld [vmem:[%s17837_s10 + $0x12c] sm:$0xff] }
  0x24   : > { %16308 = vmatmul.mubr.msk.f32.gmra.mxu0 %vm282_vm1, %v17906_v17  ;;  %v17959_v28 = vld [vmem:[%s17837_s10 + $0x244] sm:$0xff]  ;;  %v17976_v31 = vld [vmem:[%s17837_s10 + $0x24c] sm:$0xff] }
  0x25   : > { %16310 = vmatprep.mubr.msk.f32.mxu0 %vm282_vm1, %v17911_v18  ;;  %v17971_v30 = vld [vmem:[%s17837_s10 + $0x144] sm:$0xff]  ;;  %v17986_v33 = vld [vmem:[%s17837_s10 + $0x14c] sm:$0xff] }
  0x26   : > { %16335 = vmatmul.mubr.msk.f32.gmra.mxu1 %vm282_vm1, %v17916_v19  ;;  %v17979_v32 = vld [vmem:[%s17837_s10 + $0x264] sm:$0xff]  ;;  %v17996_v35 = vld [vmem:[%s17837_s10 + $0x26c] sm:$0xff] }
  0x27   : > { %16337 = vmatprep.mubr.msk.f32.mxu1 %vm282_vm1, %v17919_v20  ;;  %22343 = vst [vmem:[#allocation4_spill] sm:$0xff] %v17979_v32  ;;  %v17991_v34 = vld [vmem:[%s17837_s10 + $0x164] sm:$0xff]  ;;  %22344 = vst [vmem:[#allocation5_spill] sm:$0xff] %v17996_v35  ;;  %v18004_v37 = vld [vmem:[%s17837_s10 + $0x16c] sm:$0xff] }
  0x28   : > { %16311 = vmatmul.mubr.msk.f32.gmra.mxu0 %vm282_vm1, %v17926_v21  ;;  %v13724_v36 = vld [vmem:[%s17837_s10 + $0x85] sm:$0xff]  ;;  %v13725_v39 = vld [vmem:[%s17837_s10 + $0x8d] sm:$0xff] }
  0x29   : > { %16313 = vmatprep.mubr.msk.f32.mxu0 %vm282_vm1, %v17931_v22  ;;  %v13789_v38 = vld [vmem:[%s17837_s10 + $0x86] sm:$0xff]  ;;  %v13790_v41 = vld [vmem:[%s17837_s10 + $0x8e] sm:$0xff] }
  0x2a   : > { %16338 = vmatmul.mubr.msk.f32.gmra.mxu1 %vm282_vm1, %v17936_v23  ;;  %v18012_v40 = vld [vmem:[%s17837_s10 + $0xa5] sm:$0xff]  ;;  %v18032_v44 = vld [vmem:[%s17837_s10 + $0xad] sm:$0xff] }
  0x2b   : > { %16340 = vmatprep.mubr.msk.f32.mxu1 %vm282_vm1, %v17939_v24  ;;  %v18025_v43 = vld [vmem:[%s17837_s10 + $0xa6] sm:$0xff]  ;;  %v18050_v47 = vld [vmem:[%s17837_s10 + $0xae] sm:$0xff] }
  0x2c   : > { %16314 = vmatmul.mubr.msk.f32.gmra.mxu0 %vm282_vm1, %v17946_v25  ;;  %22345 = vst [vmem:[#allocation6_spill] sm:$0xff] %v18025_v43  ;;  %v18040_v46 = vld [vmem:[%s17837_s10 + $0xc5] sm:$0xff]  ;;  %22346 = vst [vmem:[#allocation7_spill] sm:$0xff] %v18050_v47  ;;  %v18062_v49 = vld [vmem:[%s17837_s10 + $0xcd] sm:$0xff] }
  0x2d   : > { %16316 = vmatprep.mubr.msk.f32.mxu0 %vm282_vm1, %v17951_v26  ;;  %v18055_v48 = vld [vmem:[%s17837_s10 + $0xc6] sm:$0xff]  ;;  %v18072_v51 = vld [vmem:[%s17837_s10 + $0xce] sm:$0xff] }
  0x2e   : > { %16341 = vmatmul.mubr.msk.f32.gmra.mxu1 %vm282_vm1, %v17956_v27  ;;  %22347 = vst [vmem:[#allocation8_spill] sm:$0xff] %v18055_v48  ;;  %v18065_v50 = vld [vmem:[%s17837_s10 + $0xe5] sm:$0xff]  ;;  %22348 = vst [vmem:[#allocation9_spill] sm:$0xff] %v18072_v51  ;;  %v18082_v53 = vld [vmem:[%s17837_s10 + $0xed] sm:$0xff] }
  0x2f   : > { %16343 = vmatprep.mubr.msk.f32.mxu1 %vm282_vm1, %v17959_v28  ;;  %v18077_v52 = vld [vmem:[%s17837_s10 + $0xe6] sm:$0xff]  ;;  %v18092_v55 = vld [vmem:[%s17837_s10 + $0xee] sm:$0xff] }
  0x30   : > { %16317 = vmatmul.mubr.msk.f32.gmra.mxu0 %vm282_vm1, %v17966_v29  ;;  %22349 = vst [vmem:[#allocation10_spill] sm:$0xff] %v18077_v52  ;;  %v18085_v54 = vld [vmem:[%s17837_s10 + $0x105] sm:$0xff]  ;;  %22350 = vst [vmem:[#allocation11_spill] sm:$0xff] %v18092_v55  ;;  %v18102_v57 = vld [vmem:[%s17837_s10 + $0x10d] sm:$0xff] }
  0x31   : > { %16319 = vmatprep.mubr.msk.f32.mxu0 %vm282_vm1, %v17971_v30  ;;  %v18097_v56 = vld [vmem:[%s17837_s10 + $0x106] sm:$0xff]  ;;  %v18112_v59 = vld [vmem:[%s17837_s10 + $0x10e] sm:$0xff] }
  0x32   : > { %16344 = vmatmul.mubr.msk.f32.gmra.mxu1 %vm282_vm1, %v17976_v31  ;;  %22351 = vst [vmem:[#allocation12_spill] sm:$0xff] %v18097_v56  ;;  %v18105_v58 = vld [vmem:[%s17837_s10 + $0x125] sm:$0xff]  ;;  %22352 = vst [vmem:[#allocation13_spill] sm:$0xff] %v18112_v59  ;;  %v18122_v61 = vld [vmem:[%s17837_s10 + $0x12d] sm:$0xff] }
  0x33   : > { %16346 = vmatprep.mubr.msk.f32.mxu1 %vm282_vm1, %v17979_v32  ;;  %v18117_v60 = vld [vmem:[%s17837_s10 + $0x126] sm:$0xff]  ;;  %v18132_v63 = vld [vmem:[%s17837_s10 + $0x12e] sm:$0xff] }
  0x34   : > { %16320 = vmatmul.mubr.msk.f32.gmra.mxu0 %vm282_vm1, %v17986_v33  ;;  %22353 = vst [vmem:[#allocation14_spill] sm:$0xff] %v18117_v60  ;;  %v18125_v62 = vld [vmem:[%s17837_s10 + $0x145] sm:$0xff]  ;;  %22354 = vst [vmem:[#allocation15_spill] sm:$0xff] %v18132_v63  ;;  %v18142_v1 = vld [vmem:[%s17837_s10 + $0x14d] sm:$0xff] }
  0x35   : > { %16322 = vmatprep.mubr.msk.f32.mxu0 %vm282_vm1, %v17991_v34  ;;  %v18137_v0 = vld [vmem:[%s17837_s10 + $0x146] sm:$0xff]  ;;  %v18152_v6 = vld [vmem:[%s17837_s10 + $0x14e] sm:$0xff] }
  0x36   : > { %16347 = vmatmul.mubr.msk.f32.gmra.mxu1 %vm282_vm1, %v17996_v35  ;;  %22355 = vst [vmem:[#allocation16_spill] sm:$0xff] %v18137_v0  ;;  %v18145_v2 = vld [vmem:[%s17837_s10 + $0x165] sm:$0xff]  ;;  %22356 = vst [vmem:[#allocation17_spill] sm:$0xff] %v18152_v6  ;;  %v18162_v8 = vld [vmem:[%s17837_s10 + $0x16d] sm:$0xff] }
  0x37   : > { %16351 = vmatprep.mubr.msk.f32.mxu1 %vm282_vm1, %v13724_v36  ;;  %v18172_v36 = vld [vmem:[%s17837_s10 + $0x16e] sm:$0xff]  ;;  %v18305_v35 = vld [vmem:[%s17837_s10 + $0x265] sm:$0xff] }
  0x38   : > { %16323 = vmatmul.mubr.msk.f32.gmra.mxu0 %vm282_vm1, %v18004_v37  ;;  %22358 = vst [vmem:[#allocation19_spill] sm:$0xff] %v18172_v36  ;;  %v18322_v32 = vld [vmem:[%s17837_s10 + $0x26d] sm:$0xff] }
  0x39   : > { %16401 = vmatprep.mubr.msk.f32.mxu0 %vm282_vm1, %v13789_v38  ;;  %v18177_v38 = vld [vmem:[%s17837_s10 + $0x186] sm:$0xff] }
  0x3a   : > { %16352 = vmatmul.mubr.msk.f32.vlgmr.msra.gmra.mxu1 %vm282_vm1, %v13725_v39  ;;  %22359 = vst [vmem:[#allocation20_spill] sm:$0xff] %v18177_v38  ;;  %v18182_v39 = vld [vmem:[%s17837_s10 + $0x18d] sm:$0xff] }
  0x3b   : > { %16450 = vmatpush3.msk.msra.mxu1 %vm379_vm0, %v17854_v7  ;;  %16354 = vmatprep.mubr.msk.f32.mxu1 %vm282_vm1, %v18012_v40  ;;  %v18157_v7 = vld [vmem:[%s17837_s10 + $0x166] sm:$0xff] }
  0x3c   : > { %16402 = vmatmul.mubr.msk.f32.vlgmr.msra.gmra.mxu0 %vm282_vm1, %v13790_v41  ;;  %16549 = vmatprep.subr.msk.mxu1 %vm379_vm0, %v18021_v42  ;;  %22357 = vst [vmem:[#allocation18_spill] sm:$0xff] %v18157_v7  ;;  %v18185_v41 = vld [vmem:[%s17837_s10 + $0x1a5] sm:$0xff] }
  0x3d   : > { %16500 = vmatpush3.msk.msra.mxu0 %vm379_vm0, %v17872_v11  ;;  %16404 = vmatprep.mubr.msk.f32.mxu0 %vm282_vm1, %v18025_v43  ;;  %v18165_v11 = vld [vmem:[%s17837_s10 + $0x185] sm:$0xff]  ;;  %v18302_v43 = vld [vmem:[%s17837_s10 + $0x24d] sm:$0xff] }
  0x3e   : > { %16355 = vmatmul.mubr.msk.f32.gmra.mxu1 %vm282_vm1, %v18032_v44  ;;  %16599 = vmatprep.subr.msk.mxu0 %vm379_vm0, %v18037_v45 }
  0x3f   : > { %16357 = vmatprep.mubr.msk.f32.mxu1 %vm282_vm1, %v18040_v46 }
  0x40   : > { %16405 = vmatmul.mubr.msk.f32.gmra.mxu0 %vm282_vm1, %v18050_v47  ;;  %v18285_v47 = vld [vmem:[%s17837_s10 + $0x245] sm:$0xff] }
  0x41   : > { %16407 = vmatprep.mubr.msk.f32.mxu0 %vm282_vm1, %v18055_v48  ;;  %v18282_v48 = vld [vmem:[%s17837_s10 + $0x22d] sm:$0xff] }
  0x42   : > { %16358 = vmatmul.mubr.msk.f32.gmra.mxu1 %vm282_vm1, %v18062_v49 }
  0x43   : > { %16360 = vmatprep.mubr.msk.f32.mxu1 %vm282_vm1, %v18065_v50 }
  0x44   : > { %16408 = vmatmul.mubr.msk.f32.gmra.mxu0 %vm282_vm1, %v18072_v51  ;;  %v18265_v51 = vld [vmem:[%s17837_s10 + $0x225] sm:$0xff] }
  0x45   : > { %16410 = vmatprep.mubr.msk.f32.mxu0 %vm282_vm1, %v18077_v52  ;;  %v18262_v52 = vld [vmem:[%s17837_s10 + $0x20d] sm:$0xff] }
  0x46   : > { %16361 = vmatmul.mubr.msk.f32.gmra.mxu1 %vm282_vm1, %v18082_v53 }
  0x47   : > { %16363 = vmatprep.mubr.msk.f32.mxu1 %vm282_vm1, %v18085_v54 }
  0x48   : > { %16411 = vmatmul.mubr.msk.f32.gmra.mxu0 %vm282_vm1, %v18092_v55  ;;  %v18245_v55 = vld [vmem:[%s17837_s10 + $0x205] sm:$0xff] }
  0x49   : > { %16413 = vmatprep.mubr.msk.f32.mxu0 %vm282_vm1, %v18097_v56  ;;  %v18242_v56 = vld [vmem:[%s17837_s10 + $0x1ed] sm:$0xff] }
  0x4a   : > { %16364 = vmatmul.mubr.msk.f32.gmra.mxu1 %vm282_vm1, %v18102_v57 }
  0x4b   : > { %16366 = vmatprep.mubr.msk.f32.mxu1 %vm282_vm1, %v18105_v58 }
  0x4c   : > { %16414 = vmatmul.mubr.msk.f32.gmra.mxu0 %vm282_vm1, %v18112_v59  ;;  %v18225_v59 = vld [vmem:[%s17837_s10 + $0x1e5] sm:$0xff] }
  0x4d   : > { %16416 = vmatprep.mubr.msk.f32.mxu0 %vm282_vm1, %v18117_v60  ;;  %v18222_v60 = vld [vmem:[%s17837_s10 + $0x1cd] sm:$0xff] }
  0x4e   : > { %16367 = vmatmul.mubr.msk.f32.gmra.mxu1 %vm282_vm1, %v18122_v61 }
  0x4f   : > { %16369 = vmatprep.mubr.msk.f32.mxu1 %vm282_vm1, %v18125_v62 }
  0x50   : > { %16417 = vmatmul.mubr.msk.f32.gmra.mxu0 %vm282_vm1, %v18132_v63  ;;  %v18205_v63 = vld [vmem:[%s17837_s10 + $0x1c5] sm:$0xff] }
  0x51   : > { %16419 = vmatprep.mubr.msk.f32.mxu0 %vm282_vm1, %v18137_v0  ;;  %v18202_v0 = vld [vmem:[%s17837_s10 + $0x1ad] sm:$0xff] }
  0x52   : > { %16370 = vmatmul.mubr.msk.f32.gmra.mxu1 %vm282_vm1, %v18142_v1 }
  0x53   : > { %16372 = vmatprep.mubr.msk.f32.mxu1 %vm282_vm1, %v18145_v2 }
  0x54   : > { %16420 = vmatmul.mubr.msk.f32.gmra.mxu0 %vm282_vm1, %v18152_v6  ;;  %v18197_v6 = vld [vmem:[%s17837_s10 + $0x1a6] sm:$0xff] }
  0x55   : > { %16422 = vmatprep.mubr.msk.f32.mxu0 %vm282_vm1, %v18157_v7  ;;  %v18192_v7 = vld [vmem:[%s17837_s10 + $0x18e] sm:$0xff]  ;;  %22361 = vst [vmem:[#allocation22_spill] sm:$0xff] %v18197_v6 }
  0x56   : > { %16373 = vmatmul.mubr.msk.f32.gmra.mxu1 %vm282_vm1, %v18162_v8  ;;  %22360 = vst [vmem:[#allocation21_spill] sm:$0xff] %v18192_v7 }
  0x57   : > { %16375 = vmatprep.mubr.msk.f32.mxu1 %vm282_vm1, %v18165_v11 }
  0x58   : > { %16423 = vmatmul.mubr.msk.f32.gmra.mxu0 %vm282_vm1, %v18172_v36  ;;  %v18217_v36 = vld [vmem:[%s17837_s10 + $0x1c6] sm:$0xff] }
  0x59   : > { %16425 = vmatprep.mubr.msk.f32.mxu0 %vm282_vm1, %v18177_v38  ;;  %v18212_v38 = vld [vmem:[%s17837_s10 + $0x1ae] sm:$0xff]  ;;  %22363 = vst [vmem:[#allocation24_spill] sm:$0xff] %v18217_v36 }
  0x5a   : > { %16376 = vmatmul.mubr.msk.f32.gmra.mxu1 %vm282_vm1, %v18182_v39  ;;  %22362 = vst [vmem:[#allocation23_spill] sm:$0xff] %v18212_v38 }
  0x5b   : > { %16378 = vmatprep.mubr.msk.f32.mxu1 %vm282_vm1, %v18185_v41 }
  0x5c   : > { %16426 = vmatmul.mubr.msk.f32.gmra.mxu0 %vm282_vm1, %v18192_v7  ;;  %v18237_v7 = vld [vmem:[%s17837_s10 + $0x1e6] sm:$0xff] }
  0x5d   : > { %16428 = vmatprep.mubr.msk.f32.mxu0 %vm282_vm1, %v18197_v6  ;;  %v18232_v6 = vld [vmem:[%s17837_s10 + $0x1ce] sm:$0xff]  ;;  %22365 = vst [vmem:[#allocation26_spill] sm:$0xff] %v18237_v7 }
  0x5e   : > { %16379 = vmatmul.mubr.msk.f32.gmra.mxu1 %vm282_vm1, %v18202_v0  ;;  %22364 = vst [vmem:[#allocation25_spill] sm:$0xff] %v18232_v6 }
  0x5f   : > { %16381 = vmatprep.mubr.msk.f32.mxu1 %vm282_vm1, %v18205_v63 }
  0x60   : > { %16429 = vmatmul.mubr.msk.f32.gmra.mxu0 %vm282_vm1, %v18212_v38  ;;  %v18257_v38 = vld [vmem:[%s17837_s10 + $0x206] sm:$0xff] }
  0x61   : > { %16431 = vmatprep.mubr.msk.f32.mxu0 %vm282_vm1, %v18217_v36  ;;  %v18252_v36 = vld [vmem:[%s17837_s10 + $0x1ee] sm:$0xff]  ;;  %22367 = vst [vmem:[#allocation28_spill] sm:$0xff] %v18257_v38 }
  0x62   : > { %16382 = vmatmul.mubr.msk.f32.gmra.mxu1 %vm282_vm1, %v18222_v60  ;;  %22366 = vst [vmem:[#allocation27_spill] sm:$0xff] %v18252_v36 }
  0x63   : > { %16384 = vmatprep.mubr.msk.f32.mxu1 %vm282_vm1, %v18225_v59 }
  0x64   : > { %16432 = vmatmul.mubr.msk.f32.gmra.mxu0 %vm282_vm1, %v18232_v6  ;;  %v18277_v6 = vld [vmem:[%s17837_s10 + $0x226] sm:$0xff] }
  0x65   : > { %16434 = vmatprep.mubr.msk.f32.mxu0 %vm282_vm1, %v18237_v7  ;;  %v18272_v7 = vld [vmem:[%s17837_s10 + $0x20e] sm:$0xff]  ;;  %22369 = vst [vmem:[#allocation30_spill] sm:$0xff] %v18277_v6 }
  0x66   : > { %16385 = vmatmul.mubr.msk.f32.gmra.mxu1 %vm282_vm1, %v18242_v56  ;;  %22368 = vst [vmem:[#allocation29_spill] sm:$0xff] %v18272_v7 }
  0x67   : > { %16387 = vmatprep.mubr.msk.f32.mxu1 %vm282_vm1, %v18245_v55 }
  0x68   : > { %16435 = vmatmul.mubr.msk.f32.gmra.mxu0 %vm282_vm1, %v18252_v36  ;;  %v18297_v36 = vld [vmem:[%s17837_s10 + $0x246] sm:$0xff] }
  0x69   : > { %16437 = vmatprep.mubr.msk.f32.mxu0 %vm282_vm1, %v18257_v38  ;;  %v18292_v38 = vld [vmem:[%s17837_s10 + $0x22e] sm:$0xff] }
  0x6a   : > { %16388 = vmatmul.mubr.msk.f32.gmra.mxu1 %vm282_vm1, %v18262_v52  ;;  %22370 = vst [vmem:[#allocation31_spill] sm:$0xff] %v18292_v38 }
  0x6b   : > { %16390 = vmatprep.mubr.msk.f32.mxu1 %vm282_vm1, %v18265_v51 }
  0x6c   : > { %16438 = vmatmul.mubr.msk.f32.gmra.mxu0 %vm282_vm1, %v18272_v7  ;;  %v18317_v7 = vld [vmem:[%s17837_s10 + $0x266] sm:$0xff] }
  0x6d   : > { %16440 = vmatprep.mubr.msk.f32.mxu0 %vm282_vm1, %v18277_v6  ;;  %v18312_v6 = vld [vmem:[%s17837_s10 + $0x24e] sm:$0xff] }
  0x6e   : > { %16391 = vmatmul.mubr.msk.f32.gmra.mxu1 %vm282_vm1, %v18282_v48  ;;  %22371 = vst [vmem:[#allocation32_spill] sm:$0xff] %v18312_v6 }
  0x6f   : > { %16393 = vmatprep.mubr.msk.f32.mxu1 %vm282_vm1, %v18285_v47 }
  0x70   : > { %16441 = vmatmul.mubr.msk.f32.gmra.mxu0 %vm282_vm1, %v18292_v38  ;;  %v18329_v38 = vld [vmem:[%s17837_s10 + $0x26e] sm:$0xff] }
  0x71   : > { %16443 = vmatprep.mubr.msk.f32.mxu0 %vm282_vm1, %v18297_v36 }
  0x72   : > { %16394 = vmatmul.mubr.msk.f32.gmra.mxu1 %vm282_vm1, %v18302_v43 }
  0x73   : > { %16396 = vmatprep.mubr.msk.f32.mxu1 %vm282_vm1, %v18305_v35 }
  0x74   : > { %16444 = vmatmul.mubr.msk.f32.gmra.mxu0 %vm282_vm1, %v18312_v6  ;;  %v18342_v6 = vld [vmem:[%s22301_s1 + $0x1c] sm:$0xf] }
  0x75   : > { %16446 = vmatprep.mubr.msk.f32.mxu0 %vm282_vm1, %v18317_v7 }
  0x76   : > { %16397 = vmatmul.mubr.msk.f32.gmra.mxu1 %vm282_vm1, %v18322_v32 }
  0x77   : > { %16451 = vmatprep.mubr.msk.f32.mxu1 %vm282_vm1, %v17861_v9  ;;  %v18353_v9 = vld [vmem:[%s22301_s1 + $0x20] sm:$0xf] }
  0x78   : > { %16447 = vmatmul.mubr.msk.f32.gmra.mxu0 %vm282_vm1, %v18329_v38 }
  0x79   : > { %16501 = vmatprep.mubr.msk.f32.mxu0 %vm282_vm1, %v18012_v40  ;;  %v18466_v40 = vld [vmem:[%s17837_s10 + $0x284] sm:$0xff] }
  0x7a   : > { %16452 = vmatmul.mubr.msk.f32.vlgmr.msra.gmra.mxu1 %vm282_vm1, %v17884_v13  ;;  %v22372_v13 = vld [vmem:[#allocation4_spill] sm:$0xff] }
  0x7b   : > { %16550 = vmatpush3.msk.msra.mxu1 %vm379_vm0, %v18021_v42  ;;  %16454 = vmatprep.mubr.msk.f32.mxu1 %vm282_vm1, %v17889_v14  ;;  %v22373_v42 = vld [vmem:[#allocation5_spill] sm:$0xff] }
  0x7c   : > { %16502 = vmatmul.mubr.msk.f32.vlgmr.msra.gmra.mxu0 %vm282_vm1, %v18032_v44  ;;  %16649 = vmatprep.subr.msk.mxu1 %vm379_vm0, %v18342_v6  ;;  %v13949_v44 = vld [vmem:[%s17837_s10 + $0x285] sm:$0xff] }
  0x7d   : > { %16600 = vmatpush3.msk.msra.mxu0 %vm379_vm0, %v18037_v45  ;;  %16504 = vmatprep.mubr.msk.f32.mxu0 %vm282_vm1, %v18040_v46  ;;  %v18478_v45 = vld [vmem:[%s17837_s10 + $0x28c] sm:$0xff] }
  0x7e   : > { %16455 = vmatmul.mubr.msk.f32.gmra.mxu1 %vm282_vm1, %v17906_v17  ;;  %16699 = vmatprep.subr.msk.mxu0 %vm379_vm0, %v18353_v9 }
  0x7f   : > { %16457 = vmatprep.mubr.msk.f32.mxu1 %vm282_vm1, %v17911_v18 }
  0x80   : > { %16505 = vmatmul.mubr.msk.f32.gmra.mxu0 %vm282_vm1, %v18062_v49 }
  0x81   : > { %16507 = vmatprep.mubr.msk.f32.mxu0 %vm282_vm1, %v18065_v50 }
  0x82   : > { %16458 = vmatmul.mubr.msk.f32.gmra.mxu1 %vm282_vm1, %v17926_v21 }
  0x83   : > { %16460 = vmatprep.mubr.msk.f32.mxu1 %vm282_vm1, %v17931_v22 }
  0x84   : > { %16508 = vmatmul.mubr.msk.f32.gmra.mxu0 %vm282_vm1, %v18082_v53 }
  0x85   : > { %16510 = vmatprep.mubr.msk.f32.mxu0 %vm282_vm1, %v18085_v54 }
  0x86   : > { %16461 = vmatmul.mubr.msk.f32.gmra.mxu1 %vm282_vm1, %v17946_v25 }
  0x87   : > { %16463 = vmatprep.mubr.msk.f32.mxu1 %vm282_vm1, %v17951_v26 }
  0x88   : > { %16511 = vmatmul.mubr.msk.f32.gmra.mxu0 %vm282_vm1, %v18102_v57 }
  0x89   : > { %16513 = vmatprep.mubr.msk.f32.mxu0 %vm282_vm1, %v18105_v58 }
  0x8a   : > { %16464 = vmatmul.mubr.msk.f32.gmra.mxu1 %vm282_vm1, %v17966_v29 }
  0x8b   : > { %16466 = vmatprep.mubr.msk.f32.mxu1 %vm282_vm1, %v17971_v30 }
  0x8c   : > { %16514 = vmatmul.mubr.msk.f32.gmra.mxu0 %vm282_vm1, %v18122_v61 }
  0x8d   : > { %16516 = vmatprep.mubr.msk.f32.mxu0 %vm282_vm1, %v18125_v62 }
  0x8e   : > { %16467 = vmatmul.mubr.msk.f32.gmra.mxu1 %vm282_vm1, %v17986_v33 }
  0x8f   : > { %16469 = vmatprep.mubr.msk.f32.mxu1 %vm282_vm1, %v17991_v34 }
  0x90   : > { %16517 = vmatmul.mubr.msk.f32.gmra.mxu0 %vm282_vm1, %v18142_v1 }
  0x91   : > { %16519 = vmatprep.mubr.msk.f32.mxu0 %vm282_vm1, %v18145_v2  ;;  %v22395_v2 = vld [vmem:[#allocation27_spill] sm:$0xff] }
  0x92   : > { %16470 = vmatmul.mubr.msk.f32.gmra.mxu1 %vm282_vm1, %v18004_v37 }
  0x93   : > { %16472 = vmatprep.mubr.msk.f32.mxu1 %vm282_vm1, %v17840_v3 }
  0x94   : > { %16520 = vmatmul.mubr.msk.f32.gmra.mxu0 %vm282_vm1, %v18162_v8  ;;  %v22396_v8 = vld [vmem:[#allocation28_spill] sm:$0xff] }
  0x95   : > { %16522 = vmatprep.mubr.msk.f32.mxu0 %vm282_vm1, %v18165_v11 }
  0x96   : > { %16473 = vmatmul.mubr.msk.f32.gmra.mxu1 %vm282_vm1, %v17843_v4 }
  0x97   : > { %16475 = vmatprep.mubr.msk.f32.mxu1 %vm282_vm1, %v17846_v5 }
  0x98   : > { %16523 = vmatmul.mubr.msk.f32.gmra.mxu0 %vm282_vm1, %v18182_v39  ;;  %v22397_v39 = vld [vmem:[#allocation29_spill] sm:$0xff] }
  0x99   : > { %16525 = vmatprep.mubr.msk.f32.mxu0 %vm282_vm1, %v18185_v41 }
  0x9a   : > { %16476 = vmatmul.mubr.msk.f32.gmra.mxu1 %vm282_vm1, %v17867_v10 }
  0x9b   : > { %16478 = vmatprep.mubr.msk.f32.mxu1 %vm282_vm1, %v17875_v12 }
  0x9c   : > { %16526 = vmatmul.mubr.msk.f32.gmra.mxu0 %vm282_vm1, %v18202_v0 }
  0x9d   : > { %16528 = vmatprep.mubr.msk.f32.mxu0 %vm282_vm1, %v18205_v63  ;;  %v22394_v63 = vld [vmem:[#allocation26_spill] sm:$0xff] }
  0x9e   : > { %16479 = vmatmul.mubr.msk.f32.gmra.mxu1 %vm282_vm1, %v17896_v15 }
  0x9f   : > { %16481 = vmatprep.mubr.msk.f32.mxu1 %vm282_vm1, %v17899_v16 }
  0xa0   : > { %16529 = vmatmul.mubr.msk.f32.gmra.mxu0 %vm282_vm1, %v18222_v60 }
  0xa1   : > { %16531 = vmatprep.mubr.msk.f32.mxu0 %vm282_vm1, %v18225_v59 }
  0xa2   : > { %16482 = vmatmul.mubr.msk.f32.gmra.mxu1 %vm282_vm1, %v17916_v19 }
  0xa3   : > { %16484 = vmatprep.mubr.msk.f32.mxu1 %vm282_vm1, %v17919_v20 }
  0xa4   : > { %16532 = vmatmul.mubr.msk.f32.gmra.mxu0 %vm282_vm1, %v18242_v56  ;;  %v22382_v56 = vld [vmem:[#allocation14_spill] sm:$0xff] }
  0xa5   : > { %16534 = vmatprep.mubr.msk.f32.mxu0 %vm282_vm1, %v18245_v55  ;;  %v22380_v55 = vld [vmem:[#allocation12_spill] sm:$0xff] }
  0xa6   : > { %16485 = vmatmul.mubr.msk.f32.gmra.mxu1 %vm282_vm1, %v17936_v23 }
  0xa7   : > { %16487 = vmatprep.mubr.msk.f32.mxu1 %vm282_vm1, %v17939_v24 }
  0xa8   : > { %16535 = vmatmul.mubr.msk.f32.gmra.mxu0 %vm282_vm1, %v18262_v52  ;;  %v22378_v52 = vld [vmem:[#allocation10_spill] sm:$0xff] }
  0xa9   : > { %16537 = vmatprep.mubr.msk.f32.mxu0 %vm282_vm1, %v18265_v51  ;;  %v18505_v51 = vld [vmem:[%s22301_s1 + $0x28] sm:$0xf] }
  0xaa   : > { %16488 = vmatmul.mubr.msk.f32.gmra.mxu1 %vm282_vm1, %v17956_v27 }
  0xab   : > { %16490 = vmatprep.mubr.msk.f32.mxu1 %vm282_vm1, %v17959_v28 }
  0xac   : > { %16538 = vmatmul.mubr.msk.f32.gmra.mxu0 %vm282_vm1, %v18282_v48  ;;  %v22376_v48 = vld [vmem:[#allocation8_spill] sm:$0xff] }
  0xad   : > { %16540 = vmatprep.mubr.msk.f32.mxu0 %vm282_vm1, %v18285_v47  ;;  %v13950_v47 = vld [vmem:[%s17837_s10 + $0x28d] sm:$0xff] }
  0xae   : > { %16491 = vmatmul.mubr.msk.f32.gmra.mxu1 %vm282_vm1, %v17976_v31 }
  0xaf   : > { %16493 = vmatprep.mubr.msk.f32.mxu1 %vm282_vm1, %v22372_v13 }
  0xb0   : > { %16541 = vmatmul.mubr.msk.f32.gmra.mxu0 %vm282_vm1, %v18302_v43  ;;  %v22374_v43 = vld [vmem:[#allocation6_spill] sm:$0xff] }
  0xb1   : > { %16543 = vmatprep.mubr.msk.f32.mxu0 %vm282_vm1, %v18305_v35  ;;  %v18494_v35 = vld [vmem:[%s22301_s1 + $0x24] sm:$0xf] }
  0xb2   : > { %16494 = vmatmul.mubr.msk.f32.gmra.mxu1 %vm282_vm1, %v22373_v42 }
  0xb3   : > { %16496 = vmatprep.mubr.msk.f32.mxu1 %vm282_vm1, %v18466_v40 }
  0xb4   : > { %16544 = vmatmul.mubr.msk.f32.gmra.mxu0 %vm282_vm1, %v18322_v32  ;;  %v22375_v32 = vld [vmem:[#allocation7_spill] sm:$0xff] }
  0xb5   : > { %16546 = vmatprep.mubr.msk.f32.mxu0 %vm282_vm1, %v13949_v44 }
  0xb6   : > { %16497 = vmatmul.mubr.msk.f32.gmra.mxu1 %vm282_vm1, %v18478_v45 }
  0xb7   : > { %16551 = vmatprep.mubr.msk.f32.mxu1 %vm282_vm1, %v22374_v43 }
  0xb8   : > { %16547 = vmatmul.mubr.msk.f32.gmra.mxu0 %vm282_vm1, %v13950_v47  ;;  %v22399_v47 = vld [vmem:[#allocation31_spill] sm:$0xff] }
  0xb9   : > { %16601 = vmatprep.mubr.msk.f32.mxu0 %vm282_vm1, %v17889_v14  ;;  %v22377_v14 = vld [vmem:[#allocation9_spill] sm:$0xff] }
  0xba   : > { %16552 = vmatmul.mubr.msk.f32.vlgmr.msra.gmra.mxu1 %vm282_vm1, %v22375_v32 }
  0xbb   : > { %16650 = vmatpush3.msk.msra.mxu1 %vm379_vm0, %v18342_v6  ;;  %16554 = vmatprep.mubr.msk.f32.mxu1 %vm282_vm1, %v22376_v48 }
  0xbc   : > { %16602 = vmatmul.mubr.msk.f32.vlgmr.msra.gmra.mxu0 %vm282_vm1, %v17906_v17  ;;  %16749 = vmatprep.subr.msk.mxu1 %vm379_vm0, %v18494_v35  ;;  %v22379_v17 = vld [vmem:[#allocation11_spill] sm:$0xff] }
  0xbd   : > { %16700 = vmatpush3.msk.msra.mxu0 %vm379_vm0, %v18353_v9  ;;  %16604 = vmatprep.mubr.msk.f32.mxu0 %vm282_vm1, %v17911_v18  ;;  %v22381_v18 = vld [vmem:[#allocation13_spill] sm:$0xff]  ;;  %v22398_v9 = vld [vmem:[#allocation30_spill] sm:$0xff] }
  0xbe   : > { %16555 = vmatmul.mubr.msk.f32.gmra.mxu1 %vm282_vm1, %v22377_v14  ;;  %16799 = vmatprep.subr.msk.mxu0 %vm379_vm0, %v18505_v51 }
  0xbf   : > { %16557 = vmatprep.mubr.msk.f32.mxu1 %vm282_vm1, %v22378_v52 }
  0xc0   : > { %16605 = vmatmul.mubr.msk.f32.gmra.mxu0 %vm282_vm1, %v17926_v21  ;;  %v22383_v21 = vld [vmem:[#allocation15_spill] sm:$0xff] }
  0xc1   : > { %16607 = vmatprep.mubr.msk.f32.mxu0 %vm282_vm1, %v17931_v22  ;;  %v22384_v22 = vld [vmem:[#allocation16_spill] sm:$0xff] }
  0xc2   : > { %16558 = vmatmul.mubr.msk.f32.gmra.mxu1 %vm282_vm1, %v22379_v17 }
  0xc3   : > { %16560 = vmatprep.mubr.msk.f32.mxu1 %vm282_vm1, %v22380_v55 }
  0xc4   : > { %16608 = vmatmul.mubr.msk.f32.gmra.mxu0 %vm282_vm1, %v17946_v25  ;;  %v22385_v25 = vld [vmem:[#allocation17_spill] sm:$0xff] }
  0xc5   : > { %16610 = vmatprep.mubr.msk.f32.mxu0 %vm282_vm1, %v17951_v26  ;;  %v22386_v26 = vld [vmem:[#allocation18_spill] sm:$0xff] }
  0xc6   : > { %16561 = vmatmul.mubr.msk.f32.gmra.mxu1 %vm282_vm1, %v22381_v18 }
  0xc7   : > { %16563 = vmatprep.mubr.msk.f32.mxu1 %vm282_vm1, %v22382_v56  ;;  %v22400_v56 = vld [vmem:[#allocation32_spill] sm:$0xff] }
  0xc8   : > { %16611 = vmatmul.mubr.msk.f32.gmra.mxu0 %vm282_vm1, %v17966_v29  ;;  %v22387_v29 = vld [vmem:[#allocation19_spill] sm:$0xff] }
  0xc9   : > { %16613 = vmatprep.mubr.msk.f32.mxu0 %vm282_vm1, %v17971_v30  ;;  %v22388_v30 = vld [vmem:[#allocation20_spill] sm:$0xff] }
  0xca   : > { %16564 = vmatmul.mubr.msk.f32.gmra.mxu1 %vm282_vm1, %v22383_v21  ;;  %v18639_v21 = vld [vmem:[%s17837_s10 + $0x286] sm:$0xff] }
  0xcb   : > { %16566 = vmatprep.mubr.msk.f32.mxu1 %vm282_vm1, %v22384_v22 }
  0xcc   : > { %16614 = vmatmul.mubr.msk.f32.gmra.mxu0 %vm282_vm1, %v17986_v33  ;;  %v22389_v33 = vld [vmem:[#allocation21_spill] sm:$0xff] }
  0xcd   : > { %16616 = vmatprep.mubr.msk.f32.mxu0 %vm282_vm1, %v17991_v34  ;;  %v22390_v34 = vld [vmem:[#allocation22_spill] sm:$0xff] }
  0xce   : > { %16567 = vmatmul.mubr.msk.f32.gmra.mxu1 %vm282_vm1, %v22385_v25  ;;  %v14079_v25 = vld [vmem:[%s17837_s10 + $0x2a4] sm:$0xff] }
  0xcf   : > { %16569 = vmatprep.mubr.msk.f32.mxu1 %vm282_vm1, %v22386_v26 }
  0xd0   : > { %16617 = vmatmul.mubr.msk.f32.gmra.mxu0 %vm282_vm1, %v18004_v37  ;;  %v22391_v37 = vld [vmem:[#allocation23_spill] sm:$0xff] }
  0xd1   : > { %16619 = vmatprep.mubr.msk.f32.mxu0 %vm282_vm1, %v17840_v3 }
  0xd2   : > { %16570 = vmatmul.mubr.msk.f32.gmra.mxu1 %vm282_vm1, %v22387_v29 }
  0xd3   : > { %16572 = vmatprep.mubr.msk.f32.mxu1 %vm282_vm1, %v22388_v30 }
  0xd4   : > { %16620 = vmatmul.mubr.msk.f32.gmra.mxu0 %vm282_vm1, %v17843_v4  ;;  %v22392_v4 = vld [vmem:[#allocation24_spill] sm:$0xff] }
  0xd5   : > { %16622 = vmatprep.mubr.msk.f32.mxu0 %vm282_vm1, %v17846_v5 }
  0xd6   : > { %16573 = vmatmul.mubr.msk.f32.gmra.mxu1 %vm282_vm1, %v22389_v33 }
  0xd7   : > { %16575 = vmatprep.mubr.msk.f32.mxu1 %vm282_vm1, %v22390_v34  ;;  %v18677_v34 = vld [vmem:[%s22301_s1 + $0x2c] sm:$0xf] }
  0xd8   : > { %16623 = vmatmul.mubr.msk.f32.gmra.mxu0 %vm282_vm1, %v17867_v10 }
  0xd9   : > { %16625 = vmatprep.mubr.msk.f32.mxu0 %vm282_vm1, %v17875_v12  ;;  %v22393_v12 = vld [vmem:[#allocation25_spill] sm:$0xff] }
  0xda   : > { %v16327_v3 = vpop.f32.mrf.mxu1  ;;  %16576 = vmatmul.mubr.msk.f32.gmra.mxu1 %vm282_vm1, %v22391_v37 }
  0xdb   : > { %625 = vst.msk [vmem:[#allocation2 + $0x88] sm:$0xff] %vm282_vm1, %v16327_v3  ;;  %16578 = vmatprep.mubr.msk.f32.mxu1 %vm282_vm1, %v22392_v4 }
  0xdc   : > { %v529_v5 = vpop.f32.mrf.mxu1  ;;  %v16303_v59 = vpop.f32.mrf.mxu0  ;;  %16626 = vmatmul.mubr.msk.f32.gmra.mxu0 %vm282_vm1, %v17896_v15 }
  0xdd   : > { %624 = vst.msk [vmem:[#allocation2 + $0x80] sm:$0xff] %vm282_vm1, %v529_v5  ;;  %609 = vst.msk [vmem:[#allocation2 + $0x8] sm:$0xff] %vm282_vm1, %v16303_v59  ;;  %16628 = vmatprep.mubr.msk.f32.mxu0 %vm282_vm1, %v17899_v16 }
  0xde   : > { %v16330_v10 = vpop.f32.mrf.mxu1  ;;  %16579 = vmatmul.mubr.msk.f32.gmra.mxu1 %vm282_vm1, %v22393_v12  ;;  %v449_v60 = vpop.f32.mrf.mxu0 }
  0xdf   : > { %627 = vst.msk [vmem:[#allocation2 + $0x98] sm:$0xff] %vm282_vm1, %v16330_v10  ;;  %16581 = vmatprep.mubr.msk.f32.mxu1 %vm282_vm1, %v22394_v63  ;;  %608 = vst.msk [vmem:[#allocation2] sm:$0xff] %vm282_vm1, %v449_v60 }
  0xe0   : > { %v539_v15 = vpop.f32.mrf.mxu1  ;;  %v16306_v0 = vpop.f32.mrf.mxu0  ;;  %16629 = vmatmul.mubr.msk.f32.gmra.mxu0 %vm282_vm1, %v17916_v19 }
  0xe1   : > { %626 = vst.msk [vmem:[#allocation2 + $0x90] sm:$0xff] %vm282_vm1, %v539_v15  ;;  %611 = vst.msk [vmem:[#allocation2 + $0x18] sm:$0xff] %vm282_vm1, %v16306_v0  ;;  %16631 = vmatprep.mubr.msk.f32.mxu0 %vm282_vm1, %v17919_v20 }
  0xe2   : > { %v16333_v16 = vpop.f32.mrf.mxu1  ;;  %16582 = vmatmul.mubr.msk.f32.gmra.mxu1 %vm282_vm1, %v22395_v2  ;;  %v459_v6 = vpop.f32.mrf.mxu0 }
  0xe3   : > { %629 = vst.msk [vmem:[#allocation2 + $0xa8] sm:$0xff] %vm282_vm1, %v16333_v16  ;;  %16584 = vmatprep.mubr.msk.f32.mxu1 %vm282_vm1, %v22396_v8  ;;  %610 = vst.msk [vmem:[#allocation2 + $0x10] sm:$0xff] %vm282_vm1, %v459_v6 }
  0xe4   : > { %v549_v19 = vpop.f32.mrf.mxu1  ;;  %v16309_v11 = vpop.f32.mrf.mxu0  ;;  %16632 = vmatmul.mubr.msk.f32.gmra.mxu0 %vm282_vm1, %v17936_v23 }
  0xe5   : > { %628 = vst.msk [vmem:[#allocation2 + $0xa0] sm:$0xff] %vm282_vm1, %v549_v19  ;;  %613 = vst.msk [vmem:[#allocation2 + $0x28] sm:$0xff] %vm282_vm1, %v16309_v11  ;;  %16634 = vmatprep.mubr.msk.f32.mxu0 %vm282_vm1, %v17939_v24  ;;  %v14186_v19 = vld [vmem:[%s17837_s10 + $0x12e] sm:$0xff] }
  0xe6   : > { %v16336_v20 = vpop.f32.mrf.mxu1  ;;  %16585 = vmatmul.mubr.msk.f32.gmra.mxu1 %vm282_vm1, %v22397_v39  ;;  %v469_v41 = vpop.f32.mrf.mxu0  ;;  %v996_v59 = vld [vmem:[#allocation2] sm:$0xff] }
  0xe7   : > { %631 = vst.msk [vmem:[#allocation2 + $0xb8] sm:$0xff] %vm282_vm1, %v16336_v20  ;;  %16587 = vmatprep.mubr.msk.f32.mxu1 %vm282_vm1, %v22398_v9  ;;  %612 = vst.msk [vmem:[#allocation2 + $0x20] sm:$0xff] %vm282_vm1, %v469_v41  ;;  %v14187_v41 = vld [vmem:[%s17837_s10 + $0x146] sm:$0xff] }
  0xe8   : > { %v559_v23 = vpop.f32.mrf.mxu1  ;;  %v16312_v44 = vpop.f32.mrf.mxu0  ;;  %16635 = vmatmul.mubr.msk.f32.gmra.mxu0 %vm282_vm1, %v17956_v27 }
  0xe9   : > { %630 = vst.msk [vmem:[#allocation2 + $0xb0] sm:$0xff] %vm282_vm1, %v559_v23  ;;  %615 = vst.msk [vmem:[#allocation2 + $0x38] sm:$0xff] %vm282_vm1, %v16312_v44  ;;  %16637 = vmatprep.mubr.msk.f32.mxu0 %vm282_vm1, %v17959_v28 }
  0xea   : > { %v16339_v24 = vpop.f32.mrf.mxu1  ;;  %16588 = vmatmul.mubr.msk.f32.gmra.mxu1 %vm282_vm1, %v22399_v47  ;;  %v479_v43 = vpop.f32.mrf.mxu0  ;;  %v998_v60 = vld [vmem:[#allocation2 + $0x10] sm:$0xff]  ;;  %v14124_v47 = vld [vmem:[%s17837_s10 + $0x165] sm:$0xff] }
  0xeb   : > { %633 = vst.msk [vmem:[#allocation2 + $0xc8] sm:$0xff] %vm282_vm1, %v16339_v24  ;;  %16590 = vmatprep.mubr.msk.f32.mxu1 %vm282_vm1, %v18297_v36  ;;  %614 = vst.msk [vmem:[#allocation2 + $0x30] sm:$0xff] %vm282_vm1, %v479_v43 }
  0xec   : > { %v569_v27 = vpop.f32.mrf.mxu1  ;;  %v16315_v32 = vpop.f32.mrf.mxu0  ;;  %16638 = vmatmul.mubr.msk.f32.gmra.mxu0 %vm282_vm1, %v17976_v31  ;;  %v1001_v15 = vld [vmem:[#allocation2 + $0x28] sm:$0xff] }
  0xed   : > { %632 = vst.msk [vmem:[#allocation2 + $0xc0] sm:$0xff] %vm282_vm1, %v569_v27  ;;  %617 = vst.msk [vmem:[#allocation2 + $0x48] sm:$0xff] %vm282_vm1, %v16315_v32  ;;  %16640 = vmatprep.mubr.msk.f32.mxu0 %vm282_vm1, %v22372_v13  ;;  %v14188_v32 = vld [vmem:[%s17837_s10 + $0x14e] sm:$0xff] }
  0xee   : > { %v16342_v28 = vpop.f32.mrf.mxu1  ;;  %16591 = vmatmul.mubr.msk.f32.gmra.mxu1 %vm282_vm1, %v22400_v56  ;;  %v489_v36 = vpop.f32.mrf.mxu0  ;;  %v1000_v6 = vld [vmem:[#allocation2 + $0x20] sm:$0xff] }
  0xef   : > { %635 = vst.msk [vmem:[#allocation2 + $0xd8] sm:$0xff] %vm282_vm1, %v16342_v28  ;;  %16593 = vmatprep.mubr.msk.f32.mxu1 %vm282_vm1, %v18317_v7  ;;  %616 = vst.msk [vmem:[#allocation2 + $0x40] sm:$0xff] %vm282_vm1, %v489_v36 }
  0xf0   : > { %v579_v31 = vpop.f32.mrf.mxu1  ;;  %v16318_v22 = vpop.f32.mrf.mxu0  ;;  %16641 = vmatmul.mubr.msk.f32.gmra.mxu0 %vm282_vm1, %v22373_v42  ;;  %v18654_v42 = vld [vmem:[%s17837_s10 + $0x28e] sm:$0xff]  ;;  %v1003_v39 = vld [vmem:[#allocation2 + $0x38] sm:$0xff] }
  0xf1   : > { %634 = vst.msk [vmem:[#allocation2 + $0xd0] sm:$0xff] %vm282_vm1, %v579_v31  ;;  %619 = vst.msk [vmem:[#allocation2 + $0x58] sm:$0xff] %vm282_vm1, %v16318_v22  ;;  %16643 = vmatprep.mubr.msk.f32.mxu0 %vm282_vm1, %v18466_v40  ;;  %v14189_v31 = vld [vmem:[%s17837_s10 + $0x166] sm:$0xff] }
  0xf2   : > { %v16345_v13 = vpop.f32.mrf.mxu1  ;;  %16594 = vmatmul.mubr.msk.f32.gmra.mxu1 %vm282_vm1, %v18329_v38  ;;  %v499_v7 = vpop.f32.mrf.mxu0  ;;  %v14080_v38 = vld [vmem:[%s17837_s10 + $0x2ac] sm:$0xff] }
  0xf3   : > { %637 = vst.msk [vmem:[#allocation2 + $0xe8] sm:$0xff] %vm282_vm1, %v16345_v13  ;;  %16596 = vmatprep.mubr.msk.f32.mxu1 %vm282_vm1, %v18639_v21  ;;  %618 = vst.msk [vmem:[#allocation2 + $0x50] sm:$0xff] %vm282_vm1, %v499_v7  ;;  %v1002_v24 = vld [vmem:[#allocation2 + $0x30] sm:$0xff] }
  0xf4   : > { %v589_v26 = vpop.f32.mrf.mxu1  ;;  %v16321_v29 = vpop.f32.mrf.mxu0  ;;  %16644 = vmatmul.mubr.msk.f32.gmra.mxu0 %vm282_vm1, %v18478_v45  ;;  %v1005_v56 = vld [vmem:[#allocation2 + $0x48] sm:$0xff] }
  0xf5   : > { %636 = vst.msk [vmem:[#allocation2 + $0xe0] sm:$0xff] %vm282_vm1, %v589_v26  ;;  %621 = vst.msk [vmem:[#allocation2 + $0x68] sm:$0xff] %vm282_vm1, %v16321_v29  ;;  %16646 = vmatprep.mubr.msk.f32.mxu0 %vm282_vm1, %v14079_v25  ;;  %v14125_v7 = vld [vmem:[%s17837_s10 + $0x16d] sm:$0xff] }
  0xf6   : > { %v16348_v40 = vpop.f32.mrf.mxu1  ;;  %16597 = vmatmul.mubr.msk.f32.gmra.mxu1 %vm282_vm1, %v18654_v42  ;;  %v509_v30 = vpop.f32.mrf.mxu0  ;;  %v1004_v29 = vld [vmem:[#allocation2 + $0x40] sm:$0xff] }
  0xf7   : > { %639 = vst.msk [vmem:[#allocation2 + $0xf8] sm:$0xff] %vm282_vm1, %v16348_v40  ;;  %16651 = vmatprep.mubr.msk.f32.mxu1 %vm282_vm1, %v18040_v46  ;;  %620 = vst.msk [vmem:[#allocation2 + $0x60] sm:$0xff] %vm282_vm1, %v509_v30  ;;  %v997_v46 = vld [vmem:[#allocation2 + $0x8] sm:$0xff] }
  0xf8   : > { %v599_v45 = vpop.f32.mrf.mxu1  ;;  %v16324_v33 = vpop.f32.mrf.mxu0  ;;  %16647 = vmatmul.mubr.msk.f32.gmra.mxu0 %vm282_vm1, %v14080_v38  ;;  %v14126_v38 = vld [vmem:[%s17837_s10 + $0x185] sm:$0xff] }
  0xf9   : > { %638 = vst.msk [vmem:[#allocation2 + $0xf0] sm:$0xff] %vm282_vm1, %v599_v45  ;;  %623 = vst.msk [vmem:[#allocation2 + $0x78] sm:$0xff] %vm282_vm1, %v16324_v33  ;;  %16701 = vmatprep.mubr.msk.f32.mxu0 %vm282_vm1, %v22376_v48  ;;  %v18689_v48 = vld [vmem:[%s22301_s1 + $0x30] sm:$0xf] }
  0xfa   : > { %v16353_v3 = vpop.f32.mrf.mxu1  ;;  %16652 = vmatmul.mubr.msk.f32.vlgmr.msra.gmra.mxu1 %vm282_vm1, %v18062_v49  ;;  %v519_v37 = vpop.f32.mrf.mxu0  ;;  %v14190_v45 = vld [vmem:[%s17837_s10 + $0x16e] sm:$0xff] }
  0xfb   : > { %v1029_v4 = vadd.f32 %v16353_v3, %v997_v46  ;;  %16750 = vmatpush3.msk.msra.mxu1 %vm379_vm0, %v18494_v35  ;;  %16654 = vmatprep.mubr.msk.f32.mxu1 %vm282_vm1, %v18065_v50  ;;  %622 = vst.msk [vmem:[#allocation2 + $0x70] sm:$0xff] %vm282_vm1, %v519_v37  ;;  %v999_v35 = vld [vmem:[#allocation2 + $0x18] sm:$0xff] }
  0xfc   : > { %v837_v5 = vpop.f32.mrf.mxu1  ;;  %v16403_v10 = vpop.f32.mrf.mxu0  ;;  %16702 = vmatmul.mubr.msk.f32.vlgmr.msra.gmra.mxu0 %vm282_vm1, %v22377_v14  ;;  %16849 = vmatprep.subr.msk.mxu1 %vm379_vm0, %v18677_v34  ;;  %v1007_v46 = vld [vmem:[#allocation2 + $0x58] sm:$0xff] }
  0xfd   : > { %1061 = vst.msk [vmem:[#allocation2 + $0x8] sm:$0xff] %vm282_vm1, %v1029_v4  ;;  %v1028_v49 = vadd.f32 %v996_v59, %v837_v5  ;;  %16800 = vmatpush3.msk.msra.mxu0 %vm379_vm0, %v18505_v51  ;;  %16704 = vmatprep.mubr.msk.f32.mxu0 %vm282_vm1, %v22378_v52  ;;  %v14191_v4 = vld [vmem:[%s17837_s10 + $0x186] sm:$0xff] }
  0xfe   : > { %v16356_v50 = vpop.f32.mrf.mxu1  ;;  %16655 = vmatmul.mubr.msk.f32.gmra.mxu1 %vm282_vm1, %v18082_v53  ;;  %v1289_v12 = vpop.f32.mrf.mxu0  ;;  %16899 = vmatprep.subr.msk.mxu0 %vm379_vm0, %v18689_v48 }
  0xff   : > { %1060 = vst.msk [vmem:[#allocation2] sm:$0xff] %vm282_vm1, %v1028_v49  ;;  %v1031_v14 = vadd.f32 %v16356_v50, %v999_v35  ;;  %16657 = vmatprep.mubr.msk.f32.mxu1 %vm282_vm1, %v18085_v54  ;;  %v14185_v54 = vld [vmem:[%s17837_s10 + $0x126] sm:$0xff]  ;;  %v1006_v35 = vld [vmem:[#allocation2 + $0x50] sm:$0xff] }
 0x100   : > { %v847_v51 = vpop.f32.mrf.mxu1  ;;  %v16406_v63 = vpop.f32.mrf.mxu0  ;;  %16705 = vmatmul.mubr.msk.f32.gmra.mxu0 %vm282_vm1, %v22379_v17 }
 0x101   : > { %1063 = vst.msk [vmem:[#allocation2 + $0x18] sm:$0xff] %vm282_vm1, %v1031_v14  ;;  %v1030_v53 = vadd.f32 %v998_v60, %v847_v51  ;;  %16707 = vmatprep.mubr.msk.f32.mxu0 %vm282_vm1, %v22380_v55 }
 0x102   : > { %v16359_v52 = vpop.f32.mrf.mxu1  ;;  %16658 = vmatmul.mubr.msk.f32.gmra.mxu1 %vm282_vm1, %v18102_v57  ;;  %v1299_v0 = vpop.f32.mrf.mxu0 }
 0x103   : > { %1062 = vst.msk [vmem:[#allocation2 + $0x10] sm:$0xff] %vm282_vm1, %v1030_v53  ;;  %v1033_v16 = vadd.f32 %v16359_v52, %v1001_v15  ;;  %16660 = vmatprep.mubr.msk.f32.mxu1 %vm282_vm1, %v18105_v58  ;;  %v1009_v15 = vld [vmem:[#allocation2 + $0x68] sm:$0xff] }
 0x104   : > { %v1449_v17 = vld [vmem:[#allocation2 + $0x8] sm:$0xff]  ;;  %v857_v2 = vpop.f32.mrf.mxu1  ;;  %v16409_v8 = vpop.f32.mrf.mxu0  ;;  %16708 = vmatmul.mubr.msk.f32.gmra.mxu0 %vm282_vm1, %v22381_v18 }
 0x105   : > { %1065 = vst.msk [vmem:[#allocation2 + $0x28] sm:$0xff] %vm282_vm1, %v1033_v16  ;;  %v1481_v55 = vadd.f32 %v16403_v10, %v1449_v17  ;;  %v1032_v57 = vadd.f32 %v1000_v6, %v857_v2  ;;  %16710 = vmatprep.mubr.msk.f32.mxu0 %vm282_vm1, %v14185_v54  ;;  %v14127_v10 = vld [vmem:[%s17837_s10 + $0x18d] sm:$0xff] }
 0x106   : > { %v1448_v11 = vld [vmem:[#allocation2] sm:$0xff]  ;;  %v16362_v20 = vpop.f32.mrf.mxu1  ;;  %16661 = vmatmul.mubr.msk.f32.gmra.mxu1 %vm282_vm1, %v18122_v61  ;;  %v1309_v58 = vpop.f32.mrf.mxu0  ;;  %v14129_v2 = vld [vmem:[%s17837_s10 + $0x1ad] sm:$0xff] }
 0x107   : > { %1513 = vst.msk [vmem:[#allocation2 + $0x8] sm:$0xff] %vm282_vm1, %v1481_v55  ;;  %1064 = vst.msk [vmem:[#allocation2 + $0x20] sm:$0xff] %vm282_vm1, %v1032_v57  ;;  %v1480_v18 = vadd.f32 %v1448_v11, %v1289_v12  ;;  %v1035_v9 = vadd.f32 %v16362_v20, %v1003_v39  ;;  %16663 = vmatprep.mubr.msk.f32.mxu1 %vm282_vm1, %v18125_v62  ;;  %v14128_v12 = vld [vmem:[%s17837_s10 + $0x1a5] sm:$0xff]  ;;  %v14194_v39 = vld [vmem:[%s17837_s10 + $0x1ae] sm:$0xff] }
 0x108   : > { %v1451_v23 = vld [vmem:[#allocation2 + $0x18] sm:$0xff]  ;;  %v867_v44 = vpop.f32.mrf.mxu1  ;;  %v16412_v43 = vpop.f32.mrf.mxu0  ;;  %16711 = vmatmul.mubr.msk.f32.gmra.mxu0 %vm282_vm1, %v14186_v19  ;;  %v14193_v54 = vld [vmem:[%s17837_s10 + $0x1a6] sm:$0xff] }
 0x109   : > { %1512 = vst.msk [vmem:[#allocation2] sm:$0xff] %vm282_vm1, %v1480_v18  ;;  %1067 = vst.msk [vmem:[#allocation2 + $0x38] sm:$0xff] %vm282_vm1, %v1035_v9  ;;  %v1483_v61 = vadd.f32 %v16406_v63, %v1451_v23  ;;  %v1034_v27 = vadd.f32 %v1002_v24, %v867_v44  ;;  %16713 = vmatprep.mubr.msk.f32.mxu0 %vm282_vm1, %v14187_v41  ;;  %v14192_v63 = vld [vmem:[%s17837_s10 + $0x18e] sm:$0xff]  ;;  %v1008_v55 = vld [vmem:[#allocation2 + $0x60] sm:$0xff] }
 0x10a   : > { %v1450_v62 = vld [vmem:[#allocation2 + $0x10] sm:$0xff]  ;;  %v16365_v28 = vpop.f32.mrf.mxu1  ;;  %16664 = vmatmul.mubr.msk.f32.gmra.mxu1 %vm282_vm1, %v18142_v1  ;;  %v1319_v36 = vpop.f32.mrf.mxu0  ;;  %v14130_v57 = vld [vmem:[%s17837_s10 + $0x1c5] sm:$0xff]  ;;  %v1011_v18 = vld [vmem:[#allocation2 + $0x78] sm:$0xff] }
 0x10b   : > { %1515 = vst.msk [vmem:[#allocation2 + $0x18] sm:$0xff] %vm282_vm1, %v1483_v61  ;;  %1066 = vst.msk [vmem:[#allocation2 + $0x30] sm:$0xff] %vm282_vm1, %v1034_v27  ;;  %v1482_v22 = vadd.f32 %v1450_v62, %v1299_v0  ;;  %v1037_v13 = vadd.f32 %v16365_v28, %v1005_v56  ;;  %16666 = vmatprep.mubr.msk.f32.mxu1 %vm282_vm1, %v14124_v47  ;;  %v14195_v23 = vld [vmem:[%s17837_s10 + $0x1c6] sm:$0xff]  ;;  %v1010_v27 = vld [vmem:[#allocation2 + $0x70] sm:$0xff] }
 0x10c   : > { %v1453_v25 = vld [vmem:[#allocation2 + $0x28] sm:$0xff]  ;;  %v877_v26 = vpop.f32.mrf.mxu1  ;;  %v16415_v40 = vpop.f32.mrf.mxu0  ;;  %16714 = vmatmul.mubr.msk.f32.gmra.mxu0 %vm282_vm1, %v14188_v32 }
 0x10d   : > { %1514 = vst.msk [vmem:[#allocation2 + $0x10] sm:$0xff] %vm282_vm1, %v1482_v22  ;;  %1069 = vst.msk [vmem:[#allocation2 + $0x48] sm:$0xff] %vm282_vm1, %v1037_v13  ;;  %v1485_v1 = vadd.f32 %v16409_v8, %v1453_v25  ;;  %v1036_v30 = vadd.f32 %v1004_v29, %v877_v26  ;;  %16716 = vmatprep.mubr.msk.f32.mxu0 %vm282_vm1, %v14189_v31  ;;  %v14131_v47 = vld [vmem:[%s17837_s10 + $0x1cd] sm:$0xff]  ;;  %v14132_v32 = vld [vmem:[%s17837_s10 + $0x1e5] sm:$0xff] }
 0x10e   : > { %v1452_v33 = vld [vmem:[#allocation2 + $0x20] sm:$0xff]  ;;  %v16368_v3 = vpop.f32.mrf.mxu1  ;;  %16667 = vmatmul.mubr.msk.f32.gmra.mxu1 %vm282_vm1, %v14125_v7  ;;  %v1329_v37 = vpop.f32.mrf.mxu0  ;;  %v1013_v13 = vld [vmem:[#allocation2 + $0x88] sm:$0xff] }
 0x10f   : > { %1517 = vst.msk [vmem:[#allocation2 + $0x28] sm:$0xff] %vm282_vm1, %v1485_v1  ;;  %1068 = vst.msk [vmem:[#allocation2 + $0x40] sm:$0xff] %vm282_vm1, %v1036_v30  ;;  %v1484_v5 = vadd.f32 %v1452_v33, %v1309_v58  ;;  %v1039_v59 = vadd.f32 %v16368_v3, %v1007_v46  ;;  %16669 = vmatprep.mubr.msk.f32.mxu1 %vm282_vm1, %v14126_v38  ;;  %v14197_v25 = vld [vmem:[%s17837_s10 + $0x1e6] sm:$0xff] }
 0x110   : > { %v1455_v49 = vld [vmem:[#allocation2 + $0x38] sm:$0xff]  ;;  %v887_v50 = vpop.f32.mrf.mxu1  ;;  %v16418_v14 = vpop.f32.mrf.mxu0  ;;  %16717 = vmatmul.mubr.msk.f32.gmra.mxu0 %vm282_vm1, %v14190_v45  ;;  %v14133_v38 = vld [vmem:[%s17837_s10 + $0x1ed] sm:$0xff]  ;;  %v1012_v30 = vld [vmem:[#allocation2 + $0x80] sm:$0xff] }
 0x111   : > { %1516 = vst.msk [vmem:[#allocation2 + $0x20] sm:$0xff] %vm282_vm1, %v1484_v5  ;;  %1071 = vst.msk [vmem:[#allocation2 + $0x58] sm:$0xff] %vm282_vm1, %v1039_v59  ;;  %v1487_v51 = vadd.f32 %v16412_v43, %v1455_v49  ;;  %v1038_v60 = vadd.f32 %v1006_v35, %v887_v50  ;;  %16719 = vmatprep.mubr.msk.f32.mxu0 %vm282_vm1, %v14191_v4  ;;  %v14134_v45 = vld [vmem:[%s17837_s10 + $0x205] sm:$0xff]  ;;  %v1015_v59 = vld [vmem:[#allocation2 + $0x98] sm:$0xff] }
 0x112   : > { %v1454_v53 = vld [vmem:[#allocation2 + $0x30] sm:$0xff]  ;;  %v16371_v52 = vpop.f32.mrf.mxu1  ;;  %16670 = vmatmul.mubr.msk.f32.gmra.mxu1 %vm282_vm1, %v14127_v10  ;;  %v1339_v0 = vpop.f32.mrf.mxu0  ;;  %v14199_v49 = vld [vmem:[%s17837_s10 + $0x206] sm:$0xff] }
 0x113   : > { %1519 = vst.msk [vmem:[#allocation2 + $0x38] sm:$0xff] %vm282_vm1, %v1487_v51  ;;  %1070 = vst.msk [vmem:[#allocation2 + $0x50] sm:$0xff] %vm282_vm1, %v1038_v60  ;;  %v1486_v16 = vadd.f32 %v1454_v53, %v1319_v36  ;;  %v1041_v17 = vadd.f32 %v16371_v52, %v1009_v15  ;;  %16672 = vmatprep.mubr.msk.f32.mxu1 %vm282_vm1, %v14128_v12  ;;  %v14196_v36 = vld [vmem:[%s17837_s10 + $0x1ce] sm:$0xff] }
 0x114   : > { %v1457_v6 = vld [vmem:[#allocation2 + $0x48] sm:$0xff]  ;;  %v897_v8 = vpop.f32.mrf.mxu1  ;;  %v16421_v19 = vpop.f32.mrf.mxu0  ;;  %16720 = vmatmul.mubr.msk.f32.gmra.mxu0 %vm282_vm1, %v14192_v63  ;;  %v1014_v60 = vld [vmem:[#allocation2 + $0x90] sm:$0xff] }
 0x115   : > { %1518 = vst.msk [vmem:[#allocation2 + $0x30] sm:$0xff] %vm282_vm1, %v1486_v16  ;;  %1073 = vst.msk [vmem:[#allocation2 + $0x68] sm:$0xff] %vm282_vm1, %v1041_v17  ;;  %v1489_v11 = vadd.f32 %v16415_v40, %v1457_v6  ;;  %v1040_v20 = vadd.f32 %v1008_v55, %v897_v8  ;;  %16722 = vmatprep.mubr.msk.f32.mxu0 %vm282_vm1, %v14193_v54  ;;  %v14135_v12 = vld [vmem:[%s17837_s10 + $0x20d] sm:$0xff]  ;;  %v14136_v63 = vld [vmem:[%s17837_s10 + $0x225] sm:$0xff] }
 0x116   : > { %v1456_v58 = vld [vmem:[#allocation2 + $0x40] sm:$0xff]  ;;  %v16374_v41 = vpop.f32.mrf.mxu1  ;;  %16673 = vmatmul.mubr.msk.f32.gmra.mxu1 %vm282_vm1, %v14129_v2  ;;  %v1349_v9 = vpop.f32.mrf.mxu0  ;;  %v1017_v17 = vld [vmem:[#allocation2 + $0xa8] sm:$0xff] }
 0x117   : > { %1521 = vst.msk [vmem:[#allocation2 + $0x48] sm:$0xff] %vm282_vm1, %v1489_v11  ;;  %1072 = vst.msk [vmem:[#allocation2 + $0x60] sm:$0xff] %vm282_vm1, %v1040_v20  ;;  %v1488_v44 = vadd.f32 %v1456_v58, %v1329_v37  ;;  %v1043_v24 = vadd.f32 %v16374_v41, %v1011_v18  ;;  %16675 = vmatprep.mubr.msk.f32.mxu1 %vm282_vm1, %v14130_v57  ;;  %v14198_v37 = vld [vmem:[%s17837_s10 + $0x1ee] sm:$0xff]  ;;  %v14201_v6 = vld [vmem:[%s17837_s10 + $0x226] sm:$0xff] }
 0x118   : > { %v1459_v43 = vld [vmem:[#allocation2 + $0x58] sm:$0xff]  ;;  %v907_v61 = vpop.f32.mrf.mxu1  ;;  %v16424_v62 = vpop.f32.mrf.mxu0  ;;  %16723 = vmatmul.mubr.msk.f32.gmra.mxu0 %vm282_vm1, %v14194_v39  ;;  %v14137_v57 = vld [vmem:[%s17837_s10 + $0x22d] sm:$0xff]  ;;  %v1016_v20 = vld [vmem:[#allocation2 + $0xa0] sm:$0xff] }
 0x119   : > { %1520 = vst.msk [vmem:[#allocation2 + $0x40] sm:$0xff] %vm282_vm1, %v1488_v44  ;;  %1075 = vst.msk [vmem:[#allocation2 + $0x78] sm:$0xff] %vm282_vm1, %v1043_v24  ;;  %v1491_v28 = vadd.f32 %v16418_v14, %v1459_v43  ;;  %v1042_v56 = vadd.f32 %v1010_v27, %v907_v61  ;;  %16725 = vmatprep.mubr.msk.f32.mxu0 %vm282_vm1, %v14195_v23  ;;  %v14138_v39 = vld [vmem:[%s17837_s10 + $0x245] sm:$0xff]  ;;  %v1019_v24 = vld [vmem:[#allocation2 + $0xb8] sm:$0xff] }
 0x11a   : > { %v1458_v31 = vld [vmem:[#allocation2 + $0x50] sm:$0xff]  ;;  %v16377_v22 = vpop.f32.mrf.mxu1  ;;  %16676 = vmatmul.mubr.msk.f32.gmra.mxu1 %vm282_vm1, %v14131_v47  ;;  %v1359_v7 = vpop.f32.mrf.mxu0  ;;  %v14203_v43 = vld [vmem:[%s17837_s10 + $0x246] sm:$0xff] }
 0x11b   : > { %1523 = vst.msk [vmem:[#allocation2 + $0x58] sm:$0xff] %vm282_vm1, %v1491_v28  ;;  %1074 = vst.msk [vmem:[#allocation2 + $0x70] sm:$0xff] %vm282_vm1, %v1042_v56  ;;  %v1490_v26 = vadd.f32 %v1458_v31, %v1339_v0  ;;  %v1045_v29 = vadd.f32 %v16377_v22, %v1013_v13  ;;  %16678 = vmatprep.mubr.msk.f32.mxu1 %vm282_vm1, %v14132_v32  ;;  %v14200_v0 = vld [vmem:[%s17837_s10 + $0x20e] sm:$0xff] }
 0x11c   : > { %v1461_v40 = vld [vmem:[#allocation2 + $0x68] sm:$0xff]  ;;  %v917_v1 = vpop.f32.mrf.mxu1  ;;  %v16427_v33 = vpop.f32.mrf.mxu0  ;;  %16726 = vmatmul.mubr.msk.f32.gmra.mxu0 %vm282_vm1, %v14196_v36  ;;  %v1018_v56 = vld [vmem:[#allocation2 + $0xb0] sm:$0xff] }
 0x11d   : > { %1522 = vst.msk [vmem:[#allocation2 + $0x50] sm:$0xff] %vm282_vm1, %v1490_v26  ;;  %1077 = vst.msk [vmem:[#allocation2 + $0x88] sm:$0xff] %vm282_vm1, %v1045_v29  ;;  %v1493_v3 = vadd.f32 %v16421_v19, %v1461_v40  ;;  %v1044_v46 = vadd.f32 %v1012_v30, %v917_v1  ;;  %16728 = vmatprep.mubr.msk.f32.mxu0 %vm282_vm1, %v14197_v25  ;;  %v14139_v32 = vld [vmem:[%s17837_s10 + $0x24d] sm:$0xff]  ;;  %v14140_v36 = vld [vmem:[%s17837_s10 + $0x265] sm:$0xff] }
 0x11e   : > { %v1460_v4 = vld [vmem:[#allocation2 + $0x60] sm:$0xff]  ;;  %v16380_v5 = vpop.f32.mrf.mxu1  ;;  %16679 = vmatmul.mubr.msk.f32.gmra.mxu1 %vm282_vm1, %v14133_v38  ;;  %v1369_v10 = vpop.f32.mrf.mxu0  ;;  %v1021_v29 = vld [vmem:[#allocation2 + $0xc8] sm:$0xff] }
 0x11f   : > { %1525 = vst.msk [vmem:[#allocation2 + $0x68] sm:$0xff] %vm282_vm1, %v1493_v3  ;;  %1076 = vst.msk [vmem:[#allocation2 + $0x80] sm:$0xff] %vm282_vm1, %v1044_v46  ;;  %v1492_v50 = vadd.f32 %v1460_v4, %v1349_v9  ;;  %v1047_v35 = vadd.f32 %v16380_v5, %v1015_v59  ;;  %16681 = vmatprep.mubr.msk.f32.mxu1 %vm282_vm1, %v14134_v45  ;;  %v14202_v9 = vld [vmem:[%s17837_s10 + $0x22e] sm:$0xff]  ;;  %v14205_v40 = vld [vmem:[%s17837_s10 + $0x266] sm:$0xff] }
 0x120   : > { %v1463_v14 = vld [vmem:[#allocation2 + $0x78] sm:$0xff]  ;;  %v927_v51 = vpop.f32.mrf.mxu1  ;;  %v16430_v53 = vpop.f32.mrf.mxu0  ;;  %16729 = vmatmul.mubr.msk.f32.gmra.mxu0 %vm282_vm1, %v14198_v37  ;;  %v14141_v45 = vld [vmem:[%s17837_s10 + $0x26d] sm:$0xff]  ;;  %v1020_v46 = vld [vmem:[#allocation2 + $0xc0] sm:$0xff] }
 0x121   : > { %1524 = vst.msk [vmem:[#allocation2 + $0x60] sm:$0xff] %vm282_vm1, %v1492_v50  ;;  %1079 = vst.msk [vmem:[#allocation2 + $0x98] sm:$0xff] %vm282_vm1, %v1047_v35  ;;  %v1495_v52 = vadd.f32 %v16424_v62, %v1463_v14  ;;  %v1046_v15 = vadd.f32 %v1014_v60, %v927_v51  ;;  %16731 = vmatprep.mubr.msk.f32.mxu0 %vm282_vm1, %v14199_v49  ;;  %v14142_v37 = vld [vmem:[%s17837_s10 + $0x285] sm:$0xff]  ;;  %v1023_v35 = vld [vmem:[#allocation2 + $0xd8] sm:$0xff] }
 0x122   : > { %v1462_v54 = vld [vmem:[#allocation2 + $0x70] sm:$0xff]  ;;  %v16383_v16 = vpop.f32.mrf.mxu1  ;;  %16682 = vmatmul.mubr.msk.f32.gmra.mxu1 %vm282_vm1, %v14135_v12  ;;  %v1379_v2 = vpop.f32.mrf.mxu0 }
 0x123   : > { %1527 = vst.msk [vmem:[#allocation2 + $0x78] sm:$0xff] %vm282_vm1, %v1495_v52  ;;  %1078 = vst.msk [vmem:[#allocation2 + $0x90] sm:$0xff] %vm282_vm1, %v1046_v15  ;;  %v1494_v8 = vadd.f32 %v1462_v54, %v1359_v7  ;;  %v1049_v55 = vadd.f32 %v16383_v16, %v1017_v17  ;;  %16684 = vmatprep.mubr.msk.f32.mxu1 %vm282_vm1, %v14136_v63  ;;  %v14204_v7 = vld [vmem:[%s17837_s10 + $0x24e] sm:$0xff]  ;;  %v14144_v15 = vld [vmem:[%s17837_s10 + $0x2a5] sm:$0xff] }
 0x124   : > { %v1465_v19 = vld [vmem:[#allocation2 + $0x88] sm:$0xff]  ;;  %v937_v11 = vpop.f32.mrf.mxu1  ;;  %v16433_v58 = vpop.f32.mrf.mxu0  ;;  %16732 = vmatmul.mubr.msk.f32.gmra.mxu0 %vm282_vm1, %v14200_v0  ;;  %v1022_v52 = vld [vmem:[#allocation2 + $0xd0] sm:$0xff] }
 0x125   : > { %1526 = vst.msk [vmem:[#allocation2 + $0x70] sm:$0xff] %vm282_vm1, %v1494_v8  ;;  %1081 = vst.msk [vmem:[#allocation2 + $0xa8] sm:$0xff] %vm282_vm1, %v1049_v55  ;;  %v1497_v41 = vadd.f32 %v16427_v33, %v1465_v19  ;;  %v1048_v18 = vadd.f32 %v1016_v20, %v937_v11  ;;  %16734 = vmatprep.mubr.msk.f32.mxu0 %vm282_vm1, %v14201_v6  ;;  %v14143_v60 = vld [vmem:[%s17837_s10 + $0x28d] sm:$0xff] }
 0x126   : > { %v1464_v23 = vld [vmem:[#allocation2 + $0x80] sm:$0xff]  ;;  %v16386_v44 = vpop.f32.mrf.mxu1  ;;  %16685 = vmatmul.mubr.msk.f32.gmra.mxu1 %vm282_vm1, %v14137_v57  ;;  %v1389_v47 = vpop.f32.mrf.mxu0  ;;  %v1025_v6 = vld [vmem:[#allocation2 + $0xe8] sm:$0xff] }
 0x127   : > { %1529 = vst.msk [vmem:[#allocation2 + $0x88] sm:$0xff] %vm282_vm1, %v1497_v41  ;;  %1080 = vst.msk [vmem:[#allocation2 + $0xa0] sm:$0xff] %vm282_vm1, %v1048_v18  ;;  %v1496_v61 = vadd.f32 %v1464_v23, %v1369_v10  ;;  %v1051_v27 = vadd.f32 %v16386_v44, %v1019_v24  ;;  %16687 = vmatprep.mubr.msk.f32.mxu1 %vm282_vm1, %v14138_v39  ;;  %v14206_v10 = vld [vmem:[%s17837_s10 + $0x26e] sm:$0xff]  ;;  %v14209_v55 = vld [vmem:[%s17837_s10 + $0x2a6] sm:$0xff] }
 0x128   : > { %v1467_v62 = vld [vmem:[#allocation2 + $0x98] sm:$0xff]  ;;  %v947_v28 = vpop.f32.mrf.mxu1  ;;  %v16436_v31 = vpop.f32.mrf.mxu0  ;;  %16735 = vmatmul.mubr.msk.f32.gmra.mxu0 %vm282_vm1, %v14202_v9  ;;  %v14145_v11 = vld [vmem:[%s17837_s10 + $0x2ad] sm:$0xff]  ;;  %v1024_v39 = vld [vmem:[#allocation2 + $0xe0] sm:$0xff] }
 0x129   : > { %1528 = vst.msk [vmem:[#allocation2 + $0x80] sm:$0xff] %vm282_vm1, %v1496_v61  ;;  %1083 = vst.msk [vmem:[#allocation2 + $0xb8] sm:$0xff] %vm282_vm1, %v1051_v27  ;;  %v1499_v22 = vadd.f32 %v16430_v53, %v1467_v62  ;;  %v1050_v13 = vadd.f32 %v1018_v56, %v947_v28  ;;  %16737 = vmatprep.mubr.msk.f32.mxu0 %vm282_vm1, %v14203_v43  ;;  %v14210_v23 = vld [vmem:[%s17837_s10 + $0x2ae] sm:$0xff]  ;;  %v14319_v61 = vld [vmem:[%s17837_s10 + $0x45] sm:$0xff] }
 0x12a   : > { %v1466_v25 = vld [vmem:[#allocation2 + $0x90] sm:$0xff]  ;;  %v16389_v26 = vpop.f32.mrf.mxu1  ;;  %16688 = vmatmul.mubr.msk.f32.gmra.mxu1 %vm282_vm1, %v14139_v32  ;;  %v1399_v38 = vpop.f32.mrf.mxu0 }
 0x12b   : > { %1531 = vst.msk [vmem:[#allocation2 + $0x98] sm:$0xff] %vm282_vm1, %v1499_v22  ;;  %1082 = vst.msk [vmem:[#allocation2 + $0xb0] sm:$0xff] %vm282_vm1, %v1050_v13  ;;  %v1498_v1 = vadd.f32 %v1466_v25, %v1379_v2  ;;  %v1053_v30 = vadd.f32 %v16389_v26, %v1021_v29  ;;  %16690 = vmatprep.mubr.msk.f32.mxu1 %vm282_vm1, %v14140_v36  ;;  %v14255_v32 = vld [vmem:[%s17837_s10 + $0x4a] sm:$0xff]  ;;  %v14256_v36 = vld [vmem:[%s17837_s10 + $0x62] sm:$0xff] }
 0x12c   : > { %v1469_v33 = vld [vmem:[#allocation2 + $0xa8] sm:$0xff]  ;;  %v957_v3 = vpop.f32.mrf.mxu1  ;;  %v16439_v4 = vpop.f32.mrf.mxu0  ;;  %16738 = vmatmul.mubr.msk.f32.gmra.mxu0 %vm282_vm1, %v14204_v7  ;;  %v1026_v56 = vld [vmem:[#allocation2 + $0xf0] sm:$0xff] }
 0x12d   : > { %1530 = vst.msk [vmem:[#allocation2 + $0x90] sm:$0xff] %vm282_vm1, %v1498_v1  ;;  %1085 = vst.msk [vmem:[#allocation2 + $0xc8] sm:$0xff] %vm282_vm1, %v1053_v30  ;;  %v1501_v5 = vadd.f32 %v16433_v58, %v1469_v33  ;;  %v1052_v59 = vadd.f32 %v1020_v46, %v957_v3  ;;  %16740 = vmatprep.mubr.msk.f32.mxu0 %vm282_vm1, %v14205_v40  ;;  %v14254_v58 = vld [vmem:[%s17837_s10 + $0x42] sm:$0xff]  ;;  %v14320_v7 = vld [vmem:[%s17837_s10 + $0x4d] sm:$0xff] }
 0x12e   : > { %v1468_v49 = vld [vmem:[#allocation2 + $0xa0] sm:$0xff]  ;;  %v16392_v50 = vpop.f32.mrf.mxu1  ;;  %16691 = vmatmul.mubr.msk.f32.gmra.mxu1 %vm282_vm1, %v14141_v45  ;;  %v1409_v12 = vpop.f32.mrf.mxu0  ;;  %v18884_v25 = vld [vmem:[%s22301_s1 + $0x34] sm:$0xf]  ;;  %v14257_v33 = vld [vmem:[%s17837_s10 + $0x6a] sm:$0xff] }
 0x12f   : > { %1533 = vst.msk [vmem:[#allocation2 + $0xa8] sm:$0xff] %vm282_vm1, %v1501_v5  ;;  %1084 = vst.msk [vmem:[#allocation2 + $0xc0] sm:$0xff] %vm282_vm1, %v1052_v59  ;;  %v1500_v14 = vadd.f32 %v1468_v49, %v1389_v47  ;;  %v1055_v51 = vadd.f32 %v16392_v50, %v1023_v35  ;;  %16693 = vmatprep.mubr.msk.f32.mxu1 %vm282_vm1, %v14142_v37  ;;  %v1027_v47 = vld [vmem:[#allocation2 + $0xf8] sm:$0xff]  ;;  %v14321_v1 = vld [vmem:[%s17837_s10 + $0x65] sm:$0xff] }
 0x130   : > { %v1471_v63 = vld [vmem:[#allocation2 + $0xb8] sm:$0xff]  ;;  %v967_v53 = vpop.f32.mrf.mxu1  ;;  %v16442_v0 = vpop.f32.mrf.mxu0  ;;  %16741 = vmatmul.mubr.msk.f32.gmra.mxu0 %vm282_vm1, %v14206_v10  ;;  %v14258_v5 = vld [vmem:[%s17837_s10 + $0x82] sm:$0xff]  ;;  %v14322_v49 = vld [vmem:[%s17837_s10 + $0x6d] sm:$0xff] }
 0x131   : > { %1532 = vst.msk [vmem:[#allocation2 + $0xa0] sm:$0xff] %vm282_vm1, %v1500_v14  ;;  %1087 = vst.msk [vmem:[#allocation2 + $0xd8] sm:$0xff] %vm282_vm1, %v1055_v51  ;;  %v1503_v54 = vadd.f32 %v16436_v31, %v1471_v63  ;;  %v1054_v16 = vadd.f32 %v1022_v52, %v967_v53  ;;  %16743 = vmatprep.mubr.msk.f32.mxu0 %vm282_vm1, %v18639_v21  ;;  %v18897_v3 = vld [vmem:[%s22301_s1 + $0x38] sm:$0xf]  ;;  %v14323_v51 = vld [vmem:[%s17837_s10 + $0x85] sm:$0xff] }
 0x132   : > { %v1470_v17 = vld [vmem:[#allocation2 + $0xb0] sm:$0xff]  ;;  %v16395_v2 = vpop.f32.mrf.mxu1  ;;  %16694 = vmatmul.mubr.msk.f32.gmra.mxu1 %vm282_vm1, %v14143_v60  ;;  %v1419_v8 = vpop.f32.mrf.mxu0 }
 0x133   : > { %1535 = vst.msk [vmem:[#allocation2 + $0xb8] sm:$0xff] %vm282_vm1, %v1503_v54  ;;  %1086 = vst.msk [vmem:[#allocation2 + $0xd0] sm:$0xff] %vm282_vm1, %v1054_v16  ;;  %v1502_v57 = vadd.f32 %v1470_v17, %v1399_v38  ;;  %v1057_v19 = vadd.f32 %v16395_v2, %v1025_v6  ;;  %16696 = vmatprep.mubr.msk.f32.mxu1 %vm282_vm1, %v14144_v15  ;;  %v1902_v38 = vld [vmem:[#allocation2 + $0x8] sm:$0xff]  ;;  %v1903_v15 = vld [vmem:[#allocation2 + $0x10] sm:$0xff] }
 0x134   : > { %v1473_v20 = vld [vmem:[#allocation2 + $0xc8] sm:$0xff]  ;;  %v977_v21 = vpop.f32.mrf.mxu1  ;;  %v16445_v41 = vpop.f32.mrf.mxu0  ;;  %16744 = vmatmul.mubr.msk.f32.gmra.mxu0 %vm282_vm1, %v18654_v42 }
 0x135   : > { %1534 = vst.msk [vmem:[#allocation2 + $0xb0] sm:$0xff] %vm282_vm1, %v1502_v57  ;;  %1089 = vst.msk [vmem:[#allocation2 + $0xe8] sm:$0xff] %vm282_vm1, %v1057_v19  ;;  %v1505_v18 = vadd.f32 %v16439_v4, %v1473_v20  ;;  %v1056_v9 = vadd.f32 %v1024_v39, %v977_v21  ;;  %16746 = vmatprep.mubr.msk.f32.mxu0 %vm282_vm1, %v14209_v55  ;;  %v1901_v4 = vld [vmem:[#allocation2] sm:$0xff]  ;;  %v14259_v63 = vld [vmem:[%s17837_s10 + $0x8a] sm:$0xff] }
 0x136   : > { %v1472_v44 = vld [vmem:[#allocation2 + $0xc0] sm:$0xff]  ;;  %v16398_v24 = vpop.f32.mrf.mxu1  ;;  %16697 = vmatmul.mubr.msk.f32.gmra.mxu1 %vm282_vm1, %v14145_v11  ;;  %v1429_v43 = vpop.f32.mrf.mxu0  ;;  %v14324_v2 = vld [vmem:[%s17837_s10 + $0x8d] sm:$0xff] }
 0x137   : > { %1537 = vst.msk [vmem:[#allocation2 + $0xc8] sm:$0xff] %vm282_vm1, %v1505_v18  ;;  %1088 = vst.msk [vmem:[#allocation2 + $0xe0] sm:$0xff] %vm282_vm1, %v1056_v9  ;;  %v1504_v42 = vadd.f32 %v1472_v44, %v1409_v12  ;;  %v1059_v27 = vadd.f32 %v16398_v24, %v1027_v47  ;;  %16751 = vmatprep.mubr.msk.f32.mxu1 %vm282_vm1, %v14254_v58  ;;  %v1904_v12 = vld [vmem:[#allocation2 + $0x18] sm:$0xff]  ;;  %v1906_v55 = vld [vmem:[#allocation2 + $0x28] sm:$0xff] }
 0x138   : > { %v1475_v62 = vld [vmem:[#allocation2 + $0xd8] sm:$0xff]  ;;  %v987_v28 = vpop.f32.mrf.mxu1  ;;  %v16448_v31 = vpop.f32.mrf.mxu0  ;;  %16747 = vmatmul.mubr.msk.f32.gmra.mxu0 %vm282_vm1, %v14210_v23  ;;  %v14325_v19 = vld [vmem:[%s17837_s10 + $0xa5] sm:$0xff]  ;;  %v14326_v24 = vld [vmem:[%s17837_s10 + $0xad] sm:$0xff] }
 0x139   : > { %1536 = vst.msk [vmem:[#allocation2 + $0xc0] sm:$0xff] %vm282_vm1, %v1504_v42  ;;  %1091 = vst.msk [vmem:[#allocation2 + $0xf8] sm:$0xff] %vm282_vm1, %v1059_v27  ;;  %v1507_v22 = vadd.f32 %v16442_v0, %v1475_v62  ;;  %v1058_v13 = vadd.f32 %v1026_v56, %v987_v28  ;;  %16801 = vmatprep.mubr.msk.f32.mxu0 %vm282_vm1, %v14319_v61  ;;  %v18918_v0 = vld [vmem:[%s17837_s10 + $0xa2] sm:$0xff]  ;;  %v18932_v21 = vld [vmem:[%s17837_s10 + $0xaa] sm:$0xff] }
 0x13a   : > { %v1474_v26 = vld [vmem:[#allocation2 + $0xd0] sm:$0xff]  ;;  %v16453_v29 = vpop.f32.mrf.mxu1  ;;  %16752 = vmatmul.mubr.msk.f32.vlgmr.msra.gmra.mxu1 %vm282_vm1, %v14255_v32  ;;  %v1439_v40 = vpop.f32.mrf.mxu0  ;;  %v18935_v18 = vld [vmem:[%s17837_s10 + $0xc2] sm:$0xff]  ;;  %v1908_v61 = vld [vmem:[#allocation2 + $0x38] sm:$0xff] }
 0x13b   : > { %1539 = vst.msk [vmem:[#allocation2 + $0xd8] sm:$0xff] %vm282_vm1, %v1507_v22  ;;  %1090 = vst.msk [vmem:[#allocation2 + $0xf0] sm:$0xff] %vm282_vm1, %v1058_v13  ;;  %v1506_v30 = vadd.f32 %v1474_v26, %v1419_v8  ;;  %v1934_v45 = vadd.f32 %v16453_v29, %v1902_v38  ;;  %16850 = vmatpush3.msk.msra.mxu1 %vm379_vm0, %v18677_v34  ;;  %16754 = vmatprep.mubr.msk.f32.mxu1 %vm282_vm1, %v14256_v36  ;;  %v14327_v27 = vld [vmem:[%s17837_s10 + $0xc5] sm:$0xff]  ;;  %v14328_v29 = vld [vmem:[%s17837_s10 + $0xcd] sm:$0xff] }
 0x13c   : > { %v1477_v46 = vld [vmem:[#allocation2 + $0xe8] sm:$0xff]  ;;  %v1742_v37 = vpop.f32.mrf.mxu1  ;;  %v16503_v59 = vpop.f32.mrf.mxu0  ;;  %16802 = vmatmul.mubr.msk.f32.vlgmr.msra.gmra.mxu0 %vm282_vm1, %v14320_v7  ;;  %16949 = vmatprep.subr.msk.mxu1 %vm379_vm0, %v18884_v25 }
 0x13d   : > { %1538 = vst.msk [vmem:[#allocation2 + $0xd0] sm:$0xff] %vm282_vm1, %v1506_v30  ;;  %v1509_v34 = vadd.f32 %v16445_v41, %v1477_v46  ;;  %1966 = vst.msk [vmem:[#allocation2 + $0x8] sm:$0xff] %vm282_vm1, %v1934_v45  ;;  %v1933_v10 = vadd.f32 %v1901_v4, %v1742_v37  ;;  %16900 = vmatpush3.msk.msra.mxu0 %vm379_vm0, %v18689_v48  ;;  %16804 = vmatprep.mubr.msk.f32.mxu0 %vm282_vm1, %v14321_v1  ;;  %v1905_v41 = vld [vmem:[#allocation2 + $0x20] sm:$0xff]  ;;  %v18950_v28 = vld [vmem:[%s17837_s10 + $0xca] sm:$0xff] }
 0x13e   : > { %v1476_v50 = vld [vmem:[#allocation2 + $0xe0] sm:$0xff]  ;;  %v16456_v35 = vpop.f32.mrf.mxu1  ;;  %16755 = vmatmul.mubr.msk.f32.gmra.mxu1 %vm282_vm1, %v14257_v33  ;;  %v2194_v14 = vpop.f32.mrf.mxu0  ;;  %16999 = vmatprep.subr.msk.mxu0 %vm379_vm0, %v18897_v3  ;;  %v1910_v1 = vld [vmem:[#allocation2 + $0x48] sm:$0xff] }
 0x13f   : > { %1541 = vst.msk [vmem:[#allocation2 + $0xe8] sm:$0xff] %vm282_vm1, %v1509_v34  ;;  %v1508_v60 = vadd.f32 %v1476_v50, %v1429_v43  ;;  %1965 = vst.msk [vmem:[#allocation2] sm:$0xff] %vm282_vm1, %v1933_v10  ;;  %v1936_v48 = vadd.f32 %v16456_v35, %v1904_v12  ;;  %16757 = vmatprep.mubr.msk.f32.mxu1 %vm282_vm1, %v14258_v5  ;;  %v18953_v22 = vld [vmem:[%s17837_s10 + $0xe2] sm:$0xff]  ;;  %v18968_v37 = vld [vmem:[%s17837_s10 + $0xea] sm:$0xff] }
 0x140   : > { %v1479_v53 = vld [vmem:[#allocation2 + $0xf8] sm:$0xff]  ;;  %v1752_v52 = vpop.f32.mrf.mxu1  ;;  %v16506_v54 = vpop.f32.mrf.mxu0  ;;  %16805 = vmatmul.mubr.msk.f32.gmra.mxu0 %vm282_vm1, %v14322_v49  ;;  %v14329_v45 = vld [vmem:[%s17837_s10 + $0xe5] sm:$0xff]  ;;  %v14330_v35 = vld [vmem:[%s17837_s10 + $0xed] sm:$0xff] }
 0x141   : > { %1540 = vst.msk [vmem:[#allocation2 + $0xe0] sm:$0xff] %vm282_vm1, %v1508_v60  ;;  %v1511_v16 = vadd.f32 %v16448_v31, %v1479_v53  ;;  %1968 = vst.msk [vmem:[#allocation2 + $0x18] sm:$0xff] %vm282_vm1, %v1936_v48  ;;  %v1935_v17 = vadd.f32 %v1903_v15, %v1752_v52  ;;  %16807 = vmatprep.mubr.msk.f32.mxu0 %vm282_vm1, %v14323_v51  ;;  %v1907_v31 = vld [vmem:[#allocation2 + $0x30] sm:$0xff]  ;;  %v18971_v34 = vld [vmem:[%s17837_s10 + $0x102] sm:$0xff] }
 0x142   : > { %v1478_v6 = vld [vmem:[#allocation2 + $0xf0] sm:$0xff]  ;;  %v16459_v8 = vpop.f32.mrf.mxu1  ;;  %16758 = vmatmul.mubr.msk.f32.gmra.mxu1 %vm282_vm1, %v14259_v63  ;;  %v2204_v57 = vpop.f32.mrf.mxu0  ;;  %v1912_v51 = vld [vmem:[#allocation2 + $0x58] sm:$0xff]  ;;  %v14331_v48 = vld [vmem:[%s17837_s10 + $0x105] sm:$0xff] }
 0x143   : > { %1543 = vst.msk [vmem:[#allocation2 + $0xf8] sm:$0xff] %vm282_vm1, %v1511_v16  ;;  %v1510_v11 = vadd.f32 %v1478_v6, %v1439_v40  ;;  %1967 = vst.msk [vmem:[#allocation2 + $0x10] sm:$0xff] %vm282_vm1, %v1935_v17  ;;  %v1938_v20 = vadd.f32 %v16459_v8, %v1906_v55  ;;  %16760 = vmatprep.mubr.msk.f32.mxu1 %vm282_vm1, %v18918_v0  ;;  %v18986_v52 = vld [vmem:[%s17837_s10 + $0x10a] sm:$0xff]  ;;  %v18989_v17 = vld [vmem:[%s17837_s10 + $0x122] sm:$0xff] }
 0x144   : > { %v2354_v39 = vld [vmem:[#allocation2 + $0x8] sm:$0xff]  ;;  %v1762_v58 = vpop.f32.mrf.mxu1  ;;  %v16509_v9 = vpop.f32.mrf.mxu0  ;;  %16808 = vmatmul.mubr.msk.f32.gmra.mxu0 %vm282_vm1, %v14324_v2  ;;  %v1911_v16 = vld [vmem:[#allocation2 + $0x50] sm:$0xff] }
 0x145   : > { %1542 = vst.msk [vmem:[#allocation2 + $0xf0] sm:$0xff] %vm282_vm1, %v1510_v11  ;;  %1970 = vst.msk [vmem:[#allocation2 + $0x28] sm:$0xff] %vm282_vm1, %v1938_v20  ;;  %v2386_v23 = vadd.f32 %v16503_v59, %v2354_v39  ;;  %v1937_v44 = vadd.f32 %v1905_v41, %v1762_v58  ;;  %16810 = vmatprep.mubr.msk.f32.mxu0 %vm282_vm1, %v14325_v19  ;;  %v1909_v59 = vld [vmem:[#allocation2 + $0x40] sm:$0xff]  ;;  %v14332_v55 = vld [vmem:[%s17837_s10 + $0x10d] sm:$0xff] }
 0x146   : > { %v2353_v47 = vld [vmem:[#allocation2] sm:$0xff]  ;;  %v16462_v43 = vpop.f32.mrf.mxu1  ;;  %16761 = vmatmul.mubr.msk.f32.gmra.mxu1 %vm282_vm1, %v18932_v21  ;;  %v2214_v42 = vpop.f32.mrf.mxu0  ;;  %v1914_v11 = vld [vmem:[#allocation2 + $0x68] sm:$0xff] }
 0x147   : > { %2418 = vst.msk [vmem:[#allocation2 + $0x8] sm:$0xff] %vm282_vm1, %v2386_v23  ;;  %1969 = vst.msk [vmem:[#allocation2 + $0x20] sm:$0xff] %vm282_vm1, %v1937_v44  ;;  %v2385_v32 = vadd.f32 %v2353_v47, %v2194_v14  ;;  %v1940_v62 = vadd.f32 %v16462_v43, %v1908_v61  ;;  %16763 = vmatprep.mubr.msk.f32.mxu1 %vm282_vm1, %v18935_v18  ;;  %v14333_v39 = vld [vmem:[%s17837_s10 + $0x125] sm:$0xff] }
 0x148   : > { %v2356_v56 = vld [vmem:[#allocation2 + $0x18] sm:$0xff]  ;;  %v1772_v36 = vpop.f32.mrf.mxu1  ;;  %v16512_v13 = vpop.f32.mrf.mxu0  ;;  %16811 = vmatmul.mubr.msk.f32.gmra.mxu0 %vm282_vm1, %v14326_v24  ;;  %v1913_v24 = vld [vmem:[#allocation2 + $0x60] sm:$0xff] }
 0x149   : > { %2417 = vst.msk [vmem:[#allocation2] sm:$0xff] %vm282_vm1, %v2385_v32  ;;  %1972 = vst.msk [vmem:[#allocation2 + $0x38] sm:$0xff] %vm282_vm1, %v1940_v62  ;;  %v2388_v7 = vadd.f32 %v16506_v54, %v2356_v56  ;;  %v1939_v26 = vadd.f32 %v1907_v31, %v1772_v36  ;;  %16813 = vmatprep.mubr.msk.f32.mxu0 %vm282_vm1, %v14327_v27  ;;  %v19007_v47 = vld [vmem:[%s17837_s10 + $0x142] sm:$0xff]  ;;  %v14334_v27 = vld [vmem:[%s17837_s10 + $0x12d] sm:$0xff] }
 0x14a   : > { %v2355_v38 = vld [vmem:[#allocation2 + $0x10] sm:$0xff]  ;;  %v16465_v40 = vpop.f32.mrf.mxu1  ;;  %16764 = vmatmul.mubr.msk.f32.gmra.mxu1 %vm282_vm1, %v18950_v28  ;;  %v2224_v30 = vpop.f32.mrf.mxu0  ;;  %v1916_v56 = vld [vmem:[#allocation2 + $0x78] sm:$0xff]  ;;  %v14335_v31 = vld [vmem:[%s17837_s10 + $0x145] sm:$0xff] }
 0x14b   : > { %2420 = vst.msk [vmem:[#allocation2 + $0x18] sm:$0xff] %vm282_vm1, %v2388_v7  ;;  %1971 = vst.msk [vmem:[#allocation2 + $0x30] sm:$0xff] %vm282_vm1, %v1939_v26  ;;  %v2387_v33 = vadd.f32 %v2355_v38, %v2204_v57  ;;  %v1942_v46 = vadd.f32 %v16465_v40, %v1910_v1  ;;  %16766 = vmatprep.mubr.msk.f32.mxu1 %vm282_vm1, %v18953_v22  ;;  %v19022_v26 = vld [vmem:[%s17837_s10 + $0x14a] sm:$0xff]  ;;  %v19025_v1 = vld [vmem:[%s17837_s10 + $0x162] sm:$0xff] }
 0x14c   : > { %v2358_v4 = vld [vmem:[#allocation2 + $0x28] sm:$0xff]  ;;  %v1782_v5 = vpop.f32.mrf.mxu1  ;;  %v16515_v10 = vpop.f32.mrf.mxu0  ;;  %16814 = vmatmul.mubr.msk.f32.gmra.mxu0 %vm282_vm1, %v14328_v29  ;;  %v1915_v40 = vld [vmem:[#allocation2 + $0x70] sm:$0xff] }
 0x14d   : > { %2419 = vst.msk [vmem:[#allocation2 + $0x10] sm:$0xff] %vm282_vm1, %v2387_v33  ;;  %1974 = vst.msk [vmem:[#allocation2 + $0x48] sm:$0xff] %vm282_vm1, %v1942_v46  ;;  %v2390_v49 = vadd.f32 %v16509_v9, %v2358_v4  ;;  %v1941_v50 = vadd.f32 %v1909_v59, %v1782_v5  ;;  %16816 = vmatprep.mubr.msk.f32.mxu0 %vm282_vm1, %v14329_v45  ;;  %v19004_v9 = vld [vmem:[%s17837_s10 + $0x12a] sm:$0xff] }
 0x14e   : > { %v2357_v12 = vld [vmem:[#allocation2 + $0x20] sm:$0xff]  ;;  %v16468_v14 = vpop.f32.mrf.mxu1  ;;  %16767 = vmatmul.mubr.msk.f32.gmra.mxu1 %vm282_vm1, %v18968_v37  ;;  %v2234_v60 = vpop.f32.mrf.mxu0  ;;  %v14336_v46 = vld [vmem:[%s17837_s10 + $0x14d] sm:$0xff] }
 0x14f   : > { %2422 = vst.msk [vmem:[#allocation2 + $0x28] sm:$0xff] %vm282_vm1, %v2390_v49  ;;  %1973 = vst.msk [vmem:[#allocation2 + $0x40] sm:$0xff] %vm282_vm1, %v1941_v50  ;;  %v2389_v63 = vadd.f32 %v2357_v12, %v2214_v42  ;;  %v1944_v53 = vadd.f32 %v16468_v14, %v1912_v51  ;;  %16769 = vmatprep.mubr.msk.f32.mxu1 %vm282_vm1, %v18971_v34  ;;  %v1918_v59 = vld [vmem:[#allocation2 + $0x88] sm:$0xff] }
 0x150   : > { %v2360_v15 = vld [vmem:[#allocation2 + $0x38] sm:$0xff]  ;;  %v1792_v54 = vpop.f32.mrf.mxu1  ;;  %v16518_v2 = vpop.f32.mrf.mxu0  ;;  %16817 = vmatmul.mubr.msk.f32.gmra.mxu0 %vm282_vm1, %v14330_v35  ;;  %v14337_v49 = vld [vmem:[%s17837_s10 + $0x165] sm:$0xff] }
 0x151   : > { %2421 = vst.msk [vmem:[#allocation2 + $0x20] sm:$0xff] %vm282_vm1, %v2389_v63  ;;  %1976 = vst.msk [vmem:[#allocation2 + $0x58] sm:$0xff] %vm282_vm1, %v1944_v53  ;;  %v2392_v6 = vadd.f32 %v16512_v13, %v2360_v15  ;;  %v1943_v8 = vadd.f32 %v1911_v16, %v1792_v54  ;;  %16819 = vmatprep.mubr.msk.f32.mxu0 %vm282_vm1, %v14331_v48  ;;  %v19040_v12 = vld [vmem:[%s17837_s10 + $0x16a] sm:$0xff]  ;;  %v19043_v48 = vld [vmem:[%s17837_s10 + $0x182] sm:$0xff] }
 0x152   : > { %v2359_v57 = vld [vmem:[#allocation2 + $0x30] sm:$0xff]  ;;  %v16471_v19 = vpop.f32.mrf.mxu1  ;;  %16770 = vmatmul.mubr.msk.f32.gmra.mxu1 %vm282_vm1, %v18986_v52  ;;  %v2244_v20 = vpop.f32.mrf.mxu0 }
 0x153   : > { %2424 = vst.msk [vmem:[#allocation2 + $0x38] sm:$0xff] %vm282_vm1, %v2392_v6  ;;  %1975 = vst.msk [vmem:[#allocation2 + $0x50] sm:$0xff] %vm282_vm1, %v1943_v8  ;;  %v2391_v58 = vadd.f32 %v2359_v57, %v2224_v30  ;;  %v1946_v41 = vadd.f32 %v16471_v19, %v1914_v11  ;;  %16772 = vmatprep.mubr.msk.f32.mxu1 %vm282_vm1, %v18989_v17  ;;  %v14338_v54 = vld [vmem:[%s17837_s10 + $0x16d] sm:$0xff]  ;;  %v1920_v6 = vld [vmem:[#allocation2 + $0x98] sm:$0xff] }
 0x154   : > { %v2362_v23 = vld [vmem:[#allocation2 + $0x48] sm:$0xff]  ;;  %v1802_v44 = vpop.f32.mrf.mxu1  ;;  %v16521_v43 = vpop.f32.mrf.mxu0  ;;  %16820 = vmatmul.mubr.msk.f32.gmra.mxu0 %vm282_vm1, %v14332_v55 }
 0x155   : > { %2423 = vst.msk [vmem:[#allocation2 + $0x30] sm:$0xff] %vm282_vm1, %v2391_v58  ;;  %1978 = vst.msk [vmem:[#allocation2 + $0x68] sm:$0xff] %vm282_vm1, %v1946_v41  ;;  %v2394_v61 = vadd.f32 %v16515_v10, %v2362_v23  ;;  %v1945_v42 = vadd.f32 %v1913_v24, %v1802_v44  ;;  %16822 = vmatprep.mubr.msk.f32.mxu0 %vm282_vm1, %v14333_v39  ;;  %v14339_v55 = vld [vmem:[%s17837_s10 + $0x185] sm:$0xff]  ;;  %v1919_v58 = vld [vmem:[#allocation2 + $0x90] sm:$0xff] }
 0x156   : > { %v2361_v32 = vld [vmem:[#allocation2 + $0x40] sm:$0xff]  ;;  %v16474_v62 = vpop.f32.mrf.mxu1  ;;  %16773 = vmatmul.mubr.msk.f32.gmra.mxu1 %vm282_vm1, %v19004_v9  ;;  %v2254_v36 = vpop.f32.mrf.mxu0  ;;  %v19058_v11 = vld [vmem:[%s17837_s10 + $0x18a] sm:$0xff] }
 0x157   : > { %2426 = vst.msk [vmem:[#allocation2 + $0x48] sm:$0xff] %vm282_vm1, %v2394_v61  ;;  %1977 = vst.msk [vmem:[#allocation2 + $0x60] sm:$0xff] %vm282_vm1, %v1945_v42  ;;  %v2393_v13 = vadd.f32 %v2361_v32, %v2234_v60  ;;  %v1948_v7 = vadd.f32 %v16474_v62, %v1916_v56  ;;  %16775 = vmatprep.mubr.msk.f32.mxu1 %vm282_vm1, %v19007_v47  ;;  %v1917_v60 = vld [vmem:[#allocation2 + $0x80] sm:$0xff] }
 0x158   : > { %v2364_v29 = vld [vmem:[#allocation2 + $0x58] sm:$0xff]  ;;  %v1812_v38 = vpop.f32.mrf.mxu1  ;;  %v16524_v30 = vpop.f32.mrf.mxu0  ;;  %16823 = vmatmul.mubr.msk.f32.gmra.mxu0 %vm282_vm1, %v14334_v27  ;;  %v19061_v41 = vld [vmem:[%s17837_s10 + $0x1a2] sm:$0xff] }
 0x159   : > { %2425 = vst.msk [vmem:[#allocation2 + $0x40] sm:$0xff] %vm282_vm1, %v2393_v13  ;;  %1980 = vst.msk [vmem:[#allocation2 + $0x78] sm:$0xff] %vm282_vm1, %v1948_v7  ;;  %v2396_v45 = vadd.f32 %v16518_v2, %v2364_v29  ;;  %v1947_v33 = vadd.f32 %v1915_v40, %v1812_v38  ;;  %16825 = vmatprep.mubr.msk.f32.mxu0 %vm282_vm1, %v14335_v31  ;;  %v1922_v27 = vld [vmem:[#allocation2 + $0xa8] sm:$0xff]  ;;  %v1921_v29 = vld [vmem:[#allocation2 + $0xa0] sm:$0xff] }
 0x15a   : > { %v2363_v4 = vld [vmem:[#allocation2 + $0x50] sm:$0xff]  ;;  %v16477_v5 = vpop.f32.mrf.mxu1  ;;  %16776 = vmatmul.mubr.msk.f32.gmra.mxu1 %vm282_vm1, %v19022_v26  ;;  %v2264_v10 = vpop.f32.mrf.mxu0  ;;  %v14341_v62 = vld [vmem:[%s17837_s10 + $0x1a5] sm:$0xff] }
 0x15b   : > { %2428 = vst.msk [vmem:[#allocation2 + $0x58] sm:$0xff] %vm282_vm1, %v2396_v45  ;;  %1979 = vst.msk [vmem:[#allocation2 + $0x70] sm:$0xff] %vm282_vm1, %v1947_v33  ;;  %v2395_v50 = vadd.f32 %v2363_v4, %v2244_v20  ;;  %v1950_v35 = vadd.f32 %v16477_v5, %v1918_v59  ;;  %16778 = vmatprep.mubr.msk.f32.mxu1 %vm282_vm1, %v19025_v1  ;;  %v19076_v31 = vld [vmem:[%s17837_s10 + $0x1aa] sm:$0xff]  ;;  %v19079_v38 = vld [vmem:[%s17837_s10 + $0x1c2] sm:$0xff] }
 0x15c   : > { %v2366_v14 = vld [vmem:[#allocation2 + $0x68] sm:$0xff]  ;;  %v1822_v51 = vpop.f32.mrf.mxu1  ;;  %v16527_v63 = vpop.f32.mrf.mxu0  ;;  %16826 = vmatmul.mubr.msk.f32.gmra.mxu0 %vm282_vm1, %v14336_v46  ;;  %v1924_v5 = vld [vmem:[#allocation2 + $0xb8] sm:$0xff] }
 0x15d   : > { %2427 = vst.msk [vmem:[#allocation2 + $0x50] sm:$0xff] %vm282_vm1, %v2395_v50  ;;  %1982 = vst.msk [vmem:[#allocation2 + $0x88] sm:$0xff] %vm282_vm1, %v1950_v35  ;;  %v2398_v53 = vadd.f32 %v16521_v43, %v2366_v14  ;;  %v1949_v15 = vadd.f32 %v1917_v60, %v1822_v51  ;;  %16828 = vmatprep.mubr.msk.f32.mxu0 %vm282_vm1, %v14337_v49  ;;  %v14340_v43 = vld [vmem:[%s17837_s10 + $0x18d] sm:$0xff] }
 0x15e   : > { %v2365_v16 = vld [vmem:[#allocation2 + $0x60] sm:$0xff]  ;;  %v16480_v2 = vpop.f32.mrf.mxu1  ;;  %16779 = vmatmul.mubr.msk.f32.gmra.mxu1 %vm282_vm1, %v19040_v12  ;;  %v2274_v8 = vpop.f32.mrf.mxu0  ;;  %v14342_v33 = vld [vmem:[%s17837_s10 + $0x1ad] sm:$0xff] }
 0x15f   : > { %2430 = vst.msk [vmem:[#allocation2 + $0x68] sm:$0xff] %vm282_vm1, %v2398_v53  ;;  %1981 = vst.msk [vmem:[#allocation2 + $0x80] sm:$0xff] %vm282_vm1, %v1949_v15  ;;  %v2397_v57 = vadd.f32 %v2365_v16, %v2254_v36  ;;  %v1952_v19 = vadd.f32 %v16480_v2, %v1920_v6  ;;  %16781 = vmatprep.mubr.msk.f32.mxu1 %vm282_vm1, %v19043_v48  ;;  %v19094_v35 = vld [vmem:[%s17837_s10 + $0x1ca] sm:$0xff] }
 0x160   : > { %v2368_v20 = vld [vmem:[#allocation2 + $0x78] sm:$0xff]  ;;  %v1832_v39 = vpop.f32.mrf.mxu1  ;;  %v16530_v23 = vpop.f32.mrf.mxu0  ;;  %16829 = vmatmul.mubr.msk.f32.gmra.mxu0 %vm282_vm1, %v14338_v54  ;;  %v1923_v60 = vld [vmem:[#allocation2 + $0xb0] sm:$0xff] }
 0x161   : > { %2429 = vst.msk [vmem:[#allocation2 + $0x60] sm:$0xff] %vm282_vm1, %v2397_v57  ;;  %1984 = vst.msk [vmem:[#allocation2 + $0x98] sm:$0xff] %vm282_vm1, %v1952_v19  ;;  %v2400_v44 = vadd.f32 %v16524_v30, %v2368_v20  ;;  %v1951_v24 = vadd.f32 %v1919_v58, %v1832_v39  ;;  %16831 = vmatprep.mubr.msk.f32.mxu0 %vm282_vm1, %v14339_v55  ;;  %v14344_v16 = vld [vmem:[%s17837_s10 + $0x1cd] sm:$0xff]  ;;  %v14345_v57 = vld [vmem:[%s17837_s10 + $0x1e5] sm:$0xff] }
 0x162   : > { %v2367_v61 = vld [vmem:[#allocation2 + $0x70] sm:$0xff]  ;;  %v16483_v42 = vpop.f32.mrf.mxu1  ;;  %16782 = vmatmul.mubr.msk.f32.gmra.mxu1 %vm282_vm1, %v19058_v11  ;;  %v2284_v32 = vpop.f32.mrf.mxu0 }
 0x163   : > { %2432 = vst.msk [vmem:[#allocation2 + $0x78] sm:$0xff] %vm282_vm1, %v2400_v44  ;;  %1983 = vst.msk [vmem:[#allocation2 + $0x90] sm:$0xff] %vm282_vm1, %v1951_v24  ;;  %v2399_v56 = vadd.f32 %v2367_v61, %v2264_v10  ;;  %v1954_v36 = vadd.f32 %v16483_v42, %v1922_v27  ;;  %16784 = vmatprep.mubr.msk.f32.mxu1 %vm282_vm1, %v19061_v41  ;;  %v14343_v10 = vld [vmem:[%s17837_s10 + $0x1c5] sm:$0xff]  ;;  %v14346_v27 = vld [vmem:[%s17837_s10 + $0x1ed] sm:$0xff] }
 0x164   : > { %v2370_v13 = vld [vmem:[#allocation2 + $0x88] sm:$0xff]  ;;  %v1842_v7 = vpop.f32.mrf.mxu1  ;;  %v16533_v40 = vpop.f32.mrf.mxu0  ;;  %16832 = vmatmul.mubr.msk.f32.gmra.mxu0 %vm282_vm1, %v14340_v43  ;;  %v1925_v44 = vld [vmem:[#allocation2 + $0xc0] sm:$0xff] }
 0x165   : > { %2431 = vst.msk [vmem:[#allocation2 + $0x70] sm:$0xff] %vm282_vm1, %v2399_v56  ;;  %1986 = vst.msk [vmem:[#allocation2 + $0xa8] sm:$0xff] %vm282_vm1, %v1954_v36  ;;  %v2402_v30 = vadd.f32 %v16527_v63, %v2370_v13  ;;  %v1953_v45 = vadd.f32 %v1921_v29, %v1842_v7  ;;  %16834 = vmatprep.mubr.msk.f32.mxu0 %vm282_vm1, %v14341_v62  ;;  %v19097_v63 = vld [vmem:[%s17837_s10 + $0x1e2] sm:$0xff]  ;;  %v19112_v39 = vld [vmem:[%s17837_s10 + $0x1ea] sm:$0xff] }
 0x166   : > { %v2369_v46 = vld [vmem:[#allocation2 + $0x80] sm:$0xff]  ;;  %v16486_v4 = vpop.f32.mrf.mxu1  ;;  %16785 = vmatmul.mubr.msk.f32.gmra.mxu1 %vm282_vm1, %v19076_v31  ;;  %v2294_v59 = vpop.f32.mrf.mxu0  ;;  %v1928_v56 = vld [vmem:[#allocation2 + $0xd8] sm:$0xff] }
 0x167   : > { %2434 = vst.msk [vmem:[#allocation2 + $0x88] sm:$0xff] %vm282_vm1, %v2402_v30  ;;  %1985 = vst.msk [vmem:[#allocation2 + $0xa0] sm:$0xff] %vm282_vm1, %v1953_v45  ;;  %v2401_v49 = vadd.f32 %v2369_v46, %v2274_v8  ;;  %v1956_v50 = vadd.f32 %v16486_v4, %v1924_v5  ;;  %16787 = vmatprep.mubr.msk.f32.mxu1 %vm282_vm1, %v19079_v38  ;;  %v1926_v8 = vld [vmem:[#allocation2 + $0xc8] sm:$0xff] }
 0x168   : > { %v2372_v14 = vld [vmem:[#allocation2 + $0x98] sm:$0xff]  ;;  %v1852_v51 = vpop.f32.mrf.mxu1  ;;  %v16536_v53 = vpop.f32.mrf.mxu0  ;;  %16835 = vmatmul.mubr.msk.f32.gmra.mxu0 %vm282_vm1, %v14342_v33  ;;  %v19115_v24 = vld [vmem:[%s17837_s10 + $0x202] sm:$0xff]  ;;  %v1927_v33 = vld [vmem:[#allocation2 + $0xd0] sm:$0xff] }
 0x169   : > { %2433 = vst.msk [vmem:[#allocation2 + $0x80] sm:$0xff] %vm282_vm1, %v2401_v49  ;;  %1988 = vst.msk [vmem:[#allocation2 + $0xb8] sm:$0xff] %vm282_vm1, %v1956_v50  ;;  %v2404_v15 = vadd.f32 %v16530_v23, %v2372_v14  ;;  %v1955_v54 = vadd.f32 %v1923_v60, %v1852_v51  ;;  %16837 = vmatprep.mubr.msk.f32.mxu0 %vm282_vm1, %v14343_v10  ;;  %v14347_v13 = vld [vmem:[%s17837_s10 + $0x205] sm:$0xff]  ;;  %v14348_v10 = vld [vmem:[%s17837_s10 + $0x20d] sm:$0xff] }
 0x16a   : > { %v2371_v2 = vld [vmem:[#allocation2 + $0x90] sm:$0xff]  ;;  %v16489_v6 = vpop.f32.mrf.mxu1  ;;  %16788 = vmatmul.mubr.msk.f32.gmra.mxu1 %vm282_vm1, %v19094_v35  ;;  %v2304_v55 = vpop.f32.mrf.mxu0  ;;  %v19133_v46 = vld [vmem:[%s17837_s10 + $0x222] sm:$0xff] }
 0x16b   : > { %2436 = vst.msk [vmem:[#allocation2 + $0x98] sm:$0xff] %vm282_vm1, %v2404_v15  ;;  %1987 = vst.msk [vmem:[#allocation2 + $0xb0] sm:$0xff] %vm282_vm1, %v1955_v54  ;;  %v2403_v19 = vadd.f32 %v2371_v2, %v2284_v32  ;;  %v1958_v20 = vadd.f32 %v16489_v6, %v1926_v8  ;;  %16790 = vmatprep.mubr.msk.f32.mxu1 %vm282_vm1, %v19097_v63  ;;  %v1930_v14 = vld [vmem:[#allocation2 + $0xe8] sm:$0xff]  ;;  %v1929_v6 = vld [vmem:[#allocation2 + $0xe0] sm:$0xff] }
 0x16c   : > { %v2374_v58 = vld [vmem:[#allocation2 + $0xa8] sm:$0xff]  ;;  %v1862_v23 = vpop.f32.mrf.mxu1  ;;  %v16539_v43 = vpop.f32.mrf.mxu0  ;;  %16838 = vmatmul.mubr.msk.f32.gmra.mxu0 %vm282_vm1, %v14344_v16 }
 0x16d   : > { %2435 = vst.msk [vmem:[#allocation2 + $0x90] sm:$0xff] %vm282_vm1, %v2403_v19  ;;  %1990 = vst.msk [vmem:[#allocation2 + $0xc8] sm:$0xff] %vm282_vm1, %v1958_v20  ;;  %v2406_v61 = vadd.f32 %v16533_v40, %v2374_v58  ;;  %v1957_v42 = vadd.f32 %v1925_v44, %v1862_v23  ;;  %16840 = vmatprep.mubr.msk.f32.mxu0 %vm282_vm1, %v14345_v57  ;;  %v19130_v40 = vld [vmem:[%s17837_s10 + $0x20a] sm:$0xff]  ;;  %v1932_v44 = vld [vmem:[#allocation2 + $0xf8] sm:$0xff] }
 0x16e   : > { %v2373_v32 = vld [vmem:[#allocation2 + $0xa0] sm:$0xff]  ;;  %v16492_v62 = vpop.f32.mrf.mxu1  ;;  %16791 = vmatmul.mubr.msk.f32.gmra.mxu1 %vm282_vm1, %v19112_v39  ;;  %v2314_v36 = vpop.f32.mrf.mxu0  ;;  %v19148_v54 = vld [vmem:[%s17837_s10 + $0x22a] sm:$0xff] }
 0x16f   : > { %2438 = vst.msk [vmem:[#allocation2 + $0xa8] sm:$0xff] %vm282_vm1, %v2406_v61  ;;  %1989 = vst.msk [vmem:[#allocation2 + $0xc0] sm:$0xff] %vm282_vm1, %v1957_v42  ;;  %v2405_v7 = vadd.f32 %v2373_v32, %v2294_v59  ;;  %v1960_v29 = vadd.f32 %v16492_v62, %v1928_v56  ;;  %16793 = vmatprep.mubr.msk.f32.mxu1 %vm282_vm1, %v19115_v24  ;;  %v14349_v60 = vld [vmem:[%s17837_s10 + $0x225] sm:$0xff]  ;;  %v14350_v20 = vld [vmem:[%s17837_s10 + $0x22d] sm:$0xff] }
 0x170   : > { %v2376_v30 = vld [vmem:[#allocation2 + $0xb8] sm:$0xff]  ;;  %v1872_v45 = vpop.f32.mrf.mxu1  ;;  %v16542_v4 = vpop.f32.mrf.mxu0  ;;  %16841 = vmatmul.mubr.msk.f32.gmra.mxu0 %vm282_vm1, %v14346_v27  ;;  %v14384_v8 = vld [vmem:[%s17837_s10 + $0x48] sm:$0xff]  ;;  %v1931_v56 = vld [vmem:[#allocation2 + $0xf0] sm:$0xff] }
 0x171   : > { %2437 = vst.msk [vmem:[#allocation2 + $0xa0] sm:$0xff] %vm282_vm1, %v2405_v7  ;;  %1992 = vst.msk [vmem:[#allocation2 + $0xd8] sm:$0xff] %vm282_vm1, %v1960_v29  ;;  %v2408_v5 = vadd.f32 %v16536_v53, %v2376_v30  ;;  %v1959_v59 = vadd.f32 %v1927_v33, %v1872_v45  ;;  %16843 = vmatprep.mubr.msk.f32.mxu0 %vm282_vm1, %v14347_v13  ;;  %v14386_v13 = vld [vmem:[%s17837_s10 + $0x68] sm:$0xff] }
 0x172   : > { %v2375_v49 = vld [vmem:[#allocation2 + $0xb0] sm:$0xff]  ;;  %v16495_v50 = vpop.f32.mrf.mxu1  ;;  %16794 = vmatmul.mubr.msk.f32.gmra.mxu1 %vm282_vm1, %v19130_v40  ;;  %v2324_v51 = vpop.f32.mrf.mxu0 }
 0x173   : > { %2440 = vst.msk [vmem:[#allocation2 + $0xb8] sm:$0xff] %vm282_vm1, %v2408_v5  ;;  %1991 = vst.msk [vmem:[#allocation2 + $0xd0] sm:$0xff] %vm282_vm1, %v1959_v59  ;;  %v2407_v15 = vadd.f32 %v2375_v49, %v2304_v55  ;;  %v1962_v53 = vadd.f32 %v16495_v50, %v1930_v14  ;;  %16796 = vmatprep.mubr.msk.f32.mxu1 %vm282_vm1, %v19133_v46  ;;  %v2806_v5 = vld [vmem:[#allocation2 + $0x8] sm:$0xff]  ;;  %v19183_v49 = vld [vmem:[%s22301_s1 + $0x40] sm:$0xf] }
 0x174   : > { %v2378_v16 = vld [vmem:[#allocation2 + $0xc8] sm:$0xff]  ;;  %v1882_v2 = vpop.f32.mrf.mxu1  ;;  %v16545_v57 = vpop.f32.mrf.mxu0  ;;  %16844 = vmatmul.mubr.msk.f32.gmra.mxu0 %vm282_vm1, %v14348_v10 }
 0x175   : > { %2439 = vst.msk [vmem:[#allocation2 + $0xb0] sm:$0xff] %vm282_vm1, %v2407_v15  ;;  %1994 = vst.msk [vmem:[#allocation2 + $0xe8] sm:$0xff] %vm282_vm1, %v1962_v53  ;;  %v2410_v19 = vadd.f32 %v16539_v43, %v2378_v16  ;;  %v1961_v55 = vadd.f32 %v1929_v6, %v1882_v2  ;;  %16846 = vmatprep.mubr.msk.f32.mxu0 %vm282_vm1, %v14349_v60  ;;  %v14385_v43 = vld [vmem:[%s17837_s10 + $0x50] sm:$0xff]  ;;  %v2805_v60 = vld [vmem:[#allocation2] sm:$0xff] }
 0x176   : > { %v2377_v58 = vld [vmem:[#allocation2 + $0xc0] sm:$0xff]  ;;  %v16498_v23 = vpop.f32.mrf.mxu1  ;;  %16797 = vmatmul.mubr.msk.f32.gmra.mxu1 %vm282_vm1, %v19148_v54  ;;  %v2334_v61 = vpop.f32.mrf.mxu0  ;;  %v14388_v15 = vld [vmem:[%s17837_s10 + $0x88] sm:$0xff] }
 0x177   : > { %2442 = vst.msk [vmem:[#allocation2 + $0xc8] sm:$0xff] %vm282_vm1, %v2410_v19  ;;  %1993 = vst.msk [vmem:[#allocation2 + $0xe0] sm:$0xff] %vm282_vm1, %v1961_v55  ;;  %v2409_v42 = vadd.f32 %v2377_v58, %v2314_v36  ;;  %v1964_v27 = vadd.f32 %v16498_v23, %v1932_v44  ;;  %16851 = vmatprep.mubr.msk.f32.mxu1 %vm282_vm1, %v14384_v8  ;;  %v19171_v36 = vld [vmem:[%s22301_s1 + $0x3c] sm:$0xf]  ;;  %v2807_v55 = vld [vmem:[#allocation2 + $0x10] sm:$0xff] }
 0x178   : > { %v2380_v32 = vld [vmem:[#allocation2 + $0xd8] sm:$0xff]  ;;  %v1892_v62 = vpop.f32.mrf.mxu1  ;;  %v16548_v7 = vpop.f32.mrf.mxu0  ;;  %16847 = vmatmul.mubr.msk.f32.gmra.mxu0 %vm282_vm1, %v14350_v20  ;;  %v19204_v20 = vld [vmem:[%s17837_s10 + $0xa8] sm:$0xff] }
 0x179   : > { %2441 = vst.msk [vmem:[#allocation2 + $0xc0] sm:$0xff] %vm282_vm1, %v2409_v42  ;;  %1996 = vst.msk [vmem:[#allocation2 + $0xf8] sm:$0xff] %vm282_vm1, %v1964_v27  ;;  %v2412_v29 = vadd.f32 %v16542_v4, %v2380_v32  ;;  %v1963_v30 = vadd.f32 %v1931_v56, %v1892_v62  ;;  %16901 = vmatprep.mubr.msk.f32.mxu0 %vm282_vm1, %v18918_v0  ;;  %v14387_v0 = vld [vmem:[%s17837_s10 + $0x70] sm:$0xff]  ;;  %v2810_v27 = vld [vmem:[#allocation2 + $0x28] sm:$0xff] }
 0x17a   : > { %v2379_v45 = vld [vmem:[#allocation2 + $0xd0] sm:$0xff]  ;;  %v16553_v33 = vpop.f32.mrf.mxu1  ;;  %16852 = vmatmul.mubr.msk.f32.vlgmr.msra.gmra.mxu1 %vm282_vm1, %v14385_v43  ;;  %v2344_v59 = vpop.f32.mrf.mxu0 }
 0x17b   : > { %2444 = vst.msk [vmem:[#allocation2 + $0xd8] sm:$0xff] %vm282_vm1, %v2412_v29  ;;  %1995 = vst.msk [vmem:[#allocation2 + $0xf0] sm:$0xff] %vm282_vm1, %v1963_v30  ;;  %v2411_v4 = vadd.f32 %v2379_v45, %v2324_v51  ;;  %v2838_v10 = vadd.f32 %v16553_v33, %v2806_v5  ;;  %16950 = vmatpush3.msk.msra.mxu1 %vm379_vm0, %v18884_v25  ;;  %16854 = vmatprep.mubr.msk.f32.mxu1 %vm282_vm1, %v14386_v13  ;;  %v19218_v62 = vld [vmem:[%s17837_s10 + $0xb0] sm:$0xff] }
 0x17c   : > { %v2382_v50 = vld [vmem:[#allocation2 + $0xe8] sm:$0xff]  ;;  %v2646_v14 = vpop.f32.mrf.mxu1  ;;  %v16603_v53 = vpop.f32.mrf.mxu0  ;;  %16902 = vmatmul.mubr.msk.f32.vlgmr.msra.gmra.mxu0 %vm282_vm1, %v18932_v21  ;;  %17049 = vmatprep.subr.msk.mxu1 %vm379_vm0, %v19171_v36  ;;  %v2808_v21 = vld [vmem:[#allocation2 + $0x18] sm:$0xff] }
 0x17d   : > { %2443 = vst.msk [vmem:[#allocation2 + $0xd0] sm:$0xff] %vm282_vm1, %v2411_v4  ;;  %v2414_v25 = vadd.f32 %v16545_v57, %v2382_v50  ;;  %2870 = vst.msk [vmem:[#allocation2 + $0x8] sm:$0xff] %vm282_vm1, %v2838_v10  ;;  %v2837_v51 = vadd.f32 %v2805_v60, %v2646_v14  ;;  %17000 = vmatpush3.msk.msra.mxu0 %vm379_vm0, %v18897_v3  ;;  %16904 = vmatprep.mubr.msk.f32.mxu0 %vm282_vm1, %v18935_v18  ;;  %v14389_v3 = vld [vmem:[%s17837_s10 + $0x90] sm:$0xff]  ;;  %v19239_v60 = vld [vmem:[%s17837_s10 + $0xe8] sm:$0xff] }
 0x17e   : > { %v2381_v16 = vld [vmem:[#allocation2 + $0xe0] sm:$0xff]  ;;  %v16556_v2 = vpop.f32.mrf.mxu1  ;;  %16855 = vmatmul.mubr.msk.f32.gmra.mxu1 %vm282_vm1, %v14387_v0  ;;  %v3099_v6 = vpop.f32.mrf.mxu0  ;;  %17099 = vmatprep.subr.msk.mxu0 %vm379_vm0, %v19183_v49  ;;  %v19236_v0 = vld [vmem:[%s17837_s10 + $0xd0] sm:$0xff] }
 0x17f   : > { %2446 = vst.msk [vmem:[#allocation2 + $0xe8] sm:$0xff] %vm282_vm1, %v2414_v25  ;;  %v2413_v8 = vadd.f32 %v2381_v16, %v2334_v61  ;;  %2869 = vst.msk [vmem:[#allocation2] sm:$0xff] %vm282_vm1, %v2837_v51  ;;  %v2840_v57 = vadd.f32 %v16556_v2, %v2808_v21  ;;  %16857 = vmatprep.mubr.msk.f32.mxu1 %vm282_vm1, %v14388_v15  ;;  %v2811_v14 = vld [vmem:[#allocation2 + $0x30] sm:$0xff]  ;;  %v2814_v2 = vld [vmem:[#allocation2 + $0x48] sm:$0xff] }
 0x180   : > { %v2384_v18 = vld [vmem:[#allocation2 + $0xf8] sm:$0xff]  ;;  %v2656_v19 = vpop.f32.mrf.mxu1  ;;  %v16606_v58 = vpop.f32.mrf.mxu0  ;;  %16905 = vmatmul.mubr.msk.f32.gmra.mxu0 %vm282_vm1, %v18950_v28 }
 0x181   : > { %2445 = vst.msk [vmem:[#allocation2 + $0xe0] sm:$0xff] %vm282_vm1, %v2413_v8  ;;  %v2416_v23 = vadd.f32 %v16548_v7, %v2384_v18  ;;  %2872 = vst.msk [vmem:[#allocation2 + $0x18] sm:$0xff] %vm282_vm1, %v2840_v57  ;;  %v2839_v44 = vadd.f32 %v2807_v55, %v2656_v19  ;;  %16907 = vmatprep.mubr.msk.f32.mxu0 %vm282_vm1, %v18953_v22  ;;  %v2809_v22 = vld [vmem:[#allocation2 + $0x20] sm:$0xff]  ;;  %v19221_v7 = vld [vmem:[%s17837_s10 + $0xc8] sm:$0xff] }
 0x182   : > { %v2383_v61 = vld [vmem:[#allocation2 + $0xf0] sm:$0xff]  ;;  %v16559_v42 = vpop.f32.mrf.mxu1  ;;  %16858 = vmatmul.mubr.msk.f32.gmra.mxu1 %vm282_vm1, %v14389_v3  ;;  %v3109_v43 = vpop.f32.mrf.mxu0  ;;  %v2813_v3 = vld [vmem:[#allocation2 + $0x40] sm:$0xff]  ;;  %v19257_v18 = vld [vmem:[%s17837_s10 + $0x108] sm:$0xff] }
 0x183   : > { %2448 = vst.msk [vmem:[#allocation2 + $0xf8] sm:$0xff] %vm282_vm1, %v2416_v23  ;;  %v2415_v28 = vadd.f32 %v2383_v61, %v2344_v59  ;;  %2871 = vst.msk [vmem:[#allocation2 + $0x10] sm:$0xff] %vm282_vm1, %v2839_v44  ;;  %v2842_v32 = vadd.f32 %v16559_v42, %v2810_v27  ;;  %16860 = vmatprep.mubr.msk.f32.mxu1 %vm282_vm1, %v19204_v20  ;;  %v2812_v59 = vld [vmem:[#allocation2 + $0x38] sm:$0xff]  ;;  %v19254_v8 = vld [vmem:[%s17837_s10 + $0xf0] sm:$0xff] }
 0x184   : > { %v3259_v56 = vld [vmem:[#allocation2 + $0x8] sm:$0xff]  ;;  %v2666_v13 = vpop.f32.mrf.mxu1  ;;  %v16609_v29 = vpop.f32.mrf.mxu0  ;;  %16908 = vmatmul.mubr.msk.f32.gmra.mxu0 %vm282_vm1, %v18968_v37  ;;  %v2816_v61 = vld [vmem:[#allocation2 + $0x58] sm:$0xff] }
 0x185   : > { %2447 = vst.msk [vmem:[#allocation2 + $0xf0] sm:$0xff] %vm282_vm1, %v2415_v28  ;;  %2874 = vst.msk [vmem:[#allocation2 + $0x28] sm:$0xff] %vm282_vm1, %v2842_v32  ;;  %v3291_v30 = vadd.f32 %v16603_v53, %v3259_v56  ;;  %v2841_v45 = vadd.f32 %v2809_v22, %v2666_v13  ;;  %16910 = vmatprep.mubr.msk.f32.mxu0 %vm282_vm1, %v18971_v34  ;;  %v2815_v32 = vld [vmem:[#allocation2 + $0x50] sm:$0xff]  ;;  %v19275_v56 = vld [vmem:[%s17837_s10 + $0x128] sm:$0xff] }
 0x186   : > { %v3258_v33 = vld [vmem:[#allocation2] sm:$0xff]  ;;  %v16562_v5 = vpop.f32.mrf.mxu1  ;;  %16861 = vmatmul.mubr.msk.f32.gmra.mxu1 %vm282_vm1, %v19218_v62  ;;  %v3119_v4 = vpop.f32.mrf.mxu0 }
 0x187   : > { %3323 = vst.msk [vmem:[#allocation2 + $0x8] sm:$0xff] %vm282_vm1, %v3291_v30  ;;  %2873 = vst.msk [vmem:[#allocation2 + $0x20] sm:$0xff] %vm282_vm1, %v2841_v45  ;;  %v3290_v37 = vadd.f32 %v3258_v33, %v3099_v6  ;;  %v2844_v10 = vadd.f32 %v16562_v5, %v2812_v59  ;;  %16863 = vmatprep.mubr.msk.f32.mxu1 %vm282_vm1, %v19221_v7  ;;  %v2818_v33 = vld [vmem:[#allocation2 + $0x68] sm:$0xff] }
 0x188   : > { %v3261_v50 = vld [vmem:[#allocation2 + $0x18] sm:$0xff]  ;;  %v2676_v34 = vpop.f32.mrf.mxu1  ;;  %v16612_v15 = vpop.f32.mrf.mxu0  ;;  %16911 = vmatmul.mubr.msk.f32.gmra.mxu0 %vm282_vm1, %v18986_v52 }
 0x189   : > { %3322 = vst.msk [vmem:[#allocation2] sm:$0xff] %vm282_vm1, %v3290_v37  ;;  %2876 = vst.msk [vmem:[#allocation2 + $0x38] sm:$0xff] %vm282_vm1, %v2844_v10  ;;  %v3293_v53 = vadd.f32 %v16606_v58, %v3261_v50  ;;  %v2843_v25 = vadd.f32 %v2811_v14, %v2676_v34  ;;  %16913 = vmatprep.mubr.msk.f32.mxu0 %vm282_vm1, %v18989_v17  ;;  %v2817_v10 = vld [vmem:[#allocation2 + $0x60] sm:$0xff]  ;;  %v19293_v50 = vld [vmem:[%s17837_s10 + $0x148] sm:$0xff] }
 0x18a   : > { %v3260_v51 = vld [vmem:[#allocation2 + $0x10] sm:$0xff]  ;;  %v16565_v16 = vpop.f32.mrf.mxu1  ;;  %16864 = vmatmul.mubr.msk.f32.gmra.mxu1 %vm282_vm1, %v19236_v0  ;;  %v3129_v21 = vpop.f32.mrf.mxu0 }
 0x18b   : > { %3325 = vst.msk [vmem:[#allocation2 + $0x18] sm:$0xff] %vm282_vm1, %v3293_v53  ;;  %2875 = vst.msk [vmem:[#allocation2 + $0x30] sm:$0xff] %vm282_vm1, %v2843_v25  ;;  %v3292_v52 = vadd.f32 %v3260_v51, %v3109_v43  ;;  %v2846_v6 = vadd.f32 %v16565_v16, %v2814_v2  ;;  %16866 = vmatprep.mubr.msk.f32.mxu1 %vm282_vm1, %v19239_v60  ;;  %v19272_v43 = vld [vmem:[%s17837_s10 + $0x110] sm:$0xff]  ;;  %v2820_v51 = vld [vmem:[#allocation2 + $0x78] sm:$0xff] }
 0x18c   : > { %v3263_v57 = vld [vmem:[#allocation2 + $0x28] sm:$0xff]  ;;  %v2686_v17 = vpop.f32.mrf.mxu1  ;;  %v16615_v19 = vpop.f32.mrf.mxu0  ;;  %16914 = vmatmul.mubr.msk.f32.gmra.mxu0 %vm282_vm1, %v19004_v9 }
 0x18d   : > { %3324 = vst.msk [vmem:[#allocation2 + $0x10] sm:$0xff] %vm282_vm1, %v3292_v52  ;;  %2878 = vst.msk [vmem:[#allocation2 + $0x48] sm:$0xff] %vm282_vm1, %v2846_v6  ;;  %v3295_v55 = vadd.f32 %v16609_v29, %v3263_v57  ;;  %v2845_v58 = vadd.f32 %v2813_v3, %v2686_v17  ;;  %16916 = vmatprep.mubr.msk.f32.mxu0 %vm282_vm1, %v19007_v47  ;;  %v2819_v6 = vld [vmem:[#allocation2 + $0x70] sm:$0xff]  ;;  %v19311_v57 = vld [vmem:[%s17837_s10 + $0x168] sm:$0xff] }
 0x18e   : > { %v3262_v23 = vld [vmem:[#allocation2 + $0x20] sm:$0xff]  ;;  %v16568_v44 = vpop.f32.mrf.mxu1  ;;  %16867 = vmatmul.mubr.msk.f32.gmra.mxu1 %vm282_vm1, %v19254_v8  ;;  %v3139_v42 = vpop.f32.mrf.mxu0 }
 0x18f   : > { %3327 = vst.msk [vmem:[#allocation2 + $0x28] sm:$0xff] %vm282_vm1, %v3295_v55  ;;  %2877 = vst.msk [vmem:[#allocation2 + $0x40] sm:$0xff] %vm282_vm1, %v2845_v58  ;;  %v3294_v9 = vadd.f32 %v3262_v23, %v3119_v4  ;;  %v2848_v27 = vadd.f32 %v16568_v44, %v2816_v61  ;;  %16869 = vmatprep.mubr.msk.f32.mxu1 %vm282_vm1, %v19257_v18  ;;  %v19290_v4 = vld [vmem:[%s17837_s10 + $0x130] sm:$0xff]  ;;  %v2822_v23 = vld [vmem:[#allocation2 + $0x88] sm:$0xff] }
 0x190   : > { %v3265_v28 = vld [vmem:[#allocation2 + $0x38] sm:$0xff]  ;;  %v2696_v47 = vpop.f32.mrf.mxu1  ;;  %v16618_v13 = vpop.f32.mrf.mxu0  ;;  %16917 = vmatmul.mubr.msk.f32.gmra.mxu0 %vm282_vm1, %v19022_v26 }
 0x191   : > { %3326 = vst.msk [vmem:[#allocation2 + $0x20] sm:$0xff] %vm282_vm1, %v3294_v9  ;;  %2880 = vst.msk [vmem:[#allocation2 + $0x58] sm:$0xff] %vm282_vm1, %v2848_v27  ;;  %v3297_v22 = vadd.f32 %v16612_v15, %v3265_v28  ;;  %v2847_v29 = vadd.f32 %v2815_v32, %v2696_v47  ;;  %16919 = vmatprep.mubr.msk.f32.mxu0 %vm282_vm1, %v19025_v1  ;;  %v2821_v27 = vld [vmem:[#allocation2 + $0x80] sm:$0xff]  ;;  %v19329_v28 = vld [vmem:[%s17837_s10 + $0x188] sm:$0xff] }
 0x192   : > { %v3264_v30 = vld [vmem:[#allocation2 + $0x30] sm:$0xff]  ;;  %v16571_v45 = vpop.f32.mrf.mxu1  ;;  %16870 = vmatmul.mubr.msk.f32.gmra.mxu1 %vm282_vm1, %v19272_v43  ;;  %v3149_v5 = vpop.f32.mrf.mxu0 }
 0x193   : > { %3329 = vst.msk [vmem:[#allocation2 + $0x38] sm:$0xff] %vm282_vm1, %v3297_v22  ;;  %2879 = vst.msk [vmem:[#allocation2 + $0x50] sm:$0xff] %vm282_vm1, %v2847_v29  ;;  %v3296_v26 = vadd.f32 %v3264_v30, %v3129_v21  ;;  %v2850_v59 = vadd.f32 %v16571_v45, %v2818_v33  ;;  %16872 = vmatprep.mubr.msk.f32.mxu1 %vm282_vm1, %v19275_v56  ;;  %v19308_v21 = vld [vmem:[%s17837_s10 + $0x150] sm:$0xff]  ;;  %v2824_v30 = vld [vmem:[#allocation2 + $0x98] sm:$0xff] }
 0x194   : > { %v3267_v37 = vld [vmem:[#allocation2 + $0x48] sm:$0xff]  ;;  %v2706_v1 = vpop.f32.mrf.mxu1  ;;  %v16621_v34 = vpop.f32.mrf.mxu0  ;;  %16920 = vmatmul.mubr.msk.f32.gmra.mxu0 %vm282_vm1, %v19040_v12 }
 0x195   : > { %3328 = vst.msk [vmem:[#allocation2 + $0x30] sm:$0xff] %vm282_vm1, %v3296_v26  ;;  %2882 = vst.msk [vmem:[#allocation2 + $0x68] sm:$0xff] %vm282_vm1, %v2850_v59  ;;  %v3299_v14 = vadd.f32 %v16615_v19, %v3267_v37  ;;  %v2849_v15 = vadd.f32 %v2817_v10, %v2706_v1  ;;  %16922 = vmatprep.mubr.msk.f32.mxu0 %vm282_vm1, %v19043_v48  ;;  %v2823_v59 = vld [vmem:[#allocation2 + $0x90] sm:$0xff]  ;;  %v19347_v37 = vld [vmem:[%s17837_s10 + $0x1a8] sm:$0xff] }
 0x196   : > { %v3266_v53 = vld [vmem:[#allocation2 + $0x40] sm:$0xff]  ;;  %v16574_v25 = vpop.f32.mrf.mxu1  ;;  %16873 = vmatmul.mubr.msk.f32.gmra.mxu1 %vm282_vm1, %v19290_v4  ;;  %v3159_v16 = vpop.f32.mrf.mxu0 }
 0x197   : > { %3331 = vst.msk [vmem:[#allocation2 + $0x48] sm:$0xff] %vm282_vm1, %v3299_v14  ;;  %2881 = vst.msk [vmem:[#allocation2 + $0x60] sm:$0xff] %vm282_vm1, %v2849_v15  ;;  %v3298_v12 = vadd.f32 %v3266_v53, %v3139_v42  ;;  %v2852_v2 = vadd.f32 %v16574_v25, %v2820_v51  ;;  %16875 = vmatprep.mubr.msk.f32.mxu1 %vm282_vm1, %v19293_v50  ;;  %v19326_v42 = vld [vmem:[%s17837_s10 + $0x170] sm:$0xff]  ;;  %v2826_v53 = vld [vmem:[#allocation2 + $0xa8] sm:$0xff] }
 0x198   : > { %v3269_v52 = vld [vmem:[#allocation2 + $0x58] sm:$0xff]  ;;  %v2716_v48 = vpop.f32.mrf.mxu1  ;;  %v16624_v17 = vpop.f32.mrf.mxu0  ;;  %16923 = vmatmul.mubr.msk.f32.gmra.mxu0 %vm282_vm1, %v19058_v11 }
 0x199   : > { %3330 = vst.msk [vmem:[#allocation2 + $0x40] sm:$0xff] %vm282_vm1, %v3298_v12  ;;  %2884 = vst.msk [vmem:[#allocation2 + $0x78] sm:$0xff] %vm282_vm1, %v2852_v2  ;;  %v3301_v3 = vadd.f32 %v16618_v13, %v3269_v52  ;;  %v2851_v19 = vadd.f32 %v2819_v6, %v2716_v48  ;;  %16925 = vmatprep.mubr.msk.f32.mxu0 %vm282_vm1, %v19061_v41  ;;  %v2825_v2 = vld [vmem:[#allocation2 + $0xa0] sm:$0xff]  ;;  %v19365_v52 = vld [vmem:[%s17837_s10 + $0x1c8] sm:$0xff] }
 0x19a   : > { %v3268_v55 = vld [vmem:[#allocation2 + $0x50] sm:$0xff]  ;;  %v16577_v58 = vpop.f32.mrf.mxu1  ;;  %16876 = vmatmul.mubr.msk.f32.gmra.mxu1 %vm282_vm1, %v19308_v21  ;;  %v3169_v44 = vpop.f32.mrf.mxu0 }
 0x19b   : > { %3333 = vst.msk [vmem:[#allocation2 + $0x58] sm:$0xff] %vm282_vm1, %v3301_v3  ;;  %2883 = vst.msk [vmem:[#allocation2 + $0x70] sm:$0xff] %vm282_vm1, %v2851_v19  ;;  %v3300_v11 = vadd.f32 %v3268_v55, %v3149_v5  ;;  %v2854_v61 = vadd.f32 %v16577_v58, %v2822_v23  ;;  %16878 = vmatprep.mubr.msk.f32.mxu1 %vm282_vm1, %v19311_v57  ;;  %v19344_v5 = vld [vmem:[%s17837_s10 + $0x190] sm:$0xff]  ;;  %v2828_v55 = vld [vmem:[#allocation2 + $0xb8] sm:$0xff] }
 0x19c   : > { %v3271_v9 = vld [vmem:[#allocation2 + $0x68] sm:$0xff]  ;;  %v2726_v41 = vpop.f32.mrf.mxu1  ;;  %v16627_v47 = vpop.f32.mrf.mxu0  ;;  %16926 = vmatmul.mubr.msk.f32.gmra.mxu0 %vm282_vm1, %v19076_v31 }
 0x19d   : > { %3332 = vst.msk [vmem:[#allocation2 + $0x50] sm:$0xff] %vm282_vm1, %v3300_v11  ;;  %2886 = vst.msk [vmem:[#allocation2 + $0x88] sm:$0xff] %vm282_vm1, %v2854_v61  ;;  %v3303_v32 = vadd.f32 %v16621_v34, %v3271_v9  ;;  %v2853_v13 = vadd.f32 %v2821_v27, %v2726_v41  ;;  %16928 = vmatprep.mubr.msk.f32.mxu0 %vm282_vm1, %v19079_v38  ;;  %v2827_v61 = vld [vmem:[#allocation2 + $0xb0] sm:$0xff]  ;;  %v14410_v9 = vld [vmem:[%s17837_s10 + $0x1e8] sm:$0xff] }
 0x19e   : > { %v3270_v22 = vld [vmem:[#allocation2 + $0x60] sm:$0xff]  ;;  %v16580_v29 = vpop.f32.mrf.mxu1  ;;  %16879 = vmatmul.mubr.msk.f32.gmra.mxu1 %vm282_vm1, %v19326_v42  ;;  %v3179_v45 = vpop.f32.mrf.mxu0 }
 0x19f   : > { %3335 = vst.msk [vmem:[#allocation2 + $0x68] sm:$0xff] %vm282_vm1, %v3303_v32  ;;  %2885 = vst.msk [vmem:[#allocation2 + $0x80] sm:$0xff] %vm282_vm1, %v2853_v13  ;;  %v3302_v31 = vadd.f32 %v3270_v22, %v3159_v16  ;;  %v2856_v33 = vadd.f32 %v16580_v29, %v2824_v30  ;;  %16881 = vmatprep.mubr.msk.f32.mxu1 %vm282_vm1, %v19329_v28  ;;  %v19362_v16 = vld [vmem:[%s17837_s10 + $0x1b0] sm:$0xff]  ;;  %v2830_v22 = vld [vmem:[#allocation2 + $0xc8] sm:$0xff] }
 0x1a0   : > { %v3273_v26 = vld [vmem:[#allocation2 + $0x78] sm:$0xff]  ;;  %v2736_v38 = vpop.f32.mrf.mxu1  ;;  %v16630_v1 = vpop.f32.mrf.mxu0  ;;  %16929 = vmatmul.mubr.msk.f32.gmra.mxu0 %vm282_vm1, %v19094_v35  ;;  %v14475_v30 = vld [vmem:[%s17837_s10 + $0x242] sm:$0xff] }
 0x1a1   : > { %3334 = vst.msk [vmem:[#allocation2 + $0x60] sm:$0xff] %vm282_vm1, %v3302_v31  ;;  %2888 = vst.msk [vmem:[#allocation2 + $0x98] sm:$0xff] %vm282_vm1, %v2856_v33  ;;  %v3305_v10 = vadd.f32 %v16624_v17, %v3273_v26  ;;  %v2855_v34 = vadd.f32 %v2823_v59, %v2736_v38  ;;  %16931 = vmatprep.mubr.msk.f32.mxu0 %vm282_vm1, %v19097_v63  ;;  %v14411_v31 = vld [vmem:[%s17837_s10 + $0x1f0] sm:$0xff]  ;;  %v2829_v26 = vld [vmem:[#allocation2 + $0xc0] sm:$0xff] }
 0x1a2   : > { %v3272_v14 = vld [vmem:[#allocation2 + $0x70] sm:$0xff]  ;;  %v16583_v15 = vpop.f32.mrf.mxu1  ;;  %16882 = vmatmul.mubr.msk.f32.gmra.mxu1 %vm282_vm1, %v19344_v5  ;;  %v3189_v25 = vpop.f32.mrf.mxu0  ;;  %v14412_v38 = vld [vmem:[%s17837_s10 + $0x208] sm:$0xff] }
 0x1a3   : > { %3337 = vst.msk [vmem:[#allocation2 + $0x78] sm:$0xff] %vm282_vm1, %v3305_v10  ;;  %2887 = vst.msk [vmem:[#allocation2 + $0x90] sm:$0xff] %vm282_vm1, %v2855_v34  ;;  %v3304_v35 = vadd.f32 %v3272_v14, %v3169_v44  ;;  %v2858_v51 = vadd.f32 %v16583_v15, %v2826_v53  ;;  %16884 = vmatprep.mubr.msk.f32.mxu1 %vm282_vm1, %v19347_v37  ;;  %v14409_v44 = vld [vmem:[%s17837_s10 + $0x1d0] sm:$0xff]  ;;  %v2832_v53 = vld [vmem:[#allocation2 + $0xd8] sm:$0xff] }
 0x1a4   : > { %v3275_v12 = vld [vmem:[#allocation2 + $0x88] sm:$0xff]  ;;  %v2746_v63 = vpop.f32.mrf.mxu1  ;;  %v16633_v48 = vpop.f32.mrf.mxu0  ;;  %16932 = vmatmul.mubr.msk.f32.gmra.mxu0 %vm282_vm1, %v19112_v39 }
 0x1a5   : > { %3336 = vst.msk [vmem:[#allocation2 + $0x70] sm:$0xff] %vm282_vm1, %v3304_v35  ;;  %2890 = vst.msk [vmem:[#allocation2 + $0xa8] sm:$0xff] %vm282_vm1, %v2858_v51  ;;  %v3307_v6 = vadd.f32 %v16627_v47, %v3275_v12  ;;  %v2857_v17 = vadd.f32 %v2825_v2, %v2746_v63  ;;  %16934 = vmatprep.mubr.msk.f32.mxu0 %vm282_vm1, %v19115_v24  ;;  %v14476_v34 = vld [vmem:[%s17837_s10 + $0x24a] sm:$0xff]  ;;  %v14477_v35 = vld [vmem:[%s17837_s10 + $0x262] sm:$0xff] }
 0x1a6   : > { %v3274_v3 = vld [vmem:[#allocation2 + $0x80] sm:$0xff]  ;;  %v16586_v19 = vpop.f32.mrf.mxu1  ;;  %16885 = vmatmul.mubr.msk.f32.gmra.mxu1 %vm282_vm1, %v19362_v16  ;;  %v3199_v58 = vpop.f32.mrf.mxu0  ;;  %v14413_v12 = vld [vmem:[%s17837_s10 + $0x210] sm:$0xff] }
 0x1a7   : > { %3339 = vst.msk [vmem:[#allocation2 + $0x88] sm:$0xff] %vm282_vm1, %v3307_v6  ;;  %2889 = vst.msk [vmem:[#allocation2 + $0xa0] sm:$0xff] %vm282_vm1, %v2857_v17  ;;  %v3306_v39 = vadd.f32 %v3274_v3, %v3179_v45  ;;  %v2860_v23 = vadd.f32 %v16586_v19, %v2828_v55  ;;  %16887 = vmatprep.mubr.msk.f32.mxu1 %vm282_vm1, %v19365_v52  ;;  %v14414_v6 = vld [vmem:[%s17837_s10 + $0x228] sm:$0xff] }
 0x1a8   : > { %v3277_v11 = vld [vmem:[#allocation2 + $0x98] sm:$0xff]  ;;  %v2756_v24 = vpop.f32.mrf.mxu1  ;;  %v16636_v41 = vpop.f32.mrf.mxu0  ;;  %16935 = vmatmul.mubr.msk.f32.gmra.mxu0 %vm282_vm1, %v19130_v40  ;;  %v14478_v55 = vld [vmem:[%s17837_s10 + $0x26a] sm:$0xff] }
 0x1a9   : > { %3338 = vst.msk [vmem:[#allocation2 + $0x80] sm:$0xff] %vm282_vm1, %v3306_v39  ;;  %2892 = vst.msk [vmem:[#allocation2 + $0xb8] sm:$0xff] %vm282_vm1, %v2860_v23  ;;  %v3309_v27 = vadd.f32 %v16630_v1, %v3277_v11  ;;  %v2859_v47 = vadd.f32 %v2827_v61, %v2756_v24  ;;  %16937 = vmatprep.mubr.msk.f32.mxu0 %vm282_vm1, %v19133_v46  ;;  %v2834_v23 = vld [vmem:[#allocation2 + $0xe8] sm:$0xff] }
 0x1aa   : > { %v3276_v32 = vld [vmem:[#allocation2 + $0x90] sm:$0xff]  ;;  %v16589_v13 = vpop.f32.mrf.mxu1  ;;  %16888 = vmatmul.mubr.msk.f32.gmra.mxu1 %vm282_vm1, %v14409_v44  ;;  %v3209_v29 = vpop.f32.mrf.mxu0  ;;  %v14479_v11 = vld [vmem:[%s17837_s10 + $0x282] sm:$0xff] }
 0x1ab   : > { %3341 = vst.msk [vmem:[#allocation2 + $0x98] sm:$0xff] %vm282_vm1, %v3309_v27  ;;  %2891 = vst.msk [vmem:[#allocation2 + $0xb0] sm:$0xff] %vm282_vm1, %v2859_v47  ;;  %v3308_v40 = vadd.f32 %v3276_v32, %v3189_v25  ;;  %v2862_v45 = vadd.f32 %v16589_v13, %v2830_v22  ;;  %16890 = vmatprep.mubr.msk.f32.mxu1 %vm282_vm1, %v14410_v9  ;;  %v14415_v9 = vld [vmem:[%s17837_s10 + $0x230] sm:$0xff]  ;;  %v2833_v47 = vld [vmem:[#allocation2 + $0xe0] sm:$0xff] }
 0x1ac   : > { %v3279_v33 = vld [vmem:[#allocation2 + $0xa8] sm:$0xff]  ;;  %v2766_v46 = vpop.f32.mrf.mxu1  ;;  %v16639_v59 = vpop.f32.mrf.mxu0  ;;  %16938 = vmatmul.mubr.msk.f32.gmra.mxu0 %vm282_vm1, %v19148_v54 }
 0x1ad   : > { %3340 = vst.msk [vmem:[#allocation2 + $0x90] sm:$0xff] %vm282_vm1, %v3308_v40  ;;  %2894 = vst.msk [vmem:[#allocation2 + $0xc8] sm:$0xff] %vm282_vm1, %v2862_v45  ;;  %v3311_v1 = vadd.f32 %v16633_v48, %v3279_v33  ;;  %v2861_v10 = vadd.f32 %v2829_v26, %v2766_v46  ;;  %16940 = vmatprep.mubr.msk.f32.mxu0 %vm282_vm1, %v14475_v30  ;;  %v2831_v48 = vld [vmem:[#allocation2 + $0xd0] sm:$0xff]  ;;  %v14514_v32 = vld [vmem:[%s17837_s10 + $0xa5] sm:$0xff] }
 0x1ae   : > { %v3278_v14 = vld [vmem:[#allocation2 + $0xa0] sm:$0xff]  ;;  %v16592_v15 = vpop.f32.mrf.mxu1  ;;  %16891 = vmatmul.mubr.msk.f32.gmra.mxu1 %vm282_vm1, %v14411_v31  ;;  %v3219_v25 = vpop.f32.mrf.mxu0  ;;  %v2836_v31 = vld [vmem:[#allocation2 + $0xf8] sm:$0xff] }
 0x1af   : > { %3343 = vst.msk [vmem:[#allocation2 + $0xa8] sm:$0xff] %vm282_vm1, %v3311_v1  ;;  %2893 = vst.msk [vmem:[#allocation2 + $0xc0] sm:$0xff] %vm282_vm1, %v2861_v10  ;;  %v3310_v54 = vadd.f32 %v3278_v14, %v3199_v58  ;;  %v2864_v51 = vadd.f32 %v16592_v15, %v2832_v53  ;;  %16893 = vmatprep.mubr.msk.f32.mxu1 %vm282_vm1, %v14412_v38  ;;  %v14515_v38 = vld [vmem:[%s17837_s10 + $0xad] sm:$0xff] }
 0x1b0   : > { %v3281_v63 = vld [vmem:[#allocation2 + $0xb8] sm:$0xff]  ;;  %v2776_v2 = vpop.f32.mrf.mxu1  ;;  %v16642_v17 = vpop.f32.mrf.mxu0  ;;  %16941 = vmatmul.mubr.msk.f32.gmra.mxu0 %vm282_vm1, %v14476_v34  ;;  %v2835_v10 = vld [vmem:[#allocation2 + $0xf0] sm:$0xff]  ;;  %v14516_v34 = vld [vmem:[%s17837_s10 + $0xc5] sm:$0xff] }
 0x1b1   : > { %3342 = vst.msk [vmem:[#allocation2 + $0xa0] sm:$0xff] %vm282_vm1, %v3310_v54  ;;  %2896 = vst.msk [vmem:[#allocation2 + $0xd8] sm:$0xff] %vm282_vm1, %v2864_v51  ;;  %v3313_v3 = vadd.f32 %v16636_v41, %v3281_v63  ;;  %v2863_v19 = vadd.f32 %v2831_v48, %v2776_v2  ;;  %16943 = vmatprep.mubr.msk.f32.mxu0 %vm282_vm1, %v14477_v35  ;;  %v3711_v51 = vld [vmem:[#allocation2 + $0x8] sm:$0xff] }
 0x1b2   : > { %v3280_v58 = vld [vmem:[#allocation2 + $0xb0] sm:$0xff]  ;;  %v16595_v39 = vpop.f32.mrf.mxu1  ;;  %16894 = vmatmul.mubr.msk.f32.gmra.mxu1 %vm282_vm1, %v14413_v12  ;;  %v3229_v44 = vpop.f32.mrf.mxu0  ;;  %v14872_v48 = vld [vmem:[%s22301_s1 + $0x48] sm:$0xf] }
 0x1b3   : > { %3345 = vst.msk [vmem:[#allocation2 + $0xb8] sm:$0xff] %vm282_vm1, %v3313_v3  ;;  %2895 = vst.msk [vmem:[#allocation2 + $0xd0] sm:$0xff] %vm282_vm1, %v2863_v19  ;;  %v3312_v24 = vadd.f32 %v3280_v58, %v3209_v29  ;;  %v2866_v61 = vadd.f32 %v16595_v39, %v2834_v23  ;;  %16896 = vmatprep.mubr.msk.f32.mxu1 %vm282_vm1, %v14414_v6  ;;  %v14480_v29 = vld [vmem:[%s17837_s10 + $0x28a] sm:$0xff]  ;;  %v3710_v3 = vld [vmem:[#allocation2] sm:$0xff] }
 0x1b4   : > { %v3283_v41 = vld [vmem:[#allocation2 + $0xc8] sm:$0xff]  ;;  %v2786_v27 = vpop.f32.mrf.mxu1  ;;  %v16645_v13 = vpop.f32.mrf.mxu0  ;;  %16944 = vmatmul.mubr.msk.f32.gmra.mxu0 %vm282_vm1, %v14478_v55 }
 0x1b5   : > { %3344 = vst.msk [vmem:[#allocation2 + $0xb0] sm:$0xff] %vm282_vm1, %v3312_v24  ;;  %2898 = vst.msk [vmem:[#allocation2 + $0xe8] sm:$0xff] %vm282_vm1, %v2866_v61  ;;  %v3315_v22 = vadd.f32 %v16639_v59, %v3283_v41  ;;  %v2865_v30 = vadd.f32 %v2833_v47, %v2786_v27  ;;  %16946 = vmatprep.mubr.msk.f32.mxu0 %vm282_vm1, %v14479_v11  ;;  %v14518_v19 = vld [vmem:[%s17837_s10 + $0xe5] sm:$0xff] }
 0x1b6   : > { %v3282_v40 = vld [vmem:[#allocation2 + $0xc0] sm:$0xff]  ;;  %v16598_v45 = vpop.f32.mrf.mxu1  ;;  %16897 = vmatmul.mubr.msk.f32.gmra.mxu1 %vm282_vm1, %v14415_v9  ;;  %v3239_v33 = vpop.f32.mrf.mxu0  ;;  %v3712_v9 = vld [vmem:[#allocation2 + $0x10] sm:$0xff] }
 0x1b7   : > { %3347 = vst.msk [vmem:[#allocation2 + $0xc8] sm:$0xff] %vm282_vm1, %v3315_v22  ;;  %2897 = vst.msk [vmem:[#allocation2 + $0xe0] sm:$0xff] %vm282_vm1, %v2865_v30  ;;  %v3314_v46 = vadd.f32 %v3282_v40, %v3219_v25  ;;  %v2868_v26 = vadd.f32 %v16598_v45, %v2836_v31  ;;  %16951 = vmatprep.mubr.msk.f32.mxu1 %vm282_vm1, %v14514_v32  ;;  %v14253_v25 = vld [vmem:[%s22301_s1 + $0x44] sm:$0xf]  ;;  %v3715_v30 = vld [vmem:[#allocation2 + $0x28] sm:$0xff] }
 0x1b8   : > { %v3285_v59 = vld [vmem:[#allocation2 + $0xd8] sm:$0xff]  ;;  %v2796_v1 = vpop.f32.mrf.mxu1  ;;  %v16648_v14 = vpop.f32.mrf.mxu0  ;;  %16947 = vmatmul.mubr.msk.f32.gmra.mxu0 %vm282_vm1, %v14480_v29  ;;  %v14520_v41 = vld [vmem:[%s17837_s10 + $0x105] sm:$0xff]  ;;  %v14521_v45 = vld [vmem:[%s17837_s10 + $0x10d] sm:$0xff] }
 0x1b9   : > { %3346 = vst.msk [vmem:[#allocation2 + $0xc0] sm:$0xff] %vm282_vm1, %v3314_v46  ;;  %2900 = vst.msk [vmem:[#allocation2 + $0xf8] sm:$0xff] %vm282_vm1, %v2868_v26  ;;  %v3317_v15 = vadd.f32 %v16642_v17, %v3285_v59  ;;  %v2867_v53 = vadd.f32 %v2835_v10, %v2796_v1  ;;  %17001 = vmatprep.mubr.msk.f32.mxu0 %vm282_vm1, %v19204_v20  ;;  %v14517_v20 = vld [vmem:[%s17837_s10 + $0xcd] sm:$0xff]  ;;  %v3714_v46 = vld [vmem:[#allocation2 + $0x20] sm:$0xff] }
 0x1ba   : > { %v3284_v35 = vld [vmem:[#allocation2 + $0xd0] sm:$0xff]  ;;  %v16653_v54 = vpop.f32.mrf.mxu1  ;;  %16952 = vmatmul.mubr.msk.f32.vlgmr.msra.gmra.mxu1 %vm282_vm1, %v14515_v38  ;;  %v3249_v12 = vpop.f32.mrf.mxu0 }
 0x1bb   : > { %3349 = vst.msk [vmem:[#allocation2 + $0xd8] sm:$0xff] %vm282_vm1, %v3317_v15  ;;  %2899 = vst.msk [vmem:[#allocation2 + $0xf0] sm:$0xff] %vm282_vm1, %v2867_v53  ;;  %v3316_v63 = vadd.f32 %v3284_v35, %v3229_v44  ;;  %v3743_v2 = vadd.f32 %v16653_v54, %v3711_v51  ;;  %17050 = vmatpush3.msk.msra.mxu1 %vm379_vm0, %v19171_v36  ;;  %16954 = vmatprep.mubr.msk.f32.mxu1 %vm282_vm1, %v14516_v34  ;;  %v3713_v44 = vld [vmem:[#allocation2 + $0x18] sm:$0xff]  ;;  %v14523_v53 = vld [vmem:[%s17837_s10 + $0x12d] sm:$0xff] }
 0x1bc   : > { %v3287_v6 = vld [vmem:[#allocation2 + $0xe8] sm:$0xff]  ;;  %v3551_v17 = vpop.f32.mrf.mxu1  ;;  %v16703_v55 = vpop.f32.mrf.mxu0  ;;  %17002 = vmatmul.mubr.msk.f32.vlgmr.msra.gmra.mxu0 %vm282_vm1, %v19218_v62  ;;  %17149 = vmatprep.subr.msk.mxu1 %vm379_vm0, %v14253_v25  ;;  %v3717_v34 = vld [vmem:[#allocation2 + $0x38] sm:$0xff] }
 0x1bd   : > { %3348 = vst.msk [vmem:[#allocation2 + $0xd0] sm:$0xff] %vm282_vm1, %v3316_v63  ;;  %v3319_v36 = vadd.f32 %v16645_v13, %v3287_v6  ;;  %3775 = vst.msk [vmem:[#allocation2 + $0x8] sm:$0xff] %vm282_vm1, %v3743_v2  ;;  %v3742_v58 = vadd.f32 %v3710_v3, %v3551_v17  ;;  %17100 = vmatpush3.msk.msra.mxu0 %vm379_vm0, %v19183_v49  ;;  %17004 = vmatprep.mubr.msk.f32.mxu0 %vm282_vm1, %v19221_v7  ;;  %v14519_v49 = vld [vmem:[%s17837_s10 + $0xed] sm:$0xff]  ;;  %v14524_v54 = vld [vmem:[%s17837_s10 + $0x145] sm:$0xff] }
 0x1be   : > { %v3286_v39 = vld [vmem:[#allocation2 + $0xe0] sm:$0xff]  ;;  %v16656_v23 = vpop.f32.mrf.mxu1  ;;  %16955 = vmatmul.mubr.msk.f32.gmra.mxu1 %vm282_vm1, %v14517_v20  ;;  %v4003_v62 = vpop.f32.mrf.mxu0  ;;  %17199 = vmatprep.subr.msk.mxu0 %vm379_vm0, %v14872_v48  ;;  %v3719_v48 = vld [vmem:[#allocation2 + $0x48] sm:$0xff] }
 0x1bf   : > { %3351 = vst.msk [vmem:[#allocation2 + $0xe8] sm:$0xff] %vm282_vm1, %v3319_v36  ;;  %v3318_v11 = vadd.f32 %v3286_v39, %v3239_v33  ;;  %3774 = vst.msk [vmem:[#allocation2] sm:$0xff] %vm282_vm1, %v3742_v58  ;;  %v3745_v24 = vadd.f32 %v16656_v23, %v3713_v44  ;;  %16957 = vmatprep.mubr.msk.f32.mxu1 %vm282_vm1, %v14518_v19  ;;  %v14525_v3 = vld [vmem:[%s17837_s10 + $0x14d] sm:$0xff]  ;;  %v3718_v36 = vld [vmem:[#allocation2 + $0x40] sm:$0xff] }
 0x1c0   : > { %v3289_v61 = vld [vmem:[#allocation2 + $0xf8] sm:$0xff]  ;;  %v3561_v7 = vpop.f32.mrf.mxu1  ;;  %v16706_v27 = vpop.f32.mrf.mxu0  ;;  %17005 = vmatmul.mubr.msk.f32.gmra.mxu0 %vm282_vm1, %v19236_v0  ;;  %v14526_v58 = vld [vmem:[%s17837_s10 + $0x165] sm:$0xff] }
 0x1c1   : > { %3350 = vst.msk [vmem:[#allocation2 + $0xe0] sm:$0xff] %vm282_vm1, %v3318_v11  ;;  %v3321_v47 = vadd.f32 %v16648_v14, %v3289_v61  ;;  %3777 = vst.msk [vmem:[#allocation2 + $0x18] sm:$0xff] %vm282_vm1, %v3745_v24  ;;  %v3744_v32 = vadd.f32 %v3712_v9, %v3561_v7  ;;  %17007 = vmatprep.mubr.msk.f32.mxu0 %vm282_vm1, %v19239_v60  ;;  %v14522_v60 = vld [vmem:[%s17837_s10 + $0x125] sm:$0xff] }
 0x1c2   : > { %v3288_v13 = vld [vmem:[#allocation2 + $0xf0] sm:$0xff]  ;;  %v16659_v22 = vpop.f32.mrf.mxu1  ;;  %16958 = vmatmul.mubr.msk.f32.gmra.mxu1 %vm282_vm1, %v14519_v49  ;;  %v4013_v29 = vpop.f32.mrf.mxu0  ;;  %v3721_v49 = vld [vmem:[#allocation2 + $0x58] sm:$0xff] }
 0x1c3   : > { %3353 = vst.msk [vmem:[#allocation2 + $0xf8] sm:$0xff] %vm282_vm1, %v3321_v47  ;;  %v3320_v0 = vadd.f32 %v3288_v13, %v3249_v12  ;;  %3776 = vst.msk [vmem:[#allocation2 + $0x10] sm:$0xff] %vm282_vm1, %v3744_v32  ;;  %v3747_v40 = vadd.f32 %v16659_v22, %v3715_v30  ;;  %16960 = vmatprep.mubr.msk.f32.mxu1 %vm282_vm1, %v14520_v41  ;;  %v14528_v32 = vld [vmem:[%s17837_s10 + $0x185] sm:$0xff] }
 0x1c4   : > { %v4163_v31 = vld [vmem:[#allocation2 + $0x8] sm:$0xff]  ;;  %v3571_v33 = vpop.f32.mrf.mxu1  ;;  %v16709_v26 = vpop.f32.mrf.mxu0  ;;  %17008 = vmatmul.mubr.msk.f32.gmra.mxu0 %vm282_vm1, %v19254_v8 }
 0x1c5   : > { %3352 = vst.msk [vmem:[#allocation2 + $0xf0] sm:$0xff] %vm282_vm1, %v3320_v0  ;;  %3779 = vst.msk [vmem:[#allocation2 + $0x28] sm:$0xff] %vm282_vm1, %v3747_v40  ;;  %v4195_v38 = vadd.f32 %v16703_v55, %v4163_v31  ;;  %v3746_v59 = vadd.f32 %v3714_v46, %v3571_v33  ;;  %17010 = vmatprep.mubr.msk.f32.mxu0 %vm282_vm1, %v19257_v18  ;;  %v3716_v18 = vld [vmem:[#allocation2 + $0x30] sm:$0xff] }
 0x1c6   : > { %v4162_v1 = vld [vmem:[#allocation2] sm:$0xff]  ;;  %v16662_v10 = vpop.f32.mrf.mxu1  ;;  %16961 = vmatmul.mubr.msk.f32.gmra.mxu1 %vm282_vm1, %v14521_v45  ;;  %v4023_v14 = vpop.f32.mrf.mxu0  ;;  %v3720_v0 = vld [vmem:[#allocation2 + $0x50] sm:$0xff] }
 0x1c7   : > { %4227 = vst.msk [vmem:[#allocation2 + $0x8] sm:$0xff] %vm282_vm1, %v4195_v38  ;;  %3778 = vst.msk [vmem:[#allocation2 + $0x20] sm:$0xff] %vm282_vm1, %v3746_v59  ;;  %v4194_v8 = vadd.f32 %v4162_v1, %v4003_v62  ;;  %v3749_v15 = vadd.f32 %v16662_v10, %v3717_v34  ;;  %16963 = vmatprep.mubr.msk.f32.mxu1 %vm282_vm1, %v14522_v60  ;;  %v14529_v59 = vld [vmem:[%s17837_s10 + $0x18d] sm:$0xff] }
 0x1c8   : > { %v4165_v25 = vld [vmem:[#allocation2 + $0x18] sm:$0xff]  ;;  %v3581_v35 = vpop.f32.mrf.mxu1  ;;  %v16712_v51 = vpop.f32.mrf.mxu0  ;;  %17011 = vmatmul.mubr.msk.f32.gmra.mxu0 %vm282_vm1, %v19272_v43  ;;  %v19504_v43 = vld [vmem:[%s22302_s2] ss:$0 sm:$0xff] }
 0x1c9   : > { %4226 = vst.msk [vmem:[#allocation2] sm:$0xff] %vm282_vm1, %v4194_v8  ;;  %3781 = vst.msk [vmem:[#allocation2 + $0x38] sm:$0xff] %vm282_vm1, %v3749_v15  ;;  %v4197_v12 = vadd.f32 %v16706_v27, %v4165_v25  ;;  %v3748_v63 = vadd.f32 %v3716_v18, %v3581_v35  ;;  %17013 = vmatprep.mubr.msk.f32.mxu0 %vm282_vm1, %v19275_v56 }
 0x1ca   : > { %v4164_v2 = vld [vmem:[#allocation2 + $0x10] sm:$0xff]  ;;  %v16665_v20 = vpop.f32.mrf.mxu1  ;;  %16964 = vmatmul.mubr.msk.f32.gmra.mxu1 %vm282_vm1, %v14523_v53  ;;  %v19499_v6 = vpop.f32.mrf.mxu0  ;;  %v14530_v53 = vld [vmem:[%s17837_s10 + $0x1a5] sm:$0xff] }
 0x1cb   : > { %4229 = vst.msk [vmem:[#allocation2 + $0x18] sm:$0xff] %vm282_vm1, %v4197_v12  ;;  %3780 = vst.msk [vmem:[#allocation2 + $0x30] sm:$0xff] %vm282_vm1, %v3748_v63  ;;  %v4196_v56 = vadd.f32 %v4164_v2, %v4013_v29  ;;  %v3751_v17 = vadd.f32 %v16665_v20, %v3719_v48  ;;  %16966 = vmatprep.mubr.msk.f32.mxu1 %vm282_vm1, %v14524_v54  ;;  %v3722_v12 = vld [vmem:[#allocation2 + $0x60] sm:$0xff] }
 0x1cc   : > { %v4167_v19 = vld [vmem:[#allocation2 + $0x28] sm:$0xff]  ;;  %v3591_v55 = vpop.f32.mrf.mxu1  ;;  %v19511_v39 = vpop.f32.mrf.mxu0  ;;  %17014 = vmatmul.mubr.msk.f32.gmra.mxu0 %vm282_vm1, %v19290_v4 }
 0x1cd   : > { %4228 = vst.msk [vmem:[#allocation2 + $0x10] sm:$0xff] %vm282_vm1, %v4196_v56  ;;  %3783 = vst.msk [vmem:[#allocation2 + $0x48] sm:$0xff] %vm282_vm1, %v3751_v17  ;;  %v4199_v23 = vadd.f32 %v16709_v26, %v4167_v19  ;;  %v3750_v44 = vadd.f32 %v3718_v36, %v3591_v55  ;;  %17016 = vmatprep.mubr.msk.f32.mxu0 %vm282_vm1, %v19293_v50  ;;  %v14527_v50 = vld [vmem:[%s17837_s10 + $0x16d] sm:$0xff]  ;;  %v3725_v19 = vld [vmem:[#allocation2 + $0x78] sm:$0xff] }
 0x1ce   : > { %v4259_v62 = vld [vmem:[#allocation2 + $0x8] sm:$0xff]  ;;  %v4166_v11 = vld [vmem:[#allocation2 + $0x20] sm:$0xff]  ;;  %v16668_v24 = vpop.f32.mrf.mxu1  ;;  %16967 = vmatmul.mubr.msk.f32.gmra.mxu1 %vm282_vm1, %v14525_v3  ;;  %v19520_v61 = vpop.f32.mrf.mxu0 }
 0x1cf   : > { %v4296_v4 = vadd.f32 %v19504_v43, %v4259_v62  ;;  %4231 = vst.msk [vmem:[#allocation2 + $0x28] sm:$0xff] %vm282_vm1, %v4199_v23  ;;  %3782 = vst.msk [vmem:[#allocation2 + $0x40] sm:$0xff] %vm282_vm1, %v3750_v44  ;;  %v4198_v7 = vadd.f32 %v4166_v11, %v4023_v14  ;;  %v3753_v9 = vadd.f32 %v16668_v24, %v3721_v49  ;;  %16969 = vmatprep.mubr.msk.f32.mxu1 %vm282_vm1, %v14526_v58  ;;  %v14531_v55 = vld [vmem:[%s17837_s10 + $0x1ad] sm:$0xff]  ;;  %v14532_v11 = vld [vmem:[%s17837_s10 + $0x1c5] sm:$0xff] }
 0x1d0   : > { %v4258_v41 = vld [vmem:[#allocation2] sm:$0xff]  ;;  %v4169_v27 = vld [vmem:[#allocation2 + $0x38] sm:$0xff]  ;;  %v3601_v47 = vpop.f32.mrf.mxu1  ;;  %v19528_v13 = vpop.f32.mrf.mxu0  ;;  %17017 = vmatmul.mubr.msk.f32.gmra.mxu0 %vm282_vm1, %v19308_v21 }
 0x1d1   : > { %4328 = vst.msk [vmem:[%s19533_s14 + $0x8] sm:$0xff] %vm282_vm1, %v4296_v4  ;;  %v4429_v22 = vmul.f32 %v4296_v4, %v4296_v4  ;;  %v4295_v30 = vadd.f32 %v19504_v43, %v4258_v41  ;;  %4230 = vst.msk [vmem:[#allocation2 + $0x20] sm:$0xff] %vm282_vm1, %v4198_v7  ;;  %v4201_v29 = vadd.f32 %v16712_v51, %v4169_v27  ;;  %17019 = vmatprep.mubr.msk.f32.mxu0 %vm282_vm1, %v19311_v57  ;;  %v3723_v57 = vld [vmem:[#allocation2 + $0x68] sm:$0xff] }
 0x1d2   : > { %3785 = vst.msk [vmem:[#allocation2 + $0x58] sm:$0xff] %vm282_vm1, %v3753_v9  ;;  %v4261_v21 = vld [vmem:[#allocation2 + $0x18] sm:$0xff]  ;;  %v3752_v40 = vadd.f32 %v3720_v0, %v3601_v47  ;;  %v4168_v45 = vld [vmem:[#allocation2 + $0x30] sm:$0xff]  ;;  %v16671_v31 = vpop.f32.mrf.mxu1  ;;  %16970 = vmatmul.mubr.msk.f32.gmra.mxu1 %vm282_vm1, %v14527_v50  ;;  %v19543_v33 = vpop.f32.mrf.mxu0  ;;  %v4360_v46 = vsel %vm282_vm1, %v4296_v4, 0.0 }
 0x1d3   : > { %4327 = vst.msk [vmem:[%s19533_s14] sm:$0xff] %vm282_vm1, %v4295_v30  ;;  %v4359_v60 = vsel %vm282_vm1, %v4295_v30, 0.0  ;;  %v4428_v26 = vmul.f32 %v4295_v30, %v4295_v30  ;;  %v4298_v38 = vadd.f32 %v19504_v43, %v4261_v21  ;;  %4233 = vst.msk [vmem:[#allocation2 + $0x38] sm:$0xff] %vm282_vm1, %v4201_v29  ;;  %16972 = vmatprep.mubr.msk.f32.mxu1 %vm282_vm1, %v14528_v32  ;;  %v4461_v35 = vsel %vm282_vm1, %v4429_v22, 0.0  ;;  %v3724_v9 = vld [vmem:[#allocation2 + $0x70] sm:$0xff] }
 0x1d4   : > { %v4361_v1 = vadd.f32 %v4360_v46, %v4359_v60  ;;  %v4260_v10 = vld [vmem:[#allocation2 + $0x10] sm:$0xff]  ;;  %3784 = vst.msk [vmem:[#allocation2 + $0x50] sm:$0xff] %vm282_vm1, %v3752_v40  ;;  %v4200_v34 = vadd.f32 %v4168_v45, %v19499_v6  ;;  %v3755_v14 = vadd.f32 %v16671_v31, %v3723_v57  ;;  %v4171_v8 = vld [vmem:[#allocation2 + $0x48] sm:$0xff]  ;;  %v3611_v15 = vpop.f32.mrf.mxu1  ;;  %v19556_v25 = vpop.f32.mrf.mxu0  ;;  %17020 = vmatmul.mubr.msk.f32.gmra.mxu0 %vm282_vm1, %v19326_v42 }
 0x1d5   : > { %v4460_v18 = vsel %vm282_vm1, %v4428_v26, 0.0  ;;  %4330 = vst.msk [vmem:[%s19533_s14 + $0x18] sm:$0xff] %vm282_vm1, %v4298_v38  ;;  %v4431_v54 = vmul.f32 %v4298_v38, %v4298_v38  ;;  %v4297_v51 = vadd.f32 %v19504_v43, %v4260_v10  ;;  %17022 = vmatprep.mubr.msk.f32.mxu0 %vm282_vm1, %v19329_v28  ;;  %v4203_v42 = vadd.f32 %v19511_v39, %v4171_v8  ;;  %v3727_v40 = vld [vmem:[#allocation2 + $0x88] sm:$0xff] }
 0x1d6   : > { %v4462_v63 = vadd.f32 %v4461_v35, %v4460_v18  ;;  %v4263_v2 = vld [vmem:[#allocation2 + $0x28] sm:$0xff]  ;;  %4232 = vst.msk [vmem:[#allocation2 + $0x30] sm:$0xff] %vm282_vm1, %v4200_v34  ;;  %3787 = vst.msk [vmem:[#allocation2 + $0x68] sm:$0xff] %vm282_vm1, %v3755_v14  ;;  %v3754_v20 = vadd.f32 %v3722_v12, %v3611_v15  ;;  %v4170_v48 = vld [vmem:[#allocation2 + $0x40] sm:$0xff]  ;;  %v16674_v6 = vpop.f32.mrf.mxu1  ;;  %16973 = vmatmul.mubr.msk.f32.gmra.mxu1 %vm282_vm1, %v14529_v59  ;;  %v19571_v56 = vpop.f32.mrf.mxu0  ;;  %v4364_v49 = vsel %vm282_vm1, %v4298_v38, 0.0 }
 0x1d7   : > { %4329 = vst.msk [vmem:[%s19533_s14 + $0x10] sm:$0xff] %vm282_vm1, %v4297_v51  ;;  %v4362_v28 = vsel %vm282_vm1, %v4297_v51, 0.0  ;;  %v4430_v17 = vmul.f32 %v4297_v51, %v4297_v51  ;;  %v4300_v3 = vadd.f32 %v19504_v43, %v4263_v2  ;;  %16975 = vmatprep.mubr.msk.f32.mxu1 %vm282_vm1, %v14530_v53  ;;  %4235 = vst.msk [vmem:[#allocation2 + $0x48] sm:$0xff] %vm282_vm1, %v4203_v42  ;;  %v4465_v4 = vsel %vm282_vm1, %v4431_v54, 0.0  ;;  %v3726_v38 = vld [vmem:[#allocation2 + $0x80] sm:$0xff]  ;;  %v3729_v54 = vld [vmem:[#allocation2 + $0x98] sm:$0xff] }
 0x1d8   : > { %v4363_v36 = vadd.f32 %v4362_v28, %v4361_v1  ;;  %v4262_v58 = vld [vmem:[#allocation2 + $0x20] sm:$0xff]  ;;  %3786 = vst.msk [vmem:[#allocation2 + $0x60] sm:$0xff] %vm282_vm1, %v3754_v20  ;;  %v4202_v39 = vadd.f32 %v4170_v48, %v19520_v61  ;;  %v3757_v23 = vadd.f32 %v16674_v6, %v3725_v19  ;;  %v3621_v62 = vpop.f32.mrf.mxu1  ;;  %v19583_v24 = vpop.f32.mrf.mxu0  ;;  %17023 = vmatmul.mubr.msk.f32.gmra.mxu0 %vm282_vm1, %v19344_v5  ;;  %v14535_v48 = vld [vmem:[%s17837_s10 + $0x1ed] sm:$0xff] }
 0x1d9   : > { %v4173_v44 = vld [vmem:[#allocation2 + $0x58] sm:$0xff]  ;;  %v4463_v7 = vsel %vm282_vm1, %v4430_v17, 0.0  ;;  %4332 = vst.msk [vmem:[%s19533_s14 + $0x28] sm:$0xff] %vm282_vm1, %v4300_v3  ;;  %v4299_v61 = vadd.f32 %v19504_v43, %v4262_v58  ;;  %17025 = vmatprep.mubr.msk.f32.mxu0 %vm282_vm1, %v19347_v37  ;;  %v3756_v47 = vadd.f32 %v3724_v9, %v3621_v62  ;;  %v4433_v30 = vmul.f32 %v4300_v3, %v4300_v3  ;;  %v14534_v57 = vld [vmem:[%s17837_s10 + $0x1e5] sm:$0xff]  ;;  %v3728_v19 = vld [vmem:[#allocation2 + $0x90] sm:$0xff] }
 0x1da   : > { %v4464_v50 = vadd.f32 %v4463_v7, %v4462_v63  ;;  %v4365_v41 = vadd.f32 %v4364_v49, %v4363_v36  ;;  %v4265_v27 = vld [vmem:[#allocation2 + $0x38] sm:$0xff]  ;;  %4234 = vst.msk [vmem:[#allocation2 + $0x40] sm:$0xff] %vm282_vm1, %v4202_v39  ;;  %3789 = vst.msk [vmem:[#allocation2 + $0x78] sm:$0xff] %vm282_vm1, %v3757_v23  ;;  %v4205_v5 = vadd.f32 %v19528_v13, %v4173_v44  ;;  %v16677_v32 = vpop.f32.mrf.mxu1  ;;  %16976 = vmatmul.mubr.msk.f32.gmra.mxu1 %vm282_vm1, %v14531_v55  ;;  %v19599_v22 = vpop.f32.mrf.mxu0  ;;  %v14533_v13 = vld [vmem:[%s17837_s10 + $0x1cd] sm:$0xff] }
 0x1db   : > { %4331 = vst.msk [vmem:[%s19533_s14 + $0x20] sm:$0xff] %vm282_vm1, %v4299_v61  ;;  %v4366_v37 = vsel %vm282_vm1, %v4299_v61, 0.0  ;;  %v4432_v29 = vmul.f32 %v4299_v61, %v4299_v61  ;;  %v4302_v0 = vadd.f32 %v19504_v43, %v4265_v27  ;;  %v4172_v21 = vld [vmem:[#allocation2 + $0x50] sm:$0xff]  ;;  %16978 = vmatprep.mubr.msk.f32.mxu1 %vm282_vm1, %v14532_v11  ;;  %3788 = vst.msk [vmem:[#allocation2 + $0x70] sm:$0xff] %vm282_vm1, %v3756_v47  ;;  %v4368_v1 = vsel %vm282_vm1, %v4300_v3, 0.0  ;;  %v19640_v55 = vld [vmem:[%s17837_s10 + $0x205] sm:$0xff] }
 0x1dc   : > { %v4367_v45 = vadd.f32 %v4366_v37, %v4365_v41  ;;  %v4466_v31 = vadd.f32 %v4465_v4, %v4464_v50  ;;  %4237 = vst.msk [vmem:[#allocation2 + $0x58] sm:$0xff] %vm282_vm1, %v4205_v5  ;;  %v4204_v46 = vadd.f32 %v4172_v21, %v19543_v33  ;;  %v3759_v60 = vadd.f32 %v16677_v32, %v3727_v40  ;;  %v3631_v26 = vpop.f32.mrf.mxu1  ;;  %v19611_v59 = vpop.f32.mrf.mxu0  ;;  %v14598_v33 = vld [vmem:[%s17837_s10 + $0x1d0] sm:$0xff]  ;;  %v14601_v41 = vld [vmem:[%s17837_s10 + $0x208] sm:$0xff] }
 0x1dd   : > { %17026 = vmatmul.mubr.msk.f32.gmra.mxu0 %vm282_vm1, %v19362_v16  ;;  %v4467_v10 = vsel %vm282_vm1, %v4432_v29, 0.0  ;;  %4334 = vst.msk [vmem:[%s19533_s14 + $0x38] sm:$0xff] %vm282_vm1, %v4302_v0  ;;  %v4264_v34 = vld [vmem:[#allocation2 + $0x30] sm:$0xff]  ;;  %v4175_v14 = vld [vmem:[#allocation2 + $0x68] sm:$0xff]  ;;  %v3758_v8 = vadd.f32 %v3726_v38, %v3631_v26  ;;  %v4469_v12 = vsel %vm282_vm1, %v4433_v30, 0.0  ;;  %v4435_v63 = vmul.f32 %v4302_v0, %v4302_v0 }
 0x1de   : > { %17028 = vmatprep.mubr.msk.f32.mxu0 %vm282_vm1, %v19365_v52  ;;  %v4468_v15 = vadd.f32 %v4467_v10, %v4466_v31  ;;  %v4301_v53 = vadd.f32 %v19504_v43, %v4264_v34  ;;  %v4369_v35 = vadd.f32 %v4368_v1, %v4367_v45  ;;  %4236 = vst.msk [vmem:[#allocation2 + $0x50] sm:$0xff] %vm282_vm1, %v4204_v46  ;;  %3791 = vst.msk [vmem:[#allocation2 + $0x88] sm:$0xff] %vm282_vm1, %v3759_v60  ;;  %v16680_v18 = vpop.f32.mrf.mxu1  ;;  %v19627_v51 = vpop.f32.mrf.mxu0  ;;  %v14599_v52 = vld [vmem:[%s17837_s10 + $0x1e8] sm:$0xff]  ;;  %v14600_v11 = vld [vmem:[%s17837_s10 + $0x1f0] sm:$0xff] }
 0x1df   : > { %v4207_v16 = vadd.f32 %v19556_v25, %v4175_v14  ;;  %16979 = vmatmul.mubr.msk.f32.gmra.mxu1 %vm282_vm1, %v14533_v13  ;;  %v4267_v2 = vld [vmem:[#allocation2 + $0x48] sm:$0xff]  ;;  %3790 = vst.msk [vmem:[#allocation2 + $0x80] sm:$0xff] %vm282_vm1, %v3758_v8  ;;  %v4174_v42 = vld [vmem:[#allocation2 + $0x60] sm:$0xff]  ;;  %v3761_v20 = vadd.f32 %v16680_v18, %v3729_v54  ;;  %v4372_v49 = vsel %vm282_vm1, %v4302_v0, 0.0  ;;  %v4473_v0 = vsel %vm282_vm1, %v4435_v63, 0.0  ;;  %v14602_v34 = vld [vmem:[%s17837_s10 + $0x210] sm:$0xff] }
 0x1e0   : > { %16981 = vmatprep.mubr.msk.f32.mxu1 %vm282_vm1, %v14534_v57  ;;  %4333 = vst.msk [vmem:[%s19533_s14 + $0x30] sm:$0xff] %vm282_vm1, %v4301_v53  ;;  %v4370_v25 = vsel %vm282_vm1, %v4301_v53, 0.0  ;;  %v4434_v6 = vmul.f32 %v4301_v53, %v4301_v53  ;;  %v4470_v28 = vadd.f32 %v4469_v12, %v4468_v15  ;;  %v4304_v17 = vadd.f32 %v19504_v43, %v4267_v2  ;;  %v3641_v3 = vpop.f32.mrf.mxu1  ;;  %v19642_v36 = vpop.f32.mrf.mxu0  ;;  %v19664_v29 = vld [vmem:[%s17837_s10 + $0x20d] sm:$0xff]  ;;  %v3730_v45 = vld [vmem:[#allocation2 + $0xa0] sm:$0xff] }
 0x1e1   : > { %4239 = vst.msk [vmem:[#allocation2 + $0x68] sm:$0xff] %vm282_vm1, %v4207_v16  ;;  %17029 = vmatmul.mubr.msk.f32.gmra.mxu0 %vm282_vm1, %v14598_v33  ;;  %v4371_v58 = vadd.f32 %v4370_v25, %v4369_v35  ;;  %v4266_v39 = vld [vmem:[#allocation2 + $0x40] sm:$0xff]  ;;  %v4206_v23 = vadd.f32 %v4174_v42, %v19571_v56  ;;  %3793 = vst.msk [vmem:[#allocation2 + $0x98] sm:$0xff] %vm282_vm1, %v3761_v20  ;;  %v4177_v44 = vld [vmem:[#allocation2 + $0x78] sm:$0xff]  ;;  %v3760_v62 = vadd.f32 %v3728_v19, %v3641_v3 }
 0x1e2   : > { %17031 = vmatprep.mubr.msk.f32.mxu0 %vm282_vm1, %v14599_v52  ;;  %v4471_v4 = vsel %vm282_vm1, %v4434_v6, 0.0  ;;  %4336 = vst.msk [vmem:[%s19533_s14 + $0x48] sm:$0xff] %vm282_vm1, %v4304_v17  ;;  %v4437_v7 = vmul.f32 %v4304_v17, %v4304_v17  ;;  %v4303_v61 = vadd.f32 %v19504_v43, %v4266_v39  ;;  %v16683_v9 = vpop.f32.mrf.mxu1  ;;  %v3731_v56 = vld [vmem:[#allocation2 + $0xa8] sm:$0xff]  ;;  %v19655_v50 = vpop.f32.mrf.mxu0  ;;  %v4209_v32 = vadd.f32 %v19583_v24, %v4177_v44  ;;  %v4176_v30 = vld [vmem:[#allocation2 + $0x70] sm:$0xff] }
 0x1e3   : > { %16982 = vmatmul.mubr.msk.f32.gmra.mxu1 %vm282_vm1, %v14535_v48  ;;  %v4472_v27 = vadd.f32 %v4471_v4, %v4470_v28  ;;  %v4373_v5 = vadd.f32 %v4372_v49, %v4371_v58  ;;  %v4269_v47 = vld [vmem:[#allocation2 + $0x58] sm:$0xff]  ;;  %4238 = vst.msk [vmem:[#allocation2 + $0x60] sm:$0xff] %vm282_vm1, %v4206_v23  ;;  %3792 = vst.msk [vmem:[#allocation2 + $0x90] sm:$0xff] %vm282_vm1, %v3760_v62  ;;  %v3763_v37 = vadd.f32 %v16683_v9, %v3731_v56  ;;  %v19672_v31 = vld [vmem:[%s17837_s10 + $0x225] sm:$0xff] }
 0x1e4   : > { %16984 = vmatprep.mubr.msk.f32.mxu1 %vm282_vm1, %v19640_v55  ;;  %4335 = vst.msk [vmem:[%s19533_s14 + $0x40] sm:$0xff] %vm282_vm1, %v4303_v61  ;;  %v4374_v21 = vsel %vm282_vm1, %v4303_v61, 0.0  ;;  %v4436_v40 = vmul.f32 %v4303_v61, %v4303_v61  ;;  %v4306_v13 = vadd.f32 %v19504_v43, %v4269_v47  ;;  %v3651_v24 = vpop.f32.mrf.mxu1  ;;  %v19674_v46 = vpop.f32.mrf.mxu0  ;;  %4241 = vst.msk [vmem:[#allocation2 + $0x78] sm:$0xff] %vm282_vm1, %v4209_v32  ;;  %v4376_v14 = vsel %vm282_vm1, %v4304_v17, 0.0  ;;  %v14603_v16 = vld [vmem:[%s17837_s10 + $0x228] sm:$0xff]  ;;  %v3732_v23 = vld [vmem:[#allocation2 + $0xb0] sm:$0xff] }
 0x1e5   : > { %17032 = vmatmul.mubr.msk.f32.gmra.mxu0 %vm282_vm1, %v14600_v11  ;;  %v4375_v60 = vadd.f32 %v4374_v21, %v4373_v5  ;;  %v4474_v26 = vadd.f32 %v4473_v0, %v4472_v27  ;;  %v4268_v38 = vld [vmem:[#allocation2 + $0x50] sm:$0xff]  ;;  %v4208_v57 = vadd.f32 %v4176_v30, %v19599_v22  ;;  %3795 = vst.msk [vmem:[#allocation2 + $0xa8] sm:$0xff] %vm282_vm1, %v3763_v37  ;;  %v4179_v1 = vld [vmem:[#allocation2 + $0x88] sm:$0xff]  ;;  %v4477_v8 = vsel %vm282_vm1, %v4437_v7, 0.0 }
 0x1e6   : > { %v3762_v10 = vadd.f32 %v3730_v45, %v3651_v24  ;;  %17034 = vmatprep.mubr.msk.f32.mxu0 %vm282_vm1, %v14601_v41  ;;  %v4475_v33 = vsel %vm282_vm1, %v4436_v40, 0.0  ;;  %4338 = vst.msk [vmem:[%s19533_s14 + $0x58] sm:$0xff] %vm282_vm1, %v4306_v13  ;;  %v4305_v15 = vadd.f32 %v19504_v43, %v4268_v38  ;;  %v4178_v22 = vld [vmem:[#allocation2 + $0x80] sm:$0xff]  ;;  %v16686_v53 = vpop.f32.mrf.mxu1  ;;  %v19690_v35 = vpop.f32.mrf.mxu0  ;;  %v4211_v12 = vadd.f32 %v19611_v59, %v4179_v1  ;;  %v19700_v2 = vld [vmem:[%s17837_s10 + $0x22d] sm:$0xff]  ;;  %v3733_v59 = vld [vmem:[#allocation2 + $0xb8] sm:$0xff] }
 0x1e7   : > { %16985 = vmatmul.mubr.msk.f32.gmra.mxu1 %vm282_vm1, %v19664_v29  ;;  %v4476_v18 = vadd.f32 %v4475_v33, %v4474_v26  ;;  %v4377_v54 = vadd.f32 %v4376_v14, %v4375_v60  ;;  %4240 = vst.msk [vmem:[#allocation2 + $0x70] sm:$0xff] %vm282_vm1, %v4208_v57  ;;  %v4210_v63 = vadd.f32 %v4178_v22, %v19627_v51  ;;  %v19709_v51 = vld [vmem:[%s17837_s10 + $0x245] sm:$0xff]  ;;  %v14604_v44 = vld [vmem:[%s17837_s10 + $0x230] sm:$0xff]  ;;  %v4380_v62 = vsel %vm282_vm1, %v4306_v13, 0.0 }
 0x1e8   : > { %v4271_v52 = vld [vmem:[#allocation2 + $0x68] sm:$0xff]  ;;  %3794 = vst.msk [vmem:[#allocation2 + $0xa0] sm:$0xff] %vm282_vm1, %v3762_v10  ;;  %16987 = vmatprep.mubr.msk.f32.mxu1 %vm282_vm1, %v19672_v31  ;;  %v4439_v42 = vmul.f32 %v4306_v13, %v4306_v13  ;;  %4337 = vst.msk [vmem:[%s19533_s14 + $0x50] sm:$0xff] %vm282_vm1, %v4305_v15  ;;  %v4378_v20 = vsel %vm282_vm1, %v4305_v15, 0.0  ;;  %v4438_v48 = vmul.f32 %v4305_v15, %v4305_v15  ;;  %v4181_v6 = vld [vmem:[#allocation2 + $0x98] sm:$0xff]  ;;  %v3661_v28 = vpop.f32.mrf.mxu1  ;;  %v19711_v17 = vpop.f32.mrf.mxu0 }
 0x1e9   : > { %v19706_v25 = vadd.f32 %v19504_v43, %v4271_v52  ;;  %17035 = vmatmul.mubr.msk.f32.gmra.mxu0 %vm282_vm1, %v14602_v34  ;;  %v4379_v3 = vadd.f32 %v4378_v20, %v4377_v54  ;;  %v4478_v19 = vadd.f32 %v4477_v8, %v4476_v18  ;;  %4243 = vst.msk [vmem:[#allocation2 + $0x88] sm:$0xff] %vm282_vm1, %v4211_v12  ;;  %4242 = vst.msk [vmem:[#allocation2 + $0x80] sm:$0xff] %vm282_vm1, %v4210_v63  ;;  %v14605_v56 = vld [vmem:[%s17837_s10 + $0x248] sm:$0xff]  ;;  %v3734_v57 = vld [vmem:[#allocation2 + $0xc0] sm:$0xff] }
 0x1ea   : > { %v3765_v58 = vadd.f32 %v16686_v53, %v3733_v59  ;;  %v4213_v39 = vadd.f32 %v19642_v36, %v4181_v6  ;;  %17037 = vmatprep.mubr.msk.f32.mxu0 %vm282_vm1, %v14603_v16  ;;  %v4479_v11 = vsel %vm282_vm1, %v4438_v48, 0.0  ;;  %v4270_v4 = vld [vmem:[#allocation2 + $0x60] sm:$0xff]  ;;  %v3764_v7 = vadd.f32 %v3732_v23, %v3661_v28  ;;  %v4180_v61 = vld [vmem:[#allocation2 + $0x90] sm:$0xff]  ;;  %v16689_v9 = vpop.f32.mrf.mxu1  ;;  %v19728_v36 = vpop.f32.mrf.mxu0  ;;  %v3735_v32 = vld [vmem:[#allocation2 + $0xc8] sm:$0xff] }
 0x1eb   : > { %4340 = vst.msk [vmem:[%s19533_s14 + $0x68] sm:$0xff] %vm282_vm1, %v19706_v25  ;;  %v4441_v49 = vmul.f32 %v19706_v25, %v19706_v25  ;;  %16988 = vmatmul.mubr.msk.f32.gmra.mxu1 %vm282_vm1, %v19700_v2  ;;  %v4480_v41 = vadd.f32 %v4479_v11, %v4478_v19  ;;  %v4307_v27 = vadd.f32 %v19504_v43, %v4270_v4  ;;  %v19738_v30 = vld [vmem:[%s17837_s10 + $0x24d] sm:$0xff]  ;;  %v4481_v37 = vsel %vm282_vm1, %v4439_v42, 0.0  ;;  %v4273_v0 = vld [vmem:[#allocation2 + $0x78] sm:$0xff]  ;;  %v19743_v24 = vld [vmem:[%s17837_s10 + $0x265] sm:$0xff] }
 0x1ec   : > { %v4381_v5 = vadd.f32 %v4380_v62, %v4379_v3  ;;  %3797 = vst.msk [vmem:[#allocation2 + $0xb8] sm:$0xff] %vm282_vm1, %v3765_v58  ;;  %4245 = vst.msk [vmem:[#allocation2 + $0x98] sm:$0xff] %vm282_vm1, %v4213_v39  ;;  %v4212_v47 = vadd.f32 %v4180_v61, %v19655_v50  ;;  %16990 = vmatprep.mubr.msk.f32.mxu1 %vm282_vm1, %v19709_v51  ;;  %v3767_v21 = vadd.f32 %v16689_v9, %v3735_v32  ;;  %v4183_v40 = vld [vmem:[#allocation2 + $0xa8] sm:$0xff]  ;;  %v3671_v13 = vpop.f32.mrf.mxu1  ;;  %v19745_v45 = vpop.f32.mrf.mxu0  ;;  %v14606_v1 = vld [vmem:[%s17837_s10 + $0x250] sm:$0xff] }
 0x1ed   : > { %3796 = vst.msk [vmem:[#allocation2 + $0xb0] sm:$0xff] %vm282_vm1, %v3764_v7  ;;  %17038 = vmatmul.mubr.msk.f32.gmra.mxu0 %vm282_vm1, %v14604_v44  ;;  %4339 = vst.msk [vmem:[%s19533_s14 + $0x60] sm:$0xff] %vm282_vm1, %v4307_v27  ;;  %v4382_v50 = vsel %vm282_vm1, %v4307_v27, 0.0  ;;  %v4440_v60 = vmul.f32 %v4307_v27, %v4307_v27  ;;  %v4482_v26 = vadd.f32 %v4481_v37, %v4480_v41  ;;  %v14607_v53 = vld [vmem:[%s17837_s10 + $0x268] sm:$0xff]  ;;  %v4384_v16 = vsel %vm282_vm1, %v19706_v25, 0.0  ;;  %v3737_v52 = vld [vmem:[#allocation2 + $0xd8] sm:$0xff] }
 0x1ee   : > { %v4310_v38 = vadd.f32 %v19504_v43, %v4273_v0  ;;  %4244 = vst.msk [vmem:[#allocation2 + $0x90] sm:$0xff] %vm282_vm1, %v4212_v47  ;;  %17040 = vmatprep.mubr.msk.f32.mxu0 %vm282_vm1, %v14605_v56  ;;  %v4383_v10 = vadd.f32 %v4382_v50, %v4381_v5  ;;  %v4272_v34 = vld [vmem:[#allocation2 + $0x70] sm:$0xff]  ;;  %3799 = vst.msk [vmem:[#allocation2 + $0xc8] sm:$0xff] %vm282_vm1, %v3767_v21  ;;  %v4215_v14 = vadd.f32 %v19674_v46, %v4183_v40  ;;  %v16692_v15 = vpop.f32.mrf.mxu1  ;;  %v19759_v22 = vpop.f32.mrf.mxu0  ;;  %v19778_v28 = vld [vmem:[%s17837_s10 + $0x285] sm:$0xff] }
 0x1ef   : > { %v3766_v8 = vadd.f32 %v3734_v57, %v3671_v13  ;;  %v4182_v33 = vld [vmem:[#allocation2 + $0xa0] sm:$0xff]  ;;  %16991 = vmatmul.mubr.msk.f32.gmra.mxu1 %vm282_vm1, %v19738_v30  ;;  %v4485_v18 = vsel %vm282_vm1, %v4441_v49, 0.0  ;;  %v4483_v54 = vsel %vm282_vm1, %v4440_v60, 0.0  ;;  %v4309_v46 = vadd.f32 %v19504_v43, %v4272_v34  ;;  %v19772_v12 = vld [vmem:[%s17837_s10 + $0x26d] sm:$0xff] }
 0x1f0   : > { %4342 = vst.msk [vmem:[%s19533_s14 + $0x78] sm:$0xff] %vm282_vm1, %v4310_v38  ;;  %16993 = vmatprep.mubr.msk.f32.mxu1 %vm282_vm1, %v19743_v24  ;;  %v4484_v63 = vadd.f32 %v4483_v54, %v4482_v26  ;;  %v4385_v42 = vadd.f32 %v4384_v16, %v4383_v10  ;;  %v4275_v20 = vld [vmem:[#allocation2 + $0x88] sm:$0xff]  ;;  %v4274_v48 = vld [vmem:[#allocation2 + $0x80] sm:$0xff]  ;;  %4247 = vst.msk [vmem:[#allocation2 + $0xa8] sm:$0xff] %vm282_vm1, %v4215_v14  ;;  %v4214_v25 = vadd.f32 %v4182_v33, %v19690_v35  ;;  %v3681_v6 = vpop.f32.mrf.mxu1  ;;  %v19780_v3 = vpop.f32.mrf.mxu0 }
 0x1f1   : > { %3798 = vst.msk [vmem:[#allocation2 + $0xc0] sm:$0xff] %vm282_vm1, %v3766_v8  ;;  %v3769_v59 = vadd.f32 %v16692_v15, %v3737_v52  ;;  %17041 = vmatmul.mubr.msk.f32.gmra.mxu0 %vm282_vm1, %v14606_v1  ;;  %v4443_v19 = vmul.f32 %v4310_v38, %v4310_v38  ;;  %4341 = vst.msk [vmem:[%s19533_s14 + $0x70] sm:$0xff] %vm282_vm1, %v4309_v46  ;;  %v4386_v58 = vsel %vm282_vm1, %v4309_v46, 0.0  ;;  %v3736_v44 = vld [vmem:[#allocation2 + $0xd0] sm:$0xff]  ;;  %v14609_v56 = vld [vmem:[%s17837_s10 + $0x288] sm:$0xff]  ;;  %v4388_v41 = vsel %vm282_vm1, %v4310_v38, 0.0 }
 0x1f2   : > { %v4442_v39 = vmul.f32 %v4309_v46, %v4309_v46  ;;  %v4312_v23 = vadd.f32 %v19504_v43, %v4275_v20  ;;  %17043 = vmatprep.mubr.msk.f32.mxu0 %vm282_vm1, %v14607_v53  ;;  %v14608_v35 = vld [vmem:[%s17837_s10 + $0x270] sm:$0xff]  ;;  %v4387_v62 = vadd.f32 %v4386_v58, %v4385_v42  ;;  %v4486_v11 = vadd.f32 %v4485_v18, %v4484_v63  ;;  %v16695_v61 = vpop.f32.mrf.mxu1  ;;  %v19794_v9 = vpop.f32.mrf.mxu0  ;;  %v14644_v38 = vld [vmem:[%s17837_s10 + $0x102] sm:$0xff] }
 0x1f3   : > { %v4311_v49 = vadd.f32 %v19504_v43, %v4274_v48  ;;  %v4277_v4 = vld [vmem:[#allocation2 + $0x98] sm:$0xff]  ;;  %4246 = vst.msk [vmem:[#allocation2 + $0xa0] sm:$0xff] %vm282_vm1, %v4214_v25  ;;  %3801 = vst.msk [vmem:[#allocation2 + $0xd8] sm:$0xff] %vm282_vm1, %v3769_v59  ;;  %v3768_v7 = vadd.f32 %v3736_v44, %v3681_v6  ;;  %16994 = vmatmul.mubr.msk.f32.gmra.mxu1 %vm282_vm1, %v19772_v12  ;;  %v19805_v37 = vld [vmem:[%s17837_s10 + $0x28d] sm:$0xff]  ;;  %v4489_v1 = vsel %vm282_vm1, %v4443_v19, 0.0 }
 0x1f4   : > { %v4487_v27 = vsel %vm282_vm1, %v4442_v39, 0.0  ;;  %4344 = vst.msk [vmem:[%s19533_s14 + $0x88] sm:$0xff] %vm282_vm1, %v4312_v23  ;;  %v4445_v5 = vmul.f32 %v4312_v23, %v4312_v23  ;;  %v4314_v47 = vadd.f32 %v19504_v43, %v4277_v4  ;;  %v4185_v32 = vld [vmem:[#allocation2 + $0xb8] sm:$0xff]  ;;  %16996 = vmatprep.mubr.msk.f32.mxu1 %vm282_vm1, %v19778_v28  ;;  %v4389_v21 = vadd.f32 %v4388_v41, %v4387_v62  ;;  %v4184_v60 = vld [vmem:[#allocation2 + $0xb0] sm:$0xff]  ;;  %v3691_v26 = vpop.f32.mrf.mxu1  ;;  %v19812_v57 = vpop.f32.mrf.mxu0  ;;  %v14709_v63 = vld [vmem:[%s17837_s10 + $0x105] sm:$0xff] }
 0x1f5   : > { %v4488_v0 = vadd.f32 %v4487_v27, %v4486_v11  ;;  %4343 = vst.msk [vmem:[%s19533_s14 + $0x80] sm:$0xff] %vm282_vm1, %v4311_v49  ;;  %v4390_v40 = vsel %vm282_vm1, %v4311_v49, 0.0  ;;  %v4444_v13 = vmul.f32 %v4311_v49, %v4311_v49  ;;  %v4276_v50 = vld [vmem:[#allocation2 + $0x90] sm:$0xff]  ;;  %3800 = vst.msk [vmem:[#allocation2 + $0xd0] sm:$0xff] %vm282_vm1, %v3768_v7  ;;  %17044 = vmatmul.mubr.msk.f32.gmra.mxu0 %vm282_vm1, %v14608_v35  ;;  %v4392_v10 = vsel %vm282_vm1, %v4312_v23, 0.0  ;;  %v4187_v18 = vld [vmem:[#allocation2 + $0xc8] sm:$0xff] }
 0x1f6   : > { %v4493_v34 = vsel %vm282_vm1, %v4445_v5, 0.0  ;;  %4346 = vst.msk [vmem:[%s19533_s14 + $0x98] sm:$0xff] %vm282_vm1, %v4314_v47  ;;  %v4313_v14 = vadd.f32 %v19504_v43, %v4276_v50  ;;  %17046 = vmatprep.mubr.msk.f32.mxu0 %vm282_vm1, %v14609_v56  ;;  %v14610_v8 = vld [vmem:[%s17837_s10 + $0x290] sm:$0xff]  ;;  %v4391_v33 = vadd.f32 %v4390_v40, %v4389_v21  ;;  %v4217_v16 = vadd.f32 %v19711_v17, %v4185_v32  ;;  %v16698_v54 = vpop.f32.mrf.mxu1  ;;  %v19828_v52 = vpop.f32.mrf.mxu0  ;;  %v3739_v17 = vld [vmem:[#allocation2 + $0xe8] sm:$0xff]  ;;  %v3738_v44 = vld [vmem:[#allocation2 + $0xe0] sm:$0xff] }
 0x1f7   : > { %v4490_v15 = vadd.f32 %v4489_v1, %v4488_v0  ;;  %v4491_v53 = vsel %vm282_vm1, %v4444_v13, 0.0  ;;  %16997 = vmatmul.mubr.msk.f32.gmra.mxu1 %vm282_vm1, %v19805_v37  ;;  %v14645_v46 = vld [vmem:[%s17837_s10 + $0x10a] sm:$0xff]  ;;  %v4447_v42 = vmul.f32 %v4314_v47, %v4314_v47  ;;  %v4216_v59 = vadd.f32 %v4184_v60, %v19728_v36  ;;  %v14646_v62 = vld [vmem:[%s17837_s10 + $0x122] sm:$0xff]  ;;  %v3741_v0 = vld [vmem:[#allocation2 + $0xf8] sm:$0xff] }
 0x1f8   : > { %4345 = vst.msk [vmem:[%s19533_s14 + $0x90] sm:$0xff] %vm282_vm1, %v4313_v14  ;;  %v4394_v20 = vsel %vm282_vm1, %v4313_v14, 0.0  ;;  %v4446_v48 = vmul.f32 %v4313_v14, %v4313_v14  ;;  %v4279_v25 = vld [vmem:[#allocation2 + $0xa8] sm:$0xff]  ;;  %v4186_v6 = vld [vmem:[#allocation2 + $0xc0] sm:$0xff]  ;;  %17051 = vmatprep.mubr.msk.f32.mxu1 %vm282_vm1, %v14644_v38  ;;  %v4393_v58 = vadd.f32 %v4392_v10, %v4391_v33  ;;  %4249 = vst.msk [vmem:[#allocation2 + $0xb8] sm:$0xff] %vm282_vm1, %v4217_v16  ;;  %v3701_v35 = vpop.f32.mrf.mxu1  ;;  %v19841_v11 = vpop.f32.mrf.mxu0  ;;  %v4396_v27 = vsel %vm282_vm1, %v4314_v47, 0.0 }
 0x1f9   : > { %v4492_v19 = vadd.f32 %v4491_v53, %v4490_v15  ;;  %v19837_v39 = vadd.f32 %v19504_v43, %v4279_v25  ;;  %v3771_v23 = vadd.f32 %v16695_v61, %v3739_v17  ;;  %17047 = vmatmul.mubr.msk.f32.gmra.mxu0 %vm282_vm1, %v14610_v8  ;;  %4248 = vst.msk [vmem:[#allocation2 + $0xb0] sm:$0xff] %vm282_vm1, %v4216_v59  ;;  %v14710_v41 = vld [vmem:[%s17837_s10 + $0x10d] sm:$0xff]  ;;  %v14711_v40 = vld [vmem:[%s17837_s10 + $0x125] sm:$0xff]  ;;  %v4497_v16 = vsel %vm282_vm1, %v4447_v42, 0.0 }
 0x1fa   : > { %v4495_v36 = vsel %vm282_vm1, %v4446_v48, 0.0  ;;  %v4278_v49 = vld [vmem:[#allocation2 + $0xa0] sm:$0xff]  ;;  %v4219_v4 = vadd.f32 %v19745_v45, %v4187_v18  ;;  %v3770_v7 = vadd.f32 %v3738_v44, %v3691_v26  ;;  %v4218_v56 = vadd.f32 %v4186_v6, %v19759_v22  ;;  %v4189_v61 = vld [vmem:[#allocation2 + $0xd8] sm:$0xff]  ;;  %17101 = vmatprep.mubr.msk.f32.mxu0 %vm282_vm1, %v14709_v63  ;;  %v3740_v21 = vld [vmem:[#allocation2 + $0xf0] sm:$0xff]  ;;  %v16753_v45 = vpop.f32.mrf.mxu1  ;;  %v19856_v22 = vpop.f32.mrf.mxu0 }
 0x1fb   : > { %v4395_v5 = vadd.f32 %v4394_v20, %v4393_v58  ;;  %v4494_v32 = vadd.f32 %v4493_v34, %v4492_v19  ;;  %4348 = vst.msk [vmem:[%s19533_s14 + $0xa8] sm:$0xff] %vm282_vm1, %v19837_v39  ;;  %3803 = vst.msk [vmem:[#allocation2 + $0xe8] sm:$0xff] %vm282_vm1, %v3771_v23  ;;  %17052 = vmatmul.mubr.msk.f32.vlgmr.msra.gmra.mxu1 %vm282_vm1, %v14645_v46  ;;  %v4315_v13 = vadd.f32 %v19504_v43, %v4278_v49  ;;  %v17693_v38 = vld [vmem:[%s22301_s1 + $0x44] sm:$0xf]  ;;  %v14647_v1 = vld [vmem:[%s17837_s10 + $0x12a] sm:$0xff] }
 0x1fc   : > { %4251 = vst.msk [vmem:[#allocation2 + $0xc8] sm:$0xff] %vm282_vm1, %v4219_v4  ;;  %3802 = vst.msk [vmem:[#allocation2 + $0xe0] sm:$0xff] %vm282_vm1, %v3770_v7  ;;  %v3773_v47 = vadd.f32 %v16698_v54, %v3741_v0  ;;  %v4221_v50 = vadd.f32 %v19780_v3, %v4189_v61  ;;  %v3772_v60 = vadd.f32 %v3740_v21, %v3701_v35  ;;  %v4188_v26 = vld [vmem:[#allocation2 + $0xd0] sm:$0xff]  ;;  %17150 = vmatpush3.msk.msra.mxu1 %vm379_vm0, %v17693_v38  ;;  %v19873_v10 = vld [vmem:[%s22301_s1 + $0x4c] sm:$0xf]  ;;  %v4737_v8 = vpop.f32.mrf.mxu1  ;;  %v19878_v15 = vpop.f32.mrf.mxu0 }
 0x1fd   : > { %4250 = vst.msk [vmem:[#allocation2 + $0xc0] sm:$0xff] %vm282_vm1, %v4218_v56  ;;  %4897 = vst.msk [vmem:[#allocation2 + $0x8] sm:$0xff] %vm282_vm1, %v16753_v45  ;;  %v4496_v34 = vadd.f32 %v4495_v36, %v4494_v32  ;;  %v4397_v14 = vadd.f32 %v4396_v27, %v4395_v5  ;;  %v4220_v3 = vadd.f32 %v4188_v26, %v19794_v9  ;;  %17054 = vmatprep.mubr.msk.f32.mxu1 %vm282_vm1, %v14646_v62  ;;  %v14648_v33 = vld [vmem:[%s17837_s10 + $0x142] sm:$0xff]  ;;  %v19884_v53 = vld [vmem:[%s22301_s1 + $0x50] sm:$0xf] }
 0x1fe   : > { %17102 = vmatmul.mubr.msk.f32.vlgmr.msra.gmra.mxu0 %vm282_vm1, %v14710_v41  ;;  %v4449_v18 = vmul.f32 %v19837_v39, %v19837_v39  ;;  %4347 = vst.msk [vmem:[%s19533_s14 + $0xa0] sm:$0xff] %vm282_vm1, %v4315_v13  ;;  %v4398_v9 = vsel %vm282_vm1, %v4315_v13, 0.0  ;;  %v4448_v54 = vmul.f32 %v4315_v13, %v4315_v13  ;;  %3805 = vst.msk [vmem:[#allocation2 + $0xf8] sm:$0xff] %vm282_vm1, %v3773_v47  ;;  %v17694_v46 = vld [vmem:[%s22301_s1 + $0x48] sm:$0xf]  ;;  %v14712_v63 = vld [vmem:[%s17837_s10 + $0x12d] sm:$0xff]  ;;  %v16756_v48 = vpop.f32.mrf.mxu1  ;;  %v19904_v25 = vpop.f32.mrf.mxu0  ;;  %17249 = vmatprep.subr.msk.mxu1 %vm379_vm0, %v19873_v10 }
 0x1ff   : > { %4253 = vst.msk [vmem:[#allocation2 + $0xd8] sm:$0xff] %vm282_vm1, %v4221_v50  ;;  %3804 = vst.msk [vmem:[#allocation2 + $0xf0] sm:$0xff] %vm282_vm1, %v3772_v60  ;;  %17200 = vmatpush3.msk.msra.mxu0 %vm379_vm0, %v17694_v46  ;;  %17104 = vmatprep.mubr.msk.f32.mxu0 %vm282_vm1, %v14711_v40  ;;  %v4399_v42 = vadd.f32 %v4398_v9, %v4397_v14  ;;  %v4498_v20 = vadd.f32 %v4497_v16, %v4496_v34  ;;  %v14713_v59 = vld [vmem:[%s17837_s10 + $0x145] sm:$0xff]  ;;  %v4400_v17 = vsel %vm282_vm1, %v19837_v39, 0.0  ;;  %v4281_v19 = vld [vmem:[#allocation2 + $0xb8] sm:$0xff] }
 0x200   : > { %4896 = vst.msk [vmem:[#allocation2] sm:$0xff] %vm282_vm1, %v4737_v8  ;;  %4252 = vst.msk [vmem:[#allocation2 + $0xd0] sm:$0xff] %vm282_vm1, %v4220_v3  ;;  %17055 = vmatmul.mubr.msk.f32.gmra.mxu1 %vm282_vm1, %v14647_v1  ;;  %v4499_v6 = vsel %vm282_vm1, %v4448_v54, 0.0  ;;  %v14649_v58 = vld [vmem:[%s17837_s10 + $0x14a] sm:$0xff]  ;;  %17299 = vmatprep.subr.msk.mxu0 %vm379_vm0, %v19884_v53  ;;  %v4318_v44 = vadd.f32 %v19504_v43, %v4281_v19  ;;  %v4747_v39 = vpop.f32.mrf.mxu1  ;;  %v14650_v36 = vld [vmem:[%s17837_s10 + $0x162] sm:$0xff]  ;;  %v19919_v49 = vpop.f32.mrf.mxu0  ;;  %v4501_v4 = vsel %vm282_vm1, %v4449_v18, 0.0 }
 0x201   : > { %4899 = vst.msk [vmem:[#allocation2 + $0x18] sm:$0xff] %vm282_vm1, %v16756_v48  ;;  %17057 = vmatprep.mubr.msk.f32.mxu1 %vm282_vm1, %v14648_v33  ;;  %v4500_v23 = vadd.f32 %v4499_v6, %v4498_v20  ;;  %v4280_v35 = vld [vmem:[#allocation2 + $0xb0] sm:$0xff]  ;;  %v4401_v62 = vadd.f32 %v4400_v17, %v4399_v42  ;;  %4898 = vst.msk [vmem:[#allocation2 + $0x10] sm:$0xff] %vm282_vm1, %v4747_v39  ;;  %v14715_v41 = vld [vmem:[%s17837_s10 + $0x165] sm:$0xff] }
 0x202   : > { %17105 = vmatmul.mubr.msk.f32.gmra.mxu0 %vm282_vm1, %v14712_v63  ;;  %v4317_v7 = vadd.f32 %v19504_v43, %v4280_v35  ;;  %v4191_v56 = vld [vmem:[#allocation2 + $0xe8] sm:$0xff]  ;;  %4350 = vst.msk [vmem:[%s19533_s14 + $0xb8] sm:$0xff] %vm282_vm1, %v4318_v44  ;;  %v4451_v27 = vmul.f32 %v4318_v44, %v4318_v44  ;;  %v16759_v40 = vpop.f32.mrf.mxu1  ;;  %v19932_v13 = vpop.f32.mrf.mxu0  ;;  %v4404_v9 = vsel %vm282_vm1, %v4318_v44, 0.0  ;;  %v19962_v48 = vld [vmem:[%s22302_s2] ss:$0 sm:$0xff] }
 0x203   : > { %17107 = vmatprep.mubr.msk.f32.mxu0 %vm282_vm1, %v14713_v59  ;;  %v14714_v61 = vld [vmem:[%s17837_s10 + $0x14d] sm:$0xff]  ;;  %v4502_v5 = vadd.f32 %v4501_v4, %v4500_v23  ;;  %v4223_v21 = vadd.f32 %v19812_v57, %v4191_v56  ;;  %v4190_v45 = vld [vmem:[#allocation2 + $0xe0] sm:$0xff]  ;;  %4901 = vst.msk [vmem:[#allocation2 + $0x28] sm:$0xff] %vm282_vm1, %v16759_v40 }
 0x204   : > { %v4283_v32 = vld [vmem:[#allocation2 + $0xc8] sm:$0xff]  ;;  %v4282_v0 = vld [vmem:[#allocation2 + $0xc0] sm:$0xff]  ;;  %17058 = vmatmul.mubr.msk.f32.gmra.mxu1 %vm282_vm1, %v14649_v58  ;;  %4349 = vst.msk [vmem:[%s19533_s14 + $0xb0] sm:$0xff] %vm282_vm1, %v4317_v7  ;;  %v4402_v47 = vsel %vm282_vm1, %v4317_v7, 0.0  ;;  %v4450_v50 = vmul.f32 %v4317_v7, %v4317_v7  ;;  %v4222_v3 = vadd.f32 %v4190_v45, %v19828_v52  ;;  %v19946_v18 = vpop.f32.mrf.mxu0  ;;  %v4505_v54 = vsel %vm282_vm1, %v4451_v27, 0.0 }
 0x205   : > { %v4320_v60 = vadd.f32 %v19504_v43, %v4283_v32  ;;  %v4319_v26 = vadd.f32 %v19504_v43, %v4282_v0  ;;  %v5285_v38 = vld [vmem:[#allocation2 + $0x8] sm:$0xff]  ;;  %17060 = vmatprep.mubr.msk.f32.mxu1 %vm282_vm1, %v14650_v36  ;;  %v4403_v34 = vadd.f32 %v4402_v47, %v4401_v62  ;;  %4255 = vst.msk [vmem:[#allocation2 + $0xe8] sm:$0xff] %vm282_vm1, %v4223_v21  ;;  %v4193_v8 = vld [vmem:[#allocation2 + $0xf8] sm:$0xff]  ;;  %v4757_v43 = vpop.f32.mrf.mxu1 }
 0x206   : > { %v14651_v57 = vld [vmem:[%s17837_s10 + $0x16a] sm:$0xff]  ;;  %v14652_v1 = vld [vmem:[%s17837_s10 + $0x182] sm:$0xff]  ;;  %v4285_v14 = vld [vmem:[#allocation2 + $0xd8] sm:$0xff]  ;;  %v5317_v16 = vadd.f32 %v19878_v15, %v5285_v38  ;;  %17108 = vmatmul.mubr.msk.f32.gmra.mxu0 %vm282_vm1, %v14714_v61  ;;  %v4503_v46 = vsel %vm282_vm1, %v4450_v50, 0.0  ;;  %4900 = vst.msk [vmem:[#allocation2 + $0x20] sm:$0xff] %vm282_vm1, %v4757_v43  ;;  %v5145_v19 = vpop.f32.mrf.mxu0  ;;  %v4225_v44 = vadd.f32 %v19841_v11, %v4193_v8 }
 0x207   : > { %v4192_v33 = vld [vmem:[#allocation2 + $0xf0] sm:$0xff]  ;;  %4352 = vst.msk [vmem:[%s19533_s14 + $0xc8] sm:$0xff] %vm282_vm1, %v4320_v60  ;;  %4351 = vst.msk [vmem:[%s19533_s14 + $0xc0] sm:$0xff] %vm282_vm1, %v4319_v26  ;;  %v4406_v52 = vsel %vm282_vm1, %v4319_v26, 0.0  ;;  %17110 = vmatprep.mubr.msk.f32.mxu0 %vm282_vm1, %v14715_v41  ;;  %v4504_v15 = vadd.f32 %v4503_v46, %v4502_v5  ;;  %v4405_v42 = vadd.f32 %v4404_v9, %v4403_v34  ;;  %v5284_v17 = vld [vmem:[#allocation2] sm:$0xff]  ;;  %v16762_v6 = vpop.f32.mrf.mxu1  ;;  %v4408_v27 = vsel %vm282_vm1, %v4320_v60, 0.0 }
 0x208   : > { %v4284_v63 = vld [vmem:[#allocation2 + $0xd0] sm:$0xff]  ;;  %v4452_v20 = vmul.f32 %v4319_v26, %v4319_v26  ;;  %v19965_v59 = vadd.f32 %v19962_v48, %v4285_v14  ;;  %4254 = vst.msk [vmem:[#allocation2 + $0xe0] sm:$0xff] %vm282_vm1, %v4222_v3  ;;  %5349 = vst.msk [vmem:[#allocation2 + $0x8] sm:$0xff] %vm282_vm1, %v5317_v16  ;;  %17061 = vmatmul.mubr.msk.f32.gmra.mxu1 %vm282_vm1, %v14651_v57  ;;  %v4453_v58 = vmul.f32 %v4320_v60, %v4320_v60  ;;  %v5287_v62 = vld [vmem:[#allocation2 + $0x18] sm:$0xff]  ;;  %v16812_v41 = vpop.f32.mrf.mxu0 }
 0x209   : > { %v4321_v23 = vadd.f32 %v19962_v48, %v4284_v63  ;;  %v4224_v35 = vadd.f32 %v4192_v33, %v19856_v22  ;;  %4903 = vst.msk [vmem:[#allocation2 + $0x38] sm:$0xff] %vm282_vm1, %v16762_v6  ;;  %17063 = vmatprep.mubr.msk.f32.mxu1 %vm282_vm1, %v14652_v1  ;;  %v14653_v39 = vld [vmem:[%s17837_s10 + $0x18a] sm:$0xff]  ;;  %v4407_v36 = vadd.f32 %v4406_v52, %v4405_v42  ;;  %v4767_v56 = vpop.f32.mrf.mxu1  ;;  %v14654_v11 = vld [vmem:[%s17837_s10 + $0x1a2] sm:$0xff]  ;;  %4257 = vst.msk [vmem:[#allocation2 + $0xf8] sm:$0xff] %vm282_vm1, %v4225_v44 }
 0x20a   : > { %v4506_v4 = vadd.f32 %v4505_v54, %v4504_v15  ;;  %v4507_v7 = vsel %vm282_vm1, %v4452_v20, 0.0  ;;  %4354 = vst.msk [vmem:[%s19533_s14 + $0xd8] sm:$0xff] %vm282_vm1, %v19965_v59  ;;  %v5286_v61 = vld [vmem:[#allocation2 + $0x10] sm:$0xff]  ;;  %v5316_v0 = vadd.f32 %v5284_v17, %v19904_v25  ;;  %4902 = vst.msk [vmem:[#allocation2 + $0x30] sm:$0xff] %vm282_vm1, %v4767_v56  ;;  %v17697_v21 = vld [vmem:[%s17837_s10 + $0x185] sm:$0xff]  ;;  %v5319_v47 = vadd.f32 %v19919_v49, %v5287_v62  ;;  %v5155_v38 = vpop.f32.mrf.mxu0 }
 0x20b   : > { %v17696_v22 = vld [vmem:[%s17837_s10 + $0x16d] sm:$0xff]  ;;  %4353 = vst.msk [vmem:[%s19533_s14 + $0xd0] sm:$0xff] %vm282_vm1, %v4321_v23  ;;  %v4410_v5 = vsel %vm282_vm1, %v4321_v23, 0.0  ;;  %v4454_v32 = vmul.f32 %v4321_v23, %v4321_v23  ;;  %4256 = vst.msk [vmem:[#allocation2 + $0xf0] sm:$0xff] %vm282_vm1, %v4224_v35  ;;  %v4409_v40 = vadd.f32 %v4408_v27, %v4407_v36  ;;  %v5318_v50 = vadd.f32 %v5286_v61, %v19932_v13  ;;  %v16765_v60 = vpop.f32.mrf.mxu1  ;;  %v14656_v16 = vld [vmem:[%s17837_s10 + $0x1c2] sm:$0xff] }
 0x20c   : > { %17111 = vmatmul.mubr.msk.f32.gmra.mxu0 %vm282_vm1, %v17696_v22  ;;  %v4508_v45 = vadd.f32 %v4507_v7, %v4506_v4  ;;  %v5289_v26 = vld [vmem:[#allocation2 + $0x28] sm:$0xff]  ;;  %17064 = vmatmul.mubr.msk.f32.gmra.mxu1 %vm282_vm1, %v14653_v39  ;;  %v4509_v25 = vsel %vm282_vm1, %v4453_v58, 0.0  ;;  %v4455_v57 = vmul.f32 %v19965_v59, %v19965_v59  ;;  %5348 = vst.msk [vmem:[#allocation2] sm:$0xff] %vm282_vm1, %v5316_v0  ;;  %4905 = vst.msk [vmem:[#allocation2 + $0x48] sm:$0xff] %vm282_vm1, %v16765_v60  ;;  %v16815_v43 = vpop.f32.mrf.mxu0 }
 0x20d   : > { %17113 = vmatprep.mubr.msk.f32.mxu0 %vm282_vm1, %v17697_v21  ;;  %v4287_v1 = vld [vmem:[#allocation2 + $0xe8] sm:$0xff]  ;;  %v5321_v49 = vadd.f32 %v19946_v18, %v5289_v26  ;;  %17066 = vmatprep.mubr.msk.f32.mxu1 %vm282_vm1, %v14654_v11  ;;  %v4411_v34 = vadd.f32 %v4410_v5, %v4409_v40  ;;  %v4511_v14 = vsel %vm282_vm1, %v4454_v32, 0.0  ;;  %5351 = vst.msk [vmem:[#allocation2 + $0x18] sm:$0xff] %vm282_vm1, %v5319_v47  ;;  %5350 = vst.msk [vmem:[#allocation2 + $0x10] sm:$0xff] %vm282_vm1, %v5318_v50  ;;  %v4777_v8 = vpop.f32.mrf.mxu1  ;;  %v5288_v33 = vld [vmem:[#allocation2 + $0x20] sm:$0xff] }
 0x20e   : > { %v14655_v13 = vld [vmem:[%s17837_s10 + $0x1aa] sm:$0xff]  ;;  %v4324_v3 = vadd.f32 %v19962_v48, %v4287_v1  ;;  %v4510_v18 = vadd.f32 %v4509_v25, %v4508_v45  ;;  %v4412_v54 = vsel %vm282_vm1, %v19965_v59, 0.0  ;;  %4904 = vst.msk [vmem:[#allocation2 + $0x40] sm:$0xff] %vm282_vm1, %v4777_v8  ;;  %v5320_v52 = vadd.f32 %v5288_v33, %v5145_v19  ;;  %v5165_v59 = vpop.f32.mrf.mxu0  ;;  %v14658_v58 = vld [vmem:[%s17837_s10 + $0x1e2] sm:$0xff] }
 0x20f   : > { %v17698_v9 = vld [vmem:[%s17837_s10 + $0x18d] sm:$0xff]  ;;  %v4286_v46 = vld [vmem:[#allocation2 + $0xe0] sm:$0xff]  ;;  %5353 = vst.msk [vmem:[#allocation2 + $0x28] sm:$0xff] %vm282_vm1, %v5321_v49  ;;  %v16768_v42 = vpop.f32.mrf.mxu1  ;;  %v4413_v17 = vadd.f32 %v4412_v54, %v4411_v34  ;;  %v4513_v44 = vsel %vm282_vm1, %v4455_v57, 0.0 }
 0x210   : > { %17114 = vmatmul.mubr.msk.f32.gmra.mxu0 %vm282_vm1, %v17698_v9  ;;  %v17699_v63 = vld [vmem:[%s17837_s10 + $0x1a5] sm:$0xff]  ;;  %4356 = vst.msk [vmem:[%s19533_s14 + $0xe8] sm:$0xff] %vm282_vm1, %v4324_v3  ;;  %v4323_v15 = vadd.f32 %v19962_v48, %v4286_v46  ;;  %v5291_v20 = vld [vmem:[#allocation2 + $0x38] sm:$0xff]  ;;  %17067 = vmatmul.mubr.msk.f32.gmra.mxu1 %vm282_vm1, %v14655_v13  ;;  %5352 = vst.msk [vmem:[#allocation2 + $0x20] sm:$0xff] %vm282_vm1, %v5320_v52  ;;  %v4512_v23 = vadd.f32 %v4511_v14, %v4510_v18  ;;  %v16818_v56 = vpop.f32.mrf.mxu0  ;;  %v4416_v40 = vsel %vm282_vm1, %v4324_v3, 0.0 }
 0x211   : > { %17116 = vmatprep.mubr.msk.f32.mxu0 %vm282_vm1, %v17699_v63  ;;  %4907 = vst.msk [vmem:[#allocation2 + $0x58] sm:$0xff] %vm282_vm1, %v16768_v42  ;;  %v5323_v6 = vadd.f32 %v16812_v41, %v5291_v20  ;;  %17069 = vmatprep.mubr.msk.f32.mxu1 %vm282_vm1, %v14656_v16  ;;  %v14657_v19 = vld [vmem:[%s17837_s10 + $0x1ca] sm:$0xff]  ;;  %v4457_v35 = vmul.f32 %v4324_v3, %v4324_v3  ;;  %v4289_v39 = vld [vmem:[#allocation2 + $0xf8] sm:$0xff]  ;;  %v4787_v4 = vpop.f32.mrf.mxu1  ;;  %v14660_v1 = vld [vmem:[%s17837_s10 + $0x202] sm:$0xff] }
 0x212   : > { %4355 = vst.msk [vmem:[%s19533_s14 + $0xe0] sm:$0xff] %vm282_vm1, %v4323_v15  ;;  %v4456_v62 = vmul.f32 %v4323_v15, %v4323_v15  ;;  %v4288_v36 = vld [vmem:[#allocation2 + $0xf0] sm:$0xff]  ;;  %v4414_v11 = vsel %vm282_vm1, %v4323_v15, 0.0  ;;  %v4326_v41 = vadd.f32 %v19962_v48, %v4289_v39  ;;  %4906 = vst.msk [vmem:[#allocation2 + $0x50] sm:$0xff] %vm282_vm1, %v4787_v4  ;;  %v17701_v5 = vld [vmem:[%s17837_s10 + $0x1c5] sm:$0xff]  ;;  %v5175_v45 = vpop.f32.mrf.mxu0 }
 0x213   : > { %v5290_v7 = vld [vmem:[#allocation2 + $0x30] sm:$0xff]  ;;  %v4325_v22 = vadd.f32 %v19962_v48, %v4288_v36  ;;  %5355 = vst.msk [vmem:[#allocation2 + $0x38] sm:$0xff] %vm282_vm1, %v5323_v6  ;;  %v4415_v32 = vadd.f32 %v4414_v11, %v4413_v17  ;;  %v16771_v0 = vpop.f32.mrf.mxu1  ;;  %v5293_v21 = vld [vmem:[#allocation2 + $0x48] sm:$0xff]  ;;  %v4514_v48 = vadd.f32 %v4513_v44, %v4512_v23 }
 0x214   : > { %v17700_v61 = vld [vmem:[%s17837_s10 + $0x1ad] sm:$0xff]  ;;  %v5322_v27 = vadd.f32 %v5290_v7, %v5155_v38  ;;  %17070 = vmatmul.mubr.msk.f32.gmra.mxu1 %vm282_vm1, %v14657_v19  ;;  %v4515_v47 = vsel %vm282_vm1, %v4456_v62, 0.0  ;;  %4358 = vst.msk [vmem:[%s19533_s14 + $0xf8] sm:$0xff] %vm282_vm1, %v4326_v41  ;;  %4909 = vst.msk [vmem:[#allocation2 + $0x68] sm:$0xff] %vm282_vm1, %v16771_v0  ;;  %v5325_v50 = vadd.f32 %v16815_v43, %v5293_v21  ;;  %v16821_v49 = vpop.f32.mrf.mxu0  ;;  %v17703_v8 = vld [vmem:[%s17837_s10 + $0x1e5] sm:$0xff]  ;;  %v4517_v43 = vsel %vm282_vm1, %v4457_v35, 0.0 }
 0x215   : > { %17117 = vmatmul.mubr.msk.f32.gmra.mxu0 %vm282_vm1, %v17700_v61  ;;  %4357 = vst.msk [vmem:[%s19533_s14 + $0xf0] sm:$0xff] %vm282_vm1, %v4325_v22  ;;  %17072 = vmatprep.mubr.msk.f32.mxu1 %vm282_vm1, %v14658_v58  ;;  %v14659_v60 = vld [vmem:[%s17837_s10 + $0x1ea] sm:$0xff]  ;;  %v4417_v26 = vadd.f32 %v4416_v40, %v4415_v32  ;;  %v4418_v38 = vsel %vm282_vm1, %v4325_v22, 0.0  ;;  %v4797_v25 = vpop.f32.mrf.mxu1  ;;  %v5292_v57 = vld [vmem:[#allocation2 + $0x40] sm:$0xff]  ;;  %v4458_v34 = vmul.f32 %v4325_v22, %v4325_v22  ;;  %v4420_v46 = vsel %vm282_vm1, %v4326_v41, 0.0 }
 0x216   : > { %17119 = vmatprep.mubr.msk.f32.mxu0 %vm282_vm1, %v17701_v5  ;;  %5354 = vst.msk [vmem:[#allocation2 + $0x30] sm:$0xff] %vm282_vm1, %v5322_v27  ;;  %v17702_v13 = vld [vmem:[%s17837_s10 + $0x1cd] sm:$0xff]  ;;  %v4516_v14 = vadd.f32 %v4515_v47, %v4514_v48  ;;  %5357 = vst.msk [vmem:[#allocation2 + $0x48] sm:$0xff] %vm282_vm1, %v5325_v50  ;;  %v5324_v3 = vadd.f32 %v5292_v57, %v5165_v59  ;;  %v4459_v16 = vmul.f32 %v4326_v41, %v4326_v41  ;;  %v5185_v54 = vpop.f32.mrf.mxu0  ;;  %v14662_v6 = vld [vmem:[%s17837_s10 + $0x222] sm:$0xff] }
 0x217   : > { %4908 = vst.msk [vmem:[#allocation2 + $0x60] sm:$0xff] %vm282_vm1, %v4797_v25  ;;  %v4419_v33 = vadd.f32 %v4418_v38, %v4417_v26  ;;  %v16774_v9 = vpop.f32.mrf.mxu1  ;;  %v4519_v63 = vsel %vm282_vm1, %v4458_v34, 0.0  ;;  %v14661_v42 = vld [vmem:[%s17837_s10 + $0x20a] sm:$0xff]  ;;  %v14664_v22 = vld [vmem:[%s17837_s10 + $0x242] sm:$0xff] }
 0x218   : > { %v5295_v18 = vld [vmem:[#allocation2 + $0x58] sm:$0xff]  ;;  %17073 = vmatmul.mubr.msk.f32.gmra.mxu1 %vm282_vm1, %v14659_v60  ;;  %v4518_v52 = vadd.f32 %v4517_v43, %v4516_v14  ;;  %5356 = vst.msk [vmem:[#allocation2 + $0x40] sm:$0xff] %vm282_vm1, %v5324_v3  ;;  %4911 = vst.msk [vmem:[#allocation2 + $0x78] sm:$0xff] %vm282_vm1, %v16774_v9  ;;  %v16824_v19 = vpop.f32.mrf.mxu0  ;;  %v17704_v58 = vld [vmem:[%s17837_s10 + $0x1ed] sm:$0xff]  ;;  %v4521_v62 = vsel %vm282_vm1, %v4459_v16, 0.0 }
 0x219   : > { %17120 = vmatmul.mubr.msk.f32.gmra.mxu0 %vm282_vm1, %v17702_v13  ;;  %v5327_v15 = vadd.f32 %v16818_v56, %v5295_v18  ;;  %17075 = vmatprep.mubr.msk.f32.mxu1 %vm282_vm1, %v14660_v1  ;;  %v4421_v20 = vadd.f32 %v4420_v46, %v4419_v33  ;;  %v4807_v59 = vpop.f32.mrf.mxu1  ;;  %v5294_v17 = vld [vmem:[#allocation2 + $0x50] sm:$0xff]  ;;  %v14666_v38 = vld [vmem:[%s17837_s10 + $0x262] sm:$0xff] }
 0x21a   : > { %17122 = vmatprep.mubr.msk.f32.mxu0 %vm282_vm1, %v17703_v8  ;;  %v4520_v23 = vadd.f32 %v4519_v63, %v4518_v52  ;;  %4910 = vst.msk [vmem:[#allocation2 + $0x70] sm:$0xff] %vm282_vm1, %v4807_v59  ;;  %v5326_v44 = vadd.f32 %v5294_v17, %v5175_v45  ;;  %v5195_v4 = vpop.f32.mrf.mxu0  ;;  %v14663_v61 = vld [vmem:[%s17837_s10 + $0x22a] sm:$0xff]  ;;  %v14668_v16 = vld [vmem:[%s17837_s10 + $0x282] sm:$0xff] }
 0x21b   : > { %5359 = vst.msk [vmem:[#allocation2 + $0x58] sm:$0xff] %vm282_vm1, %v5327_v15  ;;  %v4422_v35 = vrot.slane %v4421_v20, 4  ;;  %v16777_v39 = vpop.f32.mrf.mxu1  ;;  %v5297_v36 = vld [vmem:[#allocation2 + $0x68] sm:$0xff] }
 0x21c   : > { %17076 = vmatmul.mubr.msk.f32.gmra.mxu1 %vm282_vm1, %v14661_v42  ;;  %v4522_v7 = vadd.f32 %v4521_v62, %v4520_v23  ;;  %5358 = vst.msk [vmem:[#allocation2 + $0x50] sm:$0xff] %vm282_vm1, %v5326_v44  ;;  %4913 = vst.msk [vmem:[#allocation2 + $0x88] sm:$0xff] %vm282_vm1, %v16777_v39  ;;  %v5329_v56 = vadd.f32 %v16821_v49, %v5297_v36  ;;  %v16827_v27 = vpop.f32.mrf.mxu0  ;;  %v14665_v47 = vld [vmem:[%s17837_s10 + $0x24a] sm:$0xff]  ;;  %v14672_v36 = vld [vmem:[%s17837_s10 + $0x2c2] sm:$0xff] }
 0x21d   : > { %17123 = vmatmul.mubr.msk.f32.gmra.mxu0 %vm282_vm1, %v17704_v58  ;;  %17078 = vmatprep.mubr.msk.f32.mxu1 %vm282_vm1, %v14662_v6  ;;  %v4423_v11 = vadd.f32 %v4422_v35, %v4421_v20  ;;  %v14667_v3 = vld [vmem:[%s17837_s10 + $0x26a] sm:$0xff] }
 0x21e   : > { %17125 = vmatprep.mubr.msk.f32.mxu0 %vm282_vm1, %v19640_v55  ;;  %v4817_v55 = vpop.f32.mrf.mxu1  ;;  %v5296_v41 = vld [vmem:[#allocation2 + $0x60] sm:$0xff]  ;;  %v4523_v5 = vrot.slane %v4522_v7, 4  ;;  %5361 = vst.msk [vmem:[#allocation2 + $0x68] sm:$0xff] %vm282_vm1, %v5329_v56  ;;  %v5205_v40 = vpop.f32.mrf.mxu0  ;;  %v14669_v15 = vld [vmem:[%s17837_s10 + $0x28a] sm:$0xff] }
 0x21f   : > { %4912 = vst.msk [vmem:[#allocation2 + $0x80] sm:$0xff] %vm282_vm1, %v4817_v55  ;;  %v5328_v32 = vadd.f32 %v5296_v41, %v5185_v54  ;;  %v4424_v0 = vrot.slane %v4423_v11, 2  ;;  %v5299_v45 = vld [vmem:[#allocation2 + $0x78] sm:$0xff]  ;;  %v14735_v44 = vld [vmem:[%s17837_s10 + $0x2a5] sm:$0xff] }
 0x220   : > { %v16780_v21 = vpop.f32.mrf.mxu1  ;;  %17079 = vmatmul.mubr.msk.f32.gmra.mxu1 %vm282_vm1, %v14663_v61  ;;  %v4524_v48 = vadd.f32 %v4523_v5, %v4522_v7  ;;  %v14671_v35 = vld [vmem:[%s17837_s10 + $0x2aa] sm:$0xff]  ;;  %v14674_v5 = vld [vmem:[%s17837_s10 + $0x2e2] sm:$0xff] }
 0x221   : > { %17126 = vmatmul.mubr.msk.f32.gmra.mxu0 %vm282_vm1, %v19664_v29  ;;  %5360 = vst.msk [vmem:[#allocation2 + $0x60] sm:$0xff] %vm282_vm1, %v5328_v32  ;;  %4915 = vst.msk [vmem:[#allocation2 + $0x98] sm:$0xff] %vm282_vm1, %v16780_v21  ;;  %v5331_v29 = vadd.f32 %v16824_v19, %v5299_v45  ;;  %17081 = vmatprep.mubr.msk.f32.mxu1 %vm282_vm1, %v14664_v22  ;;  %v4425_v50 = vadd.f32 %v4424_v0, %v4423_v11  ;;  %v5298_v26 = vld [vmem:[#allocation2 + $0x70] sm:$0xff]  ;;  %v14737_v55 = vld [vmem:[%s17837_s10 + $0x2c5] sm:$0xff] }
 0x222   : > { %17128 = vmatprep.mubr.msk.f32.mxu0 %vm282_vm1, %v19672_v31  ;;  %v4827_v60 = vpop.f32.mrf.mxu1  ;;  %v16830_v31 = vpop.f32.mrf.mxu0  ;;  %v4525_v25 = vrot.slane %v4524_v48, 2  ;;  %v5330_v57 = vadd.f32 %v5298_v26, %v5195_v4  ;;  %v14736_v7 = vld [vmem:[%s17837_s10 + $0x2ad] sm:$0xff] }
 0x223   : > { %5363 = vst.msk [vmem:[#allocation2 + $0x78] sm:$0xff] %vm282_vm1, %v5331_v29  ;;  %4914 = vst.msk [vmem:[#allocation2 + $0x90] sm:$0xff] %vm282_vm1, %v4827_v60  ;;  %v5301_v49 = vld [vmem:[#allocation2 + $0x88] sm:$0xff]  ;;  %v4426_v34 = vrot.slane %v4425_v50, 1 }
 0x224   : > { %v16783_v1 = vpop.f32.mrf.mxu1  ;;  %17082 = vmatmul.mubr.msk.f32.gmra.mxu1 %vm282_vm1, %v14665_v47  ;;  %v5215_v13 = vpop.f32.mrf.mxu0  ;;  %v4526_v14 = vadd.f32 %v4525_v25, %v4524_v48  ;;  %5362 = vst.msk [vmem:[#allocation2 + $0x70] sm:$0xff] %vm282_vm1, %v5330_v57  ;;  %v14673_v41 = vld [vmem:[%s17837_s10 + $0x2ca] sm:$0xff] }
 0x225   : > { %17129 = vmatmul.mubr.msk.f32.gmra.mxu0 %vm282_vm1, %v19700_v2  ;;  %4917 = vst.msk [vmem:[#allocation2 + $0xa8] sm:$0xff] %vm282_vm1, %v16783_v1  ;;  %v5333_v2 = vadd.f32 %v16827_v27, %v5301_v49  ;;  %17084 = vmatprep.mubr.msk.f32.mxu1 %vm282_vm1, %v14666_v38  ;;  %v4427_v52 = vadd.f32 %v4426_v34, %v4425_v50  ;;  %v14738_v21 = vld [vmem:[%s17837_s10 + $0x2cd] sm:$0xff]  ;;  %v14739_v29 = vld [vmem:[%s17837_s10 + $0x2e5] sm:$0xff] }
 0x226   : > { %17131 = vmatprep.mubr.msk.f32.mxu0 %vm282_vm1, %v19709_v51  ;;  %v4837_v8 = vpop.f32.mrf.mxu1  ;;  %v5300_v33 = vld [vmem:[#allocation2 + $0x80] sm:$0xff]  ;;  %v16833_v43 = vpop.f32.mrf.mxu0  ;;  %v4527_v51 = vrot.slane %v4526_v14, 1  ;;  %v14675_v50 = vld [vmem:[%s17837_s10 + $0x2ea] sm:$0xff] }
 0x227   : > { %5365 = vst.msk [vmem:[#allocation2 + $0x88] sm:$0xff] %vm282_vm1, %v5333_v2  ;;  %4916 = vst.msk [vmem:[#allocation2 + $0xa0] sm:$0xff] %vm282_vm1, %v4837_v8  ;;  %v5332_v9 = vadd.f32 %v5300_v33, %v5205_v40  ;;  %v20156_v38 = vld [vmem:[%s17837_s10 + $0x108] sm:$0xff]  ;;  %v8827_v34 = vld [vmem:[%s17837_s10] sm:$0xff] }
 0x228   : > { %v16786_v18 = vpop.f32.mrf.mxu1  ;;  %v5303_v54 = vld [vmem:[#allocation2 + $0x98] sm:$0xff]  ;;  %17085 = vmatmul.mubr.msk.f32.gmra.mxu1 %vm282_vm1, %v14667_v3  ;;  %v5225_v46 = vpop.f32.mrf.mxu0  ;;  %v4528_v63 = vadd.f32 %v4527_v51, %v4526_v14  ;;  %v14740_v57 = vld [vmem:[%s17837_s10 + $0x2ed] sm:$0xff] }
 0x229   : > { %17132 = vmatmul.mubr.msk.f32.gmra.mxu0 %vm282_vm1, %v19738_v30  ;;  %5364 = vst.msk [vmem:[#allocation2 + $0x80] sm:$0xff] %vm282_vm1, %v5332_v9  ;;  %4919 = vst.msk [vmem:[#allocation2 + $0xb8] sm:$0xff] %vm282_vm1, %v16786_v18  ;;  %v5335_v30 = vadd.f32 %v16830_v31, %v5303_v54  ;;  %17087 = vmatprep.mubr.msk.f32.mxu1 %vm282_vm1, %v14668_v16  ;;  %v14775_v2 = vld [vmem:[%s17837_s10 + $0x110] sm:$0xff]  ;;  %v20171_v33 = vld [vmem:[%s17837_s10 + $0x128] sm:$0xff] }
 0x22a   : > { %17134 = vmatprep.mubr.msk.f32.mxu0 %vm282_vm1, %v19743_v24  ;;  %v4847_v42 = vpop.f32.mrf.mxu1  ;;  %v5302_v20 = vld [vmem:[#allocation2 + $0x90] sm:$0xff]  ;;  %v14670_v24 = vld [vmem:[%s17837_s10 + $0x2a2] sm:$0xff]  ;;  %v16836_v59 = vpop.f32.mrf.mxu0  ;;  %v20118_v17 = vsel %vm13104_vm2, %v4427_v52, %v4528_v63 }
 0x22b   : > { %5367 = vst.msk [vmem:[#allocation2 + $0x98] sm:$0xff] %vm282_vm1, %v5335_v30  ;;  %4918 = vst.msk [vmem:[#allocation2 + $0xb0] sm:$0xff] %vm282_vm1, %v4847_v42  ;;  %v5334_v6 = vadd.f32 %v5302_v20, %v5215_v13  ;;  %v8828_v51 = vld [vmem:[%s17837_s10 + $0x8] sm:$0xff]  ;;  %v20181_v9 = vld [vmem:[%s22301_s1 + $0x54] sm:$0xf] }
 0x22c   : > { %v16789_v19 = vpop.f32.mrf.mxu1  ;;  %v5305_v58 = vld [vmem:[#allocation2 + $0xa8] sm:$0xff]  ;;  %17088 = vmatmul.mubr.msk.f32.gmra.mxu1 %vm282_vm1, %v14669_v15  ;;  %v5235_v23 = vpop.f32.mrf.mxu0  ;;  %v8829_v63 = vld [vmem:[%s17837_s10 + $0x20] sm:$0xff]  ;;  %v14777_v42 = vld [vmem:[%s17837_s10 + $0x130] sm:$0xff] }
 0x22d   : > { %17135 = vmatmul.mubr.msk.f32.gmra.mxu0 %vm282_vm1, %v19772_v12  ;;  %5366 = vst.msk [vmem:[#allocation2 + $0x90] sm:$0xff] %vm282_vm1, %v5334_v6  ;;  %4921 = vst.msk [vmem:[#allocation2 + $0xc8] sm:$0xff] %vm282_vm1, %v16789_v19  ;;  %v5337_v12 = vadd.f32 %v16833_v43, %v5305_v58  ;;  %17090 = vmatprep.mubr.msk.f32.mxu1 %vm282_vm1, %v14670_v24  ;;  %v20194_v20 = vld [vmem:[%s22301_s1 + $0x58] sm:$0xf]  ;;  %v5736_v6 = vld [vmem:[#allocation2] sm:$0xff] }
 0x22e   : > { %17137 = vmatprep.mubr.msk.f32.mxu0 %vm282_vm1, %v19778_v28  ;;  %v4857_v62 = vpop.f32.mrf.mxu1  ;;  %v5304_v39 = vld [vmem:[#allocation2 + $0xa0] sm:$0xff]  ;;  %v16839_v28 = vpop.f32.mrf.mxu0  ;;  %v20197_v19 = vld [vmem:[%s17837_s10 + $0x148] sm:$0xff] }
 0x22f   : > { %5369 = vst.msk [vmem:[#allocation2 + $0xa8] sm:$0xff] %vm282_vm1, %v5337_v12  ;;  %4920 = vst.msk [vmem:[#allocation2 + $0xc0] sm:$0xff] %vm282_vm1, %v4857_v62  ;;  %v5336_v4 = vadd.f32 %v5304_v39, %v5225_v46  ;;  %v5737_v46 = vld [vmem:[#allocation2 + $0x8] sm:$0xff]  ;;  %v5739_v62 = vld [vmem:[#allocation2 + $0x18] sm:$0xff] }
 0x230   : > { %v16792_v56 = vpop.f32.mrf.mxu1  ;;  %v5307_v61 = vld [vmem:[#allocation2 + $0xb8] sm:$0xff]  ;;  %17091 = vmatmul.mubr.msk.f32.gmra.mxu1 %vm282_vm1, %v14671_v35  ;;  %v5245_v11 = vpop.f32.mrf.mxu0 }
 0x231   : > { %17138 = vmatmul.mubr.msk.f32.gmra.mxu0 %vm282_vm1, %v19805_v37  ;;  %5368 = vst.msk [vmem:[#allocation2 + $0xa0] sm:$0xff] %vm282_vm1, %v5336_v4  ;;  %4923 = vst.msk [vmem:[#allocation2 + $0xd8] sm:$0xff] %vm282_vm1, %v16792_v56  ;;  %v5339_v37 = vadd.f32 %v16836_v59, %v5307_v61  ;;  %17093 = vmatprep.mubr.msk.f32.mxu1 %vm282_vm1, %v14672_v36  ;;  %v8831_v36 = vld [vmem:[%s17837_s10 + $0x40] sm:$0xff]  ;;  %v14779_v4 = vld [vmem:[%s17837_s10 + $0x150] sm:$0xff] }
 0x232   : > { %17140 = vmatprep.mubr.msk.f32.mxu0 %vm282_vm1, %v14735_v44  ;;  %v4867_v22 = vpop.f32.mrf.mxu1  ;;  %v5306_v27 = vld [vmem:[#allocation2 + $0xb0] sm:$0xff]  ;;  %v16842_v32 = vpop.f32.mrf.mxu0  ;;  %v8830_v44 = vld [vmem:[%s17837_s10 + $0x28] sm:$0xff] }
 0x233   : > { %5371 = vst.msk [vmem:[#allocation2 + $0xb8] sm:$0xff] %vm282_vm1, %v5339_v37  ;;  %4922 = vst.msk [vmem:[#allocation2 + $0xd0] sm:$0xff] %vm282_vm1, %v4867_v22  ;;  %v5338_v0 = vadd.f32 %v5306_v27, %v5235_v23  ;;  %v5738_v61 = vld [vmem:[#allocation2 + $0x10] sm:$0xff]  ;;  %v8832_v22 = vld [vmem:[%s17837_s10 + $0x48] sm:$0xff] }
 0x234   : > { %v16795_v45 = vpop.f32.mrf.mxu1  ;;  %v5309_v40 = vld [vmem:[#allocation2 + $0xc8] sm:$0xff]  ;;  %17094 = vmatmul.mubr.msk.f32.gmra.mxu1 %vm282_vm1, %v14673_v41  ;;  %v5255_v48 = vpop.f32.mrf.mxu0 }
 0x235   : > { %17141 = vmatmul.mubr.msk.f32.gmra.mxu0 %vm282_vm1, %v14736_v7  ;;  %5370 = vst.msk [vmem:[#allocation2 + $0xb0] sm:$0xff] %vm282_vm1, %v5338_v0  ;;  %4925 = vst.msk [vmem:[#allocation2 + $0xe8] sm:$0xff] %vm282_vm1, %v16795_v45  ;;  %v5341_v47 = vadd.f32 %v16839_v28, %v5309_v40  ;;  %17096 = vmatprep.mubr.msk.f32.mxu1 %vm282_vm1, %v14674_v5  ;;  %v5741_v5 = vld [vmem:[#allocation2 + $0x28] sm:$0xff]  ;;  %v8833_v0 = vld [vmem:[%s17837_s10 + $0x60] sm:$0xff] }
 0x236   : > { %17143 = vmatprep.mubr.msk.f32.mxu0 %vm282_vm1, %v14737_v55  ;;  %v4877_v60 = vpop.f32.mrf.mxu1  ;;  %v5308_v26 = vld [vmem:[#allocation2 + $0xc0] sm:$0xff]  ;;  %v16845_v31 = vpop.f32.mrf.mxu0  ;;  %v14781_v45 = vld [vmem:[%s17837_s10 + $0x170] sm:$0xff] }
 0x237   : > { %5373 = vst.msk [vmem:[#allocation2 + $0xc8] sm:$0xff] %vm282_vm1, %v5341_v47  ;;  %4924 = vst.msk [vmem:[#allocation2 + $0xe0] sm:$0xff] %vm282_vm1, %v4877_v60  ;;  %v5340_v25 = vadd.f32 %v5308_v26, %v5245_v11  ;;  %v20218_v11 = vld [vmem:[%s17837_s10 + $0x168] sm:$0xff] }
 0x238   : > { %v16798_v1 = vpop.f32.mrf.mxu1  ;;  %v5311_v49 = vld [vmem:[#allocation2 + $0xd8] sm:$0xff]  ;;  %17097 = vmatmul.mubr.msk.f32.gmra.mxu1 %vm282_vm1, %v14675_v50  ;;  %v5265_v13 = vpop.f32.mrf.mxu0  ;;  %v20233_v47 = vld [vmem:[%s17837_s10 + $0x188] sm:$0xff] }
 0x239   : > { %17144 = vmatmul.mubr.msk.f32.gmra.mxu0 %vm282_vm1, %v14738_v21  ;;  %5372 = vst.msk [vmem:[#allocation2 + $0xc0] sm:$0xff] %vm282_vm1, %v5340_v25  ;;  %4927 = vst.msk [vmem:[#allocation2 + $0xf8] sm:$0xff] %vm282_vm1, %v16798_v1  ;;  %v5343_v14 = vadd.f32 %v16842_v32, %v5311_v49  ;;  %17151 = vmatprep.mubr.msk.f32.mxu1 %vm282_vm1, %v20156_v38  ;;  %v5743_v1 = vld [vmem:[#allocation2 + $0x38] sm:$0xff] }
 0x23a   : > { %17146 = vmatprep.mubr.msk.f32.mxu0 %vm282_vm1, %v14739_v29  ;;  %v4887_v3 = vpop.f32.mrf.mxu1  ;;  %v5310_v8 = vld [vmem:[#allocation2 + $0xd0] sm:$0xff]  ;;  %v16848_v16 = vpop.f32.mrf.mxu0  ;;  %v5740_v29 = vld [vmem:[#allocation2 + $0x20] sm:$0xff] }
 0x23b   : > { %5375 = vst.msk [vmem:[#allocation2 + $0xd8] sm:$0xff] %vm282_vm1, %v5343_v14  ;;  %4926 = vst.msk [vmem:[#allocation2 + $0xf0] sm:$0xff] %vm282_vm1, %v4887_v3  ;;  %v5342_v43 = vadd.f32 %v5310_v8, %v5255_v48 }
 0x23c   : > { %v5313_v18 = vld [vmem:[#allocation2 + $0xe8] sm:$0xff]  ;;  %v16853_v54 = vpop.f32.mrf.mxu1  ;;  %17152 = vmatmul.mubr.msk.f32.vlgmr.msra.gmra.mxu1 %vm282_vm1, %v14775_v2  ;;  %v5275_v52 = vpop.f32.mrf.mxu0  ;;  %v14783_v2 = vld [vmem:[%s17837_s10 + $0x190] sm:$0xff] }
 0x23d   : > { %17147 = vmatmul.mubr.msk.f32.gmra.mxu0 %vm282_vm1, %v14740_v57  ;;  %5374 = vst.msk [vmem:[#allocation2 + $0xd0] sm:$0xff] %vm282_vm1, %v5342_v43  ;;  %v5345_v30 = vadd.f32 %v16845_v31, %v5313_v18  ;;  %v5769_v15 = vadd.f32 %v16853_v54, %v5737_v46  ;;  %17250 = vmatpush3.msk.msra.mxu1 %vm379_vm0, %v19873_v10  ;;  %v8834_v31 = vld [vmem:[%s17837_s10 + $0x68] sm:$0xff] }
 0x23e   : > { %17201 = vmatprep.mubr.msk.f32.mxu0 %vm282_vm1, %v8827_v34  ;;  %17154 = vmatprep.mubr.msk.f32.mxu1 %vm282_vm1, %v20171_v33  ;;  %v5312_v24 = vld [vmem:[#allocation2 + $0xe0] sm:$0xff]  ;;  %v5577_v59 = vpop.f32.mrf.mxu1  ;;  %v16903_v58 = vpop.f32.mrf.mxu0  ;;  %v20247_v43 = vld [vmem:[%s17837_s10 + $0x1a8] sm:$0xff] }
 0x23f   : > { %17349 = vmatprep.subr.msk.mxu1 %vm379_vm0, %v20181_v9  ;;  %5377 = vst.msk [vmem:[#allocation2 + $0xe8] sm:$0xff] %vm282_vm1, %v5345_v30  ;;  %5801 = vst.msk [vmem:[#allocation2 + $0x8] sm:$0xff] %vm282_vm1, %v5769_v15  ;;  %v5344_v10 = vadd.f32 %v5312_v24, %v5265_v13  ;;  %v5768_v23 = vadd.f32 %v5736_v6, %v5577_v59  ;;  %v8835_v13 = vld [vmem:[%s17837_s10 + $0x80] sm:$0xff]  ;;  %v8836_v46 = vld [vmem:[%s17837_s10 + $0x88] sm:$0xff] }
 0x240   : > { %v5315_v12 = vld [vmem:[#allocation2 + $0xf8] sm:$0xff]  ;;  %v16856_v35 = vpop.f32.mrf.mxu1  ;;  %17155 = vmatmul.mubr.msk.f32.gmra.mxu1 %vm282_vm1, %v14777_v42  ;;  %v6029_v39 = vpop.f32.mrf.mxu0  ;;  %v5745_v30 = vld [vmem:[#allocation2 + $0x48] sm:$0xff]  ;;  %v8837_v42 = vld [vmem:[%s17837_s10 + $0xa0] sm:$0xff] }
 0x241   : > { %17202 = vmatmul.mubr.msk.f32.vlgmr.msra.gmra.mxu0 %vm282_vm1, %v8828_v51  ;;  %5376 = vst.msk [vmem:[#allocation2 + $0xe0] sm:$0xff] %vm282_vm1, %v5344_v10  ;;  %5800 = vst.msk [vmem:[#allocation2] sm:$0xff] %vm282_vm1, %v5768_v23  ;;  %v5771_v28 = vadd.f32 %v16856_v35, %v5739_v62  ;;  %17157 = vmatprep.mubr.msk.f32.mxu1 %vm282_vm1, %v20197_v19  ;;  %v14785_v6 = vld [vmem:[%s17837_s10 + $0x1b0] sm:$0xff]  ;;  %v5744_v23 = vld [vmem:[#allocation2 + $0x40] sm:$0xff] }
 0x242   : > { %17300 = vmatpush3.msk.msra.mxu0 %vm379_vm0, %v19884_v53  ;;  %17204 = vmatprep.mubr.msk.f32.mxu0 %vm282_vm1, %v8829_v63  ;;  %v5347_v53 = vadd.f32 %v16848_v16, %v5315_v12  ;;  %v5314_v7 = vld [vmem:[#allocation2 + $0xf0] sm:$0xff]  ;;  %v5587_v56 = vpop.f32.mrf.mxu1  ;;  %v16906_v55 = vpop.f32.mrf.mxu0 }
 0x243   : > { %17399 = vmatprep.subr.msk.mxu0 %vm379_vm0, %v20194_v20  ;;  %5803 = vst.msk [vmem:[#allocation2 + $0x18] sm:$0xff] %vm282_vm1, %v5771_v28  ;;  %v5346_v37 = vadd.f32 %v5314_v7, %v5275_v52  ;;  %v5770_v41 = vadd.f32 %v5738_v61, %v5587_v56  ;;  %v5742_v16 = vld [vmem:[#allocation2 + $0x30] sm:$0xff]  ;;  %v5747_v28 = vld [vmem:[#allocation2 + $0x58] sm:$0xff]  ;;  %v8839_v7 = vld [vmem:[%s17837_s10 + $0xc0] sm:$0xff] }
 0x244   : > { %5379 = vst.msk [vmem:[#allocation2 + $0xf8] sm:$0xff] %vm282_vm1, %v5347_v53  ;;  %v16859_v27 = vpop.f32.mrf.mxu1  ;;  %17158 = vmatmul.mubr.msk.f32.gmra.mxu1 %vm282_vm1, %v14779_v4  ;;  %v6039_v32 = vpop.f32.mrf.mxu0 }
 0x245   : > { %17205 = vmatmul.mubr.msk.f32.gmra.mxu0 %vm282_vm1, %v8830_v44  ;;  %5378 = vst.msk [vmem:[#allocation2 + $0xf0] sm:$0xff] %vm282_vm1, %v5346_v37  ;;  %5802 = vst.msk [vmem:[#allocation2 + $0x10] sm:$0xff] %vm282_vm1, %v5770_v41  ;;  %v5773_v21 = vadd.f32 %v16859_v27, %v5741_v5  ;;  %17160 = vmatprep.mubr.msk.f32.mxu1 %vm282_vm1, %v20218_v11  ;;  %v20262_v44 = vld [vmem:[%s17837_s10 + $0x1c8] sm:$0xff] }
 0x246   : > { %17207 = vmatprep.mubr.msk.f32.mxu0 %vm282_vm1, %v8831_v36  ;;  %v6189_v40 = vld [vmem:[#allocation2 + $0x8] sm:$0xff]  ;;  %v5597_v48 = vpop.f32.mrf.mxu1  ;;  %v16909_v50 = vpop.f32.mrf.mxu0 }
 0x247   : > { %5805 = vst.msk [vmem:[#allocation2 + $0x28] sm:$0xff] %vm282_vm1, %v5773_v21  ;;  %v6221_v60 = vadd.f32 %v16903_v58, %v6189_v40  ;;  %v5772_v26 = vadd.f32 %v5740_v29, %v5597_v48  ;;  %v20277_v27 = vld [vmem:[%s17837_s10 + $0x1e8] sm:$0xff] }
 0x248   : > { %v6188_v25 = vld [vmem:[#allocation2] sm:$0xff]  ;;  %v16862_v57 = vpop.f32.mrf.mxu1  ;;  %17161 = vmatmul.mubr.msk.f32.gmra.mxu1 %vm282_vm1, %v14781_v45  ;;  %v6049_v49 = vpop.f32.mrf.mxu0  ;;  %v8840_v21 = vld [vmem:[%s17837_s10 + $0xc8] sm:$0xff] }
 0x249   : > { %17208 = vmatmul.mubr.msk.f32.gmra.mxu0 %vm282_vm1, %v8832_v22  ;;  %6253 = vst.msk [vmem:[#allocation2 + $0x8] sm:$0xff] %vm282_vm1, %v6221_v60  ;;  %5804 = vst.msk [vmem:[#allocation2 + $0x20] sm:$0xff] %vm282_vm1, %v5772_v26  ;;  %v6220_v34 = vadd.f32 %v6188_v25, %v6029_v39  ;;  %v5775_v14 = vadd.f32 %v16862_v57, %v5743_v1  ;;  %17163 = vmatprep.mubr.msk.f32.mxu1 %vm282_vm1, %v20233_v47  ;;  %v8838_v39 = vld [vmem:[%s17837_s10 + $0xa8] sm:$0xff]  ;;  %v5746_v22 = vld [vmem:[#allocation2 + $0x50] sm:$0xff] }
 0x24a   : > { %17210 = vmatprep.mubr.msk.f32.mxu0 %vm282_vm1, %v8833_v0  ;;  %v6191_v3 = vld [vmem:[#allocation2 + $0x18] sm:$0xff]  ;;  %v5607_v8 = vpop.f32.mrf.mxu1  ;;  %v16912_v51 = vpop.f32.mrf.mxu0  ;;  %v5749_v48 = vld [vmem:[#allocation2 + $0x68] sm:$0xff]  ;;  %v5748_v1 = vld [vmem:[#allocation2 + $0x60] sm:$0xff] }
 0x24b   : > { %6252 = vst.msk [vmem:[#allocation2] sm:$0xff] %vm282_vm1, %v6220_v34  ;;  %5807 = vst.msk [vmem:[#allocation2 + $0x38] sm:$0xff] %vm282_vm1, %v5775_v14  ;;  %v6223_v18 = vadd.f32 %v16906_v55, %v6191_v3  ;;  %v5774_v54 = vadd.f32 %v5742_v16, %v5607_v8  ;;  %v14787_v55 = vld [vmem:[%s17837_s10 + $0x1d0] sm:$0xff]  ;;  %v5751_v16 = vld [vmem:[#allocation2 + $0x78] sm:$0xff] }
 0x24c   : > { %v6190_v52 = vld [vmem:[#allocation2 + $0x10] sm:$0xff]  ;;  %v16865_v63 = vpop.f32.mrf.mxu1  ;;  %17164 = vmatmul.mubr.msk.f32.gmra.mxu1 %vm282_vm1, %v14783_v2  ;;  %v6059_v15 = vpop.f32.mrf.mxu0  ;;  %v8842_v2 = vld [vmem:[%s17837_s10 + $0xe8] sm:$0xff] }
 0x24d   : > { %17211 = vmatmul.mubr.msk.f32.gmra.mxu0 %vm282_vm1, %v8834_v31  ;;  %6255 = vst.msk [vmem:[#allocation2 + $0x18] sm:$0xff] %vm282_vm1, %v6223_v18  ;;  %5806 = vst.msk [vmem:[#allocation2 + $0x30] sm:$0xff] %vm282_vm1, %v5774_v54  ;;  %v6222_v24 = vadd.f32 %v6190_v52, %v6039_v32  ;;  %v5777_v59 = vadd.f32 %v16865_v63, %v5745_v30  ;;  %17166 = vmatprep.mubr.msk.f32.mxu1 %vm282_vm1, %v20247_v43  ;;  %v14789_v31 = vld [vmem:[%s17837_s10 + $0x1f0] sm:$0xff]  ;;  %v8843_v18 = vld [vmem:[%s17837_s10 + $0x100] sm:$0xff] }
 0x24e   : > { %17213 = vmatprep.mubr.msk.f32.mxu0 %vm282_vm1, %v8835_v13  ;;  %v6193_v58 = vld [vmem:[#allocation2 + $0x28] sm:$0xff]  ;;  %v5617_v10 = vpop.f32.mrf.mxu1  ;;  %v16915_v12 = vpop.f32.mrf.mxu0  ;;  %v14791_v52 = vld [vmem:[%s17837_s10 + $0x210] sm:$0xff] }
 0x24f   : > { %6254 = vst.msk [vmem:[#allocation2 + $0x10] sm:$0xff] %vm282_vm1, %v6222_v24  ;;  %5809 = vst.msk [vmem:[#allocation2 + $0x48] sm:$0xff] %vm282_vm1, %v5777_v59  ;;  %v6225_v35 = vadd.f32 %v16909_v50, %v6193_v58  ;;  %v5776_v62 = vadd.f32 %v5744_v23, %v5617_v10  ;;  %v8841_v50 = vld [vmem:[%s17837_s10 + $0xe0] sm:$0xff]  ;;  %v5753_v23 = vld [vmem:[#allocation2 + $0x88] sm:$0xff] }
 0x250   : > { %v6192_v36 = vld [vmem:[#allocation2 + $0x20] sm:$0xff]  ;;  %v16868_v53 = vpop.f32.mrf.mxu1  ;;  %17167 = vmatmul.mubr.msk.f32.gmra.mxu1 %vm282_vm1, %v14785_v6  ;;  %v6069_v4 = vpop.f32.mrf.mxu0 }
 0x251   : > { %17214 = vmatmul.mubr.msk.f32.gmra.mxu0 %vm282_vm1, %v8836_v46  ;;  %6257 = vst.msk [vmem:[#allocation2 + $0x28] sm:$0xff] %vm282_vm1, %v6225_v35  ;;  %5808 = vst.msk [vmem:[#allocation2 + $0x40] sm:$0xff] %vm282_vm1, %v5776_v62  ;;  %v6224_v56 = vadd.f32 %v6192_v36, %v6049_v49  ;;  %v5779_v61 = vadd.f32 %v16868_v53, %v5747_v28  ;;  %17169 = vmatprep.mubr.msk.f32.mxu1 %vm282_vm1, %v20262_v44  ;;  %v14790_v49 = vld [vmem:[%s17837_s10 + $0x208] sm:$0xff]  ;;  %v8845_v35 = vld [vmem:[%s17837_s10 + $0x120] sm:$0xff] }
 0x252   : > { %17216 = vmatprep.mubr.msk.f32.mxu0 %vm282_vm1, %v8837_v42  ;;  %v6195_v37 = vld [vmem:[#allocation2 + $0x38] sm:$0xff]  ;;  %v5627_v41 = vpop.f32.mrf.mxu1  ;;  %v16918_v5 = vpop.f32.mrf.mxu0  ;;  %v14792_v42 = vld [vmem:[%s17837_s10 + $0x228] sm:$0xff]  ;;  %v14793_v36 = vld [vmem:[%s17837_s10 + $0x230] sm:$0xff] }
 0x253   : > { %6256 = vst.msk [vmem:[#allocation2 + $0x20] sm:$0xff] %vm282_vm1, %v6224_v56  ;;  %5811 = vst.msk [vmem:[#allocation2 + $0x58] sm:$0xff] %vm282_vm1, %v5779_v61  ;;  %v6227_v32 = vadd.f32 %v16912_v51, %v6195_v37  ;;  %v5778_v0 = vadd.f32 %v5746_v22, %v5627_v41  ;;  %v5755_v22 = vld [vmem:[#allocation2 + $0x98] sm:$0xff] }
 0x254   : > { %v6194_v45 = vld [vmem:[#allocation2 + $0x30] sm:$0xff]  ;;  %v16871_v40 = vpop.f32.mrf.mxu1  ;;  %17170 = vmatmul.mubr.msk.f32.gmra.mxu1 %vm282_vm1, %v14787_v55  ;;  %v6079_v29 = vpop.f32.mrf.mxu0 }
 0x255   : > { %17217 = vmatmul.mubr.msk.f32.gmra.mxu0 %vm282_vm1, %v8838_v39  ;;  %6259 = vst.msk [vmem:[#allocation2 + $0x38] sm:$0xff] %vm282_vm1, %v6227_v32  ;;  %5810 = vst.msk [vmem:[#allocation2 + $0x50] sm:$0xff] %vm282_vm1, %v5778_v0  ;;  %v6226_v60 = vadd.f32 %v6194_v45, %v6059_v15  ;;  %v5781_v26 = vadd.f32 %v16871_v40, %v5749_v48  ;;  %17172 = vmatprep.mubr.msk.f32.mxu1 %vm282_vm1, %v20277_v27  ;;  %v5750_v15 = vld [vmem:[#allocation2 + $0x70] sm:$0xff]  ;;  %v8847_v32 = vld [vmem:[%s17837_s10 + $0x140] sm:$0xff] }
 0x256   : > { %17219 = vmatprep.mubr.msk.f32.mxu0 %vm282_vm1, %v8839_v7  ;;  %v6197_v25 = vld [vmem:[#allocation2 + $0x48] sm:$0xff]  ;;  %v5637_v57 = vpop.f32.mrf.mxu1  ;;  %v16921_v13 = vpop.f32.mrf.mxu0  ;;  %v5754_v48 = vld [vmem:[#allocation2 + $0x90] sm:$0xff] }
 0x257   : > { %6258 = vst.msk [vmem:[#allocation2 + $0x30] sm:$0xff] %vm282_vm1, %v6226_v60  ;;  %5813 = vst.msk [vmem:[#allocation2 + $0x68] sm:$0xff] %vm282_vm1, %v5781_v26  ;;  %v6229_v34 = vadd.f32 %v16915_v12, %v6197_v25  ;;  %v5780_v14 = vadd.f32 %v5748_v1, %v5637_v57  ;;  %v14794_v7 = vld [vmem:[%s17837_s10 + $0x248] sm:$0xff] }
 0x258   : > { %v6196_v3 = vld [vmem:[#allocation2 + $0x40] sm:$0xff]  ;;  %v16874_v8 = vpop.f32.mrf.mxu1  ;;  %17173 = vmatmul.mubr.msk.f32.gmra.mxu1 %vm282_vm1, %v14789_v31  ;;  %v6089_v51 = vpop.f32.mrf.mxu0  ;;  %v5757_v57 = vld [vmem:[#allocation2 + $0xa8] sm:$0xff] }
 0x259   : > { %17220 = vmatmul.mubr.msk.f32.gmra.mxu0 %vm282_vm1, %v8840_v21  ;;  %6261 = vst.msk [vmem:[#allocation2 + $0x48] sm:$0xff] %vm282_vm1, %v6229_v34  ;;  %5812 = vst.msk [vmem:[#allocation2 + $0x60] sm:$0xff] %vm282_vm1, %v5780_v14  ;;  %v6228_v54 = vadd.f32 %v6196_v3, %v6069_v4  ;;  %v5783_v46 = vadd.f32 %v16874_v8, %v5751_v16  ;;  %17175 = vmatprep.mubr.msk.f32.mxu1 %vm282_vm1, %v14790_v49  ;;  %v5752_v4 = vld [vmem:[#allocation2 + $0x80] sm:$0xff]  ;;  %v14795_v21 = vld [vmem:[%s17837_s10 + $0x250] sm:$0xff] }
 0x25a   : > { %17222 = vmatprep.mubr.msk.f32.mxu0 %vm282_vm1, %v8841_v50  ;;  %v6199_v63 = vld [vmem:[#allocation2 + $0x58] sm:$0xff]  ;;  %v5647_v30 = vpop.f32.mrf.mxu1  ;;  %v16924_v24 = vpop.f32.mrf.mxu0  ;;  %v8849_v49 = vld [vmem:[%s17837_s10 + $0x160] sm:$0xff]  ;;  %v14797_v34 = vld [vmem:[%s17837_s10 + $0x270] sm:$0xff] }
 0x25b   : > { %6260 = vst.msk [vmem:[#allocation2 + $0x40] sm:$0xff] %vm282_vm1, %v6228_v54  ;;  %5815 = vst.msk [vmem:[#allocation2 + $0x78] sm:$0xff] %vm282_vm1, %v5783_v46  ;;  %v6231_v59 = vadd.f32 %v16918_v5, %v6199_v63  ;;  %v5782_v6 = vadd.f32 %v5750_v15, %v5647_v30  ;;  %v5756_v3 = vld [vmem:[#allocation2 + $0xa0] sm:$0xff]  ;;  %v14798_v8 = vld [vmem:[%s17837_s10 + $0x288] sm:$0xff] }
 0x25c   : > { %v6198_v58 = vld [vmem:[#allocation2 + $0x50] sm:$0xff]  ;;  %v16877_v10 = vpop.f32.mrf.mxu1  ;;  %17176 = vmatmul.mubr.msk.f32.gmra.mxu1 %vm282_vm1, %v14791_v52  ;;  %v6099_v12 = vpop.f32.mrf.mxu0  ;;  %v5759_v52 = vld [vmem:[#allocation2 + $0xb8] sm:$0xff]  ;;  %v8851_v30 = vld [vmem:[%s17837_s10 + $0x180] sm:$0xff] }
 0x25d   : > { %17223 = vmatmul.mubr.msk.f32.gmra.mxu0 %vm282_vm1, %v8842_v2  ;;  %6263 = vst.msk [vmem:[#allocation2 + $0x58] sm:$0xff] %vm282_vm1, %v6231_v59  ;;  %5814 = vst.msk [vmem:[#allocation2 + $0x70] sm:$0xff] %vm282_vm1, %v5782_v6  ;;  %v6230_v62 = vadd.f32 %v6198_v58, %v6079_v29  ;;  %v5785_v39 = vadd.f32 %v16877_v10, %v5753_v23  ;;  %17178 = vmatprep.mubr.msk.f32.mxu1 %vm282_vm1, %v14792_v42  ;;  %v14796_v29 = vld [vmem:[%s17837_s10 + $0x268] sm:$0xff]  ;;  %v14799_v42 = vld [vmem:[%s17837_s10 + $0x290] sm:$0xff] }
 0x25e   : > { %17225 = vmatprep.mubr.msk.f32.mxu0 %vm282_vm1, %v8843_v18  ;;  %v6201_v53 = vld [vmem:[#allocation2 + $0x68] sm:$0xff]  ;;  %v5657_v28 = vpop.f32.mrf.mxu1  ;;  %v16927_v56 = vpop.f32.mrf.mxu0  ;;  %v5758_v6 = vld [vmem:[#allocation2 + $0xb0] sm:$0xff] }
 0x25f   : > { %6262 = vst.msk [vmem:[#allocation2 + $0x50] sm:$0xff] %vm282_vm1, %v6230_v62  ;;  %5817 = vst.msk [vmem:[#allocation2 + $0x88] sm:$0xff] %vm282_vm1, %v5785_v39  ;;  %v6233_v61 = vadd.f32 %v16921_v13, %v6201_v53  ;;  %v5784_v55 = vadd.f32 %v5752_v4, %v5657_v28  ;;  %v14800_v58 = vld [vmem:[%s17837_s10 + $0x2a8] sm:$0xff]  ;;  %v8853_v53 = vld [vmem:[%s17837_s10 + $0x1a0] sm:$0xff] }
 0x260   : > { %v6200_v37 = vld [vmem:[#allocation2 + $0x60] sm:$0xff]  ;;  %v16880_v41 = vpop.f32.mrf.mxu1  ;;  %17179 = vmatmul.mubr.msk.f32.gmra.mxu1 %vm282_vm1, %v14793_v36  ;;  %v6109_v5 = vpop.f32.mrf.mxu0  ;;  %v5761_v39 = vld [vmem:[#allocation2 + $0xc8] sm:$0xff]  ;;  %v14801_v4 = vld [vmem:[%s17837_s10 + $0x2b0] sm:$0xff] }
 0x261   : > { %17226 = vmatmul.mubr.msk.f32.gmra.mxu0 %vm282_vm1, %v20156_v38  ;;  %6265 = vst.msk [vmem:[#allocation2 + $0x68] sm:$0xff] %vm282_vm1, %v6233_v61  ;;  %5816 = vst.msk [vmem:[#allocation2 + $0x80] sm:$0xff] %vm282_vm1, %v5784_v55  ;;  %v6232_v38 = vadd.f32 %v6200_v37, %v6089_v51  ;;  %v5787_v0 = vadd.f32 %v16880_v41, %v5755_v22  ;;  %17181 = vmatprep.mubr.msk.f32.mxu1 %vm282_vm1, %v14794_v7  ;;  %v5760_v61 = vld [vmem:[#allocation2 + $0xc0] sm:$0xff]  ;;  %v14802_v55 = vld [vmem:[%s17837_s10 + $0x2c8] sm:$0xff] }
 0x262   : > { %17228 = vmatprep.mubr.msk.f32.mxu0 %vm282_vm1, %v8845_v35  ;;  %v6203_v45 = vld [vmem:[#allocation2 + $0x78] sm:$0xff]  ;;  %v5667_v40 = vpop.f32.mrf.mxu1  ;;  %v16930_v50 = vpop.f32.mrf.mxu0 }
 0x263   : > { %6264 = vst.msk [vmem:[#allocation2 + $0x60] sm:$0xff] %vm282_vm1, %v6232_v38  ;;  %5819 = vst.msk [vmem:[#allocation2 + $0x98] sm:$0xff] %vm282_vm1, %v5787_v0  ;;  %v6235_v60 = vadd.f32 %v16924_v24, %v6203_v45  ;;  %v5786_v26 = vadd.f32 %v5754_v48, %v5667_v40  ;;  %v5763_v38 = vld [vmem:[#allocation2 + $0xd8] sm:$0xff]  ;;  %v14803_v40 = vld [vmem:[%s17837_s10 + $0x2d0] sm:$0xff] }
 0x264   : > { %v6202_v31 = vld [vmem:[#allocation2 + $0x70] sm:$0xff]  ;;  %v16883_v25 = vpop.f32.mrf.mxu1  ;;  %17182 = vmatmul.mubr.msk.f32.gmra.mxu1 %vm282_vm1, %v14795_v21  ;;  %v6119_v1 = vpop.f32.mrf.mxu0  ;;  %v8855_v21 = vld [vmem:[%s17837_s10 + $0x1c0] sm:$0xff] }
 0x265   : > { %17229 = vmatmul.mubr.msk.f32.gmra.mxu0 %vm282_vm1, %v20171_v33  ;;  %6267 = vst.msk [vmem:[#allocation2 + $0x78] sm:$0xff] %vm282_vm1, %v6235_v60  ;;  %5818 = vst.msk [vmem:[#allocation2 + $0x90] sm:$0xff] %vm282_vm1, %v5786_v26  ;;  %v6234_v33 = vadd.f32 %v6202_v31, %v6099_v12  ;;  %v5789_v13 = vadd.f32 %v16883_v25, %v5757_v57  ;;  %17184 = vmatprep.mubr.msk.f32.mxu1 %vm282_vm1, %v14796_v29  ;;  %v14804_v60 = vld [vmem:[%s17837_s10 + $0x2e8] sm:$0xff] }
 0x266   : > { %17231 = vmatprep.mubr.msk.f32.mxu0 %vm282_vm1, %v8847_v32  ;;  %v6205_v14 = vld [vmem:[#allocation2 + $0x88] sm:$0xff]  ;;  %v5677_v2 = vpop.f32.mrf.mxu1  ;;  %v16933_v16 = vpop.f32.mrf.mxu0 }
 0x267   : > { %6266 = vst.msk [vmem:[#allocation2 + $0x70] sm:$0xff] %vm282_vm1, %v6234_v33  ;;  %5821 = vst.msk [vmem:[#allocation2 + $0xa8] sm:$0xff] %vm282_vm1, %v5789_v13  ;;  %v6237_v51 = vadd.f32 %v16927_v56, %v6205_v14  ;;  %v5788_v18 = vadd.f32 %v5756_v3, %v5677_v2  ;;  %v8857_v13 = vld [vmem:[%s17837_s10 + $0x1e0] sm:$0xff]  ;;  %v14805_v14 = vld [vmem:[%s17837_s10 + $0x2f0] sm:$0xff] }
 0x268   : > { %v6204_v54 = vld [vmem:[#allocation2 + $0x80] sm:$0xff]  ;;  %v16886_v46 = vpop.f32.mrf.mxu1  ;;  %17185 = vmatmul.mubr.msk.f32.gmra.mxu1 %vm282_vm1, %v14797_v34  ;;  %v6129_v63 = vpop.f32.mrf.mxu0 }
 0x269   : > { %17232 = vmatmul.mubr.msk.f32.gmra.mxu0 %vm282_vm1, %v20197_v19  ;;  %6269 = vst.msk [vmem:[#allocation2 + $0x88] sm:$0xff] %vm282_vm1, %v6237_v51  ;;  %5820 = vst.msk [vmem:[#allocation2 + $0xa0] sm:$0xff] %vm282_vm1, %v5788_v18  ;;  %v6236_v19 = vadd.f32 %v6204_v54, %v6109_v5  ;;  %v5791_v15 = vadd.f32 %v16886_v46, %v5759_v52  ;;  %17187 = vmatprep.mubr.msk.f32.mxu1 %vm282_vm1, %v14798_v8  ;;  %v5764_v8 = vld [vmem:[#allocation2 + $0xe0] sm:$0xff] }
 0x26a   : > { %17234 = vmatprep.mubr.msk.f32.mxu0 %vm282_vm1, %v8849_v49  ;;  %v6207_v24 = vld [vmem:[#allocation2 + $0x98] sm:$0xff]  ;;  %v5687_v59 = vpop.f32.mrf.mxu1  ;;  %v16936_v10 = vpop.f32.mrf.mxu0  ;;  %v5765_v49 = vld [vmem:[#allocation2 + $0xe8] sm:$0xff] }
 0x26b   : > { %6268 = vst.msk [vmem:[#allocation2 + $0x80] sm:$0xff] %vm282_vm1, %v6236_v19  ;;  %5823 = vst.msk [vmem:[#allocation2 + $0xb8] sm:$0xff] %vm282_vm1, %v5791_v15  ;;  %v6239_v23 = vadd.f32 %v16930_v50, %v6207_v24  ;;  %v5790_v12 = vadd.f32 %v5758_v6, %v5687_v59  ;;  %v5762_v50 = vld [vmem:[#allocation2 + $0xd0] sm:$0xff] }
 0x26c   : > { %v6206_v35 = vld [vmem:[#allocation2 + $0x90] sm:$0xff]  ;;  %v16889_v62 = vpop.f32.mrf.mxu1  ;;  %17188 = vmatmul.mubr.msk.f32.gmra.mxu1 %vm282_vm1, %v14799_v42  ;;  %v6139_v36 = vpop.f32.mrf.mxu0 }
 0x26d   : > { %17235 = vmatmul.mubr.msk.f32.gmra.mxu0 %vm282_vm1, %v20218_v11  ;;  %6271 = vst.msk [vmem:[#allocation2 + $0x98] sm:$0xff] %vm282_vm1, %v6239_v23  ;;  %5822 = vst.msk [vmem:[#allocation2 + $0xb0] sm:$0xff] %vm282_vm1, %v5790_v12  ;;  %v6238_v11 = vadd.f32 %v6206_v35, %v6119_v1  ;;  %v5793_v28 = vadd.f32 %v16889_v62, %v5761_v39  ;;  %17190 = vmatprep.mubr.msk.f32.mxu1 %vm282_vm1, %v14800_v58  ;;  %v9667_v19 = vld [vmem:[%s17837_s10 + $0xa] sm:$0xff]  ;;  %v9668_v35 = vld [vmem:[%s17837_s10 + $0x12] sm:$0xff] }
 0x26e   : > { %17237 = vmatprep.mubr.msk.f32.mxu0 %vm282_vm1, %v8851_v30  ;;  %v6209_v7 = vld [vmem:[#allocation2 + $0xa8] sm:$0xff]  ;;  %v5697_v56 = vpop.f32.mrf.mxu1  ;;  %v16939_v37 = vpop.f32.mrf.mxu0  ;;  %v5766_v6 = vld [vmem:[#allocation2 + $0xf0] sm:$0xff]  ;;  %v20408_v62 = vld [vmem:[%s22301_s1 + $0x5c] sm:$0xf] }
 0x26f   : > { %6270 = vst.msk [vmem:[#allocation2 + $0x90] sm:$0xff] %vm282_vm1, %v6238_v11  ;;  %5825 = vst.msk [vmem:[#allocation2 + $0xc8] sm:$0xff] %vm282_vm1, %v5793_v28  ;;  %v6241_v41 = vadd.f32 %v16933_v16, %v6209_v7  ;;  %v5792_v22 = vadd.f32 %v5760_v61, %v5697_v56  ;;  %v9215_v16 = vld [vmem:[%s17837_s10 + $0x5] sm:$0xff]  ;;  %v9216_v42 = vld [vmem:[%s17837_s10 + $0xd] sm:$0xff] }
 0x270   : > { %v6208_v5 = vld [vmem:[#allocation2 + $0xa0] sm:$0xff]  ;;  %v16892_v32 = vpop.f32.mrf.mxu1  ;;  %17191 = vmatmul.mubr.msk.f32.gmra.mxu1 %vm282_vm1, %v14801_v4  ;;  %v6149_v0 = vpop.f32.mrf.mxu0  ;;  %v9669_v11 = vld [vmem:[%s17837_s10 + $0x2a] sm:$0xff] }
 0x271   : > { %17238 = vmatmul.mubr.msk.f32.gmra.mxu0 %vm282_vm1, %v20233_v47  ;;  %6273 = vst.msk [vmem:[#allocation2 + $0xa8] sm:$0xff] %vm282_vm1, %v6241_v41  ;;  %5824 = vst.msk [vmem:[#allocation2 + $0xc0] sm:$0xff] %vm282_vm1, %v5792_v22  ;;  %v6240_v47 = vadd.f32 %v6208_v5, %v6129_v63  ;;  %v5795_v45 = vadd.f32 %v16892_v32, %v5763_v38  ;;  %17193 = vmatprep.mubr.msk.f32.mxu1 %vm282_vm1, %v14802_v55  ;;  %v5767_v63 = vld [vmem:[#allocation2 + $0xf8] sm:$0xff]  ;;  %v9217_v58 = vld [vmem:[%s17837_s10 + $0x25] sm:$0xff] }
 0x272   : > { %17240 = vmatprep.mubr.msk.f32.mxu0 %vm282_vm1, %v8853_v53  ;;  %v6211_v48 = vld [vmem:[#allocation2 + $0xb8] sm:$0xff]  ;;  %v5707_v29 = vpop.f32.mrf.mxu1  ;;  %v16942_v26 = vpop.f32.mrf.mxu0  ;;  %v6641_v53 = vld [vmem:[#allocation2 + $0x8] sm:$0xff]  ;;  %v20421_v56 = vld [vmem:[%s22301_s1 + $0x60] sm:$0xf] }
 0x273   : > { %6272 = vst.msk [vmem:[#allocation2 + $0xa0] sm:$0xff] %vm282_vm1, %v6240_v47  ;;  %5827 = vst.msk [vmem:[#allocation2 + $0xd8] sm:$0xff] %vm282_vm1, %v5795_v45  ;;  %v6243_v31 = vadd.f32 %v16936_v10, %v6211_v48  ;;  %v5794_v25 = vadd.f32 %v5762_v50, %v5707_v29  ;;  %v9218_v7 = vld [vmem:[%s17837_s10 + $0x2d] sm:$0xff]  ;;  %v9219_v41 = vld [vmem:[%s17837_s10 + $0x45] sm:$0xff] }
 0x274   : > { %v6210_v57 = vld [vmem:[#allocation2 + $0xb0] sm:$0xff]  ;;  %v16895_v1 = vpop.f32.mrf.mxu1  ;;  %17194 = vmatmul.mubr.msk.f32.gmra.mxu1 %vm282_vm1, %v14803_v40  ;;  %v6159_v33 = vpop.f32.mrf.mxu0 }
 0x275   : > { %17241 = vmatmul.mubr.msk.f32.gmra.mxu0 %vm282_vm1, %v20247_v43  ;;  %6275 = vst.msk [vmem:[#allocation2 + $0xb8] sm:$0xff] %vm282_vm1, %v6243_v31  ;;  %5826 = vst.msk [vmem:[#allocation2 + $0xd0] sm:$0xff] %vm282_vm1, %v5794_v25  ;;  %v6242_v43 = vadd.f32 %v6210_v57, %v6139_v36  ;;  %v5797_v34 = vadd.f32 %v16895_v1, %v5765_v49  ;;  %17196 = vmatprep.mubr.msk.f32.mxu1 %vm282_vm1, %v14804_v60  ;;  %v9670_v32 = vld [vmem:[%s17837_s10 + $0x32] sm:$0xff]  ;;  %v9671_v45 = vld [vmem:[%s17837_s10 + $0x4a] sm:$0xff] }
 0x276   : > { %17243 = vmatprep.mubr.msk.f32.mxu0 %vm282_vm1, %v8855_v21  ;;  %v6213_v2 = vld [vmem:[#allocation2 + $0xc8] sm:$0xff]  ;;  %v5717_v3 = vpop.f32.mrf.mxu1  ;;  %v16945_v51 = vpop.f32.mrf.mxu0  ;;  %v6643_v21 = vld [vmem:[#allocation2 + $0x18] sm:$0xff]  ;;  %v6642_v60 = vld [vmem:[#allocation2 + $0x10] sm:$0xff] }
 0x277   : > { %6274 = vst.msk [vmem:[#allocation2 + $0xb0] sm:$0xff] %vm282_vm1, %v6242_v43  ;;  %5829 = vst.msk [vmem:[#allocation2 + $0xe8] sm:$0xff] %vm282_vm1, %v5797_v34  ;;  %v6245_v18 = vadd.f32 %v16939_v37, %v6213_v2  ;;  %v5796_v54 = vadd.f32 %v5764_v8, %v5717_v3  ;;  %v6640_v37 = vld [vmem:[#allocation2] sm:$0xff]  ;;  %v9220_v48 = vld [vmem:[%s17837_s10 + $0x4d] sm:$0xff] }
 0x278   : > { %v6212_v46 = vld [vmem:[#allocation2 + $0xc0] sm:$0xff]  ;;  %v16898_v52 = vpop.f32.mrf.mxu1  ;;  %17197 = vmatmul.mubr.msk.f32.gmra.mxu1 %vm282_vm1, %v14805_v14  ;;  %v6169_v30 = vpop.f32.mrf.mxu0  ;;  %v9672_v1 = vld [vmem:[%s17837_s10 + $0x52] sm:$0xff]  ;;  %v9673_v34 = vld [vmem:[%s17837_s10 + $0x6a] sm:$0xff] }
 0x279   : > { %17244 = vmatmul.mubr.msk.f32.gmra.mxu0 %vm282_vm1, %v20262_v44  ;;  %6277 = vst.msk [vmem:[#allocation2 + $0xc8] sm:$0xff] %vm282_vm1, %v6245_v18  ;;  %5828 = vst.msk [vmem:[#allocation2 + $0xe0] sm:$0xff] %vm282_vm1, %v5796_v54  ;;  %v6244_v44 = vadd.f32 %v6212_v46, %v6149_v0  ;;  %v5799_v15 = vadd.f32 %v16898_v52, %v5767_v63  ;;  %17251 = vmatprep.mubr.msk.f32.mxu1 %vm282_vm1, %v9215_v16  ;;  %v9222_v3 = vld [vmem:[%s17837_s10 + $0x6d] sm:$0xff]  ;;  %v9223_v18 = vld [vmem:[%s17837_s10 + $0x85] sm:$0xff] }
 0x27a   : > { %17246 = vmatprep.mubr.msk.f32.mxu0 %vm282_vm1, %v8857_v13  ;;  %v6215_v24 = vld [vmem:[#allocation2 + $0xd8] sm:$0xff]  ;;  %v5727_v59 = vpop.f32.mrf.mxu1  ;;  %v16948_v10 = vpop.f32.mrf.mxu0  ;;  %v6645_v13 = vld [vmem:[#allocation2 + $0x28] sm:$0xff] }
 0x27b   : > { %6276 = vst.msk [vmem:[#allocation2 + $0xc0] sm:$0xff] %vm282_vm1, %v6244_v44  ;;  %5831 = vst.msk [vmem:[#allocation2 + $0xf8] sm:$0xff] %vm282_vm1, %v5799_v15  ;;  %v6247_v23 = vadd.f32 %v16942_v26, %v6215_v24  ;;  %v5798_v12 = vadd.f32 %v5766_v6, %v5727_v59  ;;  %v9221_v26 = vld [vmem:[%s17837_s10 + $0x65] sm:$0xff]  ;;  %v9674_v63 = vld [vmem:[%s17837_s10 + $0x72] sm:$0xff] }
 0x27c   : > { %v6214_v39 = vld [vmem:[#allocation2 + $0xd0] sm:$0xff]  ;;  %v16953_v36 = vpop.f32.mrf.mxu1  ;;  %17252 = vmatmul.mubr.msk.f32.vlgmr.msra.gmra.mxu1 %vm282_vm1, %v9216_v42  ;;  %v6647_v44 = vld [vmem:[#allocation2 + $0x38] sm:$0xff] }
 0x27d   : > { %17247 = vmatmul.mubr.msk.f32.gmra.mxu0 %vm282_vm1, %v20277_v27  ;;  %v6179_v27 = vpop.f32.mrf.mxu0  ;;  %6279 = vst.msk [vmem:[#allocation2 + $0xd8] sm:$0xff] %vm282_vm1, %v6247_v23  ;;  %5830 = vst.msk [vmem:[#allocation2 + $0xf0] sm:$0xff] %vm282_vm1, %v5798_v12  ;;  %v6246_v28 = vadd.f32 %v6214_v39, %v6159_v33  ;;  %v6673_v4 = vadd.f32 %v16953_v36, %v6641_v53  ;;  %17350 = vmatpush3.msk.msra.mxu1 %vm379_vm0, %v20181_v9  ;;  %v9675_v42 = vld [vmem:[%s17837_s10 + $0x8a] sm:$0xff]  ;;  %v9676_v53 = vld [vmem:[%s17837_s10 + $0x92] sm:$0xff] }
 0x27e   : > { %17301 = vmatprep.mubr.msk.f32.mxu0 %vm282_vm1, %v9667_v19  ;;  %17254 = vmatprep.mubr.msk.f32.mxu1 %vm282_vm1, %v9217_v58  ;;  %v6217_v61 = vld [vmem:[#allocation2 + $0xe8] sm:$0xff]  ;;  %v6481_v55 = vpop.f32.mrf.mxu1  ;;  %v6646_v23 = vld [vmem:[#allocation2 + $0x30] sm:$0xff] }
 0x27f   : > { %v17003_v22 = vpop.f32.mrf.mxu0  ;;  %17449 = vmatprep.subr.msk.mxu1 %vm379_vm0, %v20408_v62  ;;  %6278 = vst.msk [vmem:[#allocation2 + $0xd0] sm:$0xff] %vm282_vm1, %v6246_v28  ;;  %v6249_v9 = vadd.f32 %v16945_v51, %v6217_v61  ;;  %6705 = vst.msk [vmem:[#allocation2 + $0x8] sm:$0xff] %vm282_vm1, %v6673_v4  ;;  %v6672_v5 = vadd.f32 %v6640_v37, %v6481_v55  ;;  %v6644_v51 = vld [vmem:[#allocation2 + $0x20] sm:$0xff]  ;;  %v9224_v6 = vld [vmem:[%s17837_s10 + $0x8d] sm:$0xff] }
 0x280   : > { %v6216_v38 = vld [vmem:[#allocation2 + $0xe0] sm:$0xff]  ;;  %v16956_v0 = vpop.f32.mrf.mxu1  ;;  %17255 = vmatmul.mubr.msk.f32.gmra.mxu1 %vm282_vm1, %v9218_v7  ;;  %v6649_v28 = vld [vmem:[#allocation2 + $0x48] sm:$0xff] }
 0x281   : > { %17302 = vmatmul.mubr.msk.f32.vlgmr.msra.gmra.mxu0 %vm282_vm1, %v9668_v35  ;;  %v6933_v47 = vpop.f32.mrf.mxu0  ;;  %6281 = vst.msk [vmem:[#allocation2 + $0xe8] sm:$0xff] %vm282_vm1, %v6249_v9  ;;  %v6248_v40 = vadd.f32 %v6216_v38, %v6169_v30  ;;  %6704 = vst.msk [vmem:[#allocation2] sm:$0xff] %vm282_vm1, %v6672_v5  ;;  %17257 = vmatprep.mubr.msk.f32.mxu1 %vm282_vm1, %v9219_v41  ;;  %v20466_v12 = vld [vmem:[%s17837_s10 + $0xa5] sm:$0xff]  ;;  %v20480_v37 = vld [vmem:[%s17837_s10 + $0xad] sm:$0xff] }
 0x282   : > { %17400 = vmatpush3.msk.msra.mxu0 %vm379_vm0, %v20194_v20  ;;  %17304 = vmatprep.mubr.msk.f32.mxu0 %vm282_vm1, %v9669_v11  ;;  %v6675_v20 = vadd.f32 %v16956_v0, %v6643_v21  ;;  %v6219_v29 = vld [vmem:[#allocation2 + $0xf8] sm:$0xff]  ;;  %v6491_v50 = vpop.f32.mrf.mxu1  ;;  %v9677_v7 = vld [vmem:[%s17837_s10 + $0xaa] sm:$0xff]  ;;  %v6648_v9 = vld [vmem:[#allocation2 + $0x40] sm:$0xff] }
 0x283   : > { %17499 = vmatprep.subr.msk.mxu0 %vm379_vm0, %v20421_v56  ;;  %v17006_v31 = vpop.f32.mrf.mxu0  ;;  %6280 = vst.msk [vmem:[#allocation2 + $0xe0] sm:$0xff] %vm282_vm1, %v6248_v40  ;;  %v6251_v25 = vadd.f32 %v16948_v10, %v6219_v29  ;;  %v6674_v57 = vadd.f32 %v6642_v60, %v6491_v50  ;;  %v20483_v5 = vld [vmem:[%s17837_s10 + $0xc5] sm:$0xff]  ;;  %v9678_v21 = vld [vmem:[%s17837_s10 + $0xb2] sm:$0xff] }
 0x284   : > { %6707 = vst.msk [vmem:[#allocation2 + $0x18] sm:$0xff] %vm282_vm1, %v6675_v20  ;;  %v6218_v49 = vld [vmem:[#allocation2 + $0xf0] sm:$0xff]  ;;  %v16959_v33 = vpop.f32.mrf.mxu1  ;;  %17258 = vmatmul.mubr.msk.f32.gmra.mxu1 %vm282_vm1, %v9220_v48  ;;  %v6651_v40 = vld [vmem:[#allocation2 + $0x58] sm:$0xff] }
 0x285   : > { %17305 = vmatmul.mubr.msk.f32.gmra.mxu0 %vm282_vm1, %v9670_v32  ;;  %v6943_v43 = vpop.f32.mrf.mxu0  ;;  %6283 = vst.msk [vmem:[#allocation2 + $0xf8] sm:$0xff] %vm282_vm1, %v6251_v25  ;;  %v6250_v14 = vadd.f32 %v6218_v49, %v6179_v27  ;;  %6706 = vst.msk [vmem:[#allocation2 + $0x10] sm:$0xff] %vm282_vm1, %v6674_v57  ;;  %v6677_v2 = vadd.f32 %v16959_v33, %v6645_v13  ;;  %17260 = vmatprep.mubr.msk.f32.mxu1 %vm282_vm1, %v9221_v26  ;;  %v9679_v48 = vld [vmem:[%s17837_s10 + $0xca] sm:$0xff]  ;;  %v9680_v13 = vld [vmem:[%s17837_s10 + $0xd2] sm:$0xff] }
 0x286   : > { %17307 = vmatprep.mubr.msk.f32.mxu0 %vm282_vm1, %v9671_v45  ;;  %v7093_v8 = vld [vmem:[#allocation2 + $0x8] sm:$0xff]  ;;  %v6501_v16 = vpop.f32.mrf.mxu1  ;;  %v6650_v25 = vld [vmem:[#allocation2 + $0x50] sm:$0xff] }
 0x287   : > { %v17009_v54 = vpop.f32.mrf.mxu0  ;;  %6282 = vst.msk [vmem:[#allocation2 + $0xf0] sm:$0xff] %vm282_vm1, %v6250_v14  ;;  %6709 = vst.msk [vmem:[#allocation2 + $0x28] sm:$0xff] %vm282_vm1, %v6677_v2  ;;  %v7125_v46 = vadd.f32 %v17003_v22, %v7093_v8  ;;  %v6676_v52 = vadd.f32 %v6644_v51, %v6501_v16  ;;  %v20498_v60 = vld [vmem:[%s17837_s10 + $0xcd] sm:$0xff]  ;;  %v20501_v57 = vld [vmem:[%s17837_s10 + $0xe5] sm:$0xff] }
 0x288   : > { %v7092_v30 = vld [vmem:[#allocation2] sm:$0xff]  ;;  %v16962_v19 = vpop.f32.mrf.mxu1  ;;  %17261 = vmatmul.mubr.msk.f32.gmra.mxu1 %vm282_vm1, %v9222_v3  ;;  %v6653_v14 = vld [vmem:[#allocation2 + $0x68] sm:$0xff] }
 0x289   : > { %17308 = vmatmul.mubr.msk.f32.gmra.mxu0 %vm282_vm1, %v9672_v1  ;;  %v6953_v15 = vpop.f32.mrf.mxu0  ;;  %7157 = vst.msk [vmem:[#allocation2 + $0x8] sm:$0xff] %vm282_vm1, %v7125_v46  ;;  %6708 = vst.msk [vmem:[#allocation2 + $0x20] sm:$0xff] %vm282_vm1, %v6676_v52  ;;  %v7124_v24 = vadd.f32 %v7092_v30, %v6933_v47  ;;  %v6679_v59 = vadd.f32 %v16962_v19, %v6647_v44  ;;  %17263 = vmatprep.mubr.msk.f32.mxu1 %vm282_vm1, %v9223_v18  ;;  %v9681_v3 = vld [vmem:[%s17837_s10 + $0xea] sm:$0xff]  ;;  %v6652_v46 = vld [vmem:[#allocation2 + $0x60] sm:$0xff] }
 0x28a   : > { %17310 = vmatprep.mubr.msk.f32.mxu0 %vm282_vm1, %v9673_v34  ;;  %v6511_v10 = vpop.f32.mrf.mxu1  ;;  %v20516_v51 = vld [vmem:[%s17837_s10 + $0xed] sm:$0xff]  ;;  %v20519_v52 = vld [vmem:[%s17837_s10 + $0x105] sm:$0xff] }
 0x28b   : > { %v7095_v58 = vld [vmem:[#allocation2 + $0x18] sm:$0xff]  ;;  %v17012_v35 = vpop.f32.mrf.mxu0  ;;  %7156 = vst.msk [vmem:[#allocation2] sm:$0xff] %vm282_vm1, %v7124_v24  ;;  %6711 = vst.msk [vmem:[#allocation2 + $0x38] sm:$0xff] %vm282_vm1, %v6679_v59  ;;  %v6678_v36 = vadd.f32 %v6646_v23, %v6511_v10  ;;  %v20534_v23 = vld [vmem:[%s17837_s10 + $0x10d] sm:$0xff] }
 0x28c   : > { %v7127_v39 = vadd.f32 %v17006_v31, %v7095_v58  ;;  %v7094_v27 = vld [vmem:[#allocation2 + $0x10] sm:$0xff]  ;;  %v16965_v11 = vpop.f32.mrf.mxu1  ;;  %17264 = vmatmul.mubr.msk.f32.gmra.mxu1 %vm282_vm1, %v9224_v6  ;;  %v6655_v24 = vld [vmem:[#allocation2 + $0x78] sm:$0xff] }
 0x28d   : > { %17311 = vmatmul.mubr.msk.f32.gmra.mxu0 %vm282_vm1, %v9674_v63  ;;  %v6963_v4 = vpop.f32.mrf.mxu0  ;;  %6710 = vst.msk [vmem:[#allocation2 + $0x30] sm:$0xff] %vm282_vm1, %v6678_v36  ;;  %v7126_v61 = vadd.f32 %v7094_v27, %v6943_v43  ;;  %v6681_v55 = vadd.f32 %v16965_v11, %v6649_v28  ;;  %17266 = vmatprep.mubr.msk.f32.mxu1 %vm282_vm1, %v20466_v12  ;;  %v9682_v44 = vld [vmem:[%s17837_s10 + $0xf2] sm:$0xff]  ;;  %v9683_v6 = vld [vmem:[%s17837_s10 + $0x10a] sm:$0xff] }
 0x28e   : > { %17313 = vmatprep.mubr.msk.f32.mxu0 %vm282_vm1, %v9675_v42  ;;  %7159 = vst.msk [vmem:[#allocation2 + $0x18] sm:$0xff] %vm282_vm1, %v7127_v39  ;;  %v7097_v41 = vld [vmem:[#allocation2 + $0x28] sm:$0xff]  ;;  %v6521_v22 = vpop.f32.mrf.mxu1  ;;  %v6654_v36 = vld [vmem:[#allocation2 + $0x70] sm:$0xff] }
 0x28f   : > { %v17015_v32 = vpop.f32.mrf.mxu0  ;;  %7158 = vst.msk [vmem:[#allocation2 + $0x10] sm:$0xff] %vm282_vm1, %v7126_v61  ;;  %6713 = vst.msk [vmem:[#allocation2 + $0x48] sm:$0xff] %vm282_vm1, %v6681_v55  ;;  %v7129_v38 = vadd.f32 %v17009_v54, %v7097_v41  ;;  %v6680_v0 = vadd.f32 %v6648_v9, %v6521_v22  ;;  %v6657_v55 = vld [vmem:[#allocation2 + $0x88] sm:$0xff] }
 0x290   : > { %v7096_v47 = vld [vmem:[#allocation2 + $0x20] sm:$0xff]  ;;  %v16968_v45 = vpop.f32.mrf.mxu1  ;;  %17267 = vmatmul.mubr.msk.f32.gmra.mxu1 %vm282_vm1, %v20480_v37  ;;  %v9685_v22 = vld [vmem:[%s17837_s10 + $0x12a] sm:$0xff] }
 0x291   : > { %17314 = vmatmul.mubr.msk.f32.gmra.mxu0 %vm282_vm1, %v9676_v53  ;;  %v6973_v20 = vpop.f32.mrf.mxu0  ;;  %7161 = vst.msk [vmem:[#allocation2 + $0x28] sm:$0xff] %vm282_vm1, %v7129_v38  ;;  %6712 = vst.msk [vmem:[#allocation2 + $0x40] sm:$0xff] %vm282_vm1, %v6680_v0  ;;  %v7128_v29 = vadd.f32 %v7096_v47, %v6953_v15  ;;  %v6683_v50 = vadd.f32 %v16968_v45, %v6651_v40  ;;  %17269 = vmatprep.mubr.msk.f32.mxu1 %vm282_vm1, %v20483_v5  ;;  %v20537_v53 = vld [vmem:[%s17837_s10 + $0x125] sm:$0xff]  ;;  %v20552_v38 = vld [vmem:[%s17837_s10 + $0x12d] sm:$0xff] }
 0x292   : > { %17316 = vmatprep.mubr.msk.f32.mxu0 %vm282_vm1, %v9677_v7  ;;  %v7099_v26 = vld [vmem:[#allocation2 + $0x38] sm:$0xff]  ;;  %v6531_v31 = vpop.f32.mrf.mxu1  ;;  %v6656_v47 = vld [vmem:[#allocation2 + $0x80] sm:$0xff] }
 0x293   : > { %v17018_v1 = vpop.f32.mrf.mxu0  ;;  %7160 = vst.msk [vmem:[#allocation2 + $0x20] sm:$0xff] %vm282_vm1, %v7128_v29  ;;  %6715 = vst.msk [vmem:[#allocation2 + $0x58] sm:$0xff] %vm282_vm1, %v6683_v50  ;;  %v7131_v49 = vadd.f32 %v17012_v35, %v7099_v26  ;;  %v6682_v33 = vadd.f32 %v6650_v25, %v6531_v31  ;;  %v20555_v45 = vld [vmem:[%s17837_s10 + $0x145] sm:$0xff]  ;;  %v9686_v29 = vld [vmem:[%s17837_s10 + $0x132] sm:$0xff] }
 0x294   : > { %v7098_v43 = vld [vmem:[#allocation2 + $0x30] sm:$0xff]  ;;  %v16971_v34 = vpop.f32.mrf.mxu1  ;;  %17270 = vmatmul.mubr.msk.f32.gmra.mxu1 %vm282_vm1, %v20498_v60  ;;  %v6659_v31 = vld [vmem:[#allocation2 + $0x98] sm:$0xff] }
 0x295   : > { %17317 = vmatmul.mubr.msk.f32.gmra.mxu0 %vm282_vm1, %v9678_v21  ;;  %v6983_v2 = vpop.f32.mrf.mxu0  ;;  %7163 = vst.msk [vmem:[#allocation2 + $0x38] sm:$0xff] %vm282_vm1, %v7131_v49  ;;  %6714 = vst.msk [vmem:[#allocation2 + $0x50] sm:$0xff] %vm282_vm1, %v6682_v33  ;;  %v7130_v8 = vadd.f32 %v7098_v43, %v6963_v4  ;;  %v6685_v16 = vadd.f32 %v16971_v34, %v6653_v14  ;;  %17272 = vmatprep.mubr.msk.f32.mxu1 %vm282_vm1, %v20501_v57  ;;  %v9684_v4 = vld [vmem:[%s17837_s10 + $0x112] sm:$0xff] }
 0x296   : > { %17319 = vmatprep.mubr.msk.f32.mxu0 %vm282_vm1, %v9679_v48  ;;  %v7101_v18 = vld [vmem:[#allocation2 + $0x48] sm:$0xff]  ;;  %v6541_v54 = vpop.f32.mrf.mxu1  ;;  %v6658_v14 = vld [vmem:[#allocation2 + $0x90] sm:$0xff] }
 0x297   : > { %v17021_v63 = vpop.f32.mrf.mxu0  ;;  %7162 = vst.msk [vmem:[#allocation2 + $0x30] sm:$0xff] %vm282_vm1, %v7130_v8  ;;  %6717 = vst.msk [vmem:[#allocation2 + $0x68] sm:$0xff] %vm282_vm1, %v6685_v16  ;;  %v7133_v30 = vadd.f32 %v17015_v32, %v7101_v18  ;;  %v6684_v19 = vadd.f32 %v6652_v46, %v6541_v54  ;;  %v9688_v18 = vld [vmem:[%s17837_s10 + $0x152] sm:$0xff] }
 0x298   : > { %v7100_v15 = vld [vmem:[#allocation2 + $0x40] sm:$0xff]  ;;  %v16974_v42 = vpop.f32.mrf.mxu1  ;;  %17273 = vmatmul.mubr.msk.f32.gmra.mxu1 %vm282_vm1, %v20516_v51 }
 0x299   : > { %17320 = vmatmul.mubr.msk.f32.gmra.mxu0 %vm282_vm1, %v9680_v13  ;;  %v6993_v59 = vpop.f32.mrf.mxu0  ;;  %7165 = vst.msk [vmem:[#allocation2 + $0x48] sm:$0xff] %vm282_vm1, %v7133_v30  ;;  %6716 = vst.msk [vmem:[#allocation2 + $0x60] sm:$0xff] %vm282_vm1, %v6684_v19  ;;  %v7132_v58 = vadd.f32 %v7100_v15, %v6973_v20  ;;  %v6687_v10 = vadd.f32 %v16974_v42, %v6655_v24  ;;  %17275 = vmatprep.mubr.msk.f32.mxu1 %vm282_vm1, %v20519_v52  ;;  %v20570_v13 = vld [vmem:[%s17837_s10 + $0x14d] sm:$0xff] }
 0x29a   : > { %17322 = vmatprep.mubr.msk.f32.mxu0 %vm282_vm1, %v9681_v3  ;;  %v7103_v35 = vld [vmem:[#allocation2 + $0x58] sm:$0xff]  ;;  %v6551_v39 = vpop.f32.mrf.mxu1  ;;  %v9689_v19 = vld [vmem:[%s17837_s10 + $0x16a] sm:$0xff] }
 0x29b   : > { %v17024_v27 = vpop.f32.mrf.mxu0  ;;  %7164 = vst.msk [vmem:[#allocation2 + $0x40] sm:$0xff] %vm282_vm1, %v7132_v58  ;;  %6719 = vst.msk [vmem:[#allocation2 + $0x78] sm:$0xff] %vm282_vm1, %v6687_v10  ;;  %v7135_v11 = vadd.f32 %v17018_v1, %v7103_v35  ;;  %v6686_v28 = vadd.f32 %v6654_v36, %v6551_v39  ;;  %v9687_v1 = vld [vmem:[%s17837_s10 + $0x14a] sm:$0xff]  ;;  %v9690_v36 = vld [vmem:[%s17837_s10 + $0x172] sm:$0xff] }
 0x29c   : > { %v7102_v7 = vld [vmem:[#allocation2 + $0x50] sm:$0xff]  ;;  %v16977_v61 = vpop.f32.mrf.mxu1  ;;  %17276 = vmatmul.mubr.msk.f32.gmra.mxu1 %vm282_vm1, %v20534_v23  ;;  %v20591_v58 = vld [vmem:[%s17837_s10 + $0x185] sm:$0xff] }
 0x29d   : > { %17323 = vmatmul.mubr.msk.f32.gmra.mxu0 %vm282_vm1, %v9682_v44  ;;  %v7003_v41 = vpop.f32.mrf.mxu0  ;;  %7167 = vst.msk [vmem:[#allocation2 + $0x58] sm:$0xff] %vm282_vm1, %v7135_v11  ;;  %6718 = vst.msk [vmem:[#allocation2 + $0x70] sm:$0xff] %vm282_vm1, %v6686_v28  ;;  %v7134_v9 = vadd.f32 %v7102_v7, %v6983_v2  ;;  %v6689_v32 = vadd.f32 %v16977_v61, %v6657_v55  ;;  %17278 = vmatprep.mubr.msk.f32.mxu1 %vm282_vm1, %v20537_v53  ;;  %v20573_v2 = vld [vmem:[%s17837_s10 + $0x165] sm:$0xff]  ;;  %v20588_v42 = vld [vmem:[%s17837_s10 + $0x16d] sm:$0xff] }
 0x29e   : > { %17325 = vmatprep.mubr.msk.f32.mxu0 %vm282_vm1, %v9683_v6  ;;  %v7105_v0 = vld [vmem:[#allocation2 + $0x68] sm:$0xff]  ;;  %v6561_v21 = vpop.f32.mrf.mxu1  ;;  %v6660_v6 = vld [vmem:[#allocation2 + $0xa0] sm:$0xff]  ;;  %v6663_v28 = vld [vmem:[#allocation2 + $0xb8] sm:$0xff] }
 0x29f   : > { %v17027_v40 = vpop.f32.mrf.mxu0  ;;  %7166 = vst.msk [vmem:[#allocation2 + $0x50] sm:$0xff] %vm282_vm1, %v7134_v9  ;;  %6721 = vst.msk [vmem:[#allocation2 + $0x88] sm:$0xff] %vm282_vm1, %v6689_v32  ;;  %v7137_v20 = vadd.f32 %v17021_v63, %v7105_v0  ;;  %v6688_v48 = vadd.f32 %v6656_v47, %v6561_v21  ;;  %v6661_v63 = vld [vmem:[#allocation2 + $0xa8] sm:$0xff]  ;;  %v6662_v32 = vld [vmem:[#allocation2 + $0xb0] sm:$0xff] }
 0x2a0   : > { %v7104_v50 = vld [vmem:[#allocation2 + $0x60] sm:$0xff]  ;;  %v16980_v26 = vpop.f32.mrf.mxu1  ;;  %17279 = vmatmul.mubr.msk.f32.gmra.mxu1 %vm282_vm1, %v20552_v38  ;;  %v9691_v7 = vld [vmem:[%s17837_s10 + $0x18a] sm:$0xff] }
 0x2a1   : > { %17326 = vmatmul.mubr.msk.f32.gmra.mxu0 %vm282_vm1, %v9684_v4  ;;  %v7013_v25 = vpop.f32.mrf.mxu0  ;;  %7169 = vst.msk [vmem:[#allocation2 + $0x68] sm:$0xff] %vm282_vm1, %v7137_v20  ;;  %6720 = vst.msk [vmem:[#allocation2 + $0x80] sm:$0xff] %vm282_vm1, %v6688_v48  ;;  %v7136_v49 = vadd.f32 %v7104_v50, %v6993_v59  ;;  %v6691_v33 = vadd.f32 %v16980_v26, %v6659_v31  ;;  %17281 = vmatprep.mubr.msk.f32.mxu1 %vm282_vm1, %v20555_v45  ;;  %v20609_v0 = vld [vmem:[%s17837_s10 + $0x1a5] sm:$0xff]  ;;  %v9692_v20 = vld [vmem:[%s17837_s10 + $0x192] sm:$0xff] }
 0x2a2   : > { %17328 = vmatprep.mubr.msk.f32.mxu0 %vm282_vm1, %v9685_v22  ;;  %v7107_v43 = vld [vmem:[#allocation2 + $0x78] sm:$0xff]  ;;  %v6571_v34 = vpop.f32.mrf.mxu1  ;;  %v6665_v50 = vld [vmem:[#allocation2 + $0xc8] sm:$0xff] }
 0x2a3   : > { %v17030_v3 = vpop.f32.mrf.mxu0  ;;  %7168 = vst.msk [vmem:[#allocation2 + $0x60] sm:$0xff] %vm282_vm1, %v7136_v49  ;;  %6723 = vst.msk [vmem:[#allocation2 + $0x98] sm:$0xff] %vm282_vm1, %v6691_v33  ;;  %v7139_v8 = vadd.f32 %v17024_v27, %v7107_v43  ;;  %v6690_v16 = vadd.f32 %v6658_v14, %v6571_v34  ;;  %v9693_v31 = vld [vmem:[%s17837_s10 + $0x1aa] sm:$0xff]  ;;  %v6664_v34 = vld [vmem:[#allocation2 + $0xc0] sm:$0xff] }
 0x2a4   : > { %v7106_v54 = vld [vmem:[#allocation2 + $0x70] sm:$0xff]  ;;  %v16983_v46 = vpop.f32.mrf.mxu1  ;;  %17282 = vmatmul.mubr.msk.f32.gmra.mxu1 %vm282_vm1, %v20570_v13  ;;  %v20627_v14 = vld [vmem:[%s17837_s10 + $0x1c5] sm:$0xff] }
 0x2a5   : > { %17329 = vmatmul.mubr.msk.f32.gmra.mxu0 %vm282_vm1, %v9686_v29  ;;  %v7023_v30 = vpop.f32.mrf.mxu0  ;;  %7171 = vst.msk [vmem:[#allocation2 + $0x78] sm:$0xff] %vm282_vm1, %v7139_v8  ;;  %6722 = vst.msk [vmem:[#allocation2 + $0x90] sm:$0xff] %vm282_vm1, %v6690_v16  ;;  %v7138_v44 = vadd.f32 %v7106_v54, %v7003_v41  ;;  %v6693_v15 = vadd.f32 %v16983_v46, %v6661_v63  ;;  %17284 = vmatprep.mubr.msk.f32.mxu1 %vm282_vm1, %v20573_v2  ;;  %v20606_v41 = vld [vmem:[%s17837_s10 + $0x18d] sm:$0xff]  ;;  %v6667_v63 = vld [vmem:[#allocation2 + $0xd8] sm:$0xff] }
 0x2a6   : > { %17331 = vmatprep.mubr.msk.f32.mxu0 %vm282_vm1, %v9687_v1  ;;  %v7109_v24 = vld [vmem:[#allocation2 + $0x88] sm:$0xff]  ;;  %v6581_v59 = vpop.f32.mrf.mxu1 }
 0x2a7   : > { %v17033_v10 = vpop.f32.mrf.mxu0  ;;  %7170 = vst.msk [vmem:[#allocation2 + $0x70] sm:$0xff] %vm282_vm1, %v7138_v44  ;;  %6725 = vst.msk [vmem:[#allocation2 + $0xa8] sm:$0xff] %vm282_vm1, %v6693_v15  ;;  %v7141_v35 = vadd.f32 %v17027_v40, %v7109_v24  ;;  %v6692_v39 = vadd.f32 %v6660_v6, %v6581_v59  ;;  %v20624_v49 = vld [vmem:[%s17837_s10 + $0x1ad] sm:$0xff] }
 0x2a8   : > { %v7108_v27 = vld [vmem:[#allocation2 + $0x80] sm:$0xff]  ;;  %v16986_v11 = vpop.f32.mrf.mxu1  ;;  %17285 = vmatmul.mubr.msk.f32.gmra.mxu1 %vm282_vm1, %v20588_v42  ;;  %v20642_v24 = vld [vmem:[%s17837_s10 + $0x1cd] sm:$0xff] }
 0x2a9   : > { %17332 = vmatmul.mubr.msk.f32.gmra.mxu0 %vm282_vm1, %v9688_v18  ;;  %v7033_v4 = vpop.f32.mrf.mxu0  ;;  %7173 = vst.msk [vmem:[#allocation2 + $0x88] sm:$0xff] %vm282_vm1, %v7141_v35  ;;  %6724 = vst.msk [vmem:[#allocation2 + $0xa0] sm:$0xff] %vm282_vm1, %v6692_v39  ;;  %v7140_v61 = vadd.f32 %v7108_v27, %v7013_v25  ;;  %v6695_v55 = vadd.f32 %v16986_v11, %v6663_v28  ;;  %17287 = vmatprep.mubr.msk.f32.mxu1 %vm282_vm1, %v20591_v58  ;;  %v9694_v18 = vld [vmem:[%s17837_s10 + $0x1b2] sm:$0xff]  ;;  %v20645_v35 = vld [vmem:[%s17837_s10 + $0x1e5] sm:$0xff] }
 0x2aa   : > { %17334 = vmatprep.mubr.msk.f32.mxu0 %vm282_vm1, %v9689_v19  ;;  %v7111_v22 = vld [vmem:[#allocation2 + $0x98] sm:$0xff]  ;;  %v6591_v9 = vpop.f32.mrf.mxu1  ;;  %v9695_v19 = vld [vmem:[%s17837_s10 + $0x1ca] sm:$0xff] }
 0x2ab   : > { %v17036_v21 = vpop.f32.mrf.mxu0  ;;  %7172 = vst.msk [vmem:[#allocation2 + $0x80] sm:$0xff] %vm282_vm1, %v7140_v61  ;;  %6727 = vst.msk [vmem:[#allocation2 + $0xb8] sm:$0xff] %vm282_vm1, %v6695_v55  ;;  %v7143_v47 = vadd.f32 %v17030_v3, %v7111_v22  ;;  %v6694_v40 = vadd.f32 %v6662_v32, %v6591_v9  ;;  %v9696_v11 = vld [vmem:[%s17837_s10 + $0x1d2] sm:$0xff]  ;;  %v9697_v55 = vld [vmem:[%s17837_s10 + $0x1ea] sm:$0xff] }
 0x2ac   : > { %v7110_v48 = vld [vmem:[#allocation2 + $0x90] sm:$0xff]  ;;  %v16989_v29 = vpop.f32.mrf.mxu1  ;;  %17288 = vmatmul.mubr.msk.f32.gmra.mxu1 %vm282_vm1, %v20606_v41 }
 0x2ad   : > { %17335 = vmatmul.mubr.msk.f32.gmra.mxu0 %vm282_vm1, %v9690_v36  ;;  %v7043_v26 = vpop.f32.mrf.mxu0  ;;  %7175 = vst.msk [vmem:[#allocation2 + $0x98] sm:$0xff] %vm282_vm1, %v7143_v47  ;;  %6726 = vst.msk [vmem:[#allocation2 + $0xb0] sm:$0xff] %vm282_vm1, %v6694_v40  ;;  %v7142_v25 = vadd.f32 %v7110_v48, %v7023_v30  ;;  %v6697_v1 = vadd.f32 %v16989_v29, %v6665_v50  ;;  %17290 = vmatprep.mubr.msk.f32.mxu1 %vm282_vm1, %v20609_v0  ;;  %v20660_v32 = vld [vmem:[%s17837_s10 + $0x1ed] sm:$0xff]  ;;  %v6668_v40 = vld [vmem:[#allocation2 + $0xe0] sm:$0xff] }
 0x2ae   : > { %17337 = vmatprep.mubr.msk.f32.mxu0 %vm282_vm1, %v9691_v7  ;;  %v7113_v33 = vld [vmem:[#allocation2 + $0xa8] sm:$0xff]  ;;  %v6601_v43 = vpop.f32.mrf.mxu1 }
 0x2af   : > { %v17039_v3 = vpop.f32.mrf.mxu0  ;;  %7174 = vst.msk [vmem:[#allocation2 + $0x90] sm:$0xff] %vm282_vm1, %v7142_v25  ;;  %6729 = vst.msk [vmem:[#allocation2 + $0xc8] sm:$0xff] %vm282_vm1, %v6697_v1  ;;  %v7145_v8 = vadd.f32 %v17033_v10, %v7113_v33  ;;  %v6696_v16 = vadd.f32 %v6664_v34, %v6601_v43  ;;  %v6666_v10 = vld [vmem:[#allocation2 + $0xd0] sm:$0xff]  ;;  %v6669_v7 = vld [vmem:[#allocation2 + $0xe8] sm:$0xff] }
 0x2b0   : > { %v7112_v54 = vld [vmem:[#allocation2 + $0xa0] sm:$0xff]  ;;  %v16992_v46 = vpop.f32.mrf.mxu1  ;;  %17291 = vmatmul.mubr.msk.f32.gmra.mxu1 %vm282_vm1, %v20624_v49  ;;  %v6671_v1 = vld [vmem:[#allocation2 + $0xf8] sm:$0xff] }
 0x2b1   : > { %17338 = vmatmul.mubr.msk.f32.gmra.mxu0 %vm282_vm1, %v9692_v20  ;;  %v7053_v30 = vpop.f32.mrf.mxu0  ;;  %7177 = vst.msk [vmem:[#allocation2 + $0xa8] sm:$0xff] %vm282_vm1, %v7145_v8  ;;  %6728 = vst.msk [vmem:[#allocation2 + $0xc0] sm:$0xff] %vm282_vm1, %v6696_v16  ;;  %v7144_v44 = vadd.f32 %v7112_v54, %v7033_v4  ;;  %v6699_v15 = vadd.f32 %v16992_v46, %v6667_v63  ;;  %17293 = vmatprep.mubr.msk.f32.mxu1 %vm282_vm1, %v20627_v14  ;;  %v14980_v20 = vld [vmem:[%s17837_s10 + $0xa0] sm:$0xff] }
 0x2b2   : > { %17340 = vmatprep.mubr.msk.f32.mxu0 %vm282_vm1, %v9693_v31  ;;  %v7115_v59 = vld [vmem:[#allocation2 + $0xb8] sm:$0xff]  ;;  %v6611_v6 = vpop.f32.mrf.mxu1  ;;  %v14982_v54 = vld [vmem:[%s17837_s10 + $0xc0] sm:$0xff] }
 0x2b3   : > { %v17042_v39 = vpop.f32.mrf.mxu0  ;;  %7176 = vst.msk [vmem:[#allocation2 + $0xa0] sm:$0xff] %vm282_vm1, %v7144_v44  ;;  %6731 = vst.msk [vmem:[#allocation2 + $0xd8] sm:$0xff] %vm282_vm1, %v6699_v15  ;;  %v7147_v36 = vadd.f32 %v17036_v21, %v7115_v59  ;;  %v6698_v27 = vadd.f32 %v6666_v10, %v6611_v6  ;;  %v7546_v59 = vld [vmem:[#allocation2 + $0x8] sm:$0xff] }
 0x2b4   : > { %v7114_v28 = vld [vmem:[#allocation2 + $0xb0] sm:$0xff]  ;;  %v16995_v4 = vpop.f32.mrf.mxu1  ;;  %17294 = vmatmul.mubr.msk.f32.gmra.mxu1 %vm282_vm1, %v20642_v24 }
 0x2b5   : > { %17341 = vmatmul.mubr.msk.f32.gmra.mxu0 %vm282_vm1, %v9694_v18  ;;  %v7063_v61 = vpop.f32.mrf.mxu0  ;;  %7179 = vst.msk [vmem:[#allocation2 + $0xb8] sm:$0xff] %vm282_vm1, %v7147_v36  ;;  %6730 = vst.msk [vmem:[#allocation2 + $0xd0] sm:$0xff] %vm282_vm1, %v6698_v27  ;;  %v7146_v22 = vadd.f32 %v7114_v28, %v7043_v26  ;;  %v6701_v9 = vadd.f32 %v16995_v4, %v6669_v7  ;;  %17296 = vmatprep.mubr.msk.f32.mxu1 %vm282_vm1, %v20645_v35  ;;  %v9698_v26 = vld [vmem:[%s17837_s10 + $0x1f2] sm:$0xff]  ;;  %v20695_v36 = vld [vmem:[%s22301_s1 + $0x68] sm:$0xf] }
 0x2b6   : > { %17343 = vmatprep.mubr.msk.f32.mxu0 %vm282_vm1, %v9695_v19  ;;  %v7117_v21 = vld [vmem:[#allocation2 + $0xc8] sm:$0xff]  ;;  %v6621_v47 = vpop.f32.mrf.mxu1  ;;  %v6670_v18 = vld [vmem:[#allocation2 + $0xf0] sm:$0xff]  ;;  %v7545_v28 = vld [vmem:[#allocation2] sm:$0xff] }
 0x2b7   : > { %v17045_v48 = vpop.f32.mrf.mxu0  ;;  %7178 = vst.msk [vmem:[#allocation2 + $0xb0] sm:$0xff] %vm282_vm1, %v7146_v22  ;;  %6733 = vst.msk [vmem:[#allocation2 + $0xe8] sm:$0xff] %vm282_vm1, %v6701_v9  ;;  %v7149_v29 = vadd.f32 %v17039_v3, %v7117_v21  ;;  %v6700_v50 = vadd.f32 %v6668_v40, %v6621_v47  ;;  %v14981_v3 = vld [vmem:[%s17837_s10 + $0xa8] sm:$0xff]  ;;  %v14984_v4 = vld [vmem:[%s17837_s10 + $0xe0] sm:$0xff] }
 0x2b8   : > { %v7116_v31 = vld [vmem:[#allocation2 + $0xc0] sm:$0xff]  ;;  %v16998_v25 = vpop.f32.mrf.mxu1  ;;  %17297 = vmatmul.mubr.msk.f32.gmra.mxu1 %vm282_vm1, %v20660_v32 }
 0x2b9   : > { %17344 = vmatmul.mubr.msk.f32.gmra.mxu0 %vm282_vm1, %v9696_v11  ;;  %v7073_v33 = vpop.f32.mrf.mxu0  ;;  %7181 = vst.msk [vmem:[#allocation2 + $0xc8] sm:$0xff] %vm282_vm1, %v7149_v29  ;;  %6732 = vst.msk [vmem:[#allocation2 + $0xe0] sm:$0xff] %vm282_vm1, %v6700_v50  ;;  %v7148_v43 = vadd.f32 %v7116_v31, %v7053_v30  ;;  %v6703_v34 = vadd.f32 %v16998_v25, %v6671_v1  ;;  %17351 = vmatprep.mubr.msk.f32.mxu1 %vm282_vm1, %v14980_v20  ;;  %v20683_v30 = vld [vmem:[%s22301_s1 + $0x64] sm:$0xf]  ;;  %v7547_v20 = vld [vmem:[#allocation2 + $0x10] sm:$0xff] }
 0x2ba   : > { %17346 = vmatprep.mubr.msk.f32.mxu0 %vm282_vm1, %v9697_v55  ;;  %v7119_v8 = vld [vmem:[#allocation2 + $0xd8] sm:$0xff]  ;;  %v6631_v16 = vpop.f32.mrf.mxu1  ;;  %v7550_v1 = vld [vmem:[#allocation2 + $0x28] sm:$0xff] }
 0x2bb   : > { %v17048_v46 = vpop.f32.mrf.mxu0  ;;  %7180 = vst.msk [vmem:[#allocation2 + $0xc0] sm:$0xff] %vm282_vm1, %v7148_v43  ;;  %6735 = vst.msk [vmem:[#allocation2 + $0xf8] sm:$0xff] %vm282_vm1, %v6703_v34  ;;  %v7151_v63 = vadd.f32 %v17042_v39, %v7119_v8  ;;  %v6702_v19 = vadd.f32 %v6670_v18, %v6631_v16  ;;  %v14987_v34 = vld [vmem:[%s17837_s10 + $0x108] sm:$0xff]  ;;  %v7549_v16 = vld [vmem:[#allocation2 + $0x20] sm:$0xff] }
 0x2bc   : > { %v7118_v44 = vld [vmem:[#allocation2 + $0xd0] sm:$0xff]  ;;  %v17053_v15 = vpop.f32.mrf.mxu1  ;;  %17352 = vmatmul.mubr.msk.f32.vlgmr.msra.gmra.mxu1 %vm282_vm1, %v14981_v3  ;;  %v14988_v18 = vld [vmem:[%s17837_s10 + $0x120] sm:$0xff] }
 0x2bd   : > { %17347 = vmatmul.mubr.msk.f32.gmra.mxu0 %vm282_vm1, %v9698_v26  ;;  %v7083_v6 = vpop.f32.mrf.mxu0  ;;  %7183 = vst.msk [vmem:[#allocation2 + $0xd8] sm:$0xff] %vm282_vm1, %v7151_v63  ;;  %6734 = vst.msk [vmem:[#allocation2 + $0xf0] sm:$0xff] %vm282_vm1, %v6702_v19  ;;  %v7150_v10 = vadd.f32 %v7118_v44, %v7063_v61  ;;  %v7578_v39 = vadd.f32 %v17053_v15, %v7546_v59  ;;  %17450 = vmatpush3.msk.msra.mxu1 %vm379_vm0, %v20408_v62  ;;  %v7552_v44 = vld [vmem:[#allocation2 + $0x38] sm:$0xff] }
 0x2be   : > { %17401 = vmatprep.mubr.msk.f32.mxu0 %vm282_vm1, %v20466_v12  ;;  %17354 = vmatprep.mubr.msk.f32.mxu1 %vm282_vm1, %v14982_v54  ;;  %v14983_v12 = vld [vmem:[%s17837_s10 + $0xc8] sm:$0xff]  ;;  %v7386_v11 = vpop.f32.mrf.mxu1 }
 0x2bf   : > { %v7121_v27 = vld [vmem:[#allocation2 + $0xe8] sm:$0xff]  ;;  %v17103_v7 = vpop.f32.mrf.mxu0  ;;  %17549 = vmatprep.subr.msk.mxu1 %vm379_vm0, %v20683_v30  ;;  %7182 = vst.msk [vmem:[#allocation2 + $0xd0] sm:$0xff] %vm282_vm1, %v7150_v10  ;;  %7610 = vst.msk [vmem:[#allocation2 + $0x8] sm:$0xff] %vm282_vm1, %v7578_v39  ;;  %v7577_v61 = vadd.f32 %v7545_v28, %v7386_v11 }
 0x2c0   : > { %v7153_v62 = vadd.f32 %v17045_v48, %v7121_v27  ;;  %v7120_v55 = vld [vmem:[#allocation2 + $0xe0] sm:$0xff]  ;;  %v17056_v22 = vpop.f32.mrf.mxu1  ;;  %17355 = vmatmul.mubr.msk.f32.gmra.mxu1 %vm282_vm1, %v14983_v12  ;;  %v7551_v12 = vld [vmem:[#allocation2 + $0x30] sm:$0xff] }
 0x2c1   : > { %17402 = vmatmul.mubr.msk.f32.vlgmr.msra.gmra.mxu0 %vm282_vm1, %v20480_v37  ;;  %v7548_v37 = vld [vmem:[#allocation2 + $0x18] sm:$0xff]  ;;  %v7838_v9 = vpop.f32.mrf.mxu0  ;;  %v7152_v21 = vadd.f32 %v7120_v55, %v7073_v33  ;;  %7609 = vst.msk [vmem:[#allocation2] sm:$0xff] %vm282_vm1, %v7577_v61  ;;  %17357 = vmatprep.mubr.msk.f32.mxu1 %vm282_vm1, %v14984_v4  ;;  %v14986_v48 = vld [vmem:[%s17837_s10 + $0x100] sm:$0xff] }
 0x2c2   : > { %17500 = vmatpush3.msk.msra.mxu0 %vm379_vm0, %v20421_v56  ;;  %17404 = vmatprep.mubr.msk.f32.mxu0 %vm282_vm1, %v20483_v5  ;;  %7185 = vst.msk [vmem:[#allocation2 + $0xe8] sm:$0xff] %vm282_vm1, %v7153_v62  ;;  %v7580_v47 = vadd.f32 %v17056_v22, %v7548_v37  ;;  %v14985_v56 = vld [vmem:[%s17837_s10 + $0xe8] sm:$0xff]  ;;  %v7123_v5 = vld [vmem:[#allocation2 + $0xf8] sm:$0xff]  ;;  %v7396_v40 = vpop.f32.mrf.mxu1  ;;  %v20740_v27 = vld [vmem:[%s17837_s10 + $0x140] sm:$0xff] }
 0x2c3   : > { %17599 = vmatprep.subr.msk.mxu0 %vm379_vm0, %v20695_v36  ;;  %v17106_v29 = vpop.f32.mrf.mxu0  ;;  %7184 = vst.msk [vmem:[#allocation2 + $0xe0] sm:$0xff] %vm282_vm1, %v7152_v21  ;;  %v7155_v50 = vadd.f32 %v17048_v46, %v7123_v5  ;;  %v7579_v26 = vadd.f32 %v7547_v20, %v7396_v40  ;;  %v7554_v62 = vld [vmem:[#allocation2 + $0x48] sm:$0xff]  ;;  %v20757_v21 = vld [vmem:[%s17837_s10 + $0x160] sm:$0xff] }
 0x2c4   : > { %7612 = vst.msk [vmem:[#allocation2 + $0x18] sm:$0xff] %vm282_vm1, %v7580_v47  ;;  %v7122_v31 = vld [vmem:[#allocation2 + $0xf0] sm:$0xff]  ;;  %v17059_v25 = vpop.f32.mrf.mxu1  ;;  %17358 = vmatmul.mubr.msk.f32.gmra.mxu1 %vm282_vm1, %v14985_v56  ;;  %v20754_v22 = vld [vmem:[%s17837_s10 + $0x148] sm:$0xff] }
 0x2c5   : > { %17405 = vmatmul.mubr.msk.f32.gmra.mxu0 %vm282_vm1, %v20498_v60  ;;  %v7848_v33 = vpop.f32.mrf.mxu0  ;;  %7187 = vst.msk [vmem:[#allocation2 + $0xf8] sm:$0xff] %vm282_vm1, %v7155_v50  ;;  %v7154_v60 = vadd.f32 %v7122_v31, %v7083_v6  ;;  %7611 = vst.msk [vmem:[#allocation2 + $0x10] sm:$0xff] %vm282_vm1, %v7579_v26  ;;  %v7582_v43 = vadd.f32 %v17059_v25, %v7550_v1  ;;  %17360 = vmatprep.mubr.msk.f32.mxu1 %vm282_vm1, %v14986_v48  ;;  %v14989_v6 = vld [vmem:[%s17837_s10 + $0x128] sm:$0xff]  ;;  %v7556_v48 = vld [vmem:[#allocation2 + $0x58] sm:$0xff] }
 0x2c6   : > { %17407 = vmatprep.mubr.msk.f32.mxu0 %vm282_vm1, %v20501_v57  ;;  %v7998_v3 = vld [vmem:[#allocation2 + $0x8] sm:$0xff]  ;;  %v7406_v8 = vpop.f32.mrf.mxu1  ;;  %v7555_v25 = vld [vmem:[#allocation2 + $0x50] sm:$0xff]  ;;  %v20775_v1 = vld [vmem:[%s17837_s10 + $0x180] sm:$0xff] }
 0x2c7   : > { %v17109_v57 = vpop.f32.mrf.mxu0  ;;  %7186 = vst.msk [vmem:[#allocation2 + $0xf0] sm:$0xff] %vm282_vm1, %v7154_v60  ;;  %7614 = vst.msk [vmem:[#allocation2 + $0x28] sm:$0xff] %vm282_vm1, %v7582_v43  ;;  %v8030_v54 = vadd.f32 %v17103_v7, %v7998_v3  ;;  %v7581_v46 = vadd.f32 %v7549_v16, %v7406_v8  ;;  %v20772_v26 = vld [vmem:[%s17837_s10 + $0x168] sm:$0xff] }
 0x2c8   : > { %v7997_v63 = vld [vmem:[#allocation2] sm:$0xff]  ;;  %v17062_v19 = vpop.f32.mrf.mxu1  ;;  %17361 = vmatmul.mubr.msk.f32.gmra.mxu1 %vm282_vm1, %v14987_v34  ;;  %v7558_v8 = vld [vmem:[#allocation2 + $0x68] sm:$0xff] }
 0x2c9   : > { %17408 = vmatmul.mubr.msk.f32.gmra.mxu0 %vm282_vm1, %v20516_v51  ;;  %v7858_v15 = vpop.f32.mrf.mxu0  ;;  %8062 = vst.msk [vmem:[#allocation2 + $0x8] sm:$0xff] %vm282_vm1, %v8030_v54  ;;  %7613 = vst.msk [vmem:[#allocation2 + $0x20] sm:$0xff] %vm282_vm1, %v7581_v46  ;;  %v8029_v51 = vadd.f32 %v7997_v63, %v7838_v9  ;;  %v7584_v59 = vadd.f32 %v17062_v19, %v7552_v44  ;;  %17363 = vmatprep.mubr.msk.f32.mxu1 %vm282_vm1, %v14988_v18  ;;  %v7557_v46 = vld [vmem:[#allocation2 + $0x60] sm:$0xff] }
 0x2ca   : > { %17410 = vmatprep.mubr.msk.f32.mxu0 %vm282_vm1, %v20519_v52  ;;  %v7416_v39 = vpop.f32.mrf.mxu1  ;;  %v20793_v63 = vld [vmem:[%s17837_s10 + $0x1a0] sm:$0xff] }
 0x2cb   : > { %v8000_v10 = vld [vmem:[#allocation2 + $0x18] sm:$0xff]  ;;  %8061 = vst.msk [vmem:[#allocation2] sm:$0xff] %vm282_vm1, %v8029_v51  ;;  %7616 = vst.msk [vmem:[#allocation2 + $0x38] sm:$0xff] %vm282_vm1, %v7584_v59  ;;  %v7583_v28 = vadd.f32 %v7551_v12, %v7416_v39  ;;  %v20808_v12 = vld [vmem:[%s17837_s10 + $0x1a8] sm:$0xff] }
 0x2cc   : > { %v17112_v52 = vpop.f32.mrf.mxu0  ;;  %v8032_v11 = vadd.f32 %v17106_v29, %v8000_v10  ;;  %v7999_v4 = vld [vmem:[#allocation2 + $0x10] sm:$0xff]  ;;  %v17065_v7 = vpop.f32.mrf.mxu1  ;;  %17364 = vmatmul.mubr.msk.f32.gmra.mxu1 %vm282_vm1, %v14989_v6  ;;  %v7560_v6 = vld [vmem:[#allocation2 + $0x78] sm:$0xff] }
 0x2cd   : > { %17411 = vmatmul.mubr.msk.f32.gmra.mxu0 %vm282_vm1, %v20534_v23  ;;  %7615 = vst.msk [vmem:[#allocation2 + $0x30] sm:$0xff] %vm282_vm1, %v7583_v28  ;;  %v8031_v23 = vadd.f32 %v7999_v4, %v7848_v33  ;;  %v7586_v55 = vadd.f32 %v17065_v7, %v7554_v62  ;;  %17366 = vmatprep.mubr.msk.f32.mxu1 %vm282_vm1, %v20740_v27  ;;  %v20811_v28 = vld [vmem:[%s17837_s10 + $0x1c0] sm:$0xff] }
 0x2ce   : > { %17413 = vmatprep.mubr.msk.f32.mxu0 %vm282_vm1, %v20537_v53  ;;  %v7868_v61 = vpop.f32.mrf.mxu0  ;;  %8064 = vst.msk [vmem:[#allocation2 + $0x18] sm:$0xff] %vm282_vm1, %v8032_v11  ;;  %v8002_v37 = vld [vmem:[#allocation2 + $0x28] sm:$0xff]  ;;  %v7426_v9 = vpop.f32.mrf.mxu1  ;;  %v7553_v53 = vld [vmem:[#allocation2 + $0x40] sm:$0xff]  ;;  %v7559_v11 = vld [vmem:[#allocation2 + $0x70] sm:$0xff] }
 0x2cf   : > { %8063 = vst.msk [vmem:[#allocation2 + $0x10] sm:$0xff] %vm282_vm1, %v8031_v23  ;;  %7618 = vst.msk [vmem:[#allocation2 + $0x48] sm:$0xff] %vm282_vm1, %v7586_v55  ;;  %v8034_v56 = vadd.f32 %v17109_v57, %v8002_v37  ;;  %v7585_v5 = vadd.f32 %v7553_v53, %v7426_v9  ;;  %v20790_v57 = vld [vmem:[%s17837_s10 + $0x188] sm:$0xff] }
 0x2d0   : > { %v17115_v47 = vpop.f32.mrf.mxu0  ;;  %v8001_v40 = vld [vmem:[#allocation2 + $0x20] sm:$0xff]  ;;  %v17068_v20 = vpop.f32.mrf.mxu1  ;;  %17367 = vmatmul.mubr.msk.f32.gmra.mxu1 %vm282_vm1, %v20754_v22  ;;  %v7562_v55 = vld [vmem:[#allocation2 + $0x88] sm:$0xff] }
 0x2d1   : > { %17414 = vmatmul.mubr.msk.f32.gmra.mxu0 %vm282_vm1, %v20552_v38  ;;  %8066 = vst.msk [vmem:[#allocation2 + $0x28] sm:$0xff] %vm282_vm1, %v8034_v56  ;;  %7617 = vst.msk [vmem:[#allocation2 + $0x40] sm:$0xff] %vm282_vm1, %v7585_v5  ;;  %v8033_v38 = vadd.f32 %v8001_v40, %v7858_v15  ;;  %v7588_v50 = vadd.f32 %v17068_v20, %v7556_v48  ;;  %17369 = vmatprep.mubr.msk.f32.mxu1 %vm282_vm1, %v20757_v21  ;;  %v20826_v53 = vld [vmem:[%s17837_s10 + $0x1c8] sm:$0xff]  ;;  %v7561_v56 = vld [vmem:[#allocation2 + $0x80] sm:$0xff] }
 0x2d2   : > { %17416 = vmatprep.mubr.msk.f32.mxu0 %vm282_vm1, %v20555_v45  ;;  %v7878_v29 = vpop.f32.mrf.mxu0  ;;  %v8004_v31 = vld [vmem:[#allocation2 + $0x38] sm:$0xff]  ;;  %v7436_v45 = vpop.f32.mrf.mxu1  ;;  %v20829_v5 = vld [vmem:[%s17837_s10 + $0x1e0] sm:$0xff] }
 0x2d3   : > { %8065 = vst.msk [vmem:[#allocation2 + $0x20] sm:$0xff] %vm282_vm1, %v8033_v38  ;;  %7620 = vst.msk [vmem:[#allocation2 + $0x58] sm:$0xff] %vm282_vm1, %v7588_v50  ;;  %v8036_v60 = vadd.f32 %v17112_v52, %v8004_v31  ;;  %v7587_v43 = vadd.f32 %v7555_v25, %v7436_v45  ;;  %v7564_v50 = vld [vmem:[#allocation2 + $0x98] sm:$0xff]  ;;  %v20844_v25 = vld [vmem:[%s17837_s10 + $0x1e8] sm:$0xff] }
 0x2d4   : > { %v8003_v34 = vld [vmem:[#allocation2 + $0x30] sm:$0xff]  ;;  %v17071_v3 = vpop.f32.mrf.mxu1  ;;  %17370 = vmatmul.mubr.msk.f32.gmra.mxu1 %vm282_vm1, %v20772_v26 }
 0x2d5   : > { %v17118_v33 = vpop.f32.mrf.mxu0  ;;  %17417 = vmatmul.mubr.msk.f32.gmra.mxu0 %vm282_vm1, %v20570_v13  ;;  %8068 = vst.msk [vmem:[#allocation2 + $0x38] sm:$0xff] %vm282_vm1, %v8036_v60  ;;  %7619 = vst.msk [vmem:[#allocation2 + $0x50] sm:$0xff] %vm282_vm1, %v7587_v43  ;;  %v8035_v13 = vadd.f32 %v8003_v34, %v7868_v61  ;;  %v7590_v18 = vadd.f32 %v17071_v3, %v7558_v8  ;;  %17372 = vmatprep.mubr.msk.f32.mxu1 %vm282_vm1, %v20775_v1  ;;  %v7563_v60 = vld [vmem:[#allocation2 + $0x90] sm:$0xff]  ;;  %v20847_v43 = vld [vmem:[%s17837_s10 + $0x200] sm:$0xff] }
 0x2d6   : > { %17419 = vmatprep.mubr.msk.f32.mxu0 %vm282_vm1, %v20573_v2  ;;  %v8006_v54 = vld [vmem:[#allocation2 + $0x48] sm:$0xff]  ;;  %v7446_v2 = vpop.f32.mrf.mxu1 }
 0x2d7   : > { %v7888_v16 = vpop.f32.mrf.mxu0  ;;  %8067 = vst.msk [vmem:[#allocation2 + $0x30] sm:$0xff] %vm282_vm1, %v8035_v13  ;;  %7622 = vst.msk [vmem:[#allocation2 + $0x68] sm:$0xff] %vm282_vm1, %v7590_v18  ;;  %v8038_v44 = vadd.f32 %v17115_v47, %v8006_v54  ;;  %v7589_v15 = vadd.f32 %v7557_v46, %v7446_v2  ;;  %v7566_v18 = vld [vmem:[#allocation2 + $0xa8] sm:$0xff] }
 0x2d8   : > { %v8005_v51 = vld [vmem:[#allocation2 + $0x40] sm:$0xff]  ;;  %v17074_v59 = vpop.f32.mrf.mxu1  ;;  %17373 = vmatmul.mubr.msk.f32.gmra.mxu1 %vm282_vm1, %v20790_v57 }
 0x2d9   : > { %v17121_v19 = vpop.f32.mrf.mxu0  ;;  %17420 = vmatmul.mubr.msk.f32.gmra.mxu0 %vm282_vm1, %v20588_v42  ;;  %8070 = vst.msk [vmem:[#allocation2 + $0x48] sm:$0xff] %vm282_vm1, %v8038_v44  ;;  %7621 = vst.msk [vmem:[#allocation2 + $0x60] sm:$0xff] %vm282_vm1, %v7589_v15  ;;  %v8037_v42 = vadd.f32 %v8005_v51, %v7878_v29  ;;  %v7592_v39 = vadd.f32 %v17074_v59, %v7560_v6  ;;  %17375 = vmatprep.mubr.msk.f32.mxu1 %vm282_vm1, %v20793_v63  ;;  %v15067_v2 = vld [vmem:[%s17837_s10 + $0x205] sm:$0xff] }
 0x2da   : > { %17422 = vmatprep.mubr.msk.f32.mxu0 %vm282_vm1, %v20591_v58  ;;  %v8008_v52 = vld [vmem:[#allocation2 + $0x58] sm:$0xff]  ;;  %v7456_v58 = vpop.f32.mrf.mxu1  ;;  %v7565_v15 = vld [vmem:[#allocation2 + $0xa0] sm:$0xff] }
 0x2db   : > { %v7898_v10 = vpop.f32.mrf.mxu0  ;;  %8069 = vst.msk [vmem:[#allocation2 + $0x40] sm:$0xff] %vm282_vm1, %v8037_v42  ;;  %7624 = vst.msk [vmem:[#allocation2 + $0x78] sm:$0xff] %vm282_vm1, %v7592_v39  ;;  %v8040_v7 = vadd.f32 %v17118_v33, %v8008_v52  ;;  %v7591_v62 = vadd.f32 %v7559_v11, %v7456_v58  ;;  %v20866_v51 = vld [vmem:[%s17837_s10 + $0x220] sm:$0xff]  ;;  %v15068_v42 = vld [vmem:[%s17837_s10 + $0x20d] sm:$0xff] }
 0x2dc   : > { %v8007_v61 = vld [vmem:[#allocation2 + $0x50] sm:$0xff]  ;;  %v17077_v23 = vpop.f32.mrf.mxu1  ;;  %17376 = vmatmul.mubr.msk.f32.gmra.mxu1 %vm282_vm1, %v20808_v12  ;;  %v7568_v58 = vld [vmem:[#allocation2 + $0xb8] sm:$0xff] }
 0x2dd   : > { %v17124_v4 = vpop.f32.mrf.mxu0  ;;  %17423 = vmatmul.mubr.msk.f32.gmra.mxu0 %vm282_vm1, %v20606_v41  ;;  %8072 = vst.msk [vmem:[#allocation2 + $0x58] sm:$0xff] %vm282_vm1, %v8040_v7  ;;  %7623 = vst.msk [vmem:[#allocation2 + $0x70] sm:$0xff] %vm282_vm1, %v7591_v62  ;;  %v8039_v41 = vadd.f32 %v8007_v61, %v7888_v16  ;;  %v7594_v9 = vadd.f32 %v17077_v23, %v7562_v55  ;;  %17378 = vmatprep.mubr.msk.f32.mxu1 %vm282_vm1, %v20811_v28  ;;  %v20882_v62 = vld [vmem:[%s17837_s10 + $0x228] sm:$0xff]  ;;  %v7567_v55 = vld [vmem:[#allocation2 + $0xb0] sm:$0xff] }
 0x2de   : > { %17425 = vmatprep.mubr.msk.f32.mxu0 %vm282_vm1, %v20609_v0  ;;  %v8010_v47 = vld [vmem:[#allocation2 + $0x68] sm:$0xff]  ;;  %v7466_v0 = vpop.f32.mrf.mxu1 }
 0x2df   : > { %v7908_v37 = vpop.f32.mrf.mxu0  ;;  %8071 = vst.msk [vmem:[#allocation2 + $0x50] sm:$0xff] %vm282_vm1, %v8039_v41  ;;  %7626 = vst.msk [vmem:[#allocation2 + $0x88] sm:$0xff] %vm282_vm1, %v7594_v9  ;;  %v8042_v20 = vadd.f32 %v17121_v19, %v8010_v47  ;;  %v7593_v48 = vadd.f32 %v7561_v56, %v7466_v0  ;;  %v15070_v0 = vld [vmem:[%s17837_s10 + $0x22d] sm:$0xff] }
 0x2e0   : > { %v8009_v29 = vld [vmem:[#allocation2 + $0x60] sm:$0xff]  ;;  %v17080_v38 = vpop.f32.mrf.mxu1  ;;  %17379 = vmatmul.mubr.msk.f32.gmra.mxu1 %vm282_vm1, %v20826_v53 }
 0x2e1   : > { %v17127_v40 = vpop.f32.mrf.mxu0  ;;  %17426 = vmatmul.mubr.msk.f32.gmra.mxu0 %vm282_vm1, %v20624_v49  ;;  %8074 = vst.msk [vmem:[#allocation2 + $0x68] sm:$0xff] %vm282_vm1, %v8042_v20  ;;  %7625 = vst.msk [vmem:[#allocation2 + $0x80] sm:$0xff] %vm282_vm1, %v7593_v48  ;;  %v8041_v49 = vadd.f32 %v8009_v29, %v7898_v10  ;;  %v7596_v45 = vadd.f32 %v17080_v38, %v7564_v50  ;;  %17381 = vmatprep.mubr.msk.f32.mxu1 %vm282_vm1, %v20829_v5  ;;  %v7570_v20 = vld [vmem:[#allocation2 + $0xc8] sm:$0xff] }
 0x2e2   : > { %17428 = vmatprep.mubr.msk.f32.mxu0 %vm282_vm1, %v20627_v14  ;;  %v8012_v33 = vld [vmem:[#allocation2 + $0x78] sm:$0xff]  ;;  %v7476_v14 = vpop.f32.mrf.mxu1  ;;  %v15071_v29 = vld [vmem:[%s17837_s10 + $0x245] sm:$0xff] }
 0x2e3   : > { %v7918_v31 = vpop.f32.mrf.mxu0  ;;  %8073 = vst.msk [vmem:[#allocation2 + $0x60] sm:$0xff] %vm282_vm1, %v8041_v49  ;;  %7628 = vst.msk [vmem:[#allocation2 + $0x98] sm:$0xff] %vm282_vm1, %v7596_v45  ;;  %v8044_v3 = vadd.f32 %v17124_v4, %v8012_v33  ;;  %v7595_v8 = vadd.f32 %v7563_v60, %v7476_v14  ;;  %v15069_v4 = vld [vmem:[%s17837_s10 + $0x225] sm:$0xff] }
 0x2e4   : > { %v8011_v16 = vld [vmem:[#allocation2 + $0x70] sm:$0xff]  ;;  %v17083_v13 = vpop.f32.mrf.mxu1  ;;  %17382 = vmatmul.mubr.msk.f32.gmra.mxu1 %vm282_vm1, %v20844_v25  ;;  %v7569_v33 = vld [vmem:[#allocation2 + $0xc0] sm:$0xff] }
 0x2e5   : > { %v17130_v34 = vpop.f32.mrf.mxu0  ;;  %17429 = vmatmul.mubr.msk.f32.gmra.mxu0 %vm282_vm1, %v20642_v24  ;;  %8076 = vst.msk [vmem:[#allocation2 + $0x78] sm:$0xff] %vm282_vm1, %v8044_v3  ;;  %7627 = vst.msk [vmem:[#allocation2 + $0x90] sm:$0xff] %vm282_vm1, %v7595_v8  ;;  %v8043_v24 = vadd.f32 %v8011_v16, %v7908_v37  ;;  %v7598_v46 = vadd.f32 %v17083_v13, %v7566_v18  ;;  %17384 = vmatprep.mubr.msk.f32.mxu1 %vm282_vm1, %v20847_v43  ;;  %v20885_v37 = vld [vmem:[%s17837_s10 + $0x240] sm:$0xff]  ;;  %v15072_v8 = vld [vmem:[%s17837_s10 + $0x24d] sm:$0xff] }
 0x2e6   : > { %17431 = vmatprep.mubr.msk.f32.mxu0 %vm282_vm1, %v20645_v35  ;;  %v20863_v35 = vld [vmem:[%s17837_s10 + $0x208] sm:$0xff]  ;;  %v7486_v44 = vpop.f32.mrf.mxu1  ;;  %v20903_v14 = vld [vmem:[%s17837_s10 + $0x260] sm:$0xff]  ;;  %v7572_v18 = vld [vmem:[#allocation2 + $0xd8] sm:$0xff] }
 0x2e7   : > { %v7928_v54 = vpop.f32.mrf.mxu0  ;;  %v8014_v19 = vld [vmem:[#allocation2 + $0x88] sm:$0xff]  ;;  %8075 = vst.msk [vmem:[#allocation2 + $0x70] sm:$0xff] %vm282_vm1, %v8043_v24  ;;  %7630 = vst.msk [vmem:[#allocation2 + $0xa8] sm:$0xff] %vm282_vm1, %v7598_v46  ;;  %v7597_v10 = vadd.f32 %v7565_v15, %v7486_v44 }
 0x2e8   : > { %v8046_v6 = vadd.f32 %v17127_v40, %v8014_v19  ;;  %v8013_v39 = vld [vmem:[#allocation2 + $0x80] sm:$0xff]  ;;  %v17086_v52 = vpop.f32.mrf.mxu1  ;;  %17385 = vmatmul.mubr.msk.f32.gmra.mxu1 %vm282_vm1, %v20863_v35  ;;  %v20918_v19 = vld [vmem:[%s17837_s10 + $0x268] sm:$0xff] }
 0x2e9   : > { %v17133_v59 = vpop.f32.mrf.mxu0  ;;  %17432 = vmatmul.mubr.msk.f32.gmra.mxu0 %vm282_vm1, %v20660_v32  ;;  %7629 = vst.msk [vmem:[#allocation2 + $0xa0] sm:$0xff] %vm282_vm1, %v7597_v10  ;;  %v8045_v32 = vadd.f32 %v8013_v39, %v7918_v31  ;;  %v7600_v7 = vadd.f32 %v17086_v52, %v7568_v58  ;;  %17387 = vmatprep.mubr.msk.f32.mxu1 %vm282_vm1, %v20866_v51  ;;  %v20900_v31 = vld [vmem:[%s17837_s10 + $0x248] sm:$0xff] }
 0x2ea   : > { %17434 = vmatprep.mubr.msk.f32.mxu0 %vm282_vm1, %v15067_v2  ;;  %8078 = vst.msk [vmem:[#allocation2 + $0x88] sm:$0xff] %vm282_vm1, %v8046_v6  ;;  %v8016_v61 = vld [vmem:[#allocation2 + $0x98] sm:$0xff]  ;;  %v7496_v23 = vpop.f32.mrf.mxu1  ;;  %v15073_v2 = vld [vmem:[%s17837_s10 + $0x265] sm:$0xff]  ;;  %v15074_v52 = vld [vmem:[%s17837_s10 + $0x26d] sm:$0xff] }
 0x2eb   : > { %v7938_v11 = vpop.f32.mrf.mxu0  ;;  %8077 = vst.msk [vmem:[#allocation2 + $0x80] sm:$0xff] %vm282_vm1, %v8045_v32  ;;  %7632 = vst.msk [vmem:[#allocation2 + $0xb8] sm:$0xff] %vm282_vm1, %v7600_v7  ;;  %v8048_v9 = vadd.f32 %v17130_v34, %v8016_v61  ;;  %v7599_v47 = vadd.f32 %v7567_v55, %v7496_v23  ;;  %v20921_v6 = vld [vmem:[%s17837_s10 + $0x280] sm:$0xff]  ;;  %v20936_v55 = vld [vmem:[%s17837_s10 + $0x288] sm:$0xff] }
 0x2ec   : > { %v8015_v56 = vld [vmem:[#allocation2 + $0x90] sm:$0xff]  ;;  %v17089_v40 = vpop.f32.mrf.mxu1  ;;  %17388 = vmatmul.mubr.msk.f32.gmra.mxu1 %vm282_vm1, %v20882_v62  ;;  %v15075_v7 = vld [vmem:[%s17837_s10 + $0x285] sm:$0xff] }
 0x2ed   : > { %v17136_v41 = vpop.f32.mrf.mxu0  ;;  %17435 = vmatmul.mubr.msk.f32.gmra.mxu0 %vm282_vm1, %v15068_v42  ;;  %8080 = vst.msk [vmem:[#allocation2 + $0x98] sm:$0xff] %vm282_vm1, %v8048_v9  ;;  %7631 = vst.msk [vmem:[#allocation2 + $0xb0] sm:$0xff] %vm282_vm1, %v7599_v47  ;;  %v8047_v38 = vadd.f32 %v8015_v56, %v7928_v54  ;;  %v7602_v50 = vadd.f32 %v17089_v40, %v7570_v20  ;;  %17390 = vmatprep.mubr.msk.f32.mxu1 %vm282_vm1, %v20885_v37  ;;  %v7573_v47 = vld [vmem:[#allocation2 + $0xe0] sm:$0xff] }
 0x2ee   : > { %17437 = vmatprep.mubr.msk.f32.mxu0 %vm282_vm1, %v15069_v4  ;;  %v8018_v49 = vld [vmem:[#allocation2 + $0xa8] sm:$0xff]  ;;  %v7506_v45 = vpop.f32.mrf.mxu1 }
 0x2ef   : > { %v7948_v48 = vpop.f32.mrf.mxu0  ;;  %8079 = vst.msk [vmem:[#allocation2 + $0x90] sm:$0xff] %vm282_vm1, %v8047_v38  ;;  %7634 = vst.msk [vmem:[#allocation2 + $0xc8] sm:$0xff] %vm282_vm1, %v7602_v50  ;;  %v8050_v34 = vadd.f32 %v17133_v59, %v8018_v49  ;;  %v7601_v3 = vadd.f32 %v7569_v33, %v7506_v45  ;;  %v7571_v59 = vld [vmem:[#allocation2 + $0xd0] sm:$0xff]  ;;  %v7574_v4 = vld [vmem:[#allocation2 + $0xe8] sm:$0xff] }
 0x2f0   : > { %v8017_v16 = vld [vmem:[#allocation2 + $0xa0] sm:$0xff]  ;;  %v17092_v13 = vpop.f32.mrf.mxu1  ;;  %17391 = vmatmul.mubr.msk.f32.gmra.mxu1 %vm282_vm1, %v20900_v31  ;;  %v7576_v50 = vld [vmem:[#allocation2 + $0xf8] sm:$0xff] }
 0x2f1   : > { %v17139_v60 = vpop.f32.mrf.mxu0  ;;  %17438 = vmatmul.mubr.msk.f32.gmra.mxu0 %vm282_vm1, %v15070_v0  ;;  %8082 = vst.msk [vmem:[#allocation2 + $0xa8] sm:$0xff] %vm282_vm1, %v8050_v34  ;;  %7633 = vst.msk [vmem:[#allocation2 + $0xc0] sm:$0xff] %vm282_vm1, %v7601_v3  ;;  %v8049_v24 = vadd.f32 %v8017_v16, %v7938_v11  ;;  %v7604_v46 = vadd.f32 %v17092_v13, %v7572_v18  ;;  %17393 = vmatprep.mubr.msk.f32.mxu1 %vm282_vm1, %v20903_v14  ;;  %v15110_v0 = vld [vmem:[%s17837_s10 + $0xaa] sm:$0xff] }
 0x2f2   : > { %17440 = vmatprep.mubr.msk.f32.mxu0 %vm282_vm1, %v15071_v29  ;;  %v8020_v44 = vld [vmem:[#allocation2 + $0xb8] sm:$0xff]  ;;  %v7516_v15 = vpop.f32.mrf.mxu1  ;;  %v15112_v16 = vld [vmem:[%s17837_s10 + $0xca] sm:$0xff] }
 0x2f3   : > { %v7958_v54 = vpop.f32.mrf.mxu0  ;;  %8081 = vst.msk [vmem:[#allocation2 + $0xa0] sm:$0xff] %vm282_vm1, %v8049_v24  ;;  %7636 = vst.msk [vmem:[#allocation2 + $0xd8] sm:$0xff] %vm282_vm1, %v7604_v46  ;;  %v8052_v42 = vadd.f32 %v17136_v41, %v8020_v44  ;;  %v7603_v39 = vadd.f32 %v7571_v59, %v7516_v15  ;;  %v8450_v46 = vld [vmem:[#allocation2 + $0x8] sm:$0xff] }
 0x2f4   : > { %v8019_v58 = vld [vmem:[#allocation2 + $0xb0] sm:$0xff]  ;;  %v17095_v11 = vpop.f32.mrf.mxu1  ;;  %17394 = vmatmul.mubr.msk.f32.gmra.mxu1 %vm282_vm1, %v20918_v19 }
 0x2f5   : > { %v17142_v10 = vpop.f32.mrf.mxu0  ;;  %17441 = vmatmul.mubr.msk.f32.gmra.mxu0 %vm282_vm1, %v15072_v8  ;;  %8084 = vst.msk [vmem:[#allocation2 + $0xb8] sm:$0xff] %vm282_vm1, %v8052_v42  ;;  %7635 = vst.msk [vmem:[#allocation2 + $0xd0] sm:$0xff] %vm282_vm1, %v7603_v39  ;;  %v8051_v61 = vadd.f32 %v8019_v58, %v7948_v48  ;;  %v7606_v23 = vadd.f32 %v17095_v11, %v7574_v4  ;;  %17396 = vmatprep.mubr.msk.f32.mxu1 %vm282_vm1, %v20921_v6  ;;  %v15076_v48 = vld [vmem:[%s17837_s10 + $0x28d] sm:$0xff]  ;;  %v8449_v39 = vld [vmem:[#allocation2] sm:$0xff] }
 0x2f6   : > { %17443 = vmatprep.mubr.msk.f32.mxu0 %vm282_vm1, %v15073_v2  ;;  %v8022_v41 = vld [vmem:[#allocation2 + $0xc8] sm:$0xff]  ;;  %v7526_v9 = vpop.f32.mrf.mxu1  ;;  %v7575_v8 = vld [vmem:[#allocation2 + $0xf0] sm:$0xff] }
 0x2f7   : > { %v7968_v32 = vpop.f32.mrf.mxu0  ;;  %8083 = vst.msk [vmem:[#allocation2 + $0xb0] sm:$0xff] %vm282_vm1, %v8051_v61  ;;  %7638 = vst.msk [vmem:[#allocation2 + $0xe8] sm:$0xff] %vm282_vm1, %v7606_v23  ;;  %v8054_v40 = vadd.f32 %v17139_v60, %v8022_v41  ;;  %v7605_v20 = vadd.f32 %v7573_v47, %v7526_v9  ;;  %v15111_v60 = vld [vmem:[%s17837_s10 + $0xb2] sm:$0xff] }
 0x2f8   : > { %v8021_v29 = vld [vmem:[#allocation2 + $0xc0] sm:$0xff]  ;;  %v17098_v38 = vpop.f32.mrf.mxu1  ;;  %17397 = vmatmul.mubr.msk.f32.gmra.mxu1 %vm282_vm1, %v20936_v55  ;;  %v15115_v41 = vld [vmem:[%s17837_s10 + $0xf2] sm:$0xff] }
 0x2f9   : > { %v17145_v56 = vpop.f32.mrf.mxu0  ;;  %17444 = vmatmul.mubr.msk.f32.gmra.mxu0 %vm282_vm1, %v15074_v52  ;;  %8086 = vst.msk [vmem:[#allocation2 + $0xc8] sm:$0xff] %vm282_vm1, %v8054_v40  ;;  %7637 = vst.msk [vmem:[#allocation2 + $0xe0] sm:$0xff] %vm282_vm1, %v7605_v20  ;;  %v8053_v45 = vadd.f32 %v8021_v29, %v7958_v54  ;;  %v7608_v33 = vadd.f32 %v17098_v38, %v7576_v50  ;;  %17451 = vmatprep.mubr.msk.f32.mxu1 %vm282_vm1, %v15110_v0  ;;  %v15114_v52 = vld [vmem:[%s17837_s10 + $0xea] sm:$0xff]  ;;  %v20987_v38 = vld [vmem:[%s22302_s2 + $0x1] ss:$0 sm:$0xff] }
 0x2fa   : > { %17446 = vmatprep.mubr.msk.f32.mxu0 %vm282_vm1, %v15075_v7  ;;  %v8024_v34 = vld [vmem:[#allocation2 + $0xd8] sm:$0xff]  ;;  %v7536_v3 = vpop.f32.mrf.mxu1  ;;  %v8451_v47 = vld [vmem:[#allocation2 + $0x10] sm:$0xff]  ;;  %v8454_v29 = vld [vmem:[#allocation2 + $0x28] sm:$0xff] }
 0x2fb   : > { %v7978_v49 = vpop.f32.mrf.mxu0  ;;  %8085 = vst.msk [vmem:[#allocation2 + $0xc0] sm:$0xff] %vm282_vm1, %v8053_v45  ;;  %7640 = vst.msk [vmem:[#allocation2 + $0xf8] sm:$0xff] %vm282_vm1, %v7608_v33  ;;  %v8056_v18 = vadd.f32 %v17142_v10, %v8024_v34  ;;  %v7607_v2 = vadd.f32 %v7575_v8, %v7536_v3  ;;  %v15113_v10 = vld [vmem:[%s17837_s10 + $0xd2] sm:$0xff]  ;;  %v15116_v0 = vld [vmem:[%s17837_s10 + $0x10a] sm:$0xff] }
 0x2fc   : > { %v8023_v54 = vld [vmem:[#allocation2 + $0xd0] sm:$0xff]  ;;  %v17153_v24 = vpop.f32.mrf.mxu1  ;;  %17452 = vmatmul.mubr.msk.f32.vlgmr.msra.gmra.mxu1 %vm282_vm1, %v15111_v60  ;;  %v8452_v7 = vld [vmem:[#allocation2 + $0x18] sm:$0xff]  ;;  %v8453_v60 = vld [vmem:[#allocation2 + $0x20] sm:$0xff] }
 0x2fd   : > { %v17148_v13 = vpop.f32.mrf.mxu0  ;;  %17447 = vmatmul.mubr.msk.f32.gmra.mxu0 %vm282_vm1, %v15076_v48  ;;  %8088 = vst.msk [vmem:[#allocation2 + $0xd8] sm:$0xff] %vm282_vm1, %v8056_v18  ;;  %7639 = vst.msk [vmem:[#allocation2 + $0xf0] sm:$0xff] %vm282_vm1, %v7607_v2  ;;  %v8055_v15 = vadd.f32 %v8023_v54, %v7968_v32  ;;  %v8482_v59 = vadd.f32 %v17153_v24, %v8450_v46  ;;  %17550 = vmatpush3.msk.msra.mxu1 %vm379_vm0, %v20683_v30  ;;  %v15118_v34 = vld [vmem:[%s17837_s10 + $0x12a] sm:$0xff]  ;;  %v8456_v2 = vld [vmem:[#allocation2 + $0x38] sm:$0xff] }
 0x2fe   : > { %17501 = vmatprep.mubr.msk.f32.mxu0 %vm282_vm1, %v20740_v27  ;;  %17454 = vmatprep.mubr.msk.f32.mxu1 %vm282_vm1, %v15112_v16  ;;  %v8026_v27 = vld [vmem:[#allocation2 + $0xe8] sm:$0xff]  ;;  %v8290_v42 = vpop.f32.mrf.mxu1 }
 0x2ff   : > { %v7988_v44 = vpop.f32.mrf.mxu0  ;;  %8087 = vst.msk [vmem:[#allocation2 + $0xd0] sm:$0xff] %vm282_vm1, %v8055_v15  ;;  %v8058_v11 = vadd.f32 %v17145_v56, %v8026_v27  ;;  %8514 = vst.msk [vmem:[#allocation2 + $0x8] sm:$0xff] %vm282_vm1, %v8482_v59  ;;  %v8481_v4 = vadd.f32 %v8449_v39, %v8290_v42  ;;  %v15120_v59 = vld [vmem:[%s17837_s10 + $0x14a] sm:$0xff] }
 0x300   : > { %v8025_v30 = vld [vmem:[#allocation2 + $0xe0] sm:$0xff]  ;;  %v17156_v32 = vpop.f32.mrf.mxu1  ;;  %17455 = vmatmul.mubr.msk.f32.gmra.mxu1 %vm282_vm1, %v15113_v10 }
 0x301   : > { %v17203_v58 = vpop.f32.mrf.mxu0  ;;  %17502 = vmatmul.mubr.msk.f32.vlgmr.msra.gmra.mxu0 %vm282_vm1, %v20754_v22  ;;  %8090 = vst.msk [vmem:[#allocation2 + $0xe8] sm:$0xff] %vm282_vm1, %v8058_v11  ;;  %v8057_v61 = vadd.f32 %v8025_v30, %v7978_v49  ;;  %8513 = vst.msk [vmem:[#allocation2] sm:$0xff] %vm282_vm1, %v8481_v4  ;;  %v8484_v23 = vadd.f32 %v17156_v32, %v8452_v7  ;;  %17457 = vmatprep.mubr.msk.f32.mxu1 %vm282_vm1, %v15114_v52 }
 0x302   : > { %17600 = vmatpush3.msk.msra.mxu0 %vm379_vm0, %v20695_v36  ;;  %17504 = vmatprep.mubr.msk.f32.mxu0 %vm282_vm1, %v20757_v21  ;;  %v8028_v36 = vld [vmem:[#allocation2 + $0xf8] sm:$0xff]  ;;  %v8300_v9 = vpop.f32.mrf.mxu1 }
 0x303   : > { %v9024_v22 = vpop.f32.mrf.mxu0  ;;  %8089 = vst.msk [vmem:[#allocation2 + $0xe0] sm:$0xff] %vm282_vm1, %v8057_v61  ;;  %v8060_v56 = vadd.f32 %v17148_v13, %v8028_v36  ;;  %8516 = vst.msk [vmem:[#allocation2 + $0x18] sm:$0xff] %vm282_vm1, %v8484_v23  ;;  %v8483_v40 = vadd.f32 %v8451_v47, %v8300_v9  ;;  %v15121_v23 = vld [vmem:[%s17837_s10 + $0x152] sm:$0xff] }
 0x304   : > { %v8027_v20 = vld [vmem:[#allocation2 + $0xf0] sm:$0xff]  ;;  %v17159_v48 = vpop.f32.mrf.mxu1  ;;  %17458 = vmatmul.mubr.msk.f32.gmra.mxu1 %vm282_vm1, %v15115_v41 }
 0x305   : > { %v17206_v21 = vpop.f32.mrf.mxu0  ;;  %17505 = vmatmul.mubr.msk.f32.gmra.mxu0 %vm282_vm1, %v20772_v26  ;;  %8092 = vst.msk [vmem:[#allocation2 + $0xf8] sm:$0xff] %vm282_vm1, %v8060_v56  ;;  %v8059_v50 = vadd.f32 %v8027_v20, %v7988_v44  ;;  %8515 = vst.msk [vmem:[#allocation2 + $0x10] sm:$0xff] %vm282_vm1, %v8483_v40  ;;  %v8486_v49 = vadd.f32 %v17159_v48, %v8454_v29  ;;  %17460 = vmatprep.mubr.msk.f32.mxu1 %vm282_vm1, %v15116_v0  ;;  %v8457_v29 = vld [vmem:[#allocation2 + $0x40] sm:$0xff] }
 0x306   : > { %17507 = vmatprep.mubr.msk.f32.mxu0 %vm282_vm1, %v20775_v1  ;;  %v15117_v1 = vld [vmem:[%s17837_s10 + $0x112] sm:$0xff]  ;;  %v8546_v45 = vld [vmem:[#allocation2 + $0x8] sm:$0xff]  ;;  %v8310_v33 = vpop.f32.mrf.mxu1 }
 0x307   : > { %v9034_v26 = vpop.f32.mrf.mxu0  ;;  %8091 = vst.msk [vmem:[#allocation2 + $0xf0] sm:$0xff] %vm282_vm1, %v8059_v50  ;;  %8518 = vst.msk [vmem:[#allocation2 + $0x28] sm:$0xff] %vm282_vm1, %v8486_v49  ;;  %v8583_v8 = vadd.f32 %v20987_v38, %v8546_v45  ;;  %v8485_v16 = vadd.f32 %v8453_v60, %v8310_v33 }
 0x308   : > { %9184 = vst.msk [vmem:[#allocation2 + $0x8] sm:$0xff] %vm282_vm1, %v17203_v58  ;;  %v8545_v13 = vld [vmem:[#allocation2] sm:$0xff]  ;;  %v17162_v18 = vpop.f32.mrf.mxu1  ;;  %17461 = vmatmul.mubr.msk.f32.gmra.mxu1 %vm282_vm1, %v15117_v1  ;;  %v8455_v58 = vld [vmem:[#allocation2 + $0x30] sm:$0xff] }
 0x309   : > { %v17209_v3 = vpop.f32.mrf.mxu0  ;;  %17508 = vmatmul.mubr.msk.f32.gmra.mxu0 %vm282_vm1, %v20790_v57  ;;  %14841 = vst.msk [vmem:[%s19533_s14 + $0x108] sm:$0xff] %vm282_vm1, %v8583_v8  ;;  %v8717_v54 = vmul.f32 %v8583_v8, %v8583_v8  ;;  %8517 = vst.msk [vmem:[#allocation2 + $0x20] sm:$0xff] %vm282_vm1, %v8485_v16  ;;  %v8582_v24 = vadd.f32 %v20987_v38, %v8545_v13  ;;  %v8488_v46 = vadd.f32 %v17162_v18, %v8456_v2 }
 0x30a   : > { %17510 = vmatprep.mubr.msk.f32.mxu0 %vm282_vm1, %v20793_v63  ;;  %9183 = vst.msk [vmem:[#allocation2] sm:$0xff] %vm282_vm1, %v9024_v22  ;;  %17463 = vmatprep.mubr.msk.f32.mxu1 %vm282_vm1, %v15118_v34  ;;  %v15119_v63 = vld [vmem:[%s17837_s10 + $0x132] sm:$0xff]  ;;  %v8320_v15 = vpop.f32.mrf.mxu1  ;;  %v8648_v27 = vsel %vm282_vm1, %v8583_v8, 0.0 }
 0x30b   : > { %v21004_v57 = vpop.f32.mrf.mxu0  ;;  %v8548_v44 = vld [vmem:[#allocation2 + $0x18] sm:$0xff]  ;;  %14840 = vst.msk [vmem:[%s19533_s14 + $0x100] sm:$0xff] %vm282_vm1, %v8582_v24  ;;  %v8647_v42 = vsel %vm282_vm1, %v8582_v24, 0.0  ;;  %v8716_v39 = vmul.f32 %v8582_v24, %v8582_v24  ;;  %8520 = vst.msk [vmem:[#allocation2 + $0x38] sm:$0xff] %vm282_vm1, %v8488_v46  ;;  %v8487_v11 = vadd.f32 %v8455_v58, %v8320_v15  ;;  %v8749_v7 = vsel %vm282_vm1, %v8717_v54, 0.0  ;;  %v21072_v54 = vld [vmem:[%s17837_s10 + $0x18a] sm:$0xff] }
 0x30c   : > { %v8585_v52 = vadd.f32 %v20987_v38, %v8548_v44  ;;  %9186 = vst.msk [vmem:[#allocation2 + $0x18] sm:$0xff] %vm282_vm1, %v17206_v21  ;;  %v8547_v4 = vld [vmem:[#allocation2 + $0x10] sm:$0xff]  ;;  %v17165_v30 = vpop.f32.mrf.mxu1  ;;  %17464 = vmatmul.mubr.msk.f32.gmra.mxu1 %vm282_vm1, %v15119_v63 }
 0x30d   : > { %v21014_v10 = vpop.f32.mrf.mxu0  ;;  %17511 = vmatmul.mubr.msk.f32.gmra.mxu0 %vm282_vm1, %v20808_v12  ;;  %v8649_v12 = vadd.f32 %v8648_v27, %v8647_v42  ;;  %v8748_v22 = vsel %vm282_vm1, %v8716_v39, 0.0  ;;  %v8584_v61 = vadd.f32 %v20987_v38, %v8547_v4  ;;  %9185 = vst.msk [vmem:[#allocation2 + $0x10] sm:$0xff] %vm282_vm1, %v9034_v26  ;;  %17466 = vmatprep.mubr.msk.f32.mxu1 %vm282_vm1, %v15120_v59  ;;  %8519 = vst.msk [vmem:[#allocation2 + $0x30] sm:$0xff] %vm282_vm1, %v8487_v11  ;;  %v21040_v21 = vld [vmem:[%s17837_s10 + $0x16a] sm:$0xff]  ;;  %v21067_v34 = vld [vmem:[%s17837_s10 + $0x172] sm:$0xff] }
 0x30e   : > { %17513 = vmatprep.mubr.msk.f32.mxu0 %vm282_vm1, %v20811_v28  ;;  %14843 = vst.msk [vmem:[%s19533_s14 + $0x118] sm:$0xff] %vm282_vm1, %v8585_v52  ;;  %v8458_v28 = vld [vmem:[#allocation2 + $0x48] sm:$0xff]  ;;  %v8750_v41 = vadd.f32 %v8749_v7, %v8748_v22  ;;  %v8719_v36 = vmul.f32 %v8585_v52, %v8585_v52  ;;  %v8330_v0 = vpop.f32.mrf.mxu1  ;;  %v8652_v45 = vsel %vm282_vm1, %v8585_v52, 0.0  ;;  %v8459_v15 = vld [vmem:[#allocation2 + $0x50] sm:$0xff] }
 0x30f   : > { %v21028_v32 = vpop.f32.mrf.mxu0  ;;  %v8490_v9 = vadd.f32 %v17165_v30, %v8458_v28  ;;  %v8550_v47 = vld [vmem:[#allocation2 + $0x28] sm:$0xff]  ;;  %14842 = vst.msk [vmem:[%s19533_s14 + $0x110] sm:$0xff] %vm282_vm1, %v8584_v61  ;;  %v8650_v40 = vsel %vm282_vm1, %v8584_v61, 0.0  ;;  %v8718_v20 = vmul.f32 %v8584_v61, %v8584_v61  ;;  %v8489_v50 = vadd.f32 %v8457_v29, %v8330_v0  ;;  %v21098_v11 = vld [vmem:[%s17837_s10 + $0x192] sm:$0xff]  ;;  %v8461_v61 = vld [vmem:[#allocation2 + $0x60] sm:$0xff] }
 0x310   : > { %v8587_v48 = vadd.f32 %v20987_v38, %v8550_v47  ;;  %9188 = vst.msk [vmem:[#allocation2 + $0x28] sm:$0xff] %vm282_vm1, %v17209_v3  ;;  %v8651_v26 = vadd.f32 %v8650_v40, %v8649_v12  ;;  %v17168_v49 = vpop.f32.mrf.mxu1  ;;  %17467 = vmatmul.mubr.msk.f32.gmra.mxu1 %vm282_vm1, %v15121_v23  ;;  %v8753_v3 = vsel %vm282_vm1, %v8719_v36, 0.0  ;;  %v8462_v39 = vld [vmem:[#allocation2 + $0x68] sm:$0xff] }
 0x311   : > { %v21042_v56 = vpop.f32.mrf.mxu0  ;;  %17514 = vmatmul.mubr.msk.f32.gmra.mxu0 %vm282_vm1, %v20826_v53  ;;  %8522 = vst.msk [vmem:[#allocation2 + $0x48] sm:$0xff] %vm282_vm1, %v8490_v9  ;;  %v8549_v53 = vld [vmem:[#allocation2 + $0x20] sm:$0xff]  ;;  %v8751_v33 = vsel %vm282_vm1, %v8718_v20, 0.0  ;;  %17469 = vmatprep.mubr.msk.f32.mxu1 %vm282_vm1, %v21040_v21  ;;  %8521 = vst.msk [vmem:[#allocation2 + $0x40] sm:$0xff] %vm282_vm1, %v8489_v50  ;;  %v21105_v28 = vld [vmem:[%s17837_s10 + $0x1aa] sm:$0xff] }
 0x312   : > { %17516 = vmatprep.mubr.msk.f32.mxu0 %vm282_vm1, %v20829_v5  ;;  %14845 = vst.msk [vmem:[%s19533_s14 + $0x128] sm:$0xff] %vm282_vm1, %v8587_v48  ;;  %v8586_v60 = vadd.f32 %v20987_v38, %v8549_v53  ;;  %9187 = vst.msk [vmem:[#allocation2 + $0x20] sm:$0xff] %vm282_vm1, %v21004_v57  ;;  %v8460_v5 = vld [vmem:[#allocation2 + $0x58] sm:$0xff]  ;;  %v8752_v8 = vadd.f32 %v8751_v33, %v8750_v41  ;;  %v8653_v16 = vadd.f32 %v8652_v45, %v8651_v26  ;;  %v8340_v2 = vpop.f32.mrf.mxu1 }
 0x313   : > { %v21055_v1 = vpop.f32.mrf.mxu0  ;;  %v8492_v13 = vadd.f32 %v17168_v49, %v8460_v5  ;;  %v8552_v18 = vld [vmem:[#allocation2 + $0x38] sm:$0xff]  ;;  %v8721_v57 = vmul.f32 %v8587_v48, %v8587_v48  ;;  %v21139_v5 = vld [vmem:[%s17837_s10 + $0x1ca] sm:$0xff] }
 0x314   : > { %14844 = vst.msk [vmem:[%s19533_s14 + $0x120] sm:$0xff] %vm282_vm1, %v8586_v60  ;;  %v8654_v46 = vsel %vm282_vm1, %v8586_v60, 0.0  ;;  %v8720_v63 = vmul.f32 %v8586_v60, %v8586_v60  ;;  %v8589_v44 = vadd.f32 %v20987_v38, %v8552_v18  ;;  %9190 = vst.msk [vmem:[#allocation2 + $0x38] sm:$0xff] %vm282_vm1, %v21014_v10  ;;  %v8754_v27 = vadd.f32 %v8753_v3, %v8752_v8  ;;  %v17171_v42 = vpop.f32.mrf.mxu1  ;;  %v21129_v53 = vld [vmem:[%s17837_s10 + $0x1b2] sm:$0xff] }
 0x315   : > { %v21074_v24 = vpop.f32.mrf.mxu0  ;;  %17517 = vmatmul.mubr.msk.f32.gmra.mxu0 %vm282_vm1, %v20844_v25  ;;  %v8655_v59 = vadd.f32 %v8654_v46, %v8653_v16  ;;  %8524 = vst.msk [vmem:[#allocation2 + $0x58] sm:$0xff] %vm282_vm1, %v8492_v13  ;;  %v8491_v25 = vadd.f32 %v8459_v15, %v8340_v2  ;;  %17470 = vmatmul.mubr.msk.f32.gmra.mxu1 %vm282_vm1, %v21067_v34  ;;  %v8656_v10 = vsel %vm282_vm1, %v8587_v48, 0.0  ;;  %v8757_v41 = vsel %vm282_vm1, %v8721_v57, 0.0  ;;  %v8464_v48 = vld [vmem:[#allocation2 + $0x78] sm:$0xff]  ;;  %v8463_v60 = vld [vmem:[#allocation2 + $0x70] sm:$0xff] }
 0x316   : > { %17519 = vmatprep.mubr.msk.f32.mxu0 %vm282_vm1, %v20847_v43  ;;  %v8755_v58 = vsel %vm282_vm1, %v8720_v63, 0.0  ;;  %14847 = vst.msk [vmem:[%s19533_s14 + $0x138] sm:$0xff] %vm282_vm1, %v8589_v44  ;;  %v8551_v43 = vld [vmem:[#allocation2 + $0x30] sm:$0xff]  ;;  %v8494_v12 = vadd.f32 %v17171_v42, %v8462_v39  ;;  %17472 = vmatprep.mubr.msk.f32.mxu1 %vm282_vm1, %v21072_v54  ;;  %v8350_v22 = vpop.f32.mrf.mxu1  ;;  %v8723_v36 = vmul.f32 %v8589_v44, %v8589_v44 }
 0x317   : > { %v21089_v52 = vpop.f32.mrf.mxu0  ;;  %v8756_v4 = vadd.f32 %v8755_v58, %v8754_v27  ;;  %8523 = vst.msk [vmem:[#allocation2 + $0x50] sm:$0xff] %vm282_vm1, %v8491_v25  ;;  %v8588_v30 = vadd.f32 %v20987_v38, %v8551_v43  ;;  %v8657_v7 = vadd.f32 %v8656_v10, %v8655_v59  ;;  %9189 = vst.msk [vmem:[#allocation2 + $0x30] sm:$0xff] %vm282_vm1, %v21028_v32  ;;  %v21163_v42 = vld [vmem:[%s17837_s10 + $0x1d2] sm:$0xff] }
 0x318   : > { %8526 = vst.msk [vmem:[#allocation2 + $0x68] sm:$0xff] %vm282_vm1, %v8494_v12  ;;  %v8554_v9 = vld [vmem:[#allocation2 + $0x48] sm:$0xff]  ;;  %v8493_v47 = vadd.f32 %v8461_v61, %v8350_v22  ;;  %v17174_v20 = vpop.f32.mrf.mxu1  ;;  %v8553_v26 = vld [vmem:[#allocation2 + $0x40] sm:$0xff]  ;;  %v8761_v8 = vsel %vm282_vm1, %v8723_v36, 0.0 }
 0x319   : > { %v21107_v23 = vpop.f32.mrf.mxu0  ;;  %17520 = vmatmul.mubr.msk.f32.gmra.mxu0 %vm282_vm1, %v20863_v35  ;;  %14846 = vst.msk [vmem:[%s19533_s14 + $0x130] sm:$0xff] %vm282_vm1, %v8588_v30  ;;  %v8658_v32 = vsel %vm282_vm1, %v8588_v30, 0.0  ;;  %v8722_v0 = vmul.f32 %v8588_v30, %v8588_v30  ;;  %v8758_v40 = vadd.f32 %v8757_v41, %v8756_v4  ;;  %v8591_v35 = vadd.f32 %v20987_v38, %v8554_v9  ;;  %v8465_v4 = vld [vmem:[#allocation2 + $0x80] sm:$0xff]  ;;  %v21173_v30 = vld [vmem:[%s17837_s10 + $0x1ea] sm:$0xff] }
 0x31a   : > { %17522 = vmatprep.mubr.msk.f32.mxu0 %vm282_vm1, %v20866_v51  ;;  %9192 = vst.msk [vmem:[#allocation2 + $0x48] sm:$0xff] %vm282_vm1, %v21042_v56  ;;  %17473 = vmatmul.mubr.msk.f32.gmra.mxu1 %vm282_vm1, %v21098_v11  ;;  %v8659_v29 = vadd.f32 %v8658_v32, %v8657_v7  ;;  %8525 = vst.msk [vmem:[#allocation2 + $0x60] sm:$0xff] %vm282_vm1, %v8493_v47  ;;  %v8496_v50 = vadd.f32 %v17174_v20, %v8464_v48  ;;  %v8660_v56 = vsel %vm282_vm1, %v8589_v44, 0.0  ;;  %v8360_v33 = vpop.f32.mrf.mxu1  ;;  %v8466_v44 = vld [vmem:[#allocation2 + $0x88] sm:$0xff] }
 0x31b   : > { %v21123_v51 = vpop.f32.mrf.mxu0  ;;  %17475 = vmatprep.mubr.msk.f32.mxu1 %vm282_vm1, %v21105_v28  ;;  %v8759_v49 = vsel %vm282_vm1, %v8722_v0, 0.0  ;;  %14849 = vst.msk [vmem:[%s19533_s14 + $0x148] sm:$0xff] %vm282_vm1, %v8591_v35  ;;  %v8590_v45 = vadd.f32 %v20987_v38, %v8553_v26  ;;  %9191 = vst.msk [vmem:[#allocation2 + $0x40] sm:$0xff] %vm282_vm1, %v21055_v1  ;;  %v8495_v2 = vadd.f32 %v8463_v60, %v8360_v33 }
 0x31c   : > { %v8760_v16 = vadd.f32 %v8759_v49, %v8758_v40  ;;  %v8661_v13 = vadd.f32 %v8660_v56, %v8659_v29  ;;  %8528 = vst.msk [vmem:[#allocation2 + $0x78] sm:$0xff] %vm282_vm1, %v8496_v50  ;;  %v8556_v18 = vld [vmem:[#allocation2 + $0x58] sm:$0xff]  ;;  %v8725_v1 = vmul.f32 %v8591_v35, %v8591_v35  ;;  %v17177_v63 = vpop.f32.mrf.mxu1  ;;  %v21207_v49 = vld [vmem:[%s17837_s10 + $0x20a] sm:$0xff] }
 0x31d   : > { %v21141_v3 = vpop.f32.mrf.mxu0  ;;  %17523 = vmatmul.mubr.msk.f32.gmra.mxu0 %vm282_vm1, %v20882_v62  ;;  %14848 = vst.msk [vmem:[%s19533_s14 + $0x140] sm:$0xff] %vm282_vm1, %v8590_v45  ;;  %v8662_v57 = vsel %vm282_vm1, %v8590_v45, 0.0  ;;  %v8724_v46 = vmul.f32 %v8590_v45, %v8590_v45  ;;  %v8593_v62 = vadd.f32 %v20987_v38, %v8556_v18  ;;  %9194 = vst.msk [vmem:[#allocation2 + $0x58] sm:$0xff] %vm282_vm1, %v21074_v24  ;;  %v8664_v24 = vsel %vm282_vm1, %v8591_v35, 0.0  ;;  %v21201_v35 = vld [vmem:[%s17837_s10 + $0x1f2] sm:$0xff] }
 0x31e   : > { %17525 = vmatprep.mubr.msk.f32.mxu0 %vm282_vm1, %v20885_v37  ;;  %17476 = vmatmul.mubr.msk.f32.gmra.mxu1 %vm282_vm1, %v21129_v53  ;;  %v8663_v37 = vadd.f32 %v8662_v57, %v8661_v13  ;;  %v8762_v59 = vadd.f32 %v8761_v8, %v8760_v16  ;;  %8527 = vst.msk [vmem:[#allocation2 + $0x70] sm:$0xff] %vm282_vm1, %v8495_v2  ;;  %v8555_v27 = vld [vmem:[#allocation2 + $0x50] sm:$0xff]  ;;  %v8370_v12 = vpop.f32.mrf.mxu1  ;;  %v8765_v36 = vsel %vm282_vm1, %v8725_v1, 0.0 }
 0x31f   : > { %v21157_v15 = vpop.f32.mrf.mxu0  ;;  %v8498_v25 = vadd.f32 %v17177_v63, %v8466_v44  ;;  %17478 = vmatprep.mubr.msk.f32.mxu1 %vm282_vm1, %v21139_v5  ;;  %v8763_v39 = vsel %vm282_vm1, %v8724_v46, 0.0  ;;  %14851 = vst.msk [vmem:[%s19533_s14 + $0x158] sm:$0xff] %vm282_vm1, %v8593_v62  ;;  %v8727_v10 = vmul.f32 %v8593_v62, %v8593_v62  ;;  %v8592_v58 = vadd.f32 %v20987_v38, %v8555_v27  ;;  %v8558_v43 = vld [vmem:[#allocation2 + $0x68] sm:$0xff]  ;;  %v8467_v16 = vld [vmem:[#allocation2 + $0x90] sm:$0xff]  ;;  %v15197_v46 = vld [vmem:[%s17837_s10 + $0x2a0] sm:$0xff] }
 0x320   : > { %9193 = vst.msk [vmem:[#allocation2 + $0x50] sm:$0xff] %vm282_vm1, %v21089_v52  ;;  %v8764_v22 = vadd.f32 %v8763_v39, %v8762_v59  ;;  %v8665_v61 = vadd.f32 %v8664_v24, %v8663_v37  ;;  %v8595_v41 = vadd.f32 %v20987_v38, %v8558_v43  ;;  %9196 = vst.msk [vmem:[#allocation2 + $0x68] sm:$0xff] %vm282_vm1, %v21107_v23  ;;  %v17180_v32 = vpop.f32.mrf.mxu1  ;;  %v8668_v20 = vsel %vm282_vm1, %v8593_v62, 0.0  ;;  %v8470_v63 = vld [vmem:[#allocation2 + $0xa8] sm:$0xff]  ;;  %v21235_v44 = vld [vmem:[%s17837_s10 + $0x212] sm:$0xff] }
 0x321   : > { %v21175_v7 = vpop.f32.mrf.mxu0  ;;  %17526 = vmatmul.mubr.msk.f32.gmra.mxu0 %vm282_vm1, %v20900_v31  ;;  %8530 = vst.msk [vmem:[#allocation2 + $0x88] sm:$0xff] %vm282_vm1, %v8498_v25  ;;  %v8497_v52 = vadd.f32 %v8465_v4, %v8370_v12  ;;  %14850 = vst.msk [vmem:[%s19533_s14 + $0x150] sm:$0xff] %vm282_vm1, %v8592_v58  ;;  %v8666_v31 = vsel %vm282_vm1, %v8592_v58, 0.0  ;;  %v8726_v9 = vmul.f32 %v8592_v58, %v8592_v58  ;;  %v8557_v47 = vld [vmem:[#allocation2 + $0x60] sm:$0xff] }
 0x322   : > { %17528 = vmatprep.mubr.msk.f32.mxu0 %vm282_vm1, %v20903_v14  ;;  %17479 = vmatmul.mubr.msk.f32.gmra.mxu1 %vm282_vm1, %v21163_v42  ;;  %v8667_v23 = vadd.f32 %v8666_v31, %v8665_v61  ;;  %v8766_v40 = vadd.f32 %v8765_v36, %v8764_v22  ;;  %14853 = vst.msk [vmem:[%s19533_s14 + $0x168] sm:$0xff] %vm282_vm1, %v8595_v41  ;;  %9195 = vst.msk [vmem:[#allocation2 + $0x60] sm:$0xff] %vm282_vm1, %v21123_v51  ;;  %v8468_v14 = vld [vmem:[#allocation2 + $0x98] sm:$0xff]  ;;  %v8380_v56 = vpop.f32.mrf.mxu1  ;;  %v8769_v51 = vsel %vm282_vm1, %v8727_v10, 0.0  ;;  %v8469_v22 = vld [vmem:[#allocation2 + $0xa0] sm:$0xff] }
 0x323   : > { %v21191_v0 = vpop.f32.mrf.mxu0  ;;  %8529 = vst.msk [vmem:[#allocation2 + $0x80] sm:$0xff] %vm282_vm1, %v8497_v52  ;;  %17481 = vmatprep.mubr.msk.f32.mxu1 %vm282_vm1, %v21173_v30  ;;  %v8767_v48 = vsel %vm282_vm1, %v8726_v9, 0.0  ;;  %v8594_v29 = vadd.f32 %v20987_v38, %v8557_v47  ;;  %v8500_v26 = vadd.f32 %v17180_v32, %v8468_v14  ;;  %v8560_v50 = vld [vmem:[#allocation2 + $0x78] sm:$0xff]  ;;  %v8729_v13 = vmul.f32 %v8595_v41, %v8595_v41  ;;  %v15198_v61 = vld [vmem:[%s17837_s10 + $0x2a8] sm:$0xff]  ;;  %v15199_v47 = vld [vmem:[%s17837_s10 + $0x2c0] sm:$0xff] }
 0x324   : > { %v8768_v33 = vadd.f32 %v8767_v48, %v8766_v40  ;;  %v8669_v60 = vadd.f32 %v8668_v20, %v8667_v23  ;;  %v8597_v8 = vadd.f32 %v20987_v38, %v8560_v50  ;;  %9198 = vst.msk [vmem:[#allocation2 + $0x78] sm:$0xff] %vm282_vm1, %v21141_v3  ;;  %v8499_v2 = vadd.f32 %v8467_v16, %v8380_v56  ;;  %v17183_v57 = vpop.f32.mrf.mxu1  ;;  %v8472_v40 = vld [vmem:[#allocation2 + $0xb8] sm:$0xff]  ;;  %v8471_v56 = vld [vmem:[#allocation2 + $0xb0] sm:$0xff] }
 0x325   : > { %v21209_v45 = vpop.f32.mrf.mxu0  ;;  %17529 = vmatmul.mubr.msk.f32.gmra.mxu0 %vm282_vm1, %v20918_v19  ;;  %14852 = vst.msk [vmem:[%s19533_s14 + $0x160] sm:$0xff] %vm282_vm1, %v8594_v29  ;;  %v8670_v19 = vsel %vm282_vm1, %v8594_v29, 0.0  ;;  %v8728_v18 = vmul.f32 %v8594_v29, %v8594_v29  ;;  %8532 = vst.msk [vmem:[#allocation2 + $0x98] sm:$0xff] %vm282_vm1, %v8500_v26  ;;  %v8559_v1 = vld [vmem:[#allocation2 + $0x70] sm:$0xff]  ;;  %v8672_v37 = vsel %vm282_vm1, %v8595_v41, 0.0  ;;  %v8502_v25 = vadd.f32 %v17183_v57, %v8470_v63  ;;  %v15201_v63 = vld [vmem:[%s17837_s10 + $0x2e0] sm:$0xff] }
 0x326   : > { %17531 = vmatprep.mubr.msk.f32.mxu0 %vm282_vm1, %v20921_v6  ;;  %17482 = vmatmul.mubr.msk.f32.gmra.mxu1 %vm282_vm1, %v21201_v35  ;;  %v8671_v6 = vadd.f32 %v8670_v19, %v8669_v60  ;;  %v8770_v62 = vadd.f32 %v8769_v51, %v8768_v33  ;;  %14855 = vst.msk [vmem:[%s19533_s14 + $0x178] sm:$0xff] %vm282_vm1, %v8597_v8  ;;  %9197 = vst.msk [vmem:[#allocation2 + $0x70] sm:$0xff] %vm282_vm1, %v21157_v15  ;;  %v8390_v39 = vpop.f32.mrf.mxu1  ;;  %v21242_v15 = vld [vmem:[%s17837_s10 + $0x22a] sm:$0xff]  ;;  %v8773_v41 = vsel %vm282_vm1, %v8729_v13, 0.0  ;;  %v21270_v14 = vld [vmem:[%s17837_s10 + $0x232] sm:$0xff] }
 0x327   : > { %v21225_v3 = vpop.f32.mrf.mxu0  ;;  %17484 = vmatprep.mubr.msk.f32.mxu1 %vm282_vm1, %v21207_v49  ;;  %v8771_v59 = vsel %vm282_vm1, %v8728_v18, 0.0  ;;  %8531 = vst.msk [vmem:[#allocation2 + $0x90] sm:$0xff] %vm282_vm1, %v8499_v2  ;;  %v8596_v27 = vadd.f32 %v20987_v38, %v8559_v1  ;;  %v8731_v43 = vmul.f32 %v8597_v8, %v8597_v8  ;;  %8534 = vst.msk [vmem:[#allocation2 + $0xa8] sm:$0xff] %vm282_vm1, %v8502_v25  ;;  %v8676_v20 = vsel %vm282_vm1, %v8597_v8, 0.0  ;;  %v15200_v19 = vld [vmem:[%s17837_s10 + $0x2c8] sm:$0xff] }
 0x328   : > { %v8562_v24 = vld [vmem:[#allocation2 + $0x88] sm:$0xff]  ;;  %v8772_v58 = vadd.f32 %v8771_v59, %v8770_v62  ;;  %v8673_v12 = vadd.f32 %v8672_v37, %v8671_v6  ;;  %v8501_v36 = vadd.f32 %v8469_v22, %v8390_v39  ;;  %v17186_v9 = vpop.f32.mrf.mxu1 }
 0x329   : > { %v21244_v10 = vpop.f32.mrf.mxu0  ;;  %17532 = vmatmul.mubr.msk.f32.gmra.mxu0 %vm282_vm1, %v20936_v55  ;;  %v8599_v4 = vadd.f32 %v20987_v38, %v8562_v24  ;;  %9200 = vst.msk [vmem:[#allocation2 + $0x88] sm:$0xff] %vm282_vm1, %v21175_v7  ;;  %14854 = vst.msk [vmem:[%s19533_s14 + $0x170] sm:$0xff] %vm282_vm1, %v8596_v27  ;;  %v8674_v55 = vsel %vm282_vm1, %v8596_v27, 0.0  ;;  %v8730_v52 = vmul.f32 %v8596_v27, %v8596_v27  ;;  %v8777_v33 = vsel %vm282_vm1, %v8731_v43, 0.0  ;;  %v8474_v6 = vld [vmem:[#allocation2 + $0xc8] sm:$0xff]  ;;  %v21301_v24 = vld [vmem:[%s17837_s10 + $0x252] sm:$0xff] }
 0x32a   : > { %17534 = vmatprep.mubr.msk.f32.mxu0 %vm282_vm1, %v15197_v46  ;;  %v8561_v31 = vld [vmem:[#allocation2 + $0x80] sm:$0xff]  ;;  %17485 = vmatmul.mubr.msk.f32.gmra.mxu1 %vm282_vm1, %v21235_v44  ;;  %v8675_v32 = vadd.f32 %v8674_v55, %v8673_v12  ;;  %v8774_v23 = vadd.f32 %v8773_v41, %v8772_v58  ;;  %8533 = vst.msk [vmem:[#allocation2 + $0xa0] sm:$0xff] %vm282_vm1, %v8501_v36  ;;  %v8400_v50 = vpop.f32.mrf.mxu1  ;;  %v21311_v22 = vld [vmem:[%s17837_s10 + $0x26a] sm:$0xff] }
 0x32b   : > { %v21260_v7 = vpop.f32.mrf.mxu0  ;;  %14857 = vst.msk [vmem:[%s19533_s14 + $0x188] sm:$0xff] %vm282_vm1, %v8599_v4  ;;  %9199 = vst.msk [vmem:[#allocation2 + $0x80] sm:$0xff] %vm282_vm1, %v21191_v0  ;;  %17487 = vmatprep.mubr.msk.f32.mxu1 %vm282_vm1, %v21242_v15  ;;  %v8775_v48 = vsel %vm282_vm1, %v8730_v52, 0.0  ;;  %v8598_v29 = vadd.f32 %v20987_v38, %v8561_v31  ;;  %v8504_v26 = vadd.f32 %v17186_v9, %v8472_v40  ;;  %v21277_v0 = vld [vmem:[%s17837_s10 + $0x24a] sm:$0xff]  ;;  %v8473_v12 = vld [vmem:[#allocation2 + $0xc0] sm:$0xff] }
 0x32c   : > { %v8776_v60 = vadd.f32 %v8775_v48, %v8774_v23  ;;  %v8677_v8 = vadd.f32 %v8676_v20, %v8675_v32  ;;  %v8564_v16 = vld [vmem:[#allocation2 + $0x98] sm:$0xff]  ;;  %v8503_v13 = vadd.f32 %v8471_v56, %v8400_v50  ;;  %v8733_v18 = vmul.f32 %v8599_v4, %v8599_v4  ;;  %v17189_v46 = vpop.f32.mrf.mxu1  ;;  %v15202_v31 = vld [vmem:[%s17837_s10 + $0x2e8] sm:$0xff]  ;;  %v15203_v48 = vld [vmem:[%s17837_s10 + $0x300] sm:$0xff] }
 0x32d   : > { %v21279_v51 = vpop.f32.mrf.mxu0  ;;  %17535 = vmatmul.mubr.msk.f32.gmra.mxu0 %vm282_vm1, %v15198_v61  ;;  %14856 = vst.msk [vmem:[%s19533_s14 + $0x180] sm:$0xff] %vm282_vm1, %v8598_v29  ;;  %v8678_v2 = vsel %vm282_vm1, %v8598_v29, 0.0  ;;  %v8732_v1 = vmul.f32 %v8598_v29, %v8598_v29  ;;  %8536 = vst.msk [vmem:[#allocation2 + $0xb8] sm:$0xff] %vm282_vm1, %v8504_v26  ;;  %v8601_v57 = vadd.f32 %v20987_v38, %v8564_v16  ;;  %v8476_v40 = vld [vmem:[#allocation2 + $0xd8] sm:$0xff] }
 0x32e   : > { %17537 = vmatprep.mubr.msk.f32.mxu0 %vm282_vm1, %v15199_v47  ;;  %9202 = vst.msk [vmem:[#allocation2 + $0x98] sm:$0xff] %vm282_vm1, %v21209_v45  ;;  %17488 = vmatmul.mubr.msk.f32.gmra.mxu1 %vm282_vm1, %v21270_v14  ;;  %v8679_v37 = vadd.f32 %v8678_v2, %v8677_v8  ;;  %v8778_v59 = vadd.f32 %v8777_v33, %v8776_v60  ;;  %8535 = vst.msk [vmem:[#allocation2 + $0xb0] sm:$0xff] %vm282_vm1, %v8503_v13  ;;  %v8563_v27 = vld [vmem:[#allocation2 + $0x90] sm:$0xff]  ;;  %v8680_v45 = vsel %vm282_vm1, %v8599_v4, 0.0  ;;  %v8410_v43 = vpop.f32.mrf.mxu1  ;;  %v8566_v52 = vld [vmem:[#allocation2 + $0xa8] sm:$0xff] }
 0x32f   : > { %v21294_v62 = vpop.f32.mrf.mxu0  ;;  %v8506_v25 = vadd.f32 %v17189_v46, %v8474_v6  ;;  %17490 = vmatprep.mubr.msk.f32.mxu1 %vm282_vm1, %v21277_v0  ;;  %v8779_v39 = vsel %vm282_vm1, %v8732_v1, 0.0  ;;  %14859 = vst.msk [vmem:[%s19533_s14 + $0x198] sm:$0xff] %vm282_vm1, %v8601_v57  ;;  %v8600_v58 = vadd.f32 %v20987_v38, %v8563_v27  ;;  %9201 = vst.msk [vmem:[#allocation2 + $0x90] sm:$0xff] %vm282_vm1, %v21225_v3  ;;  %v8781_v3 = vsel %vm282_vm1, %v8733_v18, 0.0  ;;  %v21335_v33 = vld [vmem:[%s17837_s10 + $0x272] sm:$0xff] }
 0x330   : > { %v8780_v4 = vadd.f32 %v8779_v39, %v8778_v59  ;;  %v8735_v41 = vmul.f32 %v8601_v57, %v8601_v57  ;;  %v8681_v55 = vadd.f32 %v8680_v45, %v8679_v37  ;;  %v8505_v36 = vadd.f32 %v8473_v12, %v8410_v43  ;;  %9204 = vst.msk [vmem:[#allocation2 + $0xa8] sm:$0xff] %vm282_vm1, %v21244_v10  ;;  %v17192_v23 = vpop.f32.mrf.mxu1  ;;  %v8475_v13 = vld [vmem:[#allocation2 + $0xd0] sm:$0xff]  ;;  %v8478_v39 = vld [vmem:[#allocation2 + $0xe8] sm:$0xff]  ;;  %v15205_v43 = vld [vmem:[%s17837_s10 + $0x320] sm:$0xff] }
 0x331   : > { %v21313_v61 = vpop.f32.mrf.mxu0  ;;  %17538 = vmatmul.mubr.msk.f32.gmra.mxu0 %vm282_vm1, %v15200_v19  ;;  %8538 = vst.msk [vmem:[#allocation2 + $0xc8] sm:$0xff] %vm282_vm1, %v8506_v25  ;;  %14858 = vst.msk [vmem:[%s19533_s14 + $0x190] sm:$0xff] %vm282_vm1, %v8600_v58  ;;  %v8682_v9 = vsel %vm282_vm1, %v8600_v58, 0.0  ;;  %v8734_v47 = vmul.f32 %v8600_v58, %v8600_v58  ;;  %v8603_v32 = vadd.f32 %v20987_v38, %v8566_v52  ;;  %v8565_v50 = vld [vmem:[#allocation2 + $0xa0] sm:$0xff]  ;;  %v8684_v10 = vsel %vm282_vm1, %v8601_v57, 0.0  ;;  %v21345_v19 = vld [vmem:[%s17837_s10 + $0x28a] sm:$0xff] }
 0x332   : > { %17540 = vmatprep.mubr.msk.f32.mxu0 %vm282_vm1, %v15201_v63  ;;  %17491 = vmatmul.mubr.msk.f32.gmra.mxu1 %vm282_vm1, %v21301_v24  ;;  %v8683_v29 = vadd.f32 %v8682_v9, %v8681_v55  ;;  %v8782_v26 = vadd.f32 %v8781_v3, %v8780_v4  ;;  %8537 = vst.msk [vmem:[#allocation2 + $0xc0] sm:$0xff] %vm282_vm1, %v8505_v36  ;;  %9203 = vst.msk [vmem:[#allocation2 + $0xa0] sm:$0xff] %vm282_vm1, %v21260_v7  ;;  %v8420_v16 = vpop.f32.mrf.mxu1  ;;  %v8785_v2 = vsel %vm282_vm1, %v8735_v41, 0.0  ;;  %v15204_v7 = vld [vmem:[%s17837_s10 + $0x308] sm:$0xff]  ;;  %v21372_v55 = vld [vmem:[%s17837_s10 + $0x292] sm:$0xff] }
 0x333   : > { %v21328_v20 = vpop.f32.mrf.mxu0  ;;  %v8508_v56 = vadd.f32 %v17192_v23, %v8476_v40  ;;  %17493 = vmatprep.mubr.msk.f32.mxu1 %vm282_vm1, %v21311_v22  ;;  %v8783_v60 = vsel %vm282_vm1, %v8734_v47, 0.0  ;;  %14861 = vst.msk [vmem:[%s19533_s14 + $0x1a8] sm:$0xff] %vm282_vm1, %v8603_v32  ;;  %v8602_v8 = vadd.f32 %v20987_v38, %v8565_v50  ;;  %v8507_v6 = vadd.f32 %v8475_v13, %v8420_v16  ;;  %v15240_v9 = vld [vmem:[%s17837_s10 + $0x145] sm:$0xff] }
 0x334   : > { %v8784_v1 = vadd.f32 %v8783_v60, %v8782_v26  ;;  %v8685_v57 = vadd.f32 %v8684_v10, %v8683_v29  ;;  %v8568_v46 = vld [vmem:[#allocation2 + $0xb8] sm:$0xff]  ;;  %v8737_v63 = vmul.f32 %v8603_v32, %v8603_v32  ;;  %v17195_v45 = vpop.f32.mrf.mxu1  ;;  %v8688_v52 = vsel %vm282_vm1, %v8603_v32, 0.0  ;;  %v15206_v29 = vld [vmem:[%s17837_s10 + $0x328] sm:$0xff] }
 0x335   : > { %v21347_v18 = vpop.f32.mrf.mxu0  ;;  %17541 = vmatmul.mubr.msk.f32.gmra.mxu0 %vm282_vm1, %v15202_v31  ;;  %8540 = vst.msk [vmem:[#allocation2 + $0xd8] sm:$0xff] %vm282_vm1, %v8508_v56  ;;  %14860 = vst.msk [vmem:[%s19533_s14 + $0x1a0] sm:$0xff] %vm282_vm1, %v8602_v8  ;;  %v8686_v37 = vsel %vm282_vm1, %v8602_v8, 0.0  ;;  %v8736_v59 = vmul.f32 %v8602_v8, %v8602_v8  ;;  %v8605_v27 = vadd.f32 %v20987_v38, %v8568_v46  ;;  %v8567_v25 = vld [vmem:[#allocation2 + $0xb0] sm:$0xff]  ;;  %v8480_v46 = vld [vmem:[#allocation2 + $0xf8] sm:$0xff] }
 0x336   : > { %17543 = vmatprep.mubr.msk.f32.mxu0 %vm282_vm1, %v15203_v48  ;;  %9206 = vst.msk [vmem:[#allocation2 + $0xb8] sm:$0xff] %vm282_vm1, %v21279_v51  ;;  %17494 = vmatmul.mubr.msk.f32.gmra.mxu1 %vm282_vm1, %v21335_v33  ;;  %v8687_v12 = vadd.f32 %v8686_v37, %v8685_v57  ;;  %v8786_v4 = vadd.f32 %v8785_v2, %v8784_v1  ;;  %8539 = vst.msk [vmem:[#allocation2 + $0xd0] sm:$0xff] %vm282_vm1, %v8507_v6  ;;  %v8430_v3 = vpop.f32.mrf.mxu1  ;;  %v8477_v48 = vld [vmem:[#allocation2 + $0xe0] sm:$0xff]  ;;  %v8789_v26 = vsel %vm282_vm1, %v8737_v63, 0.0  ;;  %v15241_v6 = vld [vmem:[%s17837_s10 + $0x14d] sm:$0xff] }
 0x337   : > { %v21362_v58 = vpop.f32.mrf.mxu0  ;;  %v8604_v41 = vadd.f32 %v20987_v38, %v8567_v25  ;;  %9205 = vst.msk [vmem:[#allocation2 + $0xb0] sm:$0xff] %vm282_vm1, %v21294_v62  ;;  %v8510_v51 = vadd.f32 %v17195_v45, %v8478_v39  ;;  %17496 = vmatprep.mubr.msk.f32.mxu1 %vm282_vm1, %v21345_v19  ;;  %v8787_v36 = vsel %vm282_vm1, %v8736_v59, 0.0  ;;  %14863 = vst.msk [vmem:[%s19533_s14 + $0x1b8] sm:$0xff] %vm282_vm1, %v8605_v27  ;;  %v15242_v25 = vld [vmem:[%s17837_s10 + $0x165] sm:$0xff] }
 0x338   : > { %v8570_v31 = vld [vmem:[#allocation2 + $0xc8] sm:$0xff]  ;;  %v8788_v62 = vadd.f32 %v8787_v36, %v8786_v4  ;;  %v8689_v23 = vadd.f32 %v8688_v52, %v8687_v12  ;;  %v8739_v50 = vmul.f32 %v8605_v27, %v8605_v27  ;;  %v8509_v10 = vadd.f32 %v8477_v48, %v8430_v3  ;;  %v17198_v8 = vpop.f32.mrf.mxu1  ;;  %v8479_v12 = vld [vmem:[#allocation2 + $0xf0] sm:$0xff] }
 0x339   : > { %v21379_v47 = vpop.f32.mrf.mxu0  ;;  %17544 = vmatmul.mubr.msk.f32.gmra.mxu0 %vm282_vm1, %v15204_v7  ;;  %14862 = vst.msk [vmem:[%s19533_s14 + $0x1b0] sm:$0xff] %vm282_vm1, %v8604_v41  ;;  %v8690_v40 = vsel %vm282_vm1, %v8604_v41, 0.0  ;;  %v8738_v32 = vmul.f32 %v8604_v41, %v8604_v41  ;;  %8542 = vst.msk [vmem:[#allocation2 + $0xe8] sm:$0xff] %vm282_vm1, %v8510_v51  ;;  %v8607_v56 = vadd.f32 %v20987_v38, %v8570_v31  ;;  %v8569_v60 = vld [vmem:[#allocation2 + $0xc0] sm:$0xff]  ;;  %v8692_v7 = vsel %vm282_vm1, %v8605_v27, 0.0  ;;  %v15306_v4 = vld [vmem:[%s17837_s10 + $0x152] sm:$0xff] }
 0x33a   : > { %9208 = vst.msk [vmem:[#allocation2 + $0xc8] sm:$0xff] %vm282_vm1, %v21313_v61  ;;  %17546 = vmatprep.mubr.msk.f32.mxu0 %vm282_vm1, %v15205_v43  ;;  %17497 = vmatmul.mubr.msk.f32.gmra.mxu1 %vm282_vm1, %v21372_v55  ;;  %v15305_v61 = vld [vmem:[%s17837_s10 + $0x14a] sm:$0xff]  ;;  %v8691_v13 = vadd.f32 %v8690_v40, %v8689_v23  ;;  %v8790_v2 = vadd.f32 %v8789_v26, %v8788_v62  ;;  %9207 = vst.msk [vmem:[#allocation2 + $0xc0] sm:$0xff] %vm282_vm1, %v21328_v20  ;;  %v8440_v59 = vpop.f32.mrf.mxu1  ;;  %v8793_v41 = vsel %vm282_vm1, %v8739_v50, 0.0 }
 0x33b   : > { %v21394_v16 = vpop.f32.mrf.mxu0  ;;  %v8791_v1 = vsel %vm282_vm1, %v8738_v32, 0.0  ;;  %v8606_v57 = vadd.f32 %v20987_v38, %v8569_v60  ;;  %17551 = vmatprep.mubr.msk.f32.mxu1 %vm282_vm1, %v15240_v9  ;;  %14865 = vst.msk [vmem:[%s19533_s14 + $0x1c8] sm:$0xff] %vm282_vm1, %v8607_v56  ;;  %8541 = vst.msk [vmem:[#allocation2 + $0xe0] sm:$0xff] %vm282_vm1, %v8509_v10  ;;  %v8512_v63 = vadd.f32 %v17198_v8, %v8480_v46  ;;  %v9572_v32 = vld [vmem:[#allocation2 + $0x8] sm:$0xff] }
 0x33c   : > { %v8572_v37 = vld [vmem:[#allocation2 + $0xd8] sm:$0xff]  ;;  %v8792_v20 = vadd.f32 %v8791_v1, %v8790_v2  ;;  %v8693_v39 = vadd.f32 %v8692_v7, %v8691_v13  ;;  %v8741_v51 = vmul.f32 %v8607_v56, %v8607_v56  ;;  %v8511_v36 = vadd.f32 %v8479_v12, %v8440_v59  ;;  %v17253_v3 = vpop.f32.mrf.mxu1  ;;  %v15243_v48 = vld [vmem:[%s17837_s10 + $0x16d] sm:$0xff]  ;;  %v15244_v60 = vld [vmem:[%s17837_s10 + $0x185] sm:$0xff] }
 0x33d   : > { %v21408_v45 = vpop.f32.mrf.mxu0  ;;  %17547 = vmatmul.mubr.msk.f32.gmra.mxu0 %vm282_vm1, %v15206_v29  ;;  %14864 = vst.msk [vmem:[%s19533_s14 + $0x1c0] sm:$0xff] %vm282_vm1, %v8606_v57  ;;  %v8694_v43 = vsel %vm282_vm1, %v8606_v57, 0.0  ;;  %v8740_v27 = vmul.f32 %v8606_v57, %v8606_v57  ;;  %9210 = vst.msk [vmem:[#allocation2 + $0xd8] sm:$0xff] %vm282_vm1, %v21347_v18  ;;  %v8609_v52 = vadd.f32 %v20987_v38, %v8572_v37  ;;  %v8571_v31 = vld [vmem:[#allocation2 + $0xd0] sm:$0xff]  ;;  %v8696_v29 = vsel %vm282_vm1, %v8607_v56, 0.0  ;;  %v9571_v56 = vld [vmem:[#allocation2] sm:$0xff] }
 0x33e   : > { %17601 = vmatprep.mubr.msk.f32.mxu0 %vm282_vm1, %v15305_v61  ;;  %8544 = vst.msk [vmem:[#allocation2 + $0xf8] sm:$0xff] %vm282_vm1, %v8512_v63  ;;  %17552 = vmatmul.mubr.msk.f32.vlgmr.msra.gmra.mxu1 %vm282_vm1, %v15241_v6  ;;  %v8695_v9 = vadd.f32 %v8694_v43, %v8693_v39  ;;  %v8794_v62 = vadd.f32 %v8793_v41, %v8792_v20  ;;  %9209 = vst.msk [vmem:[#allocation2 + $0xd0] sm:$0xff] %vm282_vm1, %v21362_v58  ;;  %v9412_v10 = vpop.f32.mrf.mxu1  ;;  %v8797_v1 = vsel %vm282_vm1, %v8741_v51, 0.0  ;;  %v9574_v63 = vld [vmem:[#allocation2 + $0x18] sm:$0xff]  ;;  %v15245_v39 = vld [vmem:[%s17837_s10 + $0x18d] sm:$0xff] }
 0x33f   : > { %v21422_v18 = vpop.f32.mrf.mxu0  ;;  %v8795_v23 = vsel %vm282_vm1, %v8740_v27, 0.0  ;;  %v8608_v40 = vadd.f32 %v20987_v38, %v8571_v31  ;;  %17554 = vmatprep.mubr.msk.f32.mxu1 %vm282_vm1, %v15242_v25  ;;  %14867 = vst.msk [vmem:[%s19533_s14 + $0x1d8] sm:$0xff] %vm282_vm1, %v8609_v52  ;;  %8543 = vst.msk [vmem:[#allocation2 + $0xf0] sm:$0xff] %vm282_vm1, %v8511_v36  ;;  %v9604_v50 = vadd.f32 %v17253_v3, %v9572_v32  ;;  %v17705_v43 = vld [vmem:[%s22302_s2 + $0x1] ss:$0 sm:$0xff]  ;;  %v15246_v41 = vld [vmem:[%s17837_s10 + $0x1a5] sm:$0xff] }
 0x340   : > { %v8574_v26 = vld [vmem:[#allocation2 + $0xe8] sm:$0xff]  ;;  %v8796_v61 = vadd.f32 %v8795_v23, %v8794_v62  ;;  %v8697_v58 = vadd.f32 %v8696_v29, %v8695_v9  ;;  %v8743_v57 = vmul.f32 %v8609_v52, %v8609_v52  ;;  %v9603_v6 = vadd.f32 %v9571_v56, %v9412_v10  ;;  %v17256_v7 = vpop.f32.mrf.mxu1 }
 0x341   : > { %v21435_v8 = vpop.f32.mrf.mxu0  ;;  %17602 = vmatmul.mubr.msk.f32.vlgmr.msra.gmra.mxu0 %vm282_vm1, %v15306_v4  ;;  %14866 = vst.msk [vmem:[%s19533_s14 + $0x1d0] sm:$0xff] %vm282_vm1, %v8608_v40  ;;  %v8698_v13 = vsel %vm282_vm1, %v8608_v40, 0.0  ;;  %v8742_v2 = vmul.f32 %v8608_v40, %v8608_v40  ;;  %9212 = vst.msk [vmem:[#allocation2 + $0xe8] sm:$0xff] %vm282_vm1, %v21379_v47  ;;  %v8611_v46 = vadd.f32 %v20987_v38, %v8574_v26  ;;  %v8700_v38 = vsel %vm282_vm1, %v8609_v52, 0.0  ;;  %v9573_v4 = vld [vmem:[#allocation2 + $0x10] sm:$0xff]  ;;  %v9576_v32 = vld [vmem:[#allocation2 + $0x28] sm:$0xff] }
 0x342   : > { %17604 = vmatprep.mubr.msk.f32.mxu0 %vm282_vm1, %v21040_v21  ;;  %9636 = vst.msk [vmem:[#allocation2 + $0x8] sm:$0xff] %vm282_vm1, %v9604_v50  ;;  %17555 = vmatmul.mubr.msk.f32.gmra.mxu1 %vm282_vm1, %v15243_v48  ;;  %v8699_v47 = vadd.f32 %v8698_v13, %v8697_v58  ;;  %v8798_v59 = vadd.f32 %v8797_v1, %v8796_v61  ;;  %v8573_v25 = vld [vmem:[#allocation2 + $0xe0] sm:$0xff]  ;;  %9635 = vst.msk [vmem:[#allocation2] sm:$0xff] %vm282_vm1, %v9603_v6  ;;  %v9422_v12 = vpop.f32.mrf.mxu1  ;;  %v15247_v10 = vld [vmem:[%s17837_s10 + $0x1ad] sm:$0xff] }
 0x343   : > { %v21449_v37 = vpop.f32.mrf.mxu0  ;;  %v8799_v21 = vsel %vm282_vm1, %v8742_v2, 0.0  ;;  %v9606_v20 = vadd.f32 %v17256_v7, %v9574_v63  ;;  %17557 = vmatprep.mubr.msk.f32.mxu1 %vm282_vm1, %v15244_v60  ;;  %14869 = vst.msk [vmem:[%s19533_s14 + $0x1e8] sm:$0xff] %vm282_vm1, %v8611_v46  ;;  %v8610_v27 = vadd.f32 %v17705_v43, %v8573_v25  ;;  %9211 = vst.msk [vmem:[#allocation2 + $0xe0] sm:$0xff] %vm282_vm1, %v21394_v16  ;;  %v8801_v16 = vsel %vm282_vm1, %v8743_v57, 0.0  ;;  %v9575_v13 = vld [vmem:[#allocation2 + $0x20] sm:$0xff] }
 0x344   : > { %v8800_v52 = vadd.f32 %v8799_v21, %v8798_v59  ;;  %v8745_v36 = vmul.f32 %v8611_v46, %v8611_v46  ;;  %v8701_v31 = vadd.f32 %v8700_v38, %v8699_v47  ;;  %v9605_v9 = vadd.f32 %v9573_v4, %v9422_v12  ;;  %v17259_v40 = vpop.f32.mrf.mxu1  ;;  %v15248_v2 = vld [vmem:[%s17837_s10 + $0x1c5] sm:$0xff]  ;;  %v9578_v21 = vld [vmem:[#allocation2 + $0x38] sm:$0xff] }
 0x345   : > { %v21464_v51 = vpop.f32.mrf.mxu0  ;;  %17605 = vmatmul.mubr.msk.f32.gmra.mxu0 %vm282_vm1, %v21067_v34  ;;  %v8576_v3 = vld [vmem:[#allocation2 + $0xf8] sm:$0xff]  ;;  %9638 = vst.msk [vmem:[#allocation2 + $0x18] sm:$0xff] %vm282_vm1, %v9606_v20  ;;  %14868 = vst.msk [vmem:[%s19533_s14 + $0x1e0] sm:$0xff] %vm282_vm1, %v8610_v27  ;;  %v8702_v62 = vsel %vm282_vm1, %v8610_v27, 0.0  ;;  %v8744_v23 = vmul.f32 %v8610_v27, %v8610_v27  ;;  %v9608_v50 = vadd.f32 %v17259_v40, %v9576_v32  ;;  %v8704_v60 = vsel %vm282_vm1, %v8611_v46, 0.0  ;;  %v9580_v40 = vld [vmem:[#allocation2 + $0x48] sm:$0xff] }
 0x346   : > { %17607 = vmatprep.mubr.msk.f32.mxu0 %vm282_vm1, %v21072_v54  ;;  %v8613_v34 = vadd.f32 %v17705_v43, %v8576_v3  ;;  %9214 = vst.msk [vmem:[#allocation2 + $0xf8] sm:$0xff] %vm282_vm1, %v21408_v45  ;;  %17558 = vmatmul.mubr.msk.f32.gmra.mxu1 %vm282_vm1, %v15245_v39  ;;  %v8703_v54 = vadd.f32 %v8702_v62, %v8701_v31  ;;  %v8575_v26 = vld [vmem:[#allocation2 + $0xf0] sm:$0xff]  ;;  %9637 = vst.msk [vmem:[#allocation2 + $0x10] sm:$0xff] %vm282_vm1, %v9605_v9  ;;  %v9432_v58 = vpop.f32.mrf.mxu1  ;;  %v8805_v1 = vsel %vm282_vm1, %v8745_v36, 0.0  ;;  %v15250_v36 = vld [vmem:[%s17837_s10 + $0x1e5] sm:$0xff] }
 0x347   : > { %v21478_v48 = vpop.f32.mrf.mxu0  ;;  %v8802_v29 = vadd.f32 %v8801_v16, %v8800_v52  ;;  %17560 = vmatprep.mubr.msk.f32.mxu1 %vm282_vm1, %v15246_v41  ;;  %v8803_v45 = vsel %vm282_vm1, %v8744_v23, 0.0  ;;  %v8612_v61 = vadd.f32 %v17705_v43, %v8575_v26  ;;  %9213 = vst.msk [vmem:[#allocation2 + $0xf0] sm:$0xff] %vm282_vm1, %v21422_v18  ;;  %9640 = vst.msk [vmem:[#allocation2 + $0x28] sm:$0xff] %vm282_vm1, %v9608_v50  ;;  %v15249_v43 = vld [vmem:[%s17837_s10 + $0x1cd] sm:$0xff] }
 0x348   : > { %14871 = vst.msk [vmem:[%s19533_s14 + $0x1f8] sm:$0xff] %vm282_vm1, %v8613_v34  ;;  %v8705_v46 = vadd.f32 %v8704_v60, %v8703_v54  ;;  %v9607_v7 = vadd.f32 %v9575_v13, %v9432_v58  ;;  %v8747_v18 = vmul.f32 %v8613_v34, %v8613_v34  ;;  %v17262_v59 = vpop.f32.mrf.mxu1  ;;  %v8708_v27 = vsel %vm282_vm1, %v8613_v34, 0.0  ;;  %v9577_v52 = vld [vmem:[#allocation2 + $0x30] sm:$0xff]  ;;  %v15252_v60 = vld [vmem:[%s17837_s10 + $0x205] sm:$0xff] }
 0x349   : > { %v21490_v56 = vpop.f32.mrf.mxu0  ;;  %17608 = vmatmul.mubr.msk.f32.gmra.mxu0 %vm282_vm1, %v21098_v11  ;;  %v8804_v57 = vadd.f32 %v8803_v45, %v8802_v29  ;;  %v10024_v6 = vld [vmem:[#allocation2 + $0x8] sm:$0xff]  ;;  %14870 = vst.msk [vmem:[%s19533_s14 + $0x1f0] sm:$0xff] %vm282_vm1, %v8612_v61  ;;  %v8706_v63 = vsel %vm282_vm1, %v8612_v61, 0.0  ;;  %v8746_v47 = vmul.f32 %v8612_v61, %v8612_v61  ;;  %v9610_v38 = vadd.f32 %v17262_v59, %v9578_v21 }
 0x34a   : > { %17610 = vmatprep.mubr.msk.f32.mxu0 %vm282_vm1, %v21105_v28  ;;  %v10056_v11 = vadd.f32 %v21435_v8, %v10024_v6  ;;  %17561 = vmatmul.mubr.msk.f32.gmra.mxu1 %vm282_vm1, %v15247_v10  ;;  %v8707_v20 = vadd.f32 %v8706_v63, %v8705_v46  ;;  %9639 = vst.msk [vmem:[#allocation2 + $0x20] sm:$0xff] %vm282_vm1, %v9607_v7  ;;  %v10023_v28 = vld [vmem:[#allocation2] sm:$0xff]  ;;  %v9442_v41 = vpop.f32.mrf.mxu1  ;;  %v15251_v29 = vld [vmem:[%s17837_s10 + $0x1ed] sm:$0xff] }
 0x34b   : > { %v9884_v25 = vpop.f32.mrf.mxu0  ;;  %v8806_v39 = vadd.f32 %v8805_v1, %v8804_v57  ;;  %17563 = vmatprep.mubr.msk.f32.mxu1 %vm282_vm1, %v15248_v2  ;;  %v8807_v12 = vsel %vm282_vm1, %v8746_v47, 0.0  ;;  %v10055_v8 = vadd.f32 %v10023_v28, %v21449_v37  ;;  %9642 = vst.msk [vmem:[#allocation2 + $0x38] sm:$0xff] %vm282_vm1, %v9610_v38  ;;  %v9609_v62 = vadd.f32 %v9577_v52, %v9442_v41  ;;  %v9579_v10 = vld [vmem:[#allocation2 + $0x40] sm:$0xff]  ;;  %v9582_v57 = vld [vmem:[#allocation2 + $0x58] sm:$0xff]  ;;  %v9581_v47 = vld [vmem:[#allocation2 + $0x50] sm:$0xff] }
 0x34c   : > { %10088 = vst.msk [vmem:[#allocation2 + $0x8] sm:$0xff] %vm282_vm1, %v10056_v11  ;;  %v10026_v4 = vld [vmem:[#allocation2 + $0x18] sm:$0xff]  ;;  %v8709_v3 = vadd.f32 %v8708_v27, %v8707_v20  ;;  %v8809_v37 = vsel %vm282_vm1, %v8747_v18, 0.0  ;;  %v17265_v34 = vpop.f32.mrf.mxu1  ;;  %v15254_v11 = vld [vmem:[%s17837_s10 + $0x225] sm:$0xff]  ;;  %v15255_v41 = vld [vmem:[%s17837_s10 + $0x22d] sm:$0xff] }
 0x34d   : > { %v17312_v31 = vpop.f32.mrf.mxu0  ;;  %17611 = vmatmul.mubr.msk.f32.gmra.mxu0 %vm282_vm1, %v21129_v53  ;;  %v8808_v9 = vadd.f32 %v8807_v12, %v8806_v39  ;;  %v10058_v16 = vadd.f32 %v21464_v51, %v10026_v4  ;;  %10087 = vst.msk [vmem:[#allocation2] sm:$0xff] %vm282_vm1, %v10055_v8  ;;  %v10025_v23 = vld [vmem:[#allocation2 + $0x10] sm:$0xff]  ;;  %9641 = vst.msk [vmem:[#allocation2 + $0x30] sm:$0xff] %vm282_vm1, %v9609_v62 }
 0x34e   : > { %17613 = vmatprep.mubr.msk.f32.mxu0 %vm282_vm1, %v21139_v5  ;;  %17564 = vmatmul.mubr.msk.f32.gmra.mxu1 %vm282_vm1, %v15249_v43  ;;  %v8710_v32 = vrot.slane %v8709_v3, 4  ;;  %v10057_v51 = vadd.f32 %v10025_v23, %v21478_v48  ;;  %v9612_v5 = vadd.f32 %v17265_v34, %v9580_v40  ;;  %v10028_v26 = vld [vmem:[#allocation2 + $0x28] sm:$0xff]  ;;  %v9452_v50 = vpop.f32.mrf.mxu1  ;;  %v9586_v40 = vld [vmem:[#allocation2 + $0x78] sm:$0xff] }
 0x34f   : > { %v9894_v53 = vpop.f32.mrf.mxu0  ;;  %v8810_v54 = vadd.f32 %v8809_v37, %v8808_v9  ;;  %10090 = vst.msk [vmem:[#allocation2 + $0x18] sm:$0xff] %vm282_vm1, %v10058_v16  ;;  %17566 = vmatprep.mubr.msk.f32.mxu1 %vm282_vm1, %v15250_v36  ;;  %v10060_v48 = vadd.f32 %v21490_v56, %v10028_v26  ;;  %v9611_v13 = vadd.f32 %v9579_v10, %v9452_v50  ;;  %v15253_v56 = vld [vmem:[%s17837_s10 + $0x20d] sm:$0xff]  ;;  %v9583_v36 = vld [vmem:[#allocation2 + $0x60] sm:$0xff] }
 0x350   : > { %v8711_v61 = vadd.f32 %v8710_v32, %v8709_v3  ;;  %10089 = vst.msk [vmem:[#allocation2 + $0x10] sm:$0xff] %vm282_vm1, %v10057_v51  ;;  %9644 = vst.msk [vmem:[#allocation2 + $0x48] sm:$0xff] %vm282_vm1, %v9612_v5  ;;  %v17268_v1 = vpop.f32.mrf.mxu1  ;;  %v9584_v43 = vld [vmem:[#allocation2 + $0x68] sm:$0xff]  ;;  %v9585_v26 = vld [vmem:[#allocation2 + $0x70] sm:$0xff] }
 0x351   : > { %v17315_v45 = vpop.f32.mrf.mxu0  ;;  %17614 = vmatmul.mubr.msk.f32.gmra.mxu0 %vm282_vm1, %v21163_v42  ;;  %v8811_v58 = vrot.slane %v8810_v54, 4  ;;  %v10027_v2 = vld [vmem:[#allocation2 + $0x20] sm:$0xff]  ;;  %10092 = vst.msk [vmem:[#allocation2 + $0x28] sm:$0xff] %vm282_vm1, %v10060_v48  ;;  %9643 = vst.msk [vmem:[#allocation2 + $0x40] sm:$0xff] %vm282_vm1, %v9611_v13  ;;  %v9614_v18 = vadd.f32 %v17268_v1, %v9582_v57  ;;  %v9588_v48 = vld [vmem:[#allocation2 + $0x88] sm:$0xff] }
 0x352   : > { %17616 = vmatprep.mubr.msk.f32.mxu0 %vm282_vm1, %v21173_v30  ;;  %17567 = vmatmul.mubr.msk.f32.gmra.mxu1 %vm282_vm1, %v15251_v29  ;;  %v8712_v46 = vrot.slane %v8711_v61, 2  ;;  %v10059_v7 = vadd.f32 %v10027_v2, %v9884_v25  ;;  %v10030_v63 = vld [vmem:[#allocation2 + $0x38] sm:$0xff]  ;;  %v9462_v30 = vpop.f32.mrf.mxu1  ;;  %v15258_v50 = vld [vmem:[%s17837_s10 + $0x265] sm:$0xff]  ;;  %v15259_v1 = vld [vmem:[%s17837_s10 + $0x26d] sm:$0xff] }
 0x353   : > { %v9904_v42 = vpop.f32.mrf.mxu0  ;;  %v8812_v6 = vadd.f32 %v8811_v58, %v8810_v54  ;;  %17569 = vmatprep.mubr.msk.f32.mxu1 %vm282_vm1, %v15252_v60  ;;  %9646 = vst.msk [vmem:[#allocation2 + $0x58] sm:$0xff] %vm282_vm1, %v9614_v18  ;;  %v10062_v25 = vadd.f32 %v17312_v31, %v10030_v63  ;;  %v9613_v39 = vadd.f32 %v9581_v47, %v9462_v30  ;;  %v15256_v31 = vld [vmem:[%s17837_s10 + $0x245] sm:$0xff]  ;;  %v9590_v30 = vld [vmem:[#allocation2 + $0x98] sm:$0xff] }
 0x354   : > { %v8713_v21 = vadd.f32 %v8712_v46, %v8711_v61  ;;  %10091 = vst.msk [vmem:[#allocation2 + $0x20] sm:$0xff] %vm282_vm1, %v10059_v7  ;;  %v10029_v28 = vld [vmem:[#allocation2 + $0x30] sm:$0xff]  ;;  %v17271_v38 = vpop.f32.mrf.mxu1  ;;  %v9587_v46 = vld [vmem:[#allocation2 + $0x80] sm:$0xff] }
 0x355   : > { %v17318_v59 = vpop.f32.mrf.mxu0  ;;  %17617 = vmatmul.mubr.msk.f32.gmra.mxu0 %vm282_vm1, %v21201_v35  ;;  %v8813_v20 = vrot.slane %v8812_v6, 2  ;;  %10094 = vst.msk [vmem:[#allocation2 + $0x38] sm:$0xff] %vm282_vm1, %v10062_v25  ;;  %9645 = vst.msk [vmem:[#allocation2 + $0x50] sm:$0xff] %vm282_vm1, %v9613_v39  ;;  %v10061_v8 = vadd.f32 %v10029_v28, %v9894_v53  ;;  %v9616_v4 = vadd.f32 %v17271_v38, %v9584_v43  ;;  %v9589_v25 = vld [vmem:[#allocation2 + $0x90] sm:$0xff] }
 0x356   : > { %17619 = vmatprep.mubr.msk.f32.mxu0 %vm282_vm1, %v21207_v49  ;;  %17570 = vmatmul.mubr.msk.f32.gmra.mxu1 %vm282_vm1, %v15253_v56  ;;  %v8714_v35 = vrot.slane %v8713_v21, 1  ;;  %v9472_v52 = vpop.f32.mrf.mxu1 }
 0x357   : > { %v9914_v27 = vpop.f32.mrf.mxu0  ;;  %v8814_v12 = vadd.f32 %v8813_v20, %v8812_v6  ;;  %17572 = vmatprep.mubr.msk.f32.mxu1 %vm282_vm1, %v15254_v11  ;;  %v10032_v49 = vld [vmem:[#allocation2 + $0x48] sm:$0xff]  ;;  %10093 = vst.msk [vmem:[#allocation2 + $0x30] sm:$0xff] %vm282_vm1, %v10061_v8  ;;  %9648 = vst.msk [vmem:[#allocation2 + $0x68] sm:$0xff] %vm282_vm1, %v9616_v4  ;;  %v9615_v37 = vadd.f32 %v9583_v36, %v9472_v52  ;;  %v9591_v52 = vld [vmem:[#allocation2 + $0xa0] sm:$0xff] }
 0x358   : > { %v8715_v9 = vadd.f32 %v8714_v35, %v8713_v21  ;;  %v10064_v62 = vadd.f32 %v17315_v45, %v10032_v49  ;;  %v10031_v23 = vld [vmem:[#allocation2 + $0x40] sm:$0xff]  ;;  %v17274_v34 = vpop.f32.mrf.mxu1  ;;  %v9592_v35 = vld [vmem:[#allocation2 + $0xa8] sm:$0xff] }
 0x359   : > { %v17321_v3 = vpop.f32.mrf.mxu0  ;;  %17620 = vmatmul.mubr.msk.f32.gmra.mxu0 %vm282_vm1, %v21235_v44  ;;  %v8815_v16 = vrot.slane %v8814_v12, 1  ;;  %9647 = vst.msk [vmem:[#allocation2 + $0x60] sm:$0xff] %vm282_vm1, %v9615_v37  ;;  %v10063_v54 = vadd.f32 %v10031_v23, %v9904_v42  ;;  %v9618_v51 = vadd.f32 %v17274_v34, %v9586_v40  ;;  %v15260_v6 = vld [vmem:[%s17837_s10 + $0x285] sm:$0xff]  ;;  %v9594_v23 = vld [vmem:[#allocation2 + $0xb8] sm:$0xff] }
 0x35a   : > { %17622 = vmatprep.mubr.msk.f32.mxu0 %vm282_vm1, %v21242_v15  ;;  %17573 = vmatmul.mubr.msk.f32.gmra.mxu1 %vm282_vm1, %v15255_v41  ;;  %v13107_v32 = vsel %vm13106_vm3, %v20118_v17, %v8715_v9  ;;  %10096 = vst.msk [vmem:[#allocation2 + $0x48] sm:$0xff] %vm282_vm1, %v10064_v62  ;;  %v15257_v15 = vld [vmem:[%s17837_s10 + $0x24d] sm:$0xff]  ;;  %v10034_v5 = vld [vmem:[#allocation2 + $0x58] sm:$0xff]  ;;  %v9482_v29 = vpop.f32.mrf.mxu1  ;;  %v15264_v36 = vld [vmem:[%s17837_s10 + $0x2c5] sm:$0xff] }
 0x35b   : > { %v9924_v44 = vpop.f32.mrf.mxu0  ;;  %v8816_v53 = vadd.f32 %v8815_v16, %v8814_v12  ;;  %17575 = vmatprep.mubr.msk.f32.mxu1 %vm282_vm1, %v15256_v31  ;;  %10095 = vst.msk [vmem:[#allocation2 + $0x40] sm:$0xff] %vm282_vm1, %v10063_v54  ;;  %9650 = vst.msk [vmem:[#allocation2 + $0x78] sm:$0xff] %vm282_vm1, %v9618_v51  ;;  %v10066_v17 = vadd.f32 %v17318_v59, %v10034_v5  ;;  %v9617_v45 = vadd.f32 %v9585_v26, %v9482_v29  ;;  %v15261_v59 = vld [vmem:[%s17837_s10 + $0x28d] sm:$0xff] }
 0x35c   : > { %v10033_v61 = vld [vmem:[#allocation2 + $0x50] sm:$0xff]  ;;  %v17277_v58 = vpop.f32.mrf.mxu1 }
 0x35d   : > { %v17324_v10 = vpop.f32.mrf.mxu0  ;;  %17623 = vmatmul.mubr.msk.f32.gmra.mxu0 %vm282_vm1, %v21270_v14  ;;  %v21568_v60 = vsel %vm13108_vm4, %v13107_v32, %v8816_v53  ;;  %10098 = vst.msk [vmem:[#allocation2 + $0x58] sm:$0xff] %vm282_vm1, %v10066_v17  ;;  %9649 = vst.msk [vmem:[#allocation2 + $0x70] sm:$0xff] %vm282_vm1, %v9617_v45  ;;  %v10065_v13 = vadd.f32 %v10033_v61, %v9914_v27  ;;  %v9620_v2 = vadd.f32 %v17277_v58, %v9588_v48  ;;  %v15327_v8 = vld [vmem:[%s17837_s10 + $0x2aa] sm:$0xff]  ;;  %v15328_v16 = vld [vmem:[%s17837_s10 + $0x2b2] sm:$0xff] }
 0x35e   : > { %17625 = vmatprep.mubr.msk.f32.mxu0 %vm282_vm1, %v21277_v0  ;;  %17576 = vmatmul.mubr.msk.f32.gmra.mxu1 %vm282_vm1, %v15257_v15  ;;  %v10036_v57 = vld [vmem:[#allocation2 + $0x68] sm:$0xff]  ;;  %v9492_v42 = vpop.f32.mrf.mxu1  ;;  %v9593_v51 = vld [vmem:[#allocation2 + $0xb0] sm:$0xff] }
 0x35f   : > { %v9934_v14 = vpop.f32.mrf.mxu0  ;;  %17578 = vmatprep.mubr.msk.f32.mxu1 %vm282_vm1, %v15258_v50  ;;  %10097 = vst.msk [vmem:[#allocation2 + $0x50] sm:$0xff] %vm282_vm1, %v10065_v13  ;;  %9652 = vst.msk [vmem:[#allocation2 + $0x88] sm:$0xff] %vm282_vm1, %v9620_v2  ;;  %v10068_v7 = vadd.f32 %v17321_v3, %v10036_v57  ;;  %v9619_v18 = vadd.f32 %v9587_v46, %v9492_v42  ;;  %v15263_v41 = vld [vmem:[%s17837_s10 + $0x2ad] sm:$0xff]  ;;  %v15266_v15 = vld [vmem:[%s17837_s10 + $0x2e5] sm:$0xff] }
 0x360   : > { %v10035_v56 = vld [vmem:[#allocation2 + $0x60] sm:$0xff]  ;;  %v17280_v63 = vpop.f32.mrf.mxu1  ;;  %v15329_v40 = vld [vmem:[%s17837_s10 + $0x2ca] sm:$0xff]  ;;  %v15330_v50 = vld [vmem:[%s17837_s10 + $0x2d2] sm:$0xff] }
 0x361   : > { %v17327_v0 = vpop.f32.mrf.mxu0  ;;  %17626 = vmatmul.mubr.msk.f32.gmra.mxu0 %vm282_vm1, %v21301_v24  ;;  %10100 = vst.msk [vmem:[#allocation2 + $0x68] sm:$0xff] %vm282_vm1, %v10068_v7  ;;  %9651 = vst.msk [vmem:[#allocation2 + $0x80] sm:$0xff] %vm282_vm1, %v9619_v18  ;;  %v10067_v24 = vadd.f32 %v10035_v56, %v9924_v44  ;;  %v9622_v11 = vadd.f32 %v17280_v63, %v9590_v30  ;;  %v15265_v53 = vld [vmem:[%s17837_s10 + $0x2cd] sm:$0xff]  ;;  %v9595_v57 = vld [vmem:[#allocation2 + $0xc0] sm:$0xff] }
 0x362   : > { %17628 = vmatprep.mubr.msk.f32.mxu0 %vm282_vm1, %v21311_v22  ;;  %17579 = vmatmul.mubr.msk.f32.gmra.mxu1 %vm282_vm1, %v15259_v1  ;;  %v10038_v21 = vld [vmem:[#allocation2 + $0x78] sm:$0xff]  ;;  %v9502_v20 = vpop.f32.mrf.mxu1  ;;  %v15262_v22 = vld [vmem:[%s17837_s10 + $0x2a5] sm:$0xff]  ;;  %v15267_v13 = vld [vmem:[%s17837_s10 + $0x2ed] sm:$0xff] }
 0x363   : > { %v9944_v47 = vpop.f32.mrf.mxu0  ;;  %17581 = vmatprep.mubr.msk.f32.mxu1 %vm282_vm1, %v15260_v6  ;;  %10099 = vst.msk [vmem:[#allocation2 + $0x60] sm:$0xff] %vm282_vm1, %v10067_v24  ;;  %9654 = vst.msk [vmem:[#allocation2 + $0x98] sm:$0xff] %vm282_vm1, %v9622_v11  ;;  %v10070_v28 = vadd.f32 %v17324_v10, %v10038_v21  ;;  %v9621_v38 = vadd.f32 %v9589_v25, %v9502_v20  ;;  %v9596_v45 = vld [vmem:[#allocation2 + $0xc8] sm:$0xff]  ;;  %v15332_v7 = vld [vmem:[%s17837_s10 + $0x2f2] sm:$0xff] }
 0x364   : > { %v10037_v43 = vld [vmem:[#allocation2 + $0x70] sm:$0xff]  ;;  %v17283_v27 = vpop.f32.mrf.mxu1  ;;  %v15268_v42 = vld [vmem:[%s17837_s10 + $0x305] sm:$0xff]  ;;  %v9598_v63 = vld [vmem:[#allocation2 + $0xd8] sm:$0xff] }
 0x365   : > { %v17330_v39 = vpop.f32.mrf.mxu0  ;;  %17629 = vmatmul.mubr.msk.f32.gmra.mxu0 %vm282_vm1, %v21335_v33  ;;  %10102 = vst.msk [vmem:[#allocation2 + $0x78] sm:$0xff] %vm282_vm1, %v10070_v28  ;;  %9653 = vst.msk [vmem:[#allocation2 + $0x90] sm:$0xff] %vm282_vm1, %v9621_v38  ;;  %v10069_v33 = vadd.f32 %v10037_v43, %v9934_v14  ;;  %v9624_v4 = vadd.f32 %v17283_v27, %v9592_v35  ;;  %v15331_v58 = vld [vmem:[%s17837_s10 + $0x2ea] sm:$0xff]  ;;  %v15334_v43 = vld [vmem:[%s17837_s10 + $0x312] sm:$0xff] }
 0x366   : > { %17631 = vmatprep.mubr.msk.f32.mxu0 %vm282_vm1, %v21345_v19  ;;  %17582 = vmatmul.mubr.msk.f32.gmra.mxu1 %vm282_vm1, %v15261_v59  ;;  %v10040_v49 = vld [vmem:[#allocation2 + $0x88] sm:$0xff]  ;;  %v9512_v19 = vpop.f32.mrf.mxu1  ;;  %v9597_v25 = vld [vmem:[#allocation2 + $0xd0] sm:$0xff] }
 0x367   : > { %v9954_v12 = vpop.f32.mrf.mxu0  ;;  %17584 = vmatprep.mubr.msk.f32.mxu1 %vm282_vm1, %v15262_v22  ;;  %10101 = vst.msk [vmem:[#allocation2 + $0x70] sm:$0xff] %vm282_vm1, %v10069_v33  ;;  %9656 = vst.msk [vmem:[#allocation2 + $0xa8] sm:$0xff] %vm282_vm1, %v9624_v4  ;;  %v10072_v3 = vadd.f32 %v17327_v0, %v10040_v49  ;;  %v9623_v9 = vadd.f32 %v9591_v52, %v9512_v19  ;;  %v15269_v59 = vld [vmem:[%s17837_s10 + $0x30d] sm:$0xff]  ;;  %v15270_v22 = vld [vmem:[%s17837_s10 + $0x325] sm:$0xff] }
 0x368   : > { %v10039_v62 = vld [vmem:[#allocation2 + $0x80] sm:$0xff]  ;;  %v17286_v37 = vpop.f32.mrf.mxu1  ;;  %v15335_v33 = vld [vmem:[%s17837_s10 + $0x32a] sm:$0xff] }
 0x369   : > { %v17333_v31 = vpop.f32.mrf.mxu0  ;;  %17632 = vmatmul.mubr.msk.f32.gmra.mxu0 %vm282_vm1, %v21372_v55  ;;  %10104 = vst.msk [vmem:[#allocation2 + $0x88] sm:$0xff] %vm282_vm1, %v10072_v3  ;;  %9655 = vst.msk [vmem:[#allocation2 + $0xa0] sm:$0xff] %vm282_vm1, %v9623_v9  ;;  %v10071_v55 = vadd.f32 %v10039_v62, %v9944_v47  ;;  %v9626_v44 = vadd.f32 %v17286_v37, %v9594_v23  ;;  %v15333_v47 = vld [vmem:[%s17837_s10 + $0x30a] sm:$0xff]  ;;  %v9602_v23 = vld [vmem:[#allocation2 + $0xf8] sm:$0xff] }
 0x36a   : > { %17634 = vmatprep.mubr.msk.f32.mxu0 %vm282_vm1, %v15327_v8  ;;  %17585 = vmatmul.mubr.msk.f32.gmra.mxu1 %vm282_vm1, %v15263_v41  ;;  %v10042_v32 = vld [vmem:[#allocation2 + $0x98] sm:$0xff]  ;;  %v9522_v54 = vpop.f32.mrf.mxu1  ;;  %v15271_v49 = vld [vmem:[%s17837_s10 + $0x32d] sm:$0xff] }
 0x36b   : > { %v9964_v34 = vpop.f32.mrf.mxu0  ;;  %17587 = vmatprep.mubr.msk.f32.mxu1 %vm282_vm1, %v15264_v36  ;;  %10103 = vst.msk [vmem:[#allocation2 + $0x80] sm:$0xff] %vm282_vm1, %v10071_v55  ;;  %9658 = vst.msk [vmem:[#allocation2 + $0xb8] sm:$0xff] %vm282_vm1, %v9626_v44  ;;  %v10074_v29 = vadd.f32 %v17330_v39, %v10042_v32  ;;  %v9625_v26 = vadd.f32 %v9593_v51, %v9522_v54  ;;  %v9599_v36 = vld [vmem:[#allocation2 + $0xe0] sm:$0xff]  ;;  %v9601_v32 = vld [vmem:[#allocation2 + $0xf0] sm:$0xff] }
 0x36c   : > { %v10041_v10 = vld [vmem:[#allocation2 + $0x90] sm:$0xff]  ;;  %v17289_v17 = vpop.f32.mrf.mxu1 }
 0x36d   : > { %v17336_v5 = vpop.f32.mrf.mxu0  ;;  %17635 = vmatmul.mubr.msk.f32.gmra.mxu0 %vm282_vm1, %v15328_v16  ;;  %10106 = vst.msk [vmem:[#allocation2 + $0x98] sm:$0xff] %vm282_vm1, %v10074_v29  ;;  %9657 = vst.msk [vmem:[#allocation2 + $0xb0] sm:$0xff] %vm282_vm1, %v9625_v26  ;;  %v10073_v48 = vadd.f32 %v10041_v10, %v9954_v12  ;;  %v9628_v14 = vadd.f32 %v17289_v17, %v9596_v45  ;;  %v9600_v12 = vld [vmem:[#allocation2 + $0xe8] sm:$0xff]  ;;  %v15336_v16 = vld [vmem:[%s17837_s10 + $0x332] sm:$0xff] }
 0x36e   : > { %17637 = vmatprep.mubr.msk.f32.mxu0 %vm282_vm1, %v15329_v40  ;;  %17588 = vmatmul.mubr.msk.f32.gmra.mxu1 %vm282_vm1, %v15265_v53  ;;  %v10044_v2 = vld [vmem:[#allocation2 + $0xa8] sm:$0xff]  ;;  %v9532_v1 = vpop.f32.mrf.mxu1 }
 0x36f   : > { %v9974_v61 = vpop.f32.mrf.mxu0  ;;  %17590 = vmatprep.mubr.msk.f32.mxu1 %vm282_vm1, %v15266_v15  ;;  %10105 = vst.msk [vmem:[#allocation2 + $0x90] sm:$0xff] %vm282_vm1, %v10073_v48  ;;  %9660 = vst.msk [vmem:[#allocation2 + $0xc8] sm:$0xff] %vm282_vm1, %v9628_v14  ;;  %v10076_v6 = vadd.f32 %v17333_v31, %v10044_v2  ;;  %v9627_v0 = vadd.f32 %v9595_v57, %v9532_v1  ;;  %v10476_v26 = vld [vmem:[#allocation2 + $0x8] sm:$0xff]  ;;  %v10478_v57 = vld [vmem:[#allocation2 + $0x18] sm:$0xff] }
 0x370   : > { %v10043_v18 = vld [vmem:[#allocation2 + $0xa0] sm:$0xff]  ;;  %v17292_v56 = vpop.f32.mrf.mxu1 }
 0x371   : > { %v17339_v46 = vpop.f32.mrf.mxu0  ;;  %17638 = vmatmul.mubr.msk.f32.gmra.mxu0 %vm282_vm1, %v15330_v50  ;;  %10108 = vst.msk [vmem:[#allocation2 + $0xa8] sm:$0xff] %vm282_vm1, %v10076_v6  ;;  %9659 = vst.msk [vmem:[#allocation2 + $0xc0] sm:$0xff] %vm282_vm1, %v9627_v0  ;;  %v10075_v24 = vadd.f32 %v10043_v18, %v9964_v34  ;;  %v9630_v11 = vadd.f32 %v17292_v56, %v9598_v63  ;;  %v10477_v18 = vld [vmem:[#allocation2 + $0x10] sm:$0xff] }
 0x372   : > { %17640 = vmatprep.mubr.msk.f32.mxu0 %vm282_vm1, %v15331_v58  ;;  %17591 = vmatmul.mubr.msk.f32.gmra.mxu1 %vm282_vm1, %v15267_v13  ;;  %v10046_v21 = vld [vmem:[#allocation2 + $0xb8] sm:$0xff]  ;;  %v9542_v20 = vpop.f32.mrf.mxu1  ;;  %v10475_v58 = vld [vmem:[#allocation2] sm:$0xff] }
 0x373   : > { %v9984_v30 = vpop.f32.mrf.mxu0  ;;  %17593 = vmatprep.mubr.msk.f32.mxu1 %vm282_vm1, %v15268_v42  ;;  %10107 = vst.msk [vmem:[#allocation2 + $0xa0] sm:$0xff] %vm282_vm1, %v10075_v24  ;;  %9662 = vst.msk [vmem:[#allocation2 + $0xd8] sm:$0xff] %vm282_vm1, %v9630_v11  ;;  %v10078_v28 = vadd.f32 %v17336_v5, %v10046_v21  ;;  %v9629_v38 = vadd.f32 %v9597_v25, %v9542_v20  ;;  %v10480_v11 = vld [vmem:[#allocation2 + $0x28] sm:$0xff] }
 0x374   : > { %v10045_v27 = vld [vmem:[#allocation2 + $0xb0] sm:$0xff]  ;;  %v17295_v35 = vpop.f32.mrf.mxu1 }
 0x375   : > { %v17342_v39 = vpop.f32.mrf.mxu0  ;;  %17641 = vmatmul.mubr.msk.f32.gmra.mxu0 %vm282_vm1, %v15332_v7  ;;  %10110 = vst.msk [vmem:[#allocation2 + $0xb8] sm:$0xff] %vm282_vm1, %v10078_v28  ;;  %9661 = vst.msk [vmem:[#allocation2 + $0xd0] sm:$0xff] %vm282_vm1, %v9629_v38  ;;  %v10077_v4 = vadd.f32 %v10045_v27, %v9974_v61  ;;  %v9632_v41 = vadd.f32 %v17295_v35, %v9600_v12  ;;  %v10482_v12 = vld [vmem:[#allocation2 + $0x38] sm:$0xff] }
 0x376   : > { %17643 = vmatprep.mubr.msk.f32.mxu0 %vm282_vm1, %v15333_v47  ;;  %17594 = vmatmul.mubr.msk.f32.gmra.mxu1 %vm282_vm1, %v15269_v59  ;;  %v10048_v19 = vld [vmem:[#allocation2 + $0xc8] sm:$0xff]  ;;  %v9552_v52 = vpop.f32.mrf.mxu1 }
 0x377   : > { %v9994_v8 = vpop.f32.mrf.mxu0  ;;  %17596 = vmatprep.mubr.msk.f32.mxu1 %vm282_vm1, %v15270_v22  ;;  %10109 = vst.msk [vmem:[#allocation2 + $0xb0] sm:$0xff] %vm282_vm1, %v10077_v4  ;;  %9664 = vst.msk [vmem:[#allocation2 + $0xe8] sm:$0xff] %vm282_vm1, %v9632_v41  ;;  %v10080_v3 = vadd.f32 %v17339_v46, %v10048_v19  ;;  %v9631_v9 = vadd.f32 %v9599_v36, %v9552_v52  ;;  %v10481_v19 = vld [vmem:[#allocation2 + $0x30] sm:$0xff] }
 0x378   : > { %v10047_v62 = vld [vmem:[#allocation2 + $0xc0] sm:$0xff]  ;;  %v17298_v37 = vpop.f32.mrf.mxu1 }
 0x379   : > { %v17345_v31 = vpop.f32.mrf.mxu0  ;;  %17644 = vmatmul.mubr.msk.f32.gmra.mxu0 %vm282_vm1, %v15334_v43  ;;  %10112 = vst.msk [vmem:[#allocation2 + $0xc8] sm:$0xff] %vm282_vm1, %v10080_v3  ;;  %9663 = vst.msk [vmem:[#allocation2 + $0xe0] sm:$0xff] %vm282_vm1, %v9631_v9  ;;  %v10079_v40 = vadd.f32 %v10047_v62, %v9984_v30  ;;  %v9634_v55 = vadd.f32 %v17298_v37, %v9602_v23 }
 0x37a   : > { %17646 = vmatprep.mubr.msk.f32.mxu0 %vm282_vm1, %v15335_v33  ;;  %17597 = vmatmul.mubr.msk.f32.gmra.mxu1 %vm282_vm1, %v15271_v49  ;;  %v10050_v44 = vld [vmem:[#allocation2 + $0xd8] sm:$0xff]  ;;  %v9562_v53 = vpop.f32.mrf.mxu1 }
 0x37b   : > { %v10004_v34 = vpop.f32.mrf.mxu0  ;;  %10111 = vst.msk [vmem:[#allocation2 + $0xc0] sm:$0xff] %vm282_vm1, %v10079_v40  ;;  %9666 = vst.msk [vmem:[#allocation2 + $0xf8] sm:$0xff] %vm282_vm1, %v9634_v55  ;;  %v10082_v51 = vadd.f32 %v17342_v39, %v10050_v44  ;;  %v9633_v15 = vadd.f32 %v9601_v32, %v9562_v53  ;;  %v10479_v39 = vld [vmem:[#allocation2 + $0x20] sm:$0xff] }
 0x37c   : > { %v10049_v5 = vld [vmem:[#allocation2 + $0xd0] sm:$0xff]  ;;  %v17353_v29 = vpop.f32.mrf.mxu1  ;;  %v10483_v55 = vld [vmem:[#allocation2 + $0x40] sm:$0xff] }
 0x37d   : > { %v17348_v54 = vpop.f32.mrf.mxu0  ;;  %17647 = vmatmul.mubr.msk.f32.gmra.mxu0 %vm282_vm1, %v15336_v16  ;;  %10114 = vst.msk [vmem:[#allocation2 + $0xd8] sm:$0xff] %vm282_vm1, %v10082_v51  ;;  %9665 = vst.msk [vmem:[#allocation2 + $0xf0] sm:$0xff] %vm282_vm1, %v9633_v15  ;;  %v10081_v10 = vadd.f32 %v10049_v5, %v9994_v8  ;;  %v10508_v17 = vadd.f32 %v17353_v29, %v10476_v26  ;;  %v10484_v16 = vld [vmem:[#allocation2 + $0x48] sm:$0xff]  ;;  %v10486_v15 = vld [vmem:[#allocation2 + $0x58] sm:$0xff] }
 0x37e   : > { %v10052_v45 = vld [vmem:[#allocation2 + $0xe8] sm:$0xff]  ;;  %v10316_v61 = vpop.f32.mrf.mxu1 }
 0x37f   : > { %v10014_v50 = vpop.f32.mrf.mxu0  ;;  %10113 = vst.msk [vmem:[#allocation2 + $0xd0] sm:$0xff] %vm282_vm1, %v10081_v10  ;;  %v10084_v14 = vadd.f32 %v17345_v31, %v10052_v45  ;;  %10540 = vst.msk [vmem:[#allocation2 + $0x8] sm:$0xff] %vm282_vm1, %v10508_v17  ;;  %v10507_v13 = vadd.f32 %v10475_v58, %v10316_v61  ;;  %v10485_v17 = vld [vmem:[#allocation2 + $0x50] sm:$0xff] }
 0x380   : > { %v10051_v2 = vld [vmem:[#allocation2 + $0xe0] sm:$0xff]  ;;  %v17356_v1 = vpop.f32.mrf.mxu1 }
 0x381   : > { %v17403_v48 = vpop.f32.mrf.mxu0  ;;  %10116 = vst.msk [vmem:[#allocation2 + $0xe8] sm:$0xff] %vm282_vm1, %v10084_v14  ;;  %v10083_v46 = vadd.f32 %v10051_v2, %v10004_v34  ;;  %10539 = vst.msk [vmem:[#allocation2] sm:$0xff] %vm282_vm1, %v10507_v13  ;;  %v10510_v6 = vadd.f32 %v17356_v1, %v10478_v57  ;;  %v10488_v13 = vld [vmem:[#allocation2 + $0x68] sm:$0xff] }
 0x382   : > { %v10054_v0 = vld [vmem:[#allocation2 + $0xf8] sm:$0xff]  ;;  %v10326_v7 = vpop.f32.mrf.mxu1 }
 0x383   : > { %v10768_v42 = vpop.f32.mrf.mxu0  ;;  %10115 = vst.msk [vmem:[#allocation2 + $0xe0] sm:$0xff] %vm282_vm1, %v10083_v46  ;;  %v10086_v63 = vadd.f32 %v17348_v54, %v10054_v0  ;;  %10542 = vst.msk [vmem:[#allocation2 + $0x18] sm:$0xff] %vm282_vm1, %v10510_v6  ;;  %v10509_v30 = vadd.f32 %v10477_v18, %v10326_v7  ;;  %v10487_v6 = vld [vmem:[#allocation2 + $0x60] sm:$0xff] }
 0x384   : > { %v10053_v47 = vld [vmem:[#allocation2 + $0xf0] sm:$0xff]  ;;  %v17359_v24 = vpop.f32.mrf.mxu1 }
 0x385   : > { %v17406_v56 = vpop.f32.mrf.mxu0  ;;  %10118 = vst.msk [vmem:[#allocation2 + $0xf8] sm:$0xff] %vm282_vm1, %v10086_v63  ;;  %v10085_v21 = vadd.f32 %v10053_v47, %v10014_v50  ;;  %10541 = vst.msk [vmem:[#allocation2 + $0x10] sm:$0xff] %vm282_vm1, %v10509_v30  ;;  %v10512_v20 = vadd.f32 %v17359_v24, %v10480_v11  ;;  %v10490_v30 = vld [vmem:[#allocation2 + $0x78] sm:$0xff] }
 0x386   : > { %v10928_v25 = vld [vmem:[#allocation2 + $0x8] sm:$0xff]  ;;  %v10336_v22 = vpop.f32.mrf.mxu1 }
 0x387   : > { %v10778_v59 = vpop.f32.mrf.mxu0  ;;  %10117 = vst.msk [vmem:[#allocation2 + $0xf0] sm:$0xff] %vm282_vm1, %v10085_v21  ;;  %10544 = vst.msk [vmem:[#allocation2 + $0x28] sm:$0xff] %vm282_vm1, %v10512_v20  ;;  %v10960_v38 = vadd.f32 %v17403_v48, %v10928_v25  ;;  %v10511_v43 = vadd.f32 %v10479_v39, %v10336_v22  ;;  %v10489_v20 = vld [vmem:[#allocation2 + $0x70] sm:$0xff] }
 0x388   : > { %v10927_v27 = vld [vmem:[#allocation2] sm:$0xff]  ;;  %v17362_v35 = vpop.f32.mrf.mxu1 }
 0x389   : > { %v17409_v28 = vpop.f32.mrf.mxu0  ;;  %10992 = vst.msk [vmem:[#allocation2 + $0x8] sm:$0xff] %vm282_vm1, %v10960_v38  ;;  %10543 = vst.msk [vmem:[#allocation2 + $0x20] sm:$0xff] %vm282_vm1, %v10511_v43  ;;  %v10959_v33 = vadd.f32 %v10927_v27, %v10768_v42  ;;  %v10514_v4 = vadd.f32 %v17362_v35, %v10482_v12  ;;  %v10492_v43 = vld [vmem:[#allocation2 + $0x88] sm:$0xff] }
 0x38a   : > { %v10930_v41 = vld [vmem:[#allocation2 + $0x18] sm:$0xff]  ;;  %v10346_v49 = vpop.f32.mrf.mxu1 }
 0x38b   : > { %v10788_v8 = vpop.f32.mrf.mxu0  ;;  %10991 = vst.msk [vmem:[#allocation2] sm:$0xff] %vm282_vm1, %v10959_v33  ;;  %10546 = vst.msk [vmem:[#allocation2 + $0x38] sm:$0xff] %vm282_vm1, %v10514_v4  ;;  %v10962_v36 = vadd.f32 %v17406_v56, %v10930_v41  ;;  %v10513_v31 = vadd.f32 %v10481_v19, %v10346_v49  ;;  %v10491_v4 = vld [vmem:[#allocation2 + $0x80] sm:$0xff] }
 0x38c   : > { %v10929_v3 = vld [vmem:[#allocation2 + $0x10] sm:$0xff]  ;;  %v17365_v9 = vpop.f32.mrf.mxu1 }
 0x38d   : > { %v17412_v52 = vpop.f32.mrf.mxu0  ;;  %10994 = vst.msk [vmem:[#allocation2 + $0x18] sm:$0xff] %vm282_vm1, %v10962_v36  ;;  %10545 = vst.msk [vmem:[#allocation2 + $0x30] sm:$0xff] %vm282_vm1, %v10513_v31  ;;  %v10961_v37 = vadd.f32 %v10929_v3, %v10778_v59  ;;  %v10516_v23 = vadd.f32 %v17365_v9, %v10484_v16  ;;  %v10494_v31 = vld [vmem:[#allocation2 + $0x98] sm:$0xff] }
 0x38e   : > { %v10932_v34 = vld [vmem:[#allocation2 + $0x28] sm:$0xff]  ;;  %v10356_v40 = vpop.f32.mrf.mxu1 }
 0x38f   : > { %v10798_v62 = vpop.f32.mrf.mxu0  ;;  %10993 = vst.msk [vmem:[#allocation2 + $0x10] sm:$0xff] %vm282_vm1, %v10961_v37  ;;  %10548 = vst.msk [vmem:[#allocation2 + $0x48] sm:$0xff] %vm282_vm1, %v10516_v23  ;;  %v10964_v53 = vadd.f32 %v17409_v28, %v10932_v34  ;;  %v10515_v32 = vadd.f32 %v10483_v55, %v10356_v40  ;;  %v10493_v23 = vld [vmem:[#allocation2 + $0x90] sm:$0xff] }
 0x390   : > { %v10931_v54 = vld [vmem:[#allocation2 + $0x20] sm:$0xff]  ;;  %v17368_v51 = vpop.f32.mrf.mxu1 }
 0x391   : > { %v17415_v44 = vpop.f32.mrf.mxu0  ;;  %10996 = vst.msk [vmem:[#allocation2 + $0x28] sm:$0xff] %vm282_vm1, %v10964_v53  ;;  %10547 = vst.msk [vmem:[#allocation2 + $0x40] sm:$0xff] %vm282_vm1, %v10515_v32  ;;  %v10963_v29 = vadd.f32 %v10931_v54, %v10788_v8  ;;  %v10518_v26 = vadd.f32 %v17368_v51, %v10486_v15  ;;  %v10496_v32 = vld [vmem:[#allocation2 + $0xa8] sm:$0xff] }
 0x392   : > { %v10934_v50 = vld [vmem:[#allocation2 + $0x38] sm:$0xff]  ;;  %v10366_v10 = vpop.f32.mrf.mxu1 }
 0x393   : > { %v10808_v5 = vpop.f32.mrf.mxu0  ;;  %10995 = vst.msk [vmem:[#allocation2 + $0x20] sm:$0xff] %vm282_vm1, %v10963_v29  ;;  %10550 = vst.msk [vmem:[#allocation2 + $0x58] sm:$0xff] %vm282_vm1, %v10518_v26  ;;  %v10966_v61 = vadd.f32 %v17412_v52, %v10934_v50  ;;  %v10517_v58 = vadd.f32 %v10485_v17, %v10366_v10  ;;  %v10495_v26 = vld [vmem:[#allocation2 + $0xa0] sm:$0xff] }
 0x394   : > { %v10933_v48 = vld [vmem:[#allocation2 + $0x30] sm:$0xff]  ;;  %v17371_v14 = vpop.f32.mrf.mxu1 }
 0x395   : > { %v17418_v45 = vpop.f32.mrf.mxu0  ;;  %10998 = vst.msk [vmem:[#allocation2 + $0x38] sm:$0xff] %vm282_vm1, %v10966_v61  ;;  %10549 = vst.msk [vmem:[#allocation2 + $0x50] sm:$0xff] %vm282_vm1, %v10517_v58  ;;  %v10965_v1 = vadd.f32 %v10933_v48, %v10798_v62  ;;  %v10520_v57 = vadd.f32 %v17371_v14, %v10488_v13  ;;  %v10498_v58 = vld [vmem:[#allocation2 + $0xb8] sm:$0xff] }
 0x396   : > { %v10936_v42 = vld [vmem:[#allocation2 + $0x48] sm:$0xff]  ;;  %v10376_v46 = vpop.f32.mrf.mxu1 }
 0x397   : > { %v10818_v2 = vpop.f32.mrf.mxu0  ;;  %10997 = vst.msk [vmem:[#allocation2 + $0x30] sm:$0xff] %vm282_vm1, %v10965_v1  ;;  %10552 = vst.msk [vmem:[#allocation2 + $0x68] sm:$0xff] %vm282_vm1, %v10520_v57  ;;  %v10968_v7 = vadd.f32 %v17415_v44, %v10936_v42  ;;  %v10519_v18 = vadd.f32 %v10487_v6, %v10376_v46  ;;  %v10497_v57 = vld [vmem:[#allocation2 + $0xb0] sm:$0xff] }
 0x398   : > { %v10935_v56 = vld [vmem:[#allocation2 + $0x40] sm:$0xff]  ;;  %v17374_v63 = vpop.f32.mrf.mxu1 }
 0x399   : > { %v17421_v0 = vpop.f32.mrf.mxu0  ;;  %11000 = vst.msk [vmem:[#allocation2 + $0x48] sm:$0xff] %vm282_vm1, %v10968_v7  ;;  %10551 = vst.msk [vmem:[#allocation2 + $0x60] sm:$0xff] %vm282_vm1, %v10519_v18  ;;  %v10967_v24 = vadd.f32 %v10935_v56, %v10808_v5  ;;  %v10522_v11 = vadd.f32 %v17374_v63, %v10490_v30  ;;  %v10500_v18 = vld [vmem:[#allocation2 + $0xc8] sm:$0xff] }
 0x39a   : > { %v10938_v59 = vld [vmem:[#allocation2 + $0x58] sm:$0xff]  ;;  %v10386_v21 = vpop.f32.mrf.mxu1 }
 0x39b   : > { %v10828_v47 = vpop.f32.mrf.mxu0  ;;  %10999 = vst.msk [vmem:[#allocation2 + $0x40] sm:$0xff] %vm282_vm1, %v10967_v24  ;;  %10554 = vst.msk [vmem:[#allocation2 + $0x78] sm:$0xff] %vm282_vm1, %v10522_v11  ;;  %v10970_v22 = vadd.f32 %v17418_v45, %v10938_v59  ;;  %v10521_v39 = vadd.f32 %v10489_v20, %v10386_v21  ;;  %v10499_v11 = vld [vmem:[#allocation2 + $0xc0] sm:$0xff] }
 0x39c   : > { %v10937_v28 = vld [vmem:[#allocation2 + $0x50] sm:$0xff]  ;;  %v17377_v38 = vpop.f32.mrf.mxu1 }
 0x39d   : > { %v17424_v25 = vpop.f32.mrf.mxu0  ;;  %11002 = vst.msk [vmem:[#allocation2 + $0x58] sm:$0xff] %vm282_vm1, %v10970_v22  ;;  %10553 = vst.msk [vmem:[#allocation2 + $0x70] sm:$0xff] %vm282_vm1, %v10521_v39  ;;  %v10969_v35 = vadd.f32 %v10937_v28, %v10818_v2  ;;  %v10524_v12 = vadd.f32 %v17377_v38, %v10492_v43  ;;  %v10502_v39 = vld [vmem:[#allocation2 + $0xd8] sm:$0xff] }
 0x39e   : > { %v10940_v8 = vld [vmem:[#allocation2 + $0x68] sm:$0xff]  ;;  %v10396_v33 = vpop.f32.mrf.mxu1 }
 0x39f   : > { %v10838_v27 = vpop.f32.mrf.mxu0  ;;  %11001 = vst.msk [vmem:[#allocation2 + $0x50] sm:$0xff] %vm282_vm1, %v10969_v35  ;;  %10556 = vst.msk [vmem:[#allocation2 + $0x88] sm:$0xff] %vm282_vm1, %v10524_v12  ;;  %v10972_v49 = vadd.f32 %v17421_v0, %v10940_v8  ;;  %v10523_v19 = vadd.f32 %v10491_v4, %v10396_v33  ;;  %v10501_v12 = vld [vmem:[#allocation2 + $0xd0] sm:$0xff] }
 0x3a0   : > { %v10939_v52 = vld [vmem:[#allocation2 + $0x60] sm:$0xff]  ;;  %v17380_v36 = vpop.f32.mrf.mxu1 }
 0x3a1   : > { %v17427_v41 = vpop.f32.mrf.mxu0  ;;  %11004 = vst.msk [vmem:[#allocation2 + $0x68] sm:$0xff] %vm282_vm1, %v10972_v49  ;;  %10555 = vst.msk [vmem:[#allocation2 + $0x80] sm:$0xff] %vm282_vm1, %v10523_v19  ;;  %v10971_v9 = vadd.f32 %v10939_v52, %v10828_v47  ;;  %v10526_v16 = vadd.f32 %v17380_v36, %v10494_v31  ;;  %v10504_v19 = vld [vmem:[#allocation2 + $0xe8] sm:$0xff] }
 0x3a2   : > { %v10942_v62 = vld [vmem:[#allocation2 + $0x78] sm:$0xff]  ;;  %v10406_v37 = vpop.f32.mrf.mxu1 }
 0x3a3   : > { %v10848_v3 = vpop.f32.mrf.mxu0  ;;  %11003 = vst.msk [vmem:[#allocation2 + $0x60] sm:$0xff] %vm282_vm1, %v10971_v9  ;;  %10558 = vst.msk [vmem:[#allocation2 + $0x98] sm:$0xff] %vm282_vm1, %v10526_v16  ;;  %v10974_v40 = vadd.f32 %v17424_v25, %v10942_v62  ;;  %v10525_v55 = vadd.f32 %v10493_v23, %v10406_v37  ;;  %v10503_v16 = vld [vmem:[#allocation2 + $0xe0] sm:$0xff] }
 0x3a4   : > { %v10941_v44 = vld [vmem:[#allocation2 + $0x70] sm:$0xff]  ;;  %v17383_v53 = vpop.f32.mrf.mxu1 }
 0x3a5   : > { %v17430_v34 = vpop.f32.mrf.mxu0  ;;  %11006 = vst.msk [vmem:[#allocation2 + $0x78] sm:$0xff] %vm282_vm1, %v10974_v40  ;;  %10557 = vst.msk [vmem:[#allocation2 + $0x90] sm:$0xff] %vm282_vm1, %v10525_v55  ;;  %v10973_v51 = vadd.f32 %v10941_v44, %v10838_v27  ;;  %v10528_v15 = vadd.f32 %v17383_v53, %v10496_v32  ;;  %v10506_v55 = vld [vmem:[#allocation2 + $0xf8] sm:$0xff] }
 0x3a6   : > { %v10944_v5 = vld [vmem:[#allocation2 + $0x88] sm:$0xff]  ;;  %v10416_v29 = vpop.f32.mrf.mxu1 }
 0x3a7   : > { %v10858_v54 = vpop.f32.mrf.mxu0  ;;  %11005 = vst.msk [vmem:[#allocation2 + $0x70] sm:$0xff] %vm282_vm1, %v10973_v51  ;;  %10560 = vst.msk [vmem:[#allocation2 + $0xa8] sm:$0xff] %vm282_vm1, %v10528_v15  ;;  %v10976_v10 = vadd.f32 %v17427_v41, %v10944_v5  ;;  %v10527_v17 = vadd.f32 %v10495_v26, %v10416_v29  ;;  %v10505_v15 = vld [vmem:[#allocation2 + $0xf0] sm:$0xff] }
 0x3a8   : > { %v10943_v45 = vld [vmem:[#allocation2 + $0x80] sm:$0xff]  ;;  %v17386_v61 = vpop.f32.mrf.mxu1 }
 0x3a9   : > { %v17433_v50 = vpop.f32.mrf.mxu0  ;;  %11008 = vst.msk [vmem:[#allocation2 + $0x88] sm:$0xff] %vm282_vm1, %v10976_v10  ;;  %10559 = vst.msk [vmem:[#allocation2 + $0xa0] sm:$0xff] %vm282_vm1, %v10527_v17  ;;  %v10975_v14 = vadd.f32 %v10943_v45, %v10848_v3  ;;  %v10530_v13 = vadd.f32 %v17386_v61, %v10498_v58  ;;  %v11380_v17 = vld [vmem:[#allocation2 + $0x8] sm:$0xff] }
 0x3aa   : > { %v10946_v2 = vld [vmem:[#allocation2 + $0x98] sm:$0xff]  ;;  %v10426_v1 = vpop.f32.mrf.mxu1 }
 0x3ab   : > { %v10868_v48 = vpop.f32.mrf.mxu0  ;;  %11007 = vst.msk [vmem:[#allocation2 + $0x80] sm:$0xff] %vm282_vm1, %v10975_v14  ;;  %10562 = vst.msk [vmem:[#allocation2 + $0xb8] sm:$0xff] %vm282_vm1, %v10530_v13  ;;  %v10978_v46 = vadd.f32 %v17430_v34, %v10946_v2  ;;  %v10529_v6 = vadd.f32 %v10497_v57, %v10426_v1  ;;  %v11379_v13 = vld [vmem:[#allocation2] sm:$0xff] }
 0x3ac   : > { %v10945_v0 = vld [vmem:[#allocation2 + $0x90] sm:$0xff]  ;;  %v17389_v7 = vpop.f32.mrf.mxu1 }
 0x3ad   : > { %v17436_v42 = vpop.f32.mrf.mxu0  ;;  %11010 = vst.msk [vmem:[#allocation2 + $0x98] sm:$0xff] %vm282_vm1, %v10978_v46  ;;  %10561 = vst.msk [vmem:[#allocation2 + $0xb0] sm:$0xff] %vm282_vm1, %v10529_v6  ;;  %v10977_v63 = vadd.f32 %v10945_v0, %v10858_v54  ;;  %v10532_v30 = vadd.f32 %v17389_v7, %v10500_v18  ;;  %v11382_v6 = vld [vmem:[#allocation2 + $0x18] sm:$0xff] }
 0x3ae   : > { %v10948_v47 = vld [vmem:[#allocation2 + $0xa8] sm:$0xff]  ;;  %v10436_v24 = vpop.f32.mrf.mxu1 }
 0x3af   : > { %v10878_v56 = vpop.f32.mrf.mxu0  ;;  %11009 = vst.msk [vmem:[#allocation2 + $0x90] sm:$0xff] %vm282_vm1, %v10977_v63  ;;  %10564 = vst.msk [vmem:[#allocation2 + $0xc8] sm:$0xff] %vm282_vm1, %v10532_v30  ;;  %v10980_v21 = vadd.f32 %v17433_v50, %v10948_v47  ;;  %v10531_v20 = vadd.f32 %v10499_v11, %v10436_v24  ;;  %v11381_v30 = vld [vmem:[#allocation2 + $0x10] sm:$0xff] }
 0x3b0   : > { %v10947_v25 = vld [vmem:[#allocation2 + $0xa0] sm:$0xff]  ;;  %v17392_v22 = vpop.f32.mrf.mxu1 }
 0x3b1   : > { %v17439_v59 = vpop.f32.mrf.mxu0  ;;  %11012 = vst.msk [vmem:[#allocation2 + $0xa8] sm:$0xff] %vm282_vm1, %v10980_v21  ;;  %10563 = vst.msk [vmem:[#allocation2 + $0xc0] sm:$0xff] %vm282_vm1, %v10531_v20  ;;  %v10979_v38 = vadd.f32 %v10947_v25, %v10868_v48  ;;  %v10534_v43 = vadd.f32 %v17392_v22, %v10502_v39  ;;  %v11384_v20 = vld [vmem:[#allocation2 + $0x28] sm:$0xff] }
 0x3b2   : > { %v10950_v27 = vld [vmem:[#allocation2 + $0xb8] sm:$0xff]  ;;  %v10446_v35 = vpop.f32.mrf.mxu1 }
 0x3b3   : > { %v10888_v28 = vpop.f32.mrf.mxu0  ;;  %11011 = vst.msk [vmem:[#allocation2 + $0xa0] sm:$0xff] %vm282_vm1, %v10979_v38  ;;  %10566 = vst.msk [vmem:[#allocation2 + $0xd8] sm:$0xff] %vm282_vm1, %v10534_v43  ;;  %v10982_v33 = vadd.f32 %v17436_v42, %v10950_v27  ;;  %v10533_v4 = vadd.f32 %v10501_v12, %v10446_v35  ;;  %v11383_v43 = vld [vmem:[#allocation2 + $0x20] sm:$0xff] }
 0x3b4   : > { %v10949_v41 = vld [vmem:[#allocation2 + $0xb0] sm:$0xff]  ;;  %v17395_v49 = vpop.f32.mrf.mxu1 }
 0x3b5   : > { %v17442_v8 = vpop.f32.mrf.mxu0  ;;  %11014 = vst.msk [vmem:[#allocation2 + $0xb8] sm:$0xff] %vm282_vm1, %v10982_v33  ;;  %10565 = vst.msk [vmem:[#allocation2 + $0xd0] sm:$0xff] %vm282_vm1, %v10533_v4  ;;  %v10981_v36 = vadd.f32 %v10949_v41, %v10878_v56  ;;  %v10536_v31 = vadd.f32 %v17395_v49, %v10504_v19  ;;  %v11386_v4 = vld [vmem:[#allocation2 + $0x38] sm:$0xff] }
 0x3b6   : > { %v10952_v3 = vld [vmem:[#allocation2 + $0xc8] sm:$0xff]  ;;  %v10456_v9 = vpop.f32.mrf.mxu1 }
 0x3b7   : > { %v10898_v52 = vpop.f32.mrf.mxu0  ;;  %11013 = vst.msk [vmem:[#allocation2 + $0xb0] sm:$0xff] %vm282_vm1, %v10981_v36  ;;  %10568 = vst.msk [vmem:[#allocation2 + $0xe8] sm:$0xff] %vm282_vm1, %v10536_v31  ;;  %v10984_v37 = vadd.f32 %v17439_v59, %v10952_v3  ;;  %v10535_v23 = vadd.f32 %v10503_v16, %v10456_v9  ;;  %v11385_v31 = vld [vmem:[#allocation2 + $0x30] sm:$0xff] }
 0x3b8   : > { %v10951_v34 = vld [vmem:[#allocation2 + $0xc0] sm:$0xff]  ;;  %v17398_v40 = vpop.f32.mrf.mxu1 }
 0x3b9   : > { %v17445_v62 = vpop.f32.mrf.mxu0  ;;  %11016 = vst.msk [vmem:[#allocation2 + $0xc8] sm:$0xff] %vm282_vm1, %v10984_v37  ;;  %10567 = vst.msk [vmem:[#allocation2 + $0xe0] sm:$0xff] %vm282_vm1, %v10535_v23  ;;  %v10983_v53 = vadd.f32 %v10951_v34, %v10888_v28  ;;  %v10538_v32 = vadd.f32 %v17398_v40, %v10506_v55  ;;  %v11388_v23 = vld [vmem:[#allocation2 + $0x48] sm:$0xff] }
 0x3ba   : > { %v10954_v54 = vld [vmem:[#allocation2 + $0xd8] sm:$0xff]  ;;  %v10466_v51 = vpop.f32.mrf.mxu1 }
 0x3bb   : > { %v10908_v44 = vpop.f32.mrf.mxu0  ;;  %11015 = vst.msk [vmem:[#allocation2 + $0xc0] sm:$0xff] %vm282_vm1, %v10983_v53  ;;  %10570 = vst.msk [vmem:[#allocation2 + $0xf8] sm:$0xff] %vm282_vm1, %v10538_v32  ;;  %v10986_v29 = vadd.f32 %v17442_v8, %v10954_v54  ;;  %v10537_v26 = vadd.f32 %v10505_v15, %v10466_v51  ;;  %v11387_v32 = vld [vmem:[#allocation2 + $0x40] sm:$0xff] }
 0x3bc   : > { %v10953_v50 = vld [vmem:[#allocation2 + $0xd0] sm:$0xff]  ;;  %v17453_v10 = vpop.f32.mrf.mxu1 }
 0x3bd   : > { %v17448_v5 = vpop.f32.mrf.mxu0  ;;  %11018 = vst.msk [vmem:[#allocation2 + $0xd8] sm:$0xff] %vm282_vm1, %v10986_v29  ;;  %10569 = vst.msk [vmem:[#allocation2 + $0xf0] sm:$0xff] %vm282_vm1, %v10537_v26  ;;  %v10985_v61 = vadd.f32 %v10953_v50, %v10898_v52  ;;  %v11412_v58 = vadd.f32 %v17453_v10, %v11380_v17  ;;  %v11390_v26 = vld [vmem:[#allocation2 + $0x58] sm:$0xff] }
 0x3be   : > { %v10956_v48 = vld [vmem:[#allocation2 + $0xe8] sm:$0xff]  ;;  %v11220_v14 = vpop.f32.mrf.mxu1 }
 0x3bf   : > { %v10918_v45 = vpop.f32.mrf.mxu0  ;;  %11017 = vst.msk [vmem:[#allocation2 + $0xd0] sm:$0xff] %vm282_vm1, %v10985_v61  ;;  %v10988_v1 = vadd.f32 %v17445_v62, %v10956_v48  ;;  %11444 = vst.msk [vmem:[#allocation2 + $0x8] sm:$0xff] %vm282_vm1, %v11412_v58  ;;  %v11411_v57 = vadd.f32 %v11379_v13, %v11220_v14  ;;  %v11389_v58 = vld [vmem:[#allocation2 + $0x50] sm:$0xff] }
 0x3c0   : > { %v10955_v42 = vld [vmem:[#allocation2 + $0xe0] sm:$0xff]  ;;  %v17456_v46 = vpop.f32.mrf.mxu1 }
 0x3c1   : > { %v17503_v2 = vpop.f32.mrf.mxu0  ;;  %11020 = vst.msk [vmem:[#allocation2 + $0xe8] sm:$0xff] %vm282_vm1, %v10988_v1  ;;  %v10987_v7 = vadd.f32 %v10955_v42, %v10908_v44  ;;  %11443 = vst.msk [vmem:[#allocation2] sm:$0xff] %vm282_vm1, %v11411_v57  ;;  %v11414_v18 = vadd.f32 %v17456_v46, %v11382_v6  ;;  %v11392_v57 = vld [vmem:[#allocation2 + $0x68] sm:$0xff] }
 0x3c2   : > { %v10958_v56 = vld [vmem:[#allocation2 + $0xf8] sm:$0xff]  ;;  %v11230_v63 = vpop.f32.mrf.mxu1 }
 0x3c3   : > { %v11673_v0 = vpop.f32.mrf.mxu0  ;;  %11019 = vst.msk [vmem:[#allocation2 + $0xe0] sm:$0xff] %vm282_vm1, %v10987_v7  ;;  %v10990_v24 = vadd.f32 %v17448_v5, %v10958_v56  ;;  %11446 = vst.msk [vmem:[#allocation2 + $0x18] sm:$0xff] %vm282_vm1, %v11414_v18  ;;  %v11413_v11 = vadd.f32 %v11381_v30, %v11230_v63  ;;  %v11391_v18 = vld [vmem:[#allocation2 + $0x60] sm:$0xff] }
 0x3c4   : > { %v10957_v59 = vld [vmem:[#allocation2 + $0xf0] sm:$0xff]  ;;  %v17459_v21 = vpop.f32.mrf.mxu1 }
 0x3c5   : > { %v17506_v47 = vpop.f32.mrf.mxu0  ;;  %11022 = vst.msk [vmem:[#allocation2 + $0xf8] sm:$0xff] %vm282_vm1, %v10990_v24  ;;  %v10989_v22 = vadd.f32 %v10957_v59, %v10918_v45  ;;  %11445 = vst.msk [vmem:[#allocation2 + $0x10] sm:$0xff] %vm282_vm1, %v11413_v11  ;;  %v11416_v39 = vadd.f32 %v17459_v21, %v11384_v20  ;;  %v11394_v11 = vld [vmem:[#allocation2 + $0x78] sm:$0xff] }
 0x3c6   : > { %v11833_v28 = vld [vmem:[#allocation2 + $0x8] sm:$0xff]  ;;  %v11240_v38 = vpop.f32.mrf.mxu1 }
 0x3c7   : > { %v11683_v25 = vpop.f32.mrf.mxu0  ;;  %11021 = vst.msk [vmem:[#allocation2 + $0xf0] sm:$0xff] %vm282_vm1, %v10989_v22  ;;  %11448 = vst.msk [vmem:[#allocation2 + $0x28] sm:$0xff] %vm282_vm1, %v11416_v39  ;;  %v11865_v35 = vadd.f32 %v17503_v2, %v11833_v28  ;;  %v11415_v12 = vadd.f32 %v11383_v43, %v11240_v38  ;;  %v11393_v39 = vld [vmem:[#allocation2 + $0x70] sm:$0xff] }
 0x3c8   : > { %v11832_v8 = vld [vmem:[#allocation2] sm:$0xff]  ;;  %v17462_v33 = vpop.f32.mrf.mxu1 }
 0x3c9   : > { %v17509_v27 = vpop.f32.mrf.mxu0  ;;  %11897 = vst.msk [vmem:[#allocation2 + $0x8] sm:$0xff] %vm282_vm1, %v11865_v35  ;;  %11447 = vst.msk [vmem:[#allocation2 + $0x20] sm:$0xff] %vm282_vm1, %v11415_v12  ;;  %v11864_v49 = vadd.f32 %v11832_v8, %v11673_v0  ;;  %v11418_v19 = vadd.f32 %v17462_v33, %v11386_v4  ;;  %v11396_v12 = vld [vmem:[#allocation2 + $0x88] sm:$0xff] }
 0x3ca   : > { %v11835_v52 = vld [vmem:[#allocation2 + $0x18] sm:$0xff]  ;;  %v11250_v36 = vpop.f32.mrf.mxu1 }
 0x3cb   : > { %v11693_v41 = vpop.f32.mrf.mxu0  ;;  %11896 = vst.msk [vmem:[#allocation2] sm:$0xff] %vm282_vm1, %v11864_v49  ;;  %11450 = vst.msk [vmem:[#allocation2 + $0x38] sm:$0xff] %vm282_vm1, %v11418_v19  ;;  %v11867_v9 = vadd.f32 %v17506_v47, %v11835_v52  ;;  %v11417_v16 = vadd.f32 %v11385_v31, %v11250_v36  ;;  %v11395_v19 = vld [vmem:[#allocation2 + $0x80] sm:$0xff] }
 0x3cc   : > { %v11834_v62 = vld [vmem:[#allocation2 + $0x10] sm:$0xff]  ;;  %v17465_v37 = vpop.f32.mrf.mxu1 }
 0x3cd   : > { %v17512_v3 = vpop.f32.mrf.mxu0  ;;  %11899 = vst.msk [vmem:[#allocation2 + $0x18] sm:$0xff] %vm282_vm1, %v11867_v9  ;;  %11449 = vst.msk [vmem:[#allocation2 + $0x30] sm:$0xff] %vm282_vm1, %v11417_v16  ;;  %v11866_v40 = vadd.f32 %v11834_v62, %v11683_v25  ;;  %v11420_v55 = vadd.f32 %v17465_v37, %v11388_v23  ;;  %v11398_v16 = vld [vmem:[#allocation2 + $0x98] sm:$0xff] }
 0x3ce   : > { %v11837_v44 = vld [vmem:[#allocation2 + $0x28] sm:$0xff]  ;;  %v11260_v53 = vpop.f32.mrf.mxu1 }
 0x3cf   : > { %v11703_v34 = vpop.f32.mrf.mxu0  ;;  %11898 = vst.msk [vmem:[#allocation2 + $0x10] sm:$0xff] %vm282_vm1, %v11866_v40  ;;  %11452 = vst.msk [vmem:[#allocation2 + $0x48] sm:$0xff] %vm282_vm1, %v11420_v55  ;;  %v11869_v51 = vadd.f32 %v17509_v27, %v11837_v44  ;;  %v11419_v15 = vadd.f32 %v11387_v32, %v11260_v53  ;;  %v11397_v55 = vld [vmem:[#allocation2 + $0x90] sm:$0xff] }
 0x3d0   : > { %v11836_v5 = vld [vmem:[#allocation2 + $0x20] sm:$0xff]  ;;  %v17468_v29 = vpop.f32.mrf.mxu1 }
 0x3d1   : > { %v17515_v54 = vpop.f32.mrf.mxu0  ;;  %11901 = vst.msk [vmem:[#allocation2 + $0x28] sm:$0xff] %vm282_vm1, %v11869_v51  ;;  %11451 = vst.msk [vmem:[#allocation2 + $0x40] sm:$0xff] %vm282_vm1, %v11419_v15  ;;  %v11868_v10 = vadd.f32 %v11836_v5, %v11693_v41  ;;  %v11422_v17 = vadd.f32 %v17468_v29, %v11390_v26  ;;  %v11400_v15 = vld [vmem:[#allocation2 + $0xa8] sm:$0xff] }
 0x3d2   : > { %v11839_v45 = vld [vmem:[#allocation2 + $0x38] sm:$0xff]  ;;  %v11270_v61 = vpop.f32.mrf.mxu1 }
 0x3d3   : > { %v11713_v50 = vpop.f32.mrf.mxu0  ;;  %11900 = vst.msk [vmem:[#allocation2 + $0x20] sm:$0xff] %vm282_vm1, %v11868_v10  ;;  %11454 = vst.msk [vmem:[#allocation2 + $0x58] sm:$0xff] %vm282_vm1, %v11422_v17  ;;  %v11871_v14 = vadd.f32 %v17512_v3, %v11839_v45  ;;  %v11421_v13 = vadd.f32 %v11389_v58, %v11270_v61  ;;  %v11399_v17 = vld [vmem:[#allocation2 + $0xa0] sm:$0xff] }
 0x3d4   : > { %v11838_v2 = vld [vmem:[#allocation2 + $0x30] sm:$0xff] }
 0x3d5   : > { %v17518_v48 = vpop.f32.mrf.mxu0  ;;  %v17471_v1 = vpop.f32.mrf.mxu1  ;;  %11903 = vst.msk [vmem:[#allocation2 + $0x38] sm:$0xff] %vm282_vm1, %v11871_v14  ;;  %11453 = vst.msk [vmem:[#allocation2 + $0x50] sm:$0xff] %vm282_vm1, %v11421_v13  ;;  %v11870_v46 = vadd.f32 %v11838_v2, %v11703_v34  ;;  %v11402_v13 = vld [vmem:[#allocation2 + $0xb8] sm:$0xff] }
 0x3d6   : > { %v11424_v6 = vadd.f32 %v17471_v1, %v11392_v57  ;;  %v11841_v0 = vld [vmem:[#allocation2 + $0x48] sm:$0xff] }
 0x3d7   : > { %v11723_v42 = vpop.f32.mrf.mxu0  ;;  %v11280_v7 = vpop.f32.mrf.mxu1  ;;  %11902 = vst.msk [vmem:[#allocation2 + $0x30] sm:$0xff] %vm282_vm1, %v11870_v46  ;;  %v11873_v63 = vadd.f32 %v17515_v54, %v11841_v0 }
 0x3d8   : > { %11456 = vst.msk [vmem:[#allocation2 + $0x68] sm:$0xff] %vm282_vm1, %v11424_v6  ;;  %v11423_v30 = vadd.f32 %v11391_v18, %v11280_v7  ;;  %v11840_v47 = vld [vmem:[#allocation2 + $0x40] sm:$0xff]  ;;  %v11401_v6 = vld [vmem:[#allocation2 + $0xb0] sm:$0xff] }
 0x3d9   : > { %v17521_v56 = vpop.f32.mrf.mxu0  ;;  %11905 = vst.msk [vmem:[#allocation2 + $0x48] sm:$0xff] %vm282_vm1, %v11873_v63  ;;  %v11872_v21 = vadd.f32 %v11840_v47, %v11713_v50 }
 0x3da   : > { %v17474_v24 = vpop.f32.mrf.mxu1  ;;  %11455 = vst.msk [vmem:[#allocation2 + $0x60] sm:$0xff] %vm282_vm1, %v11423_v30  ;;  %v11843_v25 = vld [vmem:[#allocation2 + $0x58] sm:$0xff]  ;;  %v11404_v30 = vld [vmem:[#allocation2 + $0xc8] sm:$0xff] }
 0x3db   : > { %v11733_v59 = vpop.f32.mrf.mxu0  ;;  %v11426_v20 = vadd.f32 %v17474_v24, %v11394_v11  ;;  %11904 = vst.msk [vmem:[#allocation2 + $0x40] sm:$0xff] %vm282_vm1, %v11872_v21  ;;  %v11875_v38 = vadd.f32 %v17518_v48, %v11843_v25 }
 0x3dc   : > { %v11290_v22 = vpop.f32.mrf.mxu1  ;;  %v11842_v27 = vld [vmem:[#allocation2 + $0x50] sm:$0xff] }
 0x3dd   : > { %v17524_v28 = vpop.f32.mrf.mxu0  ;;  %11458 = vst.msk [vmem:[#allocation2 + $0x78] sm:$0xff] %vm282_vm1, %v11426_v20  ;;  %v11425_v43 = vadd.f32 %v11393_v39, %v11290_v22  ;;  %11907 = vst.msk [vmem:[#allocation2 + $0x58] sm:$0xff] %vm282_vm1, %v11875_v38  ;;  %v11874_v33 = vadd.f32 %v11842_v27, %v11723_v42  ;;  %v11403_v20 = vld [vmem:[#allocation2 + $0xc0] sm:$0xff] }
 0x3de   : > { %v17477_v35 = vpop.f32.mrf.mxu1 }
 0x3df   : > { %v11743_v8 = vpop.f32.mrf.mxu0  ;;  %11457 = vst.msk [vmem:[#allocation2 + $0x70] sm:$0xff] %vm282_vm1, %v11425_v43  ;;  %v11428_v4 = vadd.f32 %v17477_v35, %v11396_v12  ;;  %v11845_v41 = vld [vmem:[#allocation2 + $0x68] sm:$0xff]  ;;  %11906 = vst.msk [vmem:[#allocation2 + $0x50] sm:$0xff] %vm282_vm1, %v11874_v33  ;;  %v11406_v43 = vld [vmem:[#allocation2 + $0xd8] sm:$0xff] }
 0x3e0   : > { %v11300_v49 = vpop.f32.mrf.mxu1  ;;  %v11877_v36 = vadd.f32 %v17521_v56, %v11845_v41 }
 0x3e1   : > { %v17527_v52 = vpop.f32.mrf.mxu0  ;;  %11460 = vst.msk [vmem:[#allocation2 + $0x88] sm:$0xff] %vm282_vm1, %v11428_v4  ;;  %v11427_v31 = vadd.f32 %v11395_v19, %v11300_v49  ;;  %v11844_v3 = vld [vmem:[#allocation2 + $0x60] sm:$0xff]  ;;  %v11405_v4 = vld [vmem:[#allocation2 + $0xd0] sm:$0xff] }
 0x3e2   : > { %v17480_v9 = vpop.f32.mrf.mxu1  ;;  %11909 = vst.msk [vmem:[#allocation2 + $0x68] sm:$0xff] %vm282_vm1, %v11877_v36  ;;  %v11876_v37 = vadd.f32 %v11844_v3, %v11733_v59 }
 0x3e3   : > { %v11753_v62 = vpop.f32.mrf.mxu0  ;;  %11459 = vst.msk [vmem:[#allocation2 + $0x80] sm:$0xff] %vm282_vm1, %v11427_v31  ;;  %v11430_v23 = vadd.f32 %v17480_v9, %v11398_v16  ;;  %v11408_v31 = vld [vmem:[#allocation2 + $0xe8] sm:$0xff] }
 0x3e4   : > { %v11847_v34 = vld [vmem:[#allocation2 + $0x78] sm:$0xff]  ;;  %v11310_v40 = vpop.f32.mrf.mxu1  ;;  %11908 = vst.msk [vmem:[#allocation2 + $0x60] sm:$0xff] %vm282_vm1, %v11876_v37 }
 0x3e5   : > { %v17530_v44 = vpop.f32.mrf.mxu0  ;;  %11462 = vst.msk [vmem:[#allocation2 + $0x98] sm:$0xff] %vm282_vm1, %v11430_v23  ;;  %v11879_v53 = vadd.f32 %v17524_v28, %v11847_v34  ;;  %v11429_v32 = vadd.f32 %v11397_v55, %v11310_v40  ;;  %v11407_v23 = vld [vmem:[#allocation2 + $0xe0] sm:$0xff] }
 0x3e6   : > { %v11846_v54 = vld [vmem:[#allocation2 + $0x70] sm:$0xff]  ;;  %v17483_v51 = vpop.f32.mrf.mxu1 }
 0x3e7   : > { %v11763_v5 = vpop.f32.mrf.mxu0  ;;  %11911 = vst.msk [vmem:[#allocation2 + $0x78] sm:$0xff] %vm282_vm1, %v11879_v53  ;;  %11461 = vst.msk [vmem:[#allocation2 + $0x90] sm:$0xff] %vm282_vm1, %v11429_v32  ;;  %v11878_v29 = vadd.f32 %v11846_v54, %v11743_v8  ;;  %v11432_v26 = vadd.f32 %v17483_v51, %v11400_v15  ;;  %v11410_v32 = vld [vmem:[#allocation2 + $0xf8] sm:$0xff] }
 0x3e8   : > { %v11849_v50 = vld [vmem:[#allocation2 + $0x88] sm:$0xff]  ;;  %v11320_v10 = vpop.f32.mrf.mxu1 }
 0x3e9   : > { %v17533_v45 = vpop.f32.mrf.mxu0  ;;  %11910 = vst.msk [vmem:[#allocation2 + $0x70] sm:$0xff] %vm282_vm1, %v11878_v29  ;;  %11464 = vst.msk [vmem:[#allocation2 + $0xa8] sm:$0xff] %vm282_vm1, %v11432_v26  ;;  %v11881_v61 = vadd.f32 %v17527_v52, %v11849_v50  ;;  %v11431_v58 = vadd.f32 %v11399_v17, %v11320_v10  ;;  %v11409_v26 = vld [vmem:[#allocation2 + $0xf0] sm:$0xff] }
 0x3ea   : > { %v11848_v48 = vld [vmem:[#allocation2 + $0x80] sm:$0xff]  ;;  %v17486_v14 = vpop.f32.mrf.mxu1 }
 0x3eb   : > { %v11773_v2 = vpop.f32.mrf.mxu0  ;;  %11913 = vst.msk [vmem:[#allocation2 + $0x88] sm:$0xff] %vm282_vm1, %v11881_v61  ;;  %11463 = vst.msk [vmem:[#allocation2 + $0xa0] sm:$0xff] %vm282_vm1, %v11431_v58  ;;  %v11880_v1 = vadd.f32 %v11848_v48, %v11753_v62  ;;  %v11434_v57 = vadd.f32 %v17486_v14, %v11402_v13  ;;  %v12285_v58 = vld [vmem:[#allocation2 + $0x8] sm:$0xff] }
 0x3ec   : > { %v11851_v42 = vld [vmem:[#allocation2 + $0x98] sm:$0xff]  ;;  %v11330_v46 = vpop.f32.mrf.mxu1 }
 0x3ed   : > { %v17536_v0 = vpop.f32.mrf.mxu0  ;;  %11912 = vst.msk [vmem:[#allocation2 + $0x80] sm:$0xff] %vm282_vm1, %v11880_v1  ;;  %11466 = vst.msk [vmem:[#allocation2 + $0xb8] sm:$0xff] %vm282_vm1, %v11434_v57  ;;  %v11883_v7 = vadd.f32 %v17530_v44, %v11851_v42  ;;  %v11433_v18 = vadd.f32 %v11401_v6, %v11330_v46  ;;  %v12284_v57 = vld [vmem:[#allocation2] sm:$0xff] }
 0x3ee   : > { %v11850_v56 = vld [vmem:[#allocation2 + $0x90] sm:$0xff]  ;;  %v17489_v63 = vpop.f32.mrf.mxu1 }
 0x3ef   : > { %v11783_v47 = vpop.f32.mrf.mxu0  ;;  %11915 = vst.msk [vmem:[#allocation2 + $0x98] sm:$0xff] %vm282_vm1, %v11883_v7  ;;  %11465 = vst.msk [vmem:[#allocation2 + $0xb0] sm:$0xff] %vm282_vm1, %v11433_v18  ;;  %v11882_v24 = vadd.f32 %v11850_v56, %v11763_v5  ;;  %v11436_v11 = vadd.f32 %v17489_v63, %v11404_v30  ;;  %v12287_v18 = vld [vmem:[#allocation2 + $0x18] sm:$0xff] }
 0x3f0   : > { %v11853_v59 = vld [vmem:[#allocation2 + $0xa8] sm:$0xff]  ;;  %v11340_v21 = vpop.f32.mrf.mxu1 }
 0x3f1   : > { %v17539_v25 = vpop.f32.mrf.mxu0  ;;  %11914 = vst.msk [vmem:[#allocation2 + $0x90] sm:$0xff] %vm282_vm1, %v11882_v24  ;;  %11468 = vst.msk [vmem:[#allocation2 + $0xc8] sm:$0xff] %vm282_vm1, %v11436_v11  ;;  %v11885_v22 = vadd.f32 %v17533_v45, %v11853_v59  ;;  %v11435_v39 = vadd.f32 %v11403_v20, %v11340_v21  ;;  %v12286_v11 = vld [vmem:[#allocation2 + $0x10] sm:$0xff] }
 0x3f2   : > { %v11852_v28 = vld [vmem:[#allocation2 + $0xa0] sm:$0xff]  ;;  %v17492_v38 = vpop.f32.mrf.mxu1 }
 0x3f3   : > { %v11793_v27 = vpop.f32.mrf.mxu0  ;;  %11917 = vst.msk [vmem:[#allocation2 + $0xa8] sm:$0xff] %vm282_vm1, %v11885_v22  ;;  %11467 = vst.msk [vmem:[#allocation2 + $0xc0] sm:$0xff] %vm282_vm1, %v11435_v39  ;;  %v11884_v35 = vadd.f32 %v11852_v28, %v11773_v2  ;;  %v11438_v12 = vadd.f32 %v17492_v38, %v11406_v43  ;;  %v12289_v39 = vld [vmem:[#allocation2 + $0x28] sm:$0xff] }
 0x3f4   : > { %v11855_v8 = vld [vmem:[#allocation2 + $0xb8] sm:$0xff]  ;;  %v11350_v33 = vpop.f32.mrf.mxu1 }
 0x3f5   : > { %v17542_v41 = vpop.f32.mrf.mxu0  ;;  %11916 = vst.msk [vmem:[#allocation2 + $0xa0] sm:$0xff] %vm282_vm1, %v11884_v35  ;;  %11470 = vst.msk [vmem:[#allocation2 + $0xd8] sm:$0xff] %vm282_vm1, %v11438_v12  ;;  %v11887_v49 = vadd.f32 %v17536_v0, %v11855_v8  ;;  %v11437_v19 = vadd.f32 %v11405_v4, %v11350_v33  ;;  %v12288_v12 = vld [vmem:[#allocation2 + $0x20] sm:$0xff] }
 0x3f6   : > { %v11854_v52 = vld [vmem:[#allocation2 + $0xb0] sm:$0xff]  ;;  %v17495_v36 = vpop.f32.mrf.mxu1 }
 0x3f7   : > { %v11803_v3 = vpop.f32.mrf.mxu0  ;;  %11919 = vst.msk [vmem:[#allocation2 + $0xb8] sm:$0xff] %vm282_vm1, %v11887_v49  ;;  %11469 = vst.msk [vmem:[#allocation2 + $0xd0] sm:$0xff] %vm282_vm1, %v11437_v19  ;;  %v11886_v9 = vadd.f32 %v11854_v52, %v11783_v47  ;;  %v11440_v16 = vadd.f32 %v17495_v36, %v11408_v31  ;;  %v12291_v19 = vld [vmem:[#allocation2 + $0x38] sm:$0xff] }
 0x3f8   : > { %v11857_v62 = vld [vmem:[#allocation2 + $0xc8] sm:$0xff]  ;;  %v11360_v37 = vpop.f32.mrf.mxu1 }
 0x3f9   : > { %v17545_v34 = vpop.f32.mrf.mxu0  ;;  %11918 = vst.msk [vmem:[#allocation2 + $0xb0] sm:$0xff] %vm282_vm1, %v11886_v9  ;;  %11472 = vst.msk [vmem:[#allocation2 + $0xe8] sm:$0xff] %vm282_vm1, %v11440_v16  ;;  %v11889_v40 = vadd.f32 %v17539_v25, %v11857_v62  ;;  %v11439_v55 = vadd.f32 %v11407_v23, %v11360_v37  ;;  %v12290_v16 = vld [vmem:[#allocation2 + $0x30] sm:$0xff] }
 0x3fa   : > { %v11856_v44 = vld [vmem:[#allocation2 + $0xc0] sm:$0xff]  ;;  %v17498_v53 = vpop.f32.mrf.mxu1 }
 0x3fb   : > { %v11813_v54 = vpop.f32.mrf.mxu0  ;;  %11921 = vst.msk [vmem:[#allocation2 + $0xc8] sm:$0xff] %vm282_vm1, %v11889_v40  ;;  %11471 = vst.msk [vmem:[#allocation2 + $0xe0] sm:$0xff] %vm282_vm1, %v11439_v55  ;;  %v11888_v51 = vadd.f32 %v11856_v44, %v11793_v27  ;;  %v11442_v15 = vadd.f32 %v17498_v53, %v11410_v32  ;;  %v12293_v55 = vld [vmem:[#allocation2 + $0x48] sm:$0xff] }
 0x3fc   : > { %v11859_v5 = vld [vmem:[#allocation2 + $0xd8] sm:$0xff]  ;;  %v11370_v29 = vpop.f32.mrf.mxu1 }
 0x3fd   : > { %v17548_v50 = vpop.f32.mrf.mxu0  ;;  %11920 = vst.msk [vmem:[#allocation2 + $0xc0] sm:$0xff] %vm282_vm1, %v11888_v51  ;;  %11474 = vst.msk [vmem:[#allocation2 + $0xf8] sm:$0xff] %vm282_vm1, %v11442_v15  ;;  %v11891_v10 = vadd.f32 %v17542_v41, %v11859_v5  ;;  %v11441_v17 = vadd.f32 %v11409_v26, %v11370_v29  ;;  %v12292_v5 = vld [vmem:[#allocation2 + $0x40] sm:$0xff] }
 0x3fe   : > { %v11858_v45 = vld [vmem:[#allocation2 + $0xd0] sm:$0xff]  ;;  %v17553_v61 = vpop.f32.mrf.mxu1 }
 0x3ff   : > { %v11823_v48 = vpop.f32.mrf.mxu0  ;;  %11923 = vst.msk [vmem:[#allocation2 + $0xd8] sm:$0xff] %vm282_vm1, %v11891_v10  ;;  %11473 = vst.msk [vmem:[#allocation2 + $0xf0] sm:$0xff] %vm282_vm1, %v11441_v17  ;;  %v11890_v14 = vadd.f32 %v11858_v45, %v11803_v3  ;;  %v12317_v13 = vadd.f32 %v17553_v61, %v12285_v58  ;;  %v12295_v61 = vld [vmem:[#allocation2 + $0x58] sm:$0xff] }
 0x400   : > { %v11861_v2 = vld [vmem:[#allocation2 + $0xe8] sm:$0xff]  ;;  %v12125_v1 = vpop.f32.mrf.mxu1 }
 0x401   : > { %v17603_v42 = vpop.f32.mrf.mxu0  ;;  %11922 = vst.msk [vmem:[#allocation2 + $0xd0] sm:$0xff] %vm282_vm1, %v11890_v14  ;;  %v11893_v46 = vadd.f32 %v17545_v34, %v11861_v2  ;;  %12349 = vst.msk [vmem:[#allocation2 + $0x8] sm:$0xff] %vm282_vm1, %v12317_v13  ;;  %v12316_v6 = vadd.f32 %v12284_v57, %v12125_v1 }
 0x402   : > { %v11860_v0 = vld [vmem:[#allocation2 + $0xe0] sm:$0xff]  ;;  %v17556_v7 = vpop.f32.mrf.mxu1 }
 0x403   : > { %v12577_v56 = vpop.f32.mrf.mxu0  ;;  %11925 = vst.msk [vmem:[#allocation2 + $0xe8] sm:$0xff] %vm282_vm1, %v11893_v46  ;;  %v11892_v63 = vadd.f32 %v11860_v0, %v11813_v54  ;;  %12348 = vst.msk [vmem:[#allocation2] sm:$0xff] %vm282_vm1, %v12316_v6  ;;  %v12319_v30 = vadd.f32 %v17556_v7, %v12287_v18  ;;  %v21813_v54 = vld [vmem:[%s22302_s2 + $0x2] ss:$0 sm:$0xff]  ;;  %v12294_v0 = vld [vmem:[#allocation2 + $0x50] sm:$0xff] }
 0x404   : > { %v11863_v47 = vld [vmem:[#allocation2 + $0xf8] sm:$0xff]  ;;  %v12135_v24 = vpop.f32.mrf.mxu1 }
 0x405   : > { %v17606_v59 = vpop.f32.mrf.mxu0  ;;  %11924 = vst.msk [vmem:[#allocation2 + $0xe0] sm:$0xff] %vm282_vm1, %v11892_v63  ;;  %v11895_v21 = vadd.f32 %v17548_v50, %v11863_v47  ;;  %12351 = vst.msk [vmem:[#allocation2 + $0x18] sm:$0xff] %vm282_vm1, %v12319_v30  ;;  %v12318_v20 = vadd.f32 %v12286_v11, %v12135_v24 }
 0x406   : > { %v11862_v25 = vld [vmem:[#allocation2 + $0xf0] sm:$0xff]  ;;  %v17559_v22 = vpop.f32.mrf.mxu1 }
 0x407   : > { %v12587_v28 = vpop.f32.mrf.mxu0  ;;  %11927 = vst.msk [vmem:[#allocation2 + $0xf8] sm:$0xff] %vm282_vm1, %v11895_v21  ;;  %v11894_v38 = vadd.f32 %v11862_v25, %v11823_v48  ;;  %12350 = vst.msk [vmem:[#allocation2 + $0x10] sm:$0xff] %vm282_vm1, %v12318_v20  ;;  %v12321_v43 = vadd.f32 %v17559_v22, %v12289_v39  ;;  %v12297_v21 = vld [vmem:[#allocation2 + $0x68] sm:$0xff] }
 0x408   : > { %v12737_v27 = vld [vmem:[#allocation2 + $0x8] sm:$0xff]  ;;  %v12145_v35 = vpop.f32.mrf.mxu1 }
 0x409   : > { %v17609_v8 = vpop.f32.mrf.mxu0  ;;  %11926 = vst.msk [vmem:[#allocation2 + $0xf0] sm:$0xff] %vm282_vm1, %v11894_v38  ;;  %12353 = vst.msk [vmem:[#allocation2 + $0x28] sm:$0xff] %vm282_vm1, %v12321_v43  ;;  %v12769_v33 = vadd.f32 %v17603_v42, %v12737_v27  ;;  %v12320_v4 = vadd.f32 %v12288_v12, %v12145_v35 }
 0x40a   : > { %v12736_v41 = vld [vmem:[#allocation2] sm:$0xff]  ;;  %v17562_v49 = vpop.f32.mrf.mxu1 }
 0x40b   : > { %v12597_v52 = vpop.f32.mrf.mxu0  ;;  %12801 = vst.msk [vmem:[#allocation2 + $0x8] sm:$0xff] %vm282_vm1, %v12769_v33  ;;  %12352 = vst.msk [vmem:[#allocation2 + $0x20] sm:$0xff] %vm282_vm1, %v12320_v4  ;;  %v12768_v36 = vadd.f32 %v12736_v41, %v12577_v56  ;;  %v12323_v31 = vadd.f32 %v17562_v49, %v12291_v19 }
 0x40c   : > { %v12739_v3 = vld [vmem:[#allocation2 + $0x18] sm:$0xff]  ;;  %v12155_v9 = vpop.f32.mrf.mxu1 }
 0x40d   : > { %v17612_v62 = vpop.f32.mrf.mxu0  ;;  %12800 = vst.msk [vmem:[#allocation2] sm:$0xff] %vm282_vm1, %v12768_v36  ;;  %12355 = vst.msk [vmem:[#allocation2 + $0x38] sm:$0xff] %vm282_vm1, %v12323_v31  ;;  %v12771_v37 = vadd.f32 %v17606_v59, %v12739_v3  ;;  %v12322_v23 = vadd.f32 %v12290_v16, %v12155_v9 }
 0x40e   : > { %v12738_v34 = vld [vmem:[#allocation2 + $0x10] sm:$0xff]  ;;  %v17565_v40 = vpop.f32.mrf.mxu1 }
 0x40f   : > { %v12607_v44 = vpop.f32.mrf.mxu0  ;;  %12803 = vst.msk [vmem:[#allocation2 + $0x18] sm:$0xff] %vm282_vm1, %v12771_v37  ;;  %12354 = vst.msk [vmem:[#allocation2 + $0x30] sm:$0xff] %vm282_vm1, %v12322_v23  ;;  %v12770_v53 = vadd.f32 %v12738_v34, %v12587_v28  ;;  %v12325_v32 = vadd.f32 %v17565_v40, %v12293_v55 }
 0x410   : > { %v12741_v51 = vld [vmem:[#allocation2 + $0x28] sm:$0xff]  ;;  %v12165_v15 = vpop.f32.mrf.mxu1 }
 0x411   : > { %v17615_v29 = vpop.f32.mrf.mxu0  ;;  %12802 = vst.msk [vmem:[#allocation2 + $0x10] sm:$0xff] %vm282_vm1, %v12770_v53  ;;  %12357 = vst.msk [vmem:[#allocation2 + $0x48] sm:$0xff] %vm282_vm1, %v12325_v32  ;;  %v12773_v26 = vadd.f32 %v17609_v8, %v12741_v51  ;;  %v12324_v50 = vadd.f32 %v12292_v5, %v12165_v15  ;;  %v12296_v8 = vld [vmem:[#allocation2 + $0x60] sm:$0xff] }
 0x412   : > { %v12833_v10 = vld [vmem:[#allocation2 + $0x8] sm:$0xff]  ;;  %v12740_v17 = vld [vmem:[#allocation2 + $0x20] sm:$0xff]  ;;  %v17568_v45 = vpop.f32.mrf.mxu1 }
 0x413   : > { %v12617_v58 = vpop.f32.mrf.mxu0  ;;  %v12870_v48 = vadd.f32 %v21813_v54, %v12833_v10  ;;  %12805 = vst.msk [vmem:[#allocation2 + $0x28] sm:$0xff] %vm282_vm1, %v12773_v26  ;;  %12356 = vst.msk [vmem:[#allocation2 + $0x40] sm:$0xff] %vm282_vm1, %v12324_v50  ;;  %v12772_v14 = vadd.f32 %v12740_v17, %v12597_v52  ;;  %v12327_v13 = vadd.f32 %v17568_v45, %v12295_v61  ;;  %v12298_v26 = vld [vmem:[#allocation2 + $0x70] sm:$0xff] }
 0x414   : > { %v12832_v2 = vld [vmem:[#allocation2] sm:$0xff]  ;;  %v12743_v1 = vld [vmem:[#allocation2 + $0x38] sm:$0xff]  ;;  %v12175_v57 = vpop.f32.mrf.mxu1 }
 0x415   : > { %v21820_v42 = vpop.f32.mrf.mxu0  ;;  %15372 = vst.msk [vmem:[%s19533_s14 + $0x208] sm:$0xff] %vm282_vm1, %v12870_v48  ;;  %v12869_v46 = vadd.f32 %v21813_v54, %v12832_v2  ;;  %12804 = vst.msk [vmem:[#allocation2 + $0x20] sm:$0xff] %vm282_vm1, %v12772_v14  ;;  %v12775_v6 = vadd.f32 %v17612_v62, %v12743_v1  ;;  %v12326_v18 = vadd.f32 %v12294_v0, %v12175_v57  ;;  %v12935_v43 = vsel %vm282_vm1, %v12870_v48, 0.0  ;;  %v12299_v62 = vld [vmem:[#allocation2 + $0x78] sm:$0xff] }
 0x416   : > { %12359 = vst.msk [vmem:[#allocation2 + $0x58] sm:$0xff] %vm282_vm1, %v12327_v13  ;;  %v12835_v7 = vld [vmem:[#allocation2 + $0x18] sm:$0xff]  ;;  %v12742_v56 = vld [vmem:[#allocation2 + $0x30] sm:$0xff]  ;;  %v17571_v63 = vpop.f32.mrf.mxu1  ;;  %v13004_v47 = vmul.f32 %v12870_v48, %v12870_v48 }
 0x417   : > { %v21827_v30 = vpop.f32.mrf.mxu0  ;;  %15371 = vst.msk [vmem:[%s19533_s14 + $0x200] sm:$0xff] %vm282_vm1, %v12869_v46  ;;  %v12934_v24 = vsel %vm282_vm1, %v12869_v46, 0.0  ;;  %v13003_v11 = vmul.f32 %v12869_v46, %v12869_v46  ;;  %v12872_v59 = vadd.f32 %v21813_v54, %v12835_v7  ;;  %12807 = vst.msk [vmem:[#allocation2 + $0x38] sm:$0xff] %vm282_vm1, %v12775_v6  ;;  %v12774_v25 = vadd.f32 %v12742_v56, %v12607_v44  ;;  %v12301_v46 = vld [vmem:[#allocation2 + $0x88] sm:$0xff]  ;;  %v12300_v56 = vld [vmem:[#allocation2 + $0x80] sm:$0xff] }
 0x418   : > { %v12834_v20 = vld [vmem:[#allocation2 + $0x10] sm:$0xff]  ;;  %12358 = vst.msk [vmem:[#allocation2 + $0x50] sm:$0xff] %vm282_vm1, %v12326_v18  ;;  %v12329_v22 = vadd.f32 %v17571_v63, %v12297_v21  ;;  %v12745_v39 = vld [vmem:[#allocation2 + $0x48] sm:$0xff]  ;;  %v12185_v28 = vpop.f32.mrf.mxu1  ;;  %v12936_v33 = vadd.f32 %v12935_v43, %v12934_v24  ;;  %v13036_v31 = vsel %vm282_vm1, %v13004_v47, 0.0 }
 0x419   : > { %v21835_v38 = vpop.f32.mrf.mxu0  ;;  %v13035_v27 = vsel %vm282_vm1, %v13003_v11, 0.0  ;;  %15374 = vst.msk [vmem:[%s19533_s14 + $0x218] sm:$0xff] %vm282_vm1, %v12872_v59  ;;  %v13006_v35 = vmul.f32 %v12872_v59, %v12872_v59  ;;  %v12871_v12 = vadd.f32 %v21813_v54, %v12834_v20  ;;  %12806 = vst.msk [vmem:[#allocation2 + $0x30] sm:$0xff] %vm282_vm1, %v12774_v25  ;;  %v12777_v41 = vadd.f32 %v17615_v29, %v12745_v39 }
 0x41a   : > { %v12837_v4 = vld [vmem:[#allocation2 + $0x28] sm:$0xff]  ;;  %12361 = vst.msk [vmem:[#allocation2 + $0x68] sm:$0xff] %vm282_vm1, %v12329_v22  ;;  %v12328_v49 = vadd.f32 %v12296_v8, %v12185_v28  ;;  %v12744_v19 = vld [vmem:[#allocation2 + $0x40] sm:$0xff]  ;;  %v17574_v52 = vpop.f32.mrf.mxu1  ;;  %v13037_v37 = vadd.f32 %v13036_v31, %v13035_v27  ;;  %v12939_v51 = vsel %vm282_vm1, %v12872_v59, 0.0  ;;  %v12303_v28 = vld [vmem:[#allocation2 + $0x98] sm:$0xff] }
 0x41b   : > { %v21844_v36 = vpop.f32.mrf.mxu0  ;;  %15373 = vst.msk [vmem:[%s19533_s14 + $0x210] sm:$0xff] %vm282_vm1, %v12871_v12  ;;  %v12937_v3 = vsel %vm282_vm1, %v12871_v12, 0.0  ;;  %v13005_v9 = vmul.f32 %v12871_v12, %v12871_v12  ;;  %v12874_v16 = vadd.f32 %v21813_v54, %v12837_v4  ;;  %12809 = vst.msk [vmem:[#allocation2 + $0x48] sm:$0xff] %vm282_vm1, %v12777_v41  ;;  %v12776_v40 = vadd.f32 %v12744_v19, %v12617_v58 }
 0x41c   : > { %v12938_v23 = vadd.f32 %v12937_v3, %v12936_v33  ;;  %v12836_v34 = vld [vmem:[#allocation2 + $0x20] sm:$0xff]  ;;  %12360 = vst.msk [vmem:[#allocation2 + $0x60] sm:$0xff] %vm282_vm1, %v12328_v49  ;;  %v12331_v55 = vadd.f32 %v17574_v52, %v12299_v62  ;;  %v12195_v53 = vpop.f32.mrf.mxu1  ;;  %v13040_v15 = vsel %vm282_vm1, %v13006_v35, 0.0  ;;  %v12302_v52 = vld [vmem:[#allocation2 + $0x90] sm:$0xff] }
 0x41d   : > { %v12747_v44 = vld [vmem:[#allocation2 + $0x58] sm:$0xff]  ;;  %v21853_v32 = vpop.f32.mrf.mxu0  ;;  %v13038_v5 = vsel %vm282_vm1, %v13005_v9, 0.0  ;;  %15376 = vst.msk [vmem:[%s19533_s14 + $0x228] sm:$0xff] %vm282_vm1, %v12874_v16  ;;  %v12873_v29 = vadd.f32 %v21813_v54, %v12836_v34  ;;  %12808 = vst.msk [vmem:[#allocation2 + $0x40] sm:$0xff] %vm282_vm1, %v12776_v40  ;;  %v12330_v61 = vadd.f32 %v12298_v26, %v12195_v53  ;;  %v13008_v14 = vmul.f32 %v12874_v16, %v12874_v16  ;;  %v12305_v53 = vld [vmem:[#allocation2 + $0xa8] sm:$0xff] }
 0x41e   : > { %v13039_v50 = vadd.f32 %v13038_v5, %v13037_v37  ;;  %v12940_v10 = vadd.f32 %v12939_v51, %v12938_v23  ;;  %v12839_v17 = vld [vmem:[#allocation2 + $0x38] sm:$0xff]  ;;  %12363 = vst.msk [vmem:[#allocation2 + $0x78] sm:$0xff] %vm282_vm1, %v12331_v55  ;;  %v12779_v45 = vadd.f32 %v21820_v42, %v12747_v44  ;;  %v17577_v58 = vpop.f32.mrf.mxu1  ;;  %v12943_v47 = vsel %vm282_vm1, %v12874_v16, 0.0 }
 0x41f   : > { %v21864_v48 = vpop.f32.mrf.mxu0  ;;  %15375 = vst.msk [vmem:[%s19533_s14 + $0x220] sm:$0xff] %vm282_vm1, %v12873_v29  ;;  %v12941_v13 = vsel %vm282_vm1, %v12873_v29, 0.0  ;;  %v13007_v2 = vmul.f32 %v12873_v29, %v12873_v29  ;;  %v12876_v1 = vadd.f32 %v21813_v54, %v12839_v17  ;;  %v12746_v57 = vld [vmem:[#allocation2 + $0x50] sm:$0xff]  ;;  %12362 = vst.msk [vmem:[#allocation2 + $0x70] sm:$0xff] %vm282_vm1, %v12330_v61  ;;  %v12333_v7 = vadd.f32 %v17577_v58, %v12301_v46 }
 0x420   : > { %v12942_v6 = vadd.f32 %v12941_v13, %v12940_v10  ;;  %v13041_v0 = vadd.f32 %v13040_v15, %v13039_v50  ;;  %12811 = vst.msk [vmem:[#allocation2 + $0x58] sm:$0xff] %vm282_vm1, %v12779_v45  ;;  %v12778_v42 = vadd.f32 %v12746_v57, %v21827_v30  ;;  %v12205_v18 = vpop.f32.mrf.mxu1  ;;  %v12838_v11 = vld [vmem:[#allocation2 + $0x30] sm:$0xff]  ;;  %v13044_v27 = vsel %vm282_vm1, %v13008_v14, 0.0  ;;  %v12304_v14 = vld [vmem:[#allocation2 + $0xa0] sm:$0xff] }
 0x421   : > { %v21873_v63 = vpop.f32.mrf.mxu0  ;;  %v13042_v24 = vsel %vm282_vm1, %v13007_v2, 0.0  ;;  %15378 = vst.msk [vmem:[%s19533_s14 + $0x238] sm:$0xff] %vm282_vm1, %v12876_v1  ;;  %v12749_v59 = vld [vmem:[#allocation2 + $0x68] sm:$0xff]  ;;  %v12332_v21 = vadd.f32 %v12300_v56, %v12205_v18  ;;  %v12875_v25 = vadd.f32 %v21813_v54, %v12838_v11  ;;  %12365 = vst.msk [vmem:[#allocation2 + $0x88] sm:$0xff] %vm282_vm1, %v12333_v7  ;;  %v13010_v35 = vmul.f32 %v12876_v1, %v12876_v1 }
 0x422   : > { %v13043_v20 = vadd.f32 %v13042_v24, %v13041_v0  ;;  %v12944_v22 = vadd.f32 %v12943_v47, %v12942_v6  ;;  %12810 = vst.msk [vmem:[#allocation2 + $0x50] sm:$0xff] %vm282_vm1, %v12778_v42  ;;  %v12781_v30 = vadd.f32 %v21835_v38, %v12749_v59  ;;  %v17580_v39 = vpop.f32.mrf.mxu1  ;;  %v12841_v12 = vld [vmem:[#allocation2 + $0x48] sm:$0xff]  ;;  %v12947_v23 = vsel %vm282_vm1, %v12876_v1, 0.0 }
 0x423   : > { %v21883_v43 = vpop.f32.mrf.mxu0  ;;  %12364 = vst.msk [vmem:[#allocation2 + $0x80] sm:$0xff] %vm282_vm1, %v12332_v21  ;;  %v12748_v8 = vld [vmem:[#allocation2 + $0x60] sm:$0xff]  ;;  %v12335_v33 = vadd.f32 %v17580_v39, %v12303_v28  ;;  %15377 = vst.msk [vmem:[%s19533_s14 + $0x230] sm:$0xff] %vm282_vm1, %v12875_v25  ;;  %v12945_v4 = vsel %vm282_vm1, %v12875_v25, 0.0  ;;  %v13009_v41 = vmul.f32 %v12875_v25, %v12875_v25  ;;  %v12878_v38 = vadd.f32 %v21813_v54, %v12841_v12  ;;  %v12307_v28 = vld [vmem:[#allocation2 + $0xb8] sm:$0xff] }
 0x424   : > { %v13045_v49 = vadd.f32 %v13044_v27, %v13043_v20  ;;  %12813 = vst.msk [vmem:[#allocation2 + $0x68] sm:$0xff] %vm282_vm1, %v12781_v30  ;;  %v12215_v19 = vpop.f32.mrf.mxu1  ;;  %v12946_v3 = vadd.f32 %v12945_v4, %v12944_v22  ;;  %v12840_v9 = vld [vmem:[#allocation2 + $0x40] sm:$0xff]  ;;  %v12780_v16 = vadd.f32 %v12748_v8, %v21844_v36  ;;  %v13048_v10 = vsel %vm282_vm1, %v13010_v35, 0.0  ;;  %v12306_v4 = vld [vmem:[#allocation2 + $0xb0] sm:$0xff] }
 0x425   : > { %v21892_v31 = vpop.f32.mrf.mxu0  ;;  %12367 = vst.msk [vmem:[#allocation2 + $0x98] sm:$0xff] %vm282_vm1, %v12335_v33  ;;  %v12751_v62 = vld [vmem:[#allocation2 + $0x78] sm:$0xff]  ;;  %v12334_v37 = vadd.f32 %v12302_v52, %v12215_v19  ;;  %v13046_v34 = vsel %vm282_vm1, %v13009_v41, 0.0  ;;  %15380 = vst.msk [vmem:[%s19533_s14 + $0x248] sm:$0xff] %vm282_vm1, %v12878_v38  ;;  %v13012_v40 = vmul.f32 %v12878_v38, %v12878_v38  ;;  %v12877_v55 = vadd.f32 %v21813_v54, %v12840_v9 }
 0x426   : > { %v17583_v44 = vpop.f32.mrf.mxu1  ;;  %v13047_v15 = vadd.f32 %v13046_v34, %v13045_v49  ;;  %v12948_v36 = vadd.f32 %v12947_v23, %v12946_v3  ;;  %12812 = vst.msk [vmem:[#allocation2 + $0x60] sm:$0xff] %vm282_vm1, %v12780_v16  ;;  %v12783_v29 = vadd.f32 %v21853_v32, %v12751_v62  ;;  %v12750_v26 = vld [vmem:[#allocation2 + $0x70] sm:$0xff]  ;;  %v12951_v0 = vsel %vm282_vm1, %v12878_v38, 0.0  ;;  %v12309_v34 = vld [vmem:[#allocation2 + $0xc8] sm:$0xff] }
 0x427   : > { %v21901_v51 = vpop.f32.mrf.mxu0  ;;  %v12843_v5 = vld [vmem:[#allocation2 + $0x58] sm:$0xff]  ;;  %12366 = vst.msk [vmem:[#allocation2 + $0x90] sm:$0xff] %vm282_vm1, %v12334_v37  ;;  %v12337_v50 = vadd.f32 %v17583_v44, %v12305_v53  ;;  %15379 = vst.msk [vmem:[%s19533_s14 + $0x240] sm:$0xff] %vm282_vm1, %v12877_v55  ;;  %v12949_v17 = vsel %vm282_vm1, %v12877_v55, 0.0  ;;  %v13011_v45 = vmul.f32 %v12877_v55, %v12877_v55  ;;  %v12782_v57 = vadd.f32 %v12750_v26, %v21864_v48 }
 0x428   : > { %v12880_v61 = vadd.f32 %v21813_v54, %v12843_v5  ;;  %v12225_v58 = vpop.f32.mrf.mxu1  ;;  %v12950_v2 = vadd.f32 %v12949_v17, %v12948_v36  ;;  %v13049_v32 = vadd.f32 %v13048_v10, %v13047_v15  ;;  %12815 = vst.msk [vmem:[#allocation2 + $0x78] sm:$0xff] %vm282_vm1, %v12783_v29  ;;  %v12753_v46 = vld [vmem:[#allocation2 + $0x88] sm:$0xff]  ;;  %v13052_v42 = vsel %vm282_vm1, %v13012_v40, 0.0 }
 0x429   : > { %v21911_v13 = vpop.f32.mrf.mxu0  ;;  %v12842_v1 = vld [vmem:[#allocation2 + $0x50] sm:$0xff]  ;;  %12369 = vst.msk [vmem:[#allocation2 + $0xa8] sm:$0xff] %vm282_vm1, %v12337_v50  ;;  %v12336_v6 = vadd.f32 %v12304_v14, %v12225_v58  ;;  %v13050_v7 = vsel %vm282_vm1, %v13011_v45, 0.0  ;;  %12814 = vst.msk [vmem:[#allocation2 + $0x70] sm:$0xff] %vm282_vm1, %v12782_v57  ;;  %v12785_v21 = vadd.f32 %v21873_v63, %v12753_v46  ;;  %v12308_v50 = vld [vmem:[#allocation2 + $0xc0] sm:$0xff] }
 0x42a   : > { %15382 = vst.msk [vmem:[%s19533_s14 + $0x258] sm:$0xff] %vm282_vm1, %v12880_v61  ;;  %v12879_v18 = vadd.f32 %v21813_v54, %v12842_v1  ;;  %v12752_v56 = vld [vmem:[#allocation2 + $0x80] sm:$0xff]  ;;  %v17586_v47 = vpop.f32.mrf.mxu1  ;;  %v13051_v48 = vadd.f32 %v13050_v7, %v13049_v32  ;;  %v12952_v11 = vadd.f32 %v12951_v0, %v12950_v2  ;;  %v13014_v25 = vmul.f32 %v12880_v61, %v12880_v61 }
 0x42b   : > { %v21922_v24 = vpop.f32.mrf.mxu0  ;;  %v12845_v59 = vld [vmem:[#allocation2 + $0x68] sm:$0xff]  ;;  %12368 = vst.msk [vmem:[#allocation2 + $0xa0] sm:$0xff] %vm282_vm1, %v12336_v6  ;;  %v12784_v20 = vadd.f32 %v12752_v56, %v21883_v43  ;;  %12817 = vst.msk [vmem:[#allocation2 + $0x88] sm:$0xff] %vm282_vm1, %v12785_v21  ;;  %v12339_v43 = vadd.f32 %v17586_v47, %v12307_v28  ;;  %v12955_v41 = vsel %vm282_vm1, %v12880_v61, 0.0  ;;  %v12311_v6 = vld [vmem:[#allocation2 + $0xd8] sm:$0xff] }
 0x42c   : > { %15381 = vst.msk [vmem:[%s19533_s14 + $0x250] sm:$0xff] %vm282_vm1, %v12879_v18  ;;  %v12953_v22 = vsel %vm282_vm1, %v12879_v18, 0.0  ;;  %v13013_v30 = vmul.f32 %v12879_v18, %v12879_v18  ;;  %v12882_v39 = vadd.f32 %v21813_v54, %v12845_v59  ;;  %v12755_v27 = vld [vmem:[#allocation2 + $0x98] sm:$0xff]  ;;  %v12235_v35 = vpop.f32.mrf.mxu1  ;;  %v13053_v63 = vadd.f32 %v13052_v42, %v13051_v48 }
 0x42d   : > { %v21932_v12 = vpop.f32.mrf.mxu0  ;;  %v12954_v8 = vadd.f32 %v12953_v22, %v12952_v11  ;;  %12816 = vst.msk [vmem:[#allocation2 + $0x80] sm:$0xff] %vm282_vm1, %v12784_v20  ;;  %v12787_v33 = vadd.f32 %v21892_v31, %v12755_v27  ;;  %v12844_v19 = vld [vmem:[#allocation2 + $0x60] sm:$0xff]  ;;  %v12338_v52 = vadd.f32 %v12306_v4, %v12235_v35  ;;  %12371 = vst.msk [vmem:[#allocation2 + $0xb8] sm:$0xff] %vm282_vm1, %v12339_v43  ;;  %v13056_v40 = vsel %vm282_vm1, %v13014_v25, 0.0  ;;  %v12310_v20 = vld [vmem:[#allocation2 + $0xd0] sm:$0xff] }
 0x42e   : > { %v13054_v49 = vsel %vm282_vm1, %v13013_v30, 0.0  ;;  %15384 = vst.msk [vmem:[%s19533_s14 + $0x268] sm:$0xff] %vm282_vm1, %v12882_v39  ;;  %v13016_v38 = vmul.f32 %v12882_v39, %v12882_v39  ;;  %v12754_v3 = vld [vmem:[#allocation2 + $0x90] sm:$0xff]  ;;  %v17589_v9 = vpop.f32.mrf.mxu1  ;;  %v12881_v37 = vadd.f32 %v21813_v54, %v12844_v19  ;;  %v12959_v32 = vsel %vm282_vm1, %v12882_v39, 0.0 }
 0x42f   : > { %v21941_v16 = vpop.f32.mrf.mxu0  ;;  %v13055_v62 = vadd.f32 %v13054_v49, %v13053_v63  ;;  %v12956_v23 = vadd.f32 %v12955_v41, %v12954_v8  ;;  %12819 = vst.msk [vmem:[#allocation2 + $0x98] sm:$0xff] %vm282_vm1, %v12787_v33  ;;  %v12786_v31 = vadd.f32 %v12754_v3, %v21901_v51  ;;  %v12847_v55 = vld [vmem:[#allocation2 + $0x78] sm:$0xff]  ;;  %12370 = vst.msk [vmem:[#allocation2 + $0xb0] sm:$0xff] %vm282_vm1, %v12338_v52 }
 0x430   : > { %v12341_v44 = vadd.f32 %v17589_v9, %v12309_v34  ;;  %v12757_v53 = vld [vmem:[#allocation2 + $0xa8] sm:$0xff]  ;;  %v12245_v15 = vpop.f32.mrf.mxu1  ;;  %15383 = vst.msk [vmem:[%s19533_s14 + $0x260] sm:$0xff] %vm282_vm1, %v12881_v37  ;;  %v12957_v5 = vsel %vm282_vm1, %v12881_v37, 0.0  ;;  %v13015_v29 = vmul.f32 %v12881_v37, %v12881_v37  ;;  %v12884_v51 = vadd.f32 %v21813_v54, %v12847_v55  ;;  %v12846_v17 = vld [vmem:[#allocation2 + $0x70] sm:$0xff] }
 0x431   : > { %v21949_v36 = vpop.f32.mrf.mxu0  ;;  %v13057_v26 = vadd.f32 %v13056_v40, %v13055_v62  ;;  %12818 = vst.msk [vmem:[#allocation2 + $0x90] sm:$0xff] %vm282_vm1, %v12786_v31  ;;  %v12958_v10 = vadd.f32 %v12957_v5, %v12956_v23  ;;  %v12789_v45 = vadd.f32 %v21911_v13, %v12757_v53  ;;  %v12340_v61 = vadd.f32 %v12308_v50, %v12245_v15 }
 0x432   : > { %12373 = vst.msk [vmem:[#allocation2 + $0xc8] sm:$0xff] %vm282_vm1, %v12341_v44  ;;  %v12756_v58 = vld [vmem:[#allocation2 + $0xa0] sm:$0xff]  ;;  %v17592_v14 = vpop.f32.mrf.mxu1  ;;  %v13060_v1 = vsel %vm282_vm1, %v13016_v38, 0.0  ;;  %v13058_v57 = vsel %vm282_vm1, %v13015_v29, 0.0  ;;  %15386 = vst.msk [vmem:[%s19533_s14 + $0x278] sm:$0xff] %vm282_vm1, %v12884_v51  ;;  %v12883_v46 = vadd.f32 %v21813_v54, %v12846_v17  ;;  %v12849_v13 = vld [vmem:[#allocation2 + $0x88] sm:$0xff]  ;;  %v13018_v48 = vmul.f32 %v12884_v51, %v12884_v51 }
 0x433   : > { %v21958_v2 = vpop.f32.mrf.mxu0  ;;  %v13059_v0 = vadd.f32 %v13058_v57, %v13057_v26  ;;  %v12960_v42 = vadd.f32 %v12959_v32, %v12958_v10  ;;  %12821 = vst.msk [vmem:[#allocation2 + $0xa8] sm:$0xff] %vm282_vm1, %v12789_v45  ;;  %12372 = vst.msk [vmem:[#allocation2 + $0xc0] sm:$0xff] %vm282_vm1, %v12340_v61  ;;  %v12788_v18 = vadd.f32 %v12756_v58, %v21922_v24  ;;  %v12963_v35 = vsel %vm282_vm1, %v12884_v51, 0.0  ;;  %v12313_v10 = vld [vmem:[#allocation2 + $0xe8] sm:$0xff] }
 0x434   : > { %v12848_v7 = vld [vmem:[#allocation2 + $0x80] sm:$0xff]  ;;  %v12343_v56 = vadd.f32 %v17592_v14, %v12311_v6  ;;  %v12255_v47 = vpop.f32.mrf.mxu1  ;;  %15385 = vst.msk [vmem:[%s19533_s14 + $0x270] sm:$0xff] %vm282_vm1, %v12883_v46  ;;  %v12961_v11 = vsel %vm282_vm1, %v12883_v46, 0.0  ;;  %v13017_v59 = vmul.f32 %v12883_v46, %v12883_v46  ;;  %v12886_v21 = vadd.f32 %v21813_v54, %v12849_v13  ;;  %v12759_v33 = vld [vmem:[#allocation2 + $0xb8] sm:$0xff] }
 0x435   : > { %v12962_v25 = vadd.f32 %v12961_v11, %v12960_v42  ;;  %v13061_v22 = vadd.f32 %v13060_v1, %v13059_v0  ;;  %v12885_v30 = vadd.f32 %v21813_v54, %v12848_v7  ;;  %12820 = vst.msk [vmem:[#allocation2 + $0xa0] sm:$0xff] %vm282_vm1, %v12788_v18  ;;  %v12342_v24 = vadd.f32 %v12310_v20, %v12255_v47  ;;  %v21976_v27 = vpop.f32.mrf.mxu0  ;;  %v12312_v14 = vld [vmem:[#allocation2 + $0xe0] sm:$0xff]  ;;  %v12315_v18 = vld [vmem:[#allocation2 + $0xf8] sm:$0xff] }
 0x436   : > { %v12851_v39 = vld [vmem:[#allocation2 + $0x98] sm:$0xff]  ;;  %12375 = vst.msk [vmem:[#allocation2 + $0xd8] sm:$0xff] %vm282_vm1, %v12343_v56  ;;  %v17595_v28 = vpop.f32.mrf.mxu1  ;;  %v13062_v8 = vsel %vm282_vm1, %v13017_v59, 0.0  ;;  %15388 = vst.msk [vmem:[%s19533_s14 + $0x288] sm:$0xff] %vm282_vm1, %v12886_v21  ;;  %v13020_v63 = vmul.f32 %v12886_v21, %v12886_v21  ;;  %v12758_v52 = vld [vmem:[#allocation2 + $0xb0] sm:$0xff]  ;;  %v13064_v9 = vsel %vm282_vm1, %v13018_v48, 0.0  ;;  %v12791_v55 = vadd.f32 %v21932_v12, %v12759_v33 }
 0x437   : > { %v12888_v43 = vadd.f32 %v21813_v54, %v12851_v39  ;;  %v13063_v4 = vadd.f32 %v13062_v8, %v13061_v22  ;;  %15387 = vst.msk [vmem:[%s19533_s14 + $0x280] sm:$0xff] %vm282_vm1, %v12885_v30  ;;  %v12964_v41 = vadd.f32 %v12963_v35, %v12962_v25  ;;  %v12965_v49 = vsel %vm282_vm1, %v12885_v30, 0.0  ;;  %12374 = vst.msk [vmem:[#allocation2 + $0xd0] sm:$0xff] %vm282_vm1, %v12342_v24  ;;  %v12707_v15 = vpop.f32.mrf.mxu0  ;;  %v12314_v56 = vld [vmem:[#allocation2 + $0xf0] sm:$0xff] }
 0x438   : > { %v13019_v38 = vmul.f32 %v12885_v30, %v12885_v30  ;;  %v12850_v19 = vld [vmem:[#allocation2 + $0x90] sm:$0xff]  ;;  %v12265_v3 = vpop.f32.mrf.mxu1  ;;  %v12967_v62 = vsel %vm282_vm1, %v12886_v21, 0.0  ;;  %v13068_v37 = vsel %vm282_vm1, %v13020_v63, 0.0  ;;  %v12790_v50 = vadd.f32 %v12758_v52, %v21941_v16  ;;  %12823 = vst.msk [vmem:[#allocation2 + $0xb8] sm:$0xff] %vm282_vm1, %v12791_v55 }
 0x439   : > { %15390 = vst.msk [vmem:[%s19533_s14 + $0x298] sm:$0xff] %vm282_vm1, %v12888_v43  ;;  %v12887_v23 = vadd.f32 %v21813_v54, %v12850_v19  ;;  %v12966_v31 = vadd.f32 %v12965_v49, %v12964_v41  ;;  %v13065_v34 = vadd.f32 %v13064_v9, %v13063_v4  ;;  %v12761_v44 = vld [vmem:[#allocation2 + $0xc8] sm:$0xff]  ;;  %v13022_v5 = vmul.f32 %v12888_v43, %v12888_v43  ;;  %v17645_v47 = vpop.f32.mrf.mxu0 }
 0x43a   : > { %v13066_v40 = vsel %vm282_vm1, %v13019_v38, 0.0  ;;  %v17598_v53 = vpop.f32.mrf.mxu1  ;;  %v12853_v51 = vld [vmem:[#allocation2 + $0xa8] sm:$0xff]  ;;  %v12760_v17 = vld [vmem:[#allocation2 + $0xc0] sm:$0xff]  ;;  %v12345_v12 = vadd.f32 %v17595_v28, %v12313_v10  ;;  %12822 = vst.msk [vmem:[#allocation2 + $0xb0] sm:$0xff] %vm282_vm1, %v12790_v50  ;;  %v12793_v46 = vadd.f32 %v21949_v36, %v12761_v44  ;;  %v12344_v16 = vadd.f32 %v12312_v14, %v12265_v3 }
 0x43b   : > { %15389 = vst.msk [vmem:[%s19533_s14 + $0x290] sm:$0xff] %vm282_vm1, %v12887_v23  ;;  %v12969_v29 = vsel %vm282_vm1, %v12887_v23, 0.0  ;;  %v13021_v26 = vmul.f32 %v12887_v23, %v12887_v23  ;;  %v13067_v45 = vadd.f32 %v13066_v40, %v13065_v34  ;;  %v12968_v61 = vadd.f32 %v12967_v62, %v12966_v31  ;;  %v12717_v35 = vpop.f32.mrf.mxu0 }
 0x43c   : > { %v12890_v58 = vadd.f32 %v21813_v54, %v12853_v51  ;;  %v12275_v32 = vpop.f32.mrf.mxu1  ;;  %v12852_v57 = vld [vmem:[#allocation2 + $0xa0] sm:$0xff]  ;;  %v12792_v6 = vadd.f32 %v12760_v17, %v21958_v2  ;;  %v12971_v42 = vsel %vm282_vm1, %v12888_v43, 0.0  ;;  %12377 = vst.msk [vmem:[#allocation2 + $0xe8] sm:$0xff] %vm282_vm1, %v12345_v12  ;;  %12825 = vst.msk [vmem:[#allocation2 + $0xc8] sm:$0xff] %vm282_vm1, %v12793_v46  ;;  %v12347_v36 = vadd.f32 %v17598_v53, %v12315_v18 }
 0x43d   : > { %v13070_v1 = vsel %vm282_vm1, %v13021_v26, 0.0  ;;  %v12763_v0 = vld [vmem:[#allocation2 + $0xd8] sm:$0xff]  ;;  %v12970_v13 = vadd.f32 %v12969_v29, %v12968_v61  ;;  %v13069_v7 = vadd.f32 %v13068_v37, %v13067_v45  ;;  %v12889_v48 = vadd.f32 %v21813_v54, %v12852_v57  ;;  %12376 = vst.msk [vmem:[#allocation2 + $0xe0] sm:$0xff] %vm282_vm1, %v12344_v16  ;;  %v17648_v34 = vpop.f32.mrf.mxu0 }
 0x43e   : > { %15392 = vst.msk [vmem:[%s19533_s14 + $0x2a8] sm:$0xff] %vm282_vm1, %v12890_v58  ;;  %12824 = vst.msk [vmem:[#allocation2 + $0xc0] sm:$0xff] %vm282_vm1, %v12792_v6  ;;  %v12795_v2 = vadd.f32 %v21976_v27, %v12763_v0  ;;  %v12346_v11 = vadd.f32 %v12314_v56, %v12275_v32  ;;  %v12762_v59 = vld [vmem:[#allocation2 + $0xd0] sm:$0xff]  ;;  %v13072_v22 = vsel %vm282_vm1, %v13022_v5, 0.0  ;;  %v13024_v30 = vmul.f32 %v12890_v58, %v12890_v58 }
 0x43f   : > { %v13071_v21 = vadd.f32 %v13070_v1, %v13069_v7  ;;  %v12972_v20 = vadd.f32 %v12971_v42, %v12970_v13  ;;  %v12794_v25 = vadd.f32 %v12762_v59, %v12707_v15  ;;  %15391 = vst.msk [vmem:[%s19533_s14 + $0x2a0] sm:$0xff] %vm282_vm1, %v12889_v48  ;;  %v12973_v39 = vsel %vm282_vm1, %v12889_v48, 0.0  ;;  %12379 = vst.msk [vmem:[#allocation2 + $0xf8] sm:$0xff] %vm282_vm1, %v12347_v36  ;;  %v12855_v43 = vld [vmem:[#allocation2 + $0xb8] sm:$0xff]  ;;  %v12727_v1 = vpop.f32.mrf.mxu0 }
 0x440   : > { %v13023_v24 = vmul.f32 %v12889_v48, %v12889_v48  ;;  %12827 = vst.msk [vmem:[#allocation2 + $0xd8] sm:$0xff] %vm282_vm1, %v12795_v2  ;;  %12378 = vst.msk [vmem:[#allocation2 + $0xf0] sm:$0xff] %vm282_vm1, %v12346_v11  ;;  %v12975_v8 = vsel %vm282_vm1, %v12890_v58, 0.0  ;;  %v12892_v4 = vadd.f32 %v21813_v54, %v12855_v43  ;;  %v13076_v38 = vsel %vm282_vm1, %v13024_v30, 0.0 }
 0x441   : > { %v12974_v28 = vadd.f32 %v12973_v39, %v12972_v20  ;;  %v13073_v27 = vadd.f32 %v13072_v22, %v13071_v21  ;;  %12826 = vst.msk [vmem:[#allocation2 + $0xd0] sm:$0xff] %vm282_vm1, %v12794_v25  ;;  %v12854_v41 = vld [vmem:[#allocation2 + $0xb0] sm:$0xff] }
 0x442   : > { %v13074_v63 = vsel %vm282_vm1, %v13023_v24, 0.0  ;;  %v12891_v19 = vadd.f32 %v21813_v54, %v12854_v41  ;;  %15394 = vst.msk [vmem:[%s19533_s14 + $0x2b8] sm:$0xff] %vm282_vm1, %v12892_v4  ;;  %v13026_v3 = vmul.f32 %v12892_v4, %v12892_v4  ;;  %v12979_v50 = vsel %vm282_vm1, %v12892_v4, 0.0 }
 0x443   : > { %v13075_v33 = vadd.f32 %v13074_v63, %v13073_v27  ;;  %v12976_v49 = vadd.f32 %v12975_v8, %v12974_v28  ;;  %v12765_v52 = vld [vmem:[#allocation2 + $0xe8] sm:$0xff] }
 0x444   : > { %v12857_v62 = vld [vmem:[#allocation2 + $0xc8] sm:$0xff]  ;;  %v12797_v23 = vadd.f32 %v17645_v47, %v12765_v52  ;;  %v12764_v31 = vld [vmem:[#allocation2 + $0xe0] sm:$0xff]  ;;  %15393 = vst.msk [vmem:[%s19533_s14 + $0x2b0] sm:$0xff] %vm282_vm1, %v12891_v19  ;;  %v12977_v40 = vsel %vm282_vm1, %v12891_v19, 0.0  ;;  %v13025_v55 = vmul.f32 %v12891_v19, %v12891_v19  ;;  %v13080_v10 = vsel %vm282_vm1, %v13026_v3, 0.0 }
 0x445   : > { %v13077_v9 = vadd.f32 %v13076_v38, %v13075_v33  ;;  %v12856_v37 = vld [vmem:[#allocation2 + $0xc0] sm:$0xff]  ;;  %v12894_v44 = vadd.f32 %v21813_v54, %v12857_v62  ;;  %v12978_v15 = vadd.f32 %v12977_v40, %v12976_v49  ;;  %v12796_v29 = vadd.f32 %v12764_v31, %v12717_v35 }
 0x446   : > { %v12893_v53 = vadd.f32 %v21813_v54, %v12856_v37  ;;  %12829 = vst.msk [vmem:[#allocation2 + $0xe8] sm:$0xff] %vm282_vm1, %v12797_v23  ;;  %v12767_v26 = vld [vmem:[#allocation2 + $0xf8] sm:$0xff]  ;;  %v13078_v17 = vsel %vm282_vm1, %v13025_v55, 0.0 }
 0x447   : > { %v12859_v5 = vld [vmem:[#allocation2 + $0xd8] sm:$0xff]  ;;  %v12766_v51 = vld [vmem:[#allocation2 + $0xf0] sm:$0xff]  ;;  %15396 = vst.msk [vmem:[%s19533_s14 + $0x2c8] sm:$0xff] %vm282_vm1, %v12894_v44  ;;  %v13079_v58 = vadd.f32 %v13078_v17, %v13077_v9  ;;  %v12980_v12 = vadd.f32 %v12979_v50, %v12978_v15  ;;  %12828 = vst.msk [vmem:[#allocation2 + $0xe0] sm:$0xff] %vm282_vm1, %v12796_v29  ;;  %v13028_v57 = vmul.f32 %v12894_v44, %v12894_v44  ;;  %v12983_v7 = vsel %vm282_vm1, %v12894_v44, 0.0 }
 0x448   : > { %15395 = vst.msk [vmem:[%s19533_s14 + $0x2c0] sm:$0xff] %vm282_vm1, %v12893_v53  ;;  %v12981_v45 = vsel %vm282_vm1, %v12893_v53, 0.0  ;;  %v12858_v61 = vld [vmem:[#allocation2 + $0xd0] sm:$0xff]  ;;  %v13027_v14 = vmul.f32 %v12893_v53, %v12893_v53  ;;  %v12896_v32 = vadd.f32 %v21813_v54, %v12859_v5  ;;  %v12799_v16 = vadd.f32 %v17648_v34, %v12767_v26 }
 0x449   : > { %v12895_v46 = vadd.f32 %v21813_v54, %v12858_v61  ;;  %v12798_v6 = vadd.f32 %v12766_v51, %v12727_v1  ;;  %v12982_v0 = vadd.f32 %v12981_v45, %v12980_v12  ;;  %v13081_v42 = vadd.f32 %v13080_v10, %v13079_v58 }
 0x44a   : > { %v13082_v13 = vsel %vm282_vm1, %v13027_v14, 0.0  ;;  %15398 = vst.msk [vmem:[%s19533_s14 + $0x2d8] sm:$0xff] %vm282_vm1, %v12896_v32  ;;  %12831 = vst.msk [vmem:[#allocation2 + $0xf8] sm:$0xff] %vm282_vm1, %v12799_v16  ;;  %v13084_v36 = vsel %vm282_vm1, %v13028_v57, 0.0  ;;  %v13030_v2 = vmul.f32 %v12896_v32, %v12896_v32  ;;  %v12987_v30 = vsel %vm282_vm1, %v12896_v32, 0.0  ;;  %v13354_v16 = vld [vmem:[%s19533_s14 + $0x8] sm:$0xff] (%p17803_p3) }
 0x44b   : > { %15397 = vst.msk [vmem:[%s19533_s14 + $0x2d0] sm:$0xff] %vm282_vm1, %v12895_v46  ;;  %v12985_v18 = vsel %vm282_vm1, %v12895_v46, 0.0  ;;  %v13029_v56 = vmul.f32 %v12895_v46, %v12895_v46  ;;  %12830 = vst.msk [vmem:[#allocation2 + $0xf0] sm:$0xff] %vm282_vm1, %v12798_v6  ;;  %v13083_v47 = vadd.f32 %v13082_v13, %v13081_v42  ;;  %v12984_v48 = vadd.f32 %v12983_v7, %v12982_v0  ;;  %v13352_v46 = vld [vmem:[%s19533_s14] sm:$0xff] (%p17803_p3)  ;;  %v13358_v6 = vld [vmem:[%s19533_s14 + $0x18] sm:$0xff] (%p17803_p3) }
 0x44c   : > { %v13088_v28 = vsel %vm282_vm1, %v13030_v2, 0.0  ;;  %v13360_v0 = vld [vmem:[%s19533_s14 + $0x20] sm:$0xff] (%p17803_p3)  ;;  %v13362_v42 = vld [vmem:[%s19533_s14 + $0x28] sm:$0xff] (%p17803_p3)  ;;  %13353 = vst [vmem:[%s22094_s22] sm:$0xff] (%p17803_p3), %v13352_v46  ;;  %13355 = vst [vmem:[%s22094_s22 + $0x8] sm:$0xff] (%p17803_p3), %v13354_v16 }
 0x44d   : > { %v13086_v11 = vsel %vm282_vm1, %v13029_v56, 0.0  ;;  %v12861_v59 = vld [vmem:[#allocation2 + $0xe8] sm:$0xff]  ;;  %v12986_v21 = vadd.f32 %v12985_v18, %v12984_v48  ;;  %v13085_v20 = vadd.f32 %v13084_v36, %v13083_v47  ;;  %13359 = vst [vmem:[%s22094_s22 + $0x18] sm:$0xff] (%p17803_p3), %v13358_v6  ;;  %13361 = vst [vmem:[%s22094_s22 + $0x20] sm:$0xff] (%p17803_p3), %v13360_v0  ;;  %v13364_v13 = vld [vmem:[%s19533_s14 + $0x30] sm:$0xff] (%p17803_p3) }
 0x44e   : > { %v12898_v25 = vadd.f32 %v21813_v54, %v12861_v59  ;;  %v12860_v22 = vld [vmem:[#allocation2 + $0xe0] sm:$0xff]  ;;  %13363 = vst [vmem:[%s22094_s22 + $0x28] sm:$0xff] (%p17803_p3), %v13362_v42  ;;  %v13366_v7 = vld [vmem:[%s19533_s14 + $0x38] sm:$0xff] (%p17803_p3)  ;;  %13365 = vst [vmem:[%s22094_s22 + $0x30] sm:$0xff] (%p17803_p3), %v13364_v13 }
 0x44f   : > { %v13087_v39 = vadd.f32 %v13086_v11, %v13085_v20  ;;  %v12897_v24 = vadd.f32 %v21813_v54, %v12860_v22  ;;  %v12988_v27 = vadd.f32 %v12987_v30, %v12986_v21  ;;  %v13368_v18 = vld [vmem:[%s19533_s14 + $0x40] sm:$0xff] (%p17803_p3)  ;;  %13367 = vst [vmem:[%s22094_s22 + $0x38] sm:$0xff] (%p17803_p3), %v13366_v7  ;;  %v13370_v56 = vld [vmem:[%s19533_s14 + $0x48] sm:$0xff] (%p17803_p3)  ;;  %v13372_v47 = vld [vmem:[%s19533_s14 + $0x50] sm:$0xff] (%p17803_p3) }
 0x450   : > { %15400 = vst.msk [vmem:[%s19533_s14 + $0x2e8] sm:$0xff] %vm282_vm1, %v12898_v25  ;;  %v13032_v35 = vmul.f32 %v12898_v25, %v12898_v25  ;;  %v12991_v19 = vsel %vm282_vm1, %v12898_v25, 0.0  ;;  %13369 = vst [vmem:[%s22094_s22 + $0x40] sm:$0xff] (%p17803_p3), %v13368_v18  ;;  %v13374_v48 = vld [vmem:[%s19533_s14 + $0x58] sm:$0xff] (%p17803_p3)  ;;  %v13376_v36 = vld [vmem:[%s19533_s14 + $0x60] sm:$0xff] (%p17803_p3) }
 0x451   : > { %15399 = vst.msk [vmem:[%s19533_s14 + $0x2e0] sm:$0xff] %vm282_vm1, %v12897_v24  ;;  %v12989_v8 = vsel %vm282_vm1, %v12897_v24, 0.0  ;;  %v13031_v63 = vmul.f32 %v12897_v24, %v12897_v24  ;;  %v13089_v43 = vadd.f32 %v13088_v28, %v13087_v39  ;;  %v12863_v33 = vld [vmem:[#allocation2 + $0xf8] sm:$0xff]  ;;  %13371 = vst [vmem:[%s22094_s22 + $0x48] sm:$0xff] (%p17803_p3), %v13370_v56  ;;  %v13378_v2 = vld [vmem:[%s19533_s14 + $0x68] sm:$0xff] (%p17803_p3) }
 0x452   : > { %v12862_v4 = vld [vmem:[#allocation2 + $0xf0] sm:$0xff]  ;;  %v12990_v41 = vadd.f32 %v12989_v8, %v12988_v27  ;;  %v12900_v49 = vadd.f32 %v21813_v54, %v12863_v33  ;;  %v13092_v62 = vsel %vm282_vm1, %v13032_v35, 0.0  ;;  %13373 = vst [vmem:[%s22094_s22 + $0x50] sm:$0xff] (%p17803_p3), %v13372_v47  ;;  %13375 = vst [vmem:[%s22094_s22 + $0x58] sm:$0xff] (%p17803_p3), %v13374_v48  ;;  %v13382_v59 = vld [vmem:[%s19533_s14 + $0x78] sm:$0xff] (%p17803_p3) }
 0x453   : > { %v12899_v38 = vadd.f32 %v21813_v54, %v12862_v4  ;;  %v13090_v52 = vsel %vm282_vm1, %v13031_v63, 0.0  ;;  %v13380_v11 = vld [vmem:[%s19533_s14 + $0x70] sm:$0xff] (%p17803_p3)  ;;  %13377 = vst [vmem:[%s22094_s22 + $0x60] sm:$0xff] (%p17803_p3), %v13376_v36  ;;  %13379 = vst [vmem:[%s22094_s22 + $0x68] sm:$0xff] (%p17803_p3), %v13378_v2  ;;  %v13384_v21 = vld [vmem:[%s19533_s14 + $0x80] sm:$0xff] (%p17803_p3) }
 0x454   : > { %v13091_v3 = vadd.f32 %v13090_v52, %v13089_v43  ;;  %15402 = vst.msk [vmem:[%s19533_s14 + $0x2f8] sm:$0xff] %vm282_vm1, %v12900_v49  ;;  %v12992_v9 = vadd.f32 %v12991_v19, %v12990_v41  ;;  %v13034_v37 = vmul.f32 %v12900_v49, %v12900_v49  ;;  %v12995_v54 = vsel %vm282_vm1, %v12900_v49, 0.0  ;;  %13381 = vst [vmem:[%s22094_s22 + $0x70] sm:$0xff] (%p17803_p3), %v13380_v11  ;;  %v13386_v20 = vld [vmem:[%s19533_s14 + $0x88] sm:$0xff] (%p17803_p3)  ;;  %v13388_v25 = vld [vmem:[%s19533_s14 + $0x90] sm:$0xff] (%p17803_p3) }
 0x455   : > { %15401 = vst.msk [vmem:[%s19533_s14 + $0x2f0] sm:$0xff] %vm282_vm1, %v12899_v38  ;;  %v12993_v23 = vsel %vm282_vm1, %v12899_v38, 0.0  ;;  %v13033_v31 = vmul.f32 %v12899_v38, %v12899_v38  ;;  %13383 = vst [vmem:[%s22094_s22 + $0x78] sm:$0xff] (%p17803_p3), %v13382_v59  ;;  %v13390_v22 = vld [vmem:[%s19533_s14 + $0x98] sm:$0xff] (%p17803_p3)  ;;  %v13392_v30 = vld [vmem:[%s19533_s14 + $0xa0] sm:$0xff] (%p17803_p3) }
 0x456   : > { %v12994_v34 = vadd.f32 %v12993_v23, %v12992_v9  ;;  %v13093_v40 = vadd.f32 %v13092_v62, %v13091_v3  ;;  %v13096_v15 = vsel %vm282_vm1, %v13034_v37, 0.0  ;;  %13385 = vst [vmem:[%s22094_s22 + $0x80] sm:$0xff] (%p17803_p3), %v13384_v21  ;;  %13387 = vst [vmem:[%s22094_s22 + $0x88] sm:$0xff] (%p17803_p3), %v13386_v20  ;;  %v13394_v39 = vld [vmem:[%s19533_s14 + $0xa8] sm:$0xff] (%p17803_p3)  ;;  %v13396_v24 = vld [vmem:[%s19533_s14 + $0xb0] sm:$0xff] (%p17803_p3) }
 0x457   : > { %v13094_v55 = vsel %vm282_vm1, %v13033_v31, 0.0  ;;  %13389 = vst [vmem:[%s22094_s22 + $0x90] sm:$0xff] (%p17803_p3), %v13388_v25  ;;  %13391 = vst [vmem:[%s22094_s22 + $0x98] sm:$0xff] (%p17803_p3), %v13390_v22  ;;  %v13398_v28 = vld [vmem:[%s19533_s14 + $0xb8] sm:$0xff] (%p17803_p3)  ;;  %v13400_v27 = vld [vmem:[%s19533_s14 + $0xc0] sm:$0xff] (%p17803_p3) }
 0x458   : > { %v12996_v44 = vadd.f32 %v12995_v54, %v12994_v34  ;;  %v13095_v53 = vadd.f32 %v13094_v55, %v13093_v40  ;;  %13393 = vst [vmem:[%s22094_s22 + $0xa0] sm:$0xff] (%p17803_p3), %v13392_v30  ;;  %13395 = vst [vmem:[%s22094_s22 + $0xa8] sm:$0xff] (%p17803_p3), %v13394_v39  ;;  %v13402_v35 = vld [vmem:[%s19533_s14 + $0xc8] sm:$0xff] (%p17803_p3)  ;;  %v13404_v8 = vld [vmem:[%s19533_s14 + $0xd0] sm:$0xff] (%p17803_p3) }
 0x459   : > { %13397 = vst [vmem:[%s22094_s22 + $0xb0] sm:$0xff] (%p17803_p3), %v13396_v24  ;;  %13399 = vst [vmem:[%s22094_s22 + $0xb8] sm:$0xff] (%p17803_p3), %v13398_v28  ;;  %v13406_v63 = vld [vmem:[%s19533_s14 + $0xd8] sm:$0xff] (%p17803_p3)  ;;  %v13408_v43 = vld [vmem:[%s19533_s14 + $0xe0] sm:$0xff] (%p17803_p3) }
 0x45a   : > { %v12997_v5 = vrot.slane %v12996_v44, 4  ;;  %v13097_v29 = vadd.f32 %v13096_v15, %v13095_v53  ;;  %13401 = vst [vmem:[%s22094_s22 + $0xc0] sm:$0xff] (%p17803_p3), %v13400_v27  ;;  %13403 = vst [vmem:[%s22094_s22 + $0xc8] sm:$0xff] (%p17803_p3), %v13402_v35  ;;  %v13410_v33 = vld [vmem:[%s19533_s14 + $0xe8] sm:$0xff] (%p17803_p3)  ;;  %v13412_v4 = vld [vmem:[%s19533_s14 + $0xf0] sm:$0xff] (%p17803_p3) }
 0x45b   : > { %13405 = vst [vmem:[%s22094_s22 + $0xd0] sm:$0xff] (%p17803_p3), %v13404_v8  ;;  %13407 = vst [vmem:[%s22094_s22 + $0xd8] sm:$0xff] (%p17803_p3), %v13406_v63  ;;  %v13414_v41 = vld [vmem:[%s19533_s14 + $0xf8] sm:$0xff] (%p17803_p3)  ;;  %v13416_v49 = vld [vmem:[%s19533_s14 + $0x100] sm:$0xff] (%p17803_p3) }
 0x45c   : > { %v12998_v26 = vadd.f32 %v12997_v5, %v12996_v44  ;;  %v13098_v51 = vrot.slane %v13097_v29, 4  ;;  %13409 = vst [vmem:[%s22094_s22 + $0xe0] sm:$0xff] (%p17803_p3), %v13408_v43  ;;  %13411 = vst [vmem:[%s22094_s22 + $0xe8] sm:$0xff] (%p17803_p3), %v13410_v33  ;;  %v13418_v38 = vld [vmem:[%s19533_s14 + $0x108] sm:$0xff] (%p17803_p3)  ;;  %v13420_v19 = vld [vmem:[%s19533_s14 + $0x110] sm:$0xff] (%p17803_p3) }
 0x45d   : > { %13413 = vst [vmem:[%s22094_s22 + $0xf0] sm:$0xff] (%p17803_p3), %v13412_v4  ;;  %13415 = vst [vmem:[%s22094_s22 + $0xf8] sm:$0xff] (%p17803_p3), %v13414_v41  ;;  %v13422_v52 = vld [vmem:[%s19533_s14 + $0x118] sm:$0xff] (%p17803_p3)  ;;  %v13424_v3 = vld [vmem:[%s19533_s14 + $0x120] sm:$0xff] (%p17803_p3) }
 0x45e   : > { %v12999_v50 = vrot.slane %v12998_v26, 2  ;;  %v13099_v10 = vadd.f32 %v13098_v51, %v13097_v29  ;;  %13417 = vst [vmem:[%s22094_s22 + $0x200] sm:$0xff] (%p17803_p3), %v13416_v49  ;;  %13419 = vst [vmem:[%s22094_s22 + $0x208] sm:$0xff] (%p17803_p3), %v13418_v38  ;;  %v13426_v9 = vld [vmem:[%s19533_s14 + $0x128] sm:$0xff] (%p17803_p3)  ;;  %v13428_v62 = vld [vmem:[%s19533_s14 + $0x130] sm:$0xff] (%p17803_p3) }
 0x45f   : > { %13421 = vst [vmem:[%s22094_s22 + $0x210] sm:$0xff] (%p17803_p3), %v13420_v19  ;;  %13423 = vst [vmem:[%s22094_s22 + $0x218] sm:$0xff] (%p17803_p3), %v13422_v52  ;;  %v13430_v37 = vld [vmem:[%s19533_s14 + $0x138] sm:$0xff] (%p17803_p3)  ;;  %v13432_v23 = vld [vmem:[%s19533_s14 + $0x140] sm:$0xff] (%p17803_p3) }
 0x460   : > { %v13000_v17 = vadd.f32 %v12999_v50, %v12998_v26  ;;  %v13100_v45 = vrot.slane %v13099_v10, 2  ;;  %13425 = vst [vmem:[%s22094_s22 + $0x220] sm:$0xff] (%p17803_p3), %v13424_v3  ;;  %13427 = vst [vmem:[%s22094_s22 + $0x228] sm:$0xff] (%p17803_p3), %v13426_v9  ;;  %v13434_v31 = vld [vmem:[%s19533_s14 + $0x148] sm:$0xff] (%p17803_p3)  ;;  %v13436_v34 = vld [vmem:[%s19533_s14 + $0x150] sm:$0xff] (%p17803_p3) }
 0x461   : > { %13429 = vst [vmem:[%s22094_s22 + $0x230] sm:$0xff] (%p17803_p3), %v13428_v62  ;;  %13431 = vst [vmem:[%s22094_s22 + $0x238] sm:$0xff] (%p17803_p3), %v13430_v37  ;;  %v13438_v40 = vld [vmem:[%s19533_s14 + $0x158] sm:$0xff] (%p17803_p3)  ;;  %v13440_v54 = vld [vmem:[%s19533_s14 + $0x160] sm:$0xff] (%p17803_p3) }
 0x462   : > { %v13001_v61 = vrot.slane %v13000_v17, 1  ;;  %v13101_v58 = vadd.f32 %v13100_v45, %v13099_v10  ;;  %13433 = vst [vmem:[%s22094_s22 + $0x240] sm:$0xff] (%p17803_p3), %v13432_v23  ;;  %13435 = vst [vmem:[%s22094_s22 + $0x248] sm:$0xff] (%p17803_p3), %v13434_v31  ;;  %v13442_v55 = vld [vmem:[%s19533_s14 + $0x168] sm:$0xff] (%p17803_p3)  ;;  %v13444_v44 = vld [vmem:[%s19533_s14 + $0x170] sm:$0xff] (%p17803_p3) }
 0x463   : > { %13437 = vst [vmem:[%s22094_s22 + $0x250] sm:$0xff] (%p17803_p3), %v13436_v34  ;;  %13439 = vst [vmem:[%s22094_s22 + $0x258] sm:$0xff] (%p17803_p3), %v13438_v40  ;;  %v13446_v53 = vld [vmem:[%s19533_s14 + $0x178] sm:$0xff] (%p17803_p3)  ;;  %v13448_v15 = vld [vmem:[%s19533_s14 + $0x180] sm:$0xff] (%p17803_p3) }
 0x464   : > { %v13002_v12 = vadd.f32 %v13001_v61, %v13000_v17  ;;  %v13102_v14 = vrot.slane %v13101_v58, 1  ;;  %13441 = vst [vmem:[%s22094_s22 + $0x260] sm:$0xff] (%p17803_p3), %v13440_v54  ;;  %13443 = vst [vmem:[%s22094_s22 + $0x268] sm:$0xff] (%p17803_p3), %v13442_v55  ;;  %v13450_v5 = vld [vmem:[%s19533_s14 + $0x188] sm:$0xff] (%p17803_p3)  ;;  %v13452_v29 = vld [vmem:[%s19533_s14 + $0x190] sm:$0xff] (%p17803_p3) }
 0x465   : > { %13128 = sbr.rel (!%p17803_p3) target bundleno = 1151 (0x47f), region = 36  ;;  %13445 = vst [vmem:[%s22094_s22 + $0x270] sm:$0xff] (%p17803_p3), %v13444_v44  ;;  %13447 = vst [vmem:[%s22094_s22 + $0x278] sm:$0xff] (%p17803_p3), %v13446_v53  ;;  %v13454_v26 = vld [vmem:[%s19533_s14 + $0x198] sm:$0xff] (%p17803_p3)  ;;  %v13456_v51 = vld [vmem:[%s19533_s14 + $0x1a0] sm:$0xff] (%p17803_p3) }
 0x466   : > { %v13103_v32 = vadd.f32 %v13102_v14, %v13101_v58  ;;  %v13110_v1 = vsel %vm379_vm0, %v21568_v60, %v13002_v12  ;;  %v13356_v60 = vld [vmem:[%s19533_s14 + $0x10] sm:$0xff] (%p17803_p3)  ;;  %13449 = vst [vmem:[%s22094_s22 + $0x280] sm:$0xff] (%p17803_p3), %v13448_v15  ;;  %13451 = vst [vmem:[%s22094_s22 + $0x288] sm:$0xff] (%p17803_p3), %v13450_v5  ;;  %v13458_v50 = vld [vmem:[%s19533_s14 + $0x1a8] sm:$0xff] (%p17803_p3) }
 0x467   : > { %13357 = vst [vmem:[%s22094_s22 + $0x10] sm:$0xff] (%p17803_p3), %v13356_v60  ;;  %13453 = vst [vmem:[%s22094_s22 + $0x290] sm:$0xff] (%p17803_p3), %v13452_v29  ;;  %v13460_v10 = vld [vmem:[%s19533_s14 + $0x1b0] sm:$0xff] (%p17803_p3)  ;;  %v13462_v17 = vld [vmem:[%s19533_s14 + $0x1b8] sm:$0xff] (%p17803_p3) }
 0x468   : > { %v13112_v57 = vsel %vm13111_vm5, %v13110_v1, %v13103_v32  ;;  %13455 = vst [vmem:[%s22094_s22 + $0x298] sm:$0xff] (%p17803_p3), %v13454_v26  ;;  %13457 = vst [vmem:[%s22094_s22 + $0x2a0] sm:$0xff] (%p17803_p3), %v13456_v51  ;;  %v13464_v45 = vld [vmem:[%s19533_s14 + $0x1c0] sm:$0xff] (%p17803_p3)  ;;  %v13466_v61 = vld [vmem:[%s19533_s14 + $0x1c8] sm:$0xff] (%p17803_p3) }
 0x469   : > { %13114 = vst.msk [vmem:[%s239_s12] sm:$0x3f] %vm13113_vm6, %v13112_v57  ;;  %13459 = vst [vmem:[%s22094_s22 + $0x2a8] sm:$0xff] (%p17803_p3), %v13458_v50  ;;  %v13468_v58 = vld [vmem:[%s19533_s14 + $0x1d0] sm:$0xff] (%p17803_p3)  ;;  %v13470_v12 = vld [vmem:[%s19533_s14 + $0x1d8] sm:$0xff] (%p17803_p3) }
 0x46a   : > { %13461 = vst [vmem:[%s22094_s22 + $0x2b0] sm:$0xff] %v13460_v10  ;;  %13463 = vst [vmem:[%s22094_s22 + $0x2b8] sm:$0xff] %v13462_v17  ;;  %v13472_v14 = vld [vmem:[%s19533_s14 + $0x1e0] sm:$0xff]  ;;  %v13474_v32 = vld [vmem:[%s19533_s14 + $0x1e8] sm:$0xff] }
 0x46b   : > { %13465 = vst [vmem:[%s22094_s22 + $0x2c0] sm:$0xff] %v13464_v45  ;;  %13467 = vst [vmem:[%s22094_s22 + $0x2c8] sm:$0xff] %v13466_v61  ;;  %v13476_v1 = vld [vmem:[%s19533_s14 + $0x1f0] sm:$0xff]  ;;  %v13478_v57 = vld [vmem:[%s19533_s14 + $0x1f8] sm:$0xff] }
 0x46c   : > { %13469 = vst [vmem:[%s22094_s22 + $0x2d0] sm:$0xff] %v13468_v58  ;;  %13471 = vst [vmem:[%s22094_s22 + $0x2d8] sm:$0xff] %v13470_v12  ;;  %v13480_v46 = vld [vmem:[%s19533_s14 + $0x200] sm:$0xff]  ;;  %v13482_v16 = vld [vmem:[%s19533_s14 + $0x208] sm:$0xff] }
 0x46d   : > { %13473 = vst [vmem:[%s22094_s22 + $0x2e0] sm:$0xff] %v13472_v14  ;;  %13475 = vst [vmem:[%s22094_s22 + $0x2e8] sm:$0xff] %v13474_v32  ;;  %v13484_v60 = vld [vmem:[%s19533_s14 + $0x210] sm:$0xff]  ;;  %v13486_v6 = vld [vmem:[%s19533_s14 + $0x218] sm:$0xff] }
 0x46e   : > { %13477 = vst [vmem:[%s22094_s22 + $0x2f0] sm:$0xff] %v13476_v1  ;;  %13479 = vst [vmem:[%s22094_s22 + $0x2f8] sm:$0xff] %v13478_v57  ;;  %v13488_v0 = vld [vmem:[%s19533_s14 + $0x220] sm:$0xff]  ;;  %v13490_v42 = vld [vmem:[%s19533_s14 + $0x228] sm:$0xff] }
 0x46f   : > { %13481 = vst [vmem:[%s22094_s22 + $0x400] sm:$0xff] %v13480_v46  ;;  %13483 = vst [vmem:[%s22094_s22 + $0x408] sm:$0xff] %v13482_v16  ;;  %v13492_v13 = vld [vmem:[%s19533_s14 + $0x230] sm:$0xff]  ;;  %v13494_v7 = vld [vmem:[%s19533_s14 + $0x238] sm:$0xff] }
 0x470   : > { %13485 = vst [vmem:[%s22094_s22 + $0x410] sm:$0xff] %v13484_v60  ;;  %13487 = vst [vmem:[%s22094_s22 + $0x418] sm:$0xff] %v13486_v6  ;;  %v13496_v18 = vld [vmem:[%s19533_s14 + $0x240] sm:$0xff]  ;;  %v13498_v56 = vld [vmem:[%s19533_s14 + $0x248] sm:$0xff] }
 0x471   : > { %13489 = vst [vmem:[%s22094_s22 + $0x420] sm:$0xff] %v13488_v0  ;;  %13491 = vst [vmem:[%s22094_s22 + $0x428] sm:$0xff] %v13490_v42  ;;  %v13500_v47 = vld [vmem:[%s19533_s14 + $0x250] sm:$0xff]  ;;  %v13502_v48 = vld [vmem:[%s19533_s14 + $0x258] sm:$0xff] }
 0x472   : > { %13493 = vst [vmem:[%s22094_s22 + $0x430] sm:$0xff] %v13492_v13  ;;  %13495 = vst [vmem:[%s22094_s22 + $0x438] sm:$0xff] %v13494_v7  ;;  %v13504_v36 = vld [vmem:[%s19533_s14 + $0x260] sm:$0xff]  ;;  %v13506_v2 = vld [vmem:[%s19533_s14 + $0x268] sm:$0xff] }
 0x473   : > { %13497 = vst [vmem:[%s22094_s22 + $0x440] sm:$0xff] %v13496_v18  ;;  %13499 = vst [vmem:[%s22094_s22 + $0x448] sm:$0xff] %v13498_v56  ;;  %v13508_v11 = vld [vmem:[%s19533_s14 + $0x270] sm:$0xff]  ;;  %v13510_v59 = vld [vmem:[%s19533_s14 + $0x278] sm:$0xff] }
 0x474   : > { %13501 = vst [vmem:[%s22094_s22 + $0x450] sm:$0xff] %v13500_v47  ;;  %13503 = vst [vmem:[%s22094_s22 + $0x458] sm:$0xff] %v13502_v48  ;;  %v13512_v21 = vld [vmem:[%s19533_s14 + $0x280] sm:$0xff]  ;;  %v13514_v20 = vld [vmem:[%s19533_s14 + $0x288] sm:$0xff] }
 0x475   : > { %13505 = vst [vmem:[%s22094_s22 + $0x460] sm:$0xff] %v13504_v36  ;;  %13507 = vst [vmem:[%s22094_s22 + $0x468] sm:$0xff] %v13506_v2  ;;  %v13516_v25 = vld [vmem:[%s19533_s14 + $0x290] sm:$0xff]  ;;  %v13518_v22 = vld [vmem:[%s19533_s14 + $0x298] sm:$0xff] }
 0x476   : > { %13509 = vst [vmem:[%s22094_s22 + $0x470] sm:$0xff] %v13508_v11  ;;  %13511 = vst [vmem:[%s22094_s22 + $0x478] sm:$0xff] %v13510_v59  ;;  %v13520_v30 = vld [vmem:[%s19533_s14 + $0x2a0] sm:$0xff]  ;;  %v13522_v39 = vld [vmem:[%s19533_s14 + $0x2a8] sm:$0xff] }
 0x477   : > { %13513 = vst [vmem:[%s22094_s22 + $0x480] sm:$0xff] %v13512_v21  ;;  %13515 = vst [vmem:[%s22094_s22 + $0x488] sm:$0xff] %v13514_v20  ;;  %v13524_v24 = vld [vmem:[%s19533_s14 + $0x2b0] sm:$0xff]  ;;  %v13526_v28 = vld [vmem:[%s19533_s14 + $0x2b8] sm:$0xff] }
 0x478   : > { %13517 = vst [vmem:[%s22094_s22 + $0x490] sm:$0xff] %v13516_v25  ;;  %13519 = vst [vmem:[%s22094_s22 + $0x498] sm:$0xff] %v13518_v22  ;;  %v13528_v27 = vld [vmem:[%s19533_s14 + $0x2c0] sm:$0xff]  ;;  %v13530_v35 = vld [vmem:[%s19533_s14 + $0x2c8] sm:$0xff] }
 0x479   : > { %13521 = vst [vmem:[%s22094_s22 + $0x4a0] sm:$0xff] %v13520_v30  ;;  %13523 = vst [vmem:[%s22094_s22 + $0x4a8] sm:$0xff] %v13522_v39  ;;  %v13532_v8 = vld [vmem:[%s19533_s14 + $0x2d0] sm:$0xff]  ;;  %v13534_v63 = vld [vmem:[%s19533_s14 + $0x2d8] sm:$0xff] }
 0x47a   : > { %13525 = vst [vmem:[%s22094_s22 + $0x4b0] sm:$0xff] %v13524_v24  ;;  %13527 = vst [vmem:[%s22094_s22 + $0x4b8] sm:$0xff] %v13526_v28  ;;  %v13536_v43 = vld [vmem:[%s19533_s14 + $0x2e0] sm:$0xff]  ;;  %v13538_v33 = vld [vmem:[%s19533_s14 + $0x2e8] sm:$0xff] }
 0x47b   : > { %13529 = vst [vmem:[%s22094_s22 + $0x4c0] sm:$0xff] %v13528_v27  ;;  %13531 = vst [vmem:[%s22094_s22 + $0x4c8] sm:$0xff] %v13530_v35  ;;  %v13540_v4 = vld [vmem:[%s19533_s14 + $0x2f0] sm:$0xff]  ;;  %v13542_v41 = vld [vmem:[%s19533_s14 + $0x2f8] sm:$0xff] }
 0x47c   : > { %13533 = vst [vmem:[%s22094_s22 + $0x4d0] sm:$0xff] %v13532_v8  ;;  %13535 = vst [vmem:[%s22094_s22 + $0x4d8] sm:$0xff] %v13534_v63 }
 0x47d   : > { %13537 = vst [vmem:[%s22094_s22 + $0x4e0] sm:$0xff] %v13536_v43  ;;  %13539 = vst [vmem:[%s22094_s22 + $0x4e8] sm:$0xff] %v13538_v33 }
 0x47e   : > { %13541 = vst [vmem:[%s22094_s22 + $0x4f0] sm:$0xff] %v13540_v4  ;;  %13543 = vst [vmem:[%s22094_s22 + $0x4f8] sm:$0xff] %v13542_v41 }
 0x47f PF: > { %s15_s19 = sadd.s32 1, %s17744_s19   ;;  %s22401_s15 = smov %s17732_s16 }
 0x480   : > { %p12_p9 = scmp.ge.s32.totalorder %s15_s19, 4   ;;  %s22402_s16 = smov %s17812_s25 }
 0x481   : > { %s22403_s17 = smov %s17740_s18  ;;  %s22404_s18 = smov %s22406_s21 }
 0x482   :  { %14 = sbr.rel (!%p12_p9) target bundleno = 3 (0x3), region = 122 }

</bundles_post_ra>
